<compile_context>
chip_gen: v6e
topology: v6e:2x2x1
jax: 0.10.0
libtpu: 0.0.40
codegen_flags: <defaults>
</compile_context>

<pallas_src>
import functools

import numpy as np
import jax
import jax.numpy as jnp
from jax.experimental import pallas as pl
from jax.experimental.pallas import tpu as pltpu


# ----------------------------------------------------------------------------
# helpers
# ----------------------------------------------------------------------------
def _round_up(x, m):
    return ((x + m - 1) // m) * m


def _largest_divisor_leq(n, cap):
    cap = max(1, min(n, int(cap)))
    for d in range(cap, 0, -1):
        if n % d == 0:
            return d
    return 1


# 48 MiB: fits v7x (64 MiB physical per TC) with headroom; v5e/v6e (128 MiB)
# could go higher but this is safe everywhere.
_VMEM_LIMIT = 48 * 1024 * 1024


def _gelu_exact(x):
    # Exact (erf-based) GELU via the Abramowitz–Stegun erf polynomial
    # (|err| < 1.5e-7) using only Mosaic-native ops (exp, mul, where).
    z = x * 0.7071067811865476
    az = jnp.abs(z)
    t = 1.0 / (1.0 + 0.3275911 * az)
    poly = t * (0.254829592 + t * (-0.284496736 + t * (1.421413741 +
                t * (-1.453152027 + t * 1.061405429))))
    erf_abs = 1.0 - poly * jnp.exp(-az * az)
    erf = jnp.where(z >= 0, erf_abs, -erf_abs)
    return 0.5 * x * (1.0 + erf)


# ----------------------------------------------------------------------------
# fused (LayerNorm?) -> matmul + bias -> (GELU?) -> (+residual?) -> (LN_out?)
# ----------------------------------------------------------------------------
def _fused_linear_kernel(*refs, has_ln, has_res, act, has_ln_out, eps,
                         use_scratch):
    idx = 0
    x_ref = refs[idx]; idx += 1
    g_ref = b_ref = None
    if has_ln:
        g_ref = refs[idx]; idx += 1
        b_ref = refs[idx]; idx += 1
    w_ref = refs[idx]; idx += 1
    bias_ref = refs[idx]; idx += 1
    res_ref = None
    if has_res:
        res_ref = refs[idx]; idx += 1
    og_ref = ob_ref = None
    if has_ln_out:
        og_ref = refs[idx]; idx += 1
        ob_ref = refs[idx]; idx += 1
    o_ref = refs[idx]; idx += 1
    x_scratch = refs[idx] if use_scratch else None

    def _prep():
        if has_ln:
            x = x_ref[...].astype(jnp.float32)
            mu = jnp.mean(x, axis=-1, keepdims=True)
            var = jnp.mean(jnp.square(x - mu), axis=-1, keepdims=True)
            x = (x - mu) * jax.lax.rsqrt(var + eps) * g_ref[...] + b_ref[...]
            return x.astype(jnp.bfloat16)
        return x_ref[...].astype(jnp.bfloat16)

    if use_scratch:
        # LN + cast of the (TM, K) row block is computed once per row block
        # (at j == 0) and reused across all N-tiles.
        @pl.when(pl.program_id(1) == 0)
        def _():
            x_scratch[...] = _prep()
        xb = x_scratch[...]
    else:
        xb = _prep()

    y = jnp.dot(xb, w_ref[...], preferred_element_type=jnp.float32)
    y = y + bias_ref[...]
    if act == "gelu":
        y = _gelu_exact(y)
    if has_res:
        y = y + res_ref[...].astype(jnp.float32)
    if has_ln_out:
        mu = jnp.mean(y, axis=-1, keepdims=True)
        var = jnp.mean(jnp.square(y - mu), axis=-1, keepdims=True)
        y = (y - mu) * jax.lax.rsqrt(var + eps) * og_ref[...] + ob_ref[...]
    o_ref[...] = y.astype(o_ref.dtype)


def fused_linear(x, w, b=None, *, ln=None, act=None, residual=None,
                 ln_out=None, eps=1e-5, out_dtype=jnp.float32):
    """y = LNout?[ +residual [gelu]( LN?(x) @ w + b ) ].

    x:(M,K); w:(K,N) (already transposed, ideally bf16); b:(N,)|None."""
    M, K = x.shape
    Kw, N = w.shape
    assert Kw == K
    wb = w if w.dtype == jnp.bfloat16 else w.astype(jnp.bfloat16)
    bias = (jnp.zeros((N,), jnp.float32) if b is None
            else b.astype(jnp.float32)).reshape(1, N)

    if M >= 512 and M % 512 == 0:
        TM = 512
    elif M >= 256:
        TM = 256
    else:
        TM = _round_up(max(M, 1), 8)
    Mp = _round_up(M, TM)
    if Mp != M:
        x = jnp.pad(x, ((0, Mp - M), (0, 0)))
    if residual is not None and Mp != M:
        residual = jnp.pad(residual, ((0, Mp - M), (0, 0)))

    # tile the output (lane) dimension only when wide, divisible, and no
    # output-side LayerNorm (ln_out needs the full row resident)
    TN = 512 if (ln_out is None and N > 512 and N % 512 == 0) else N
    grid_j = N // TN

    has_ln = ln is not None
    has_res = residual is not None
    has_ln_out = ln_out is not None
    use_scratch = has_ln and grid_j > 1

    in_specs = [pl.BlockSpec((TM, K), lambda i, j: (i, 0))]
    args = [x]
    if has_ln:
        g, beta = ln
        in_specs += [pl.BlockSpec((1, K), lambda i, j: (0, 0)),
                     pl.BlockSpec((1, K), lambda i, j: (0, 0))]
        args += [g.astype(jnp.float32).reshape(1, K),
                 beta.astype(jnp.float32).reshape(1, K)]
    in_specs += [pl.BlockSpec((K, TN), lambda i, j: (0, j)),
                 pl.BlockSpec((1, TN), lambda i, j: (0, j))]
    args += [wb, bias]
    if has_res:
        in_specs += [pl.BlockSpec((TM, TN), lambda i, j: (i, j))]
        args += [residual]
    if has_ln_out:
        og, ob = ln_out
        in_specs += [pl.BlockSpec((1, N), lambda i, j: (0, 0)),
                     pl.BlockSpec((1, N), lambda i, j: (0, 0))]
        args += [og.astype(jnp.float32).reshape(1, N),
                 ob.astype(jnp.float32).reshape(1, N)]

    scratch_shapes = ([pltpu.VMEM((TM, K), jnp.bfloat16)]
                      if use_scratch else [])

    out = pl.pallas_call(
        functools.partial(_fused_linear_kernel, has_ln=has_ln,
                          has_res=has_res, act=act, has_ln_out=has_ln_out,
                          eps=eps, use_scratch=use_scratch),
        out_shape=jax.ShapeDtypeStruct((Mp, N), out_dtype),
        grid=(Mp // TM, grid_j),
        in_specs=in_specs,
        out_specs=pl.BlockSpec((TM, TN), lambda i, j: (i, j)),
        scratch_shapes=scratch_shapes,
        compiler_params=pltpu.CompilerParams(
            dimension_semantics=("parallel",
                                 "arbitrary" if use_scratch else "parallel"),
            vmem_limit_bytes=_VMEM_LIMIT),
    )(*args)
    return out[:M] if Mp != M else out


# ----------------------------------------------------------------------------
# standalone LayerNorm (final norm, padded-attention fallback)
# ----------------------------------------------------------------------------
def _layernorm_kernel(x_ref, g_ref, b_ref, o_ref, *, eps):
    x = x_ref[...].astype(jnp.float32)
    mean = jnp.mean(x, axis=-1, keepdims=True)
    var = jnp.mean(jnp.square(x - mean), axis=-1, keepdims=True)
    o_ref[...] = (x - mean) * jax.lax.rsqrt(var + eps) * g_ref[...] + b_ref[...]


def pallas_layernorm(x, gamma, beta, eps=1e-5):
    shape = x.shape
    C = shape[-1]
    x2 = x.reshape(-1, C)
    M = x2.shape[0]
    TM = 256 if M >= 256 else _round_up(max(M, 1), 8)
    Mp = _round_up(M, TM)
    xp = x2 if Mp == M else jnp.pad(x2, ((0, Mp - M), (0, 0)))

    out = pl.pallas_call(
        functools.partial(_layernorm_kernel, eps=eps),
        out_shape=jax.ShapeDtypeStruct((Mp, C), jnp.float32),
        grid=(Mp // TM,),
        in_specs=[
            pl.BlockSpec((TM, C), lambda i: (i, 0)),
            pl.BlockSpec((1, C), lambda i: (0, 0)),
            pl.BlockSpec((1, C), lambda i: (0, 0)),
        ],
        out_specs=pl.BlockSpec((TM, C), lambda i: (i, 0)),
        compiler_params=pltpu.CompilerParams(
            dimension_semantics=("parallel",),
            vmem_limit_bytes=_VMEM_LIMIT),
    )(xp, gamma.astype(jnp.float32).reshape(1, C),
      beta.astype(jnp.float32).reshape(1, C))
    out = out if Mp == M else out[:M]
    return out.reshape(shape)


# ----------------------------------------------------------------------------
# windowed multi-head attention core: all heads of WG windows per grid step
# ----------------------------------------------------------------------------
def _window_attn_kernel(qkv_ref, bias_ref, o_ref, *, num_heads, head_dim,
                        scale):
    C = num_heads * head_dim
    qkv = qkv_ref[...]                  # (WG, S, 3C) bf16
    bias = bias_ref[...]                # (1 | WG, heads, S, S) f32
    outs = []
    # TODO(synk): per-head lane slices still trigger relayouts; a fully
    # batched (window, head) dot_general would need a qkv HBM re-layout.
    for h in range(num_heads):
        q = qkv[:, :, h * head_dim:(h + 1) * head_dim]
        k = qkv[:, :, C + h * head_dim:C + (h + 1) * head_dim]
        v = qkv[:, :, 2 * C + h * head_dim:2 * C + (h + 1) * head_dim]
        s = jnp.einsum("gqd,gkd->gqk", q, k,
                       preferred_element_type=jnp.float32)
        s = s * scale + bias[:, h]
        m = jnp.max(s, axis=-1, keepdims=True)
        e = jnp.exp(s - m)
        p = e * pl.reciprocal(jnp.sum(e, axis=-1, keepdims=True), approx=True)
        o = jnp.einsum("gqk,gkd->gqd", p.astype(jnp.bfloat16), v,
                       preferred_element_type=jnp.float32)
        outs.append(o)
    # single lane-dense full-width store (no per-head masked partial stores)
    o_ref[...] = jnp.concatenate(outs, axis=-1).astype(o_ref.dtype)


def pallas_window_attention(qkv, bias_win, num_heads, scale):
    """qkv: (BW, S, 3C) bf16; bias_win: (1|NW, heads, S, S) f32.

    Returns (BW, S, C) bf16."""
    BW, S, C3 = qkv.shape
    C = C3 // 3
    head_dim = C // num_heads
    NB = bias_win.shape[0]              # 1 (non-shifted) or NW (shifted)

    # windows per grid step: amortize per-step (~0.35us) overhead by targeting
    # a few MiB of qkv per step, while keeping the bias block indexable.
    per_window_bytes = S * C3 * 2 + S * C * 2
    if NB > 1:
        per_window_bytes += num_heads * S * S * 4
    wg_cap = max(1, min(BW, (4 * 1024 * 1024) // max(per_window_bytes, 1),
                        1024))

    if NB == 1:
        WG = _largest_divisor_leq(BW, wg_cap)
        bias_arg = bias_win
        bias_spec = pl.BlockSpec((1, num_heads, S, S),
                                 lambda g: (0, 0, 0, 0))
    else:
        NW = NB
        b_img = BW // NW
        if wg_cap >= NW:
            m = _largest_divisor_leq(b_img, max(1, wg_cap // NW))
            WG = m * NW
            bias_arg = bias_win if m == 1 else jnp.tile(bias_win,
                                                        (m, 1, 1, 1))
            bias_spec = pl.BlockSpec((WG, num_heads, S, S),
                                     lambda g: (0, 0, 0, 0))
        else:
            WG = _largest_divisor_leq(NW, wg_cap)
            nblk = NW // WG
            bias_arg = bias_win
            bias_spec = pl.BlockSpec((WG, num_heads, S, S),
                                     lambda g: (g % nblk, 0, 0, 0))

    return pl.pallas_call(
        functools.partial(_window_attn_kernel, num_heads=num_heads,
                          head_dim=head_dim, scale=scale),
        out_shape=jax.ShapeDtypeStruct((BW, S, C), jnp.bfloat16),
        grid=(BW // WG,),
        in_specs=[
            pl.BlockSpec((WG, S, C3), lambda g: (g, 0, 0)),
            bias_spec,
        ],
        out_specs=pl.BlockSpec((WG, S, C), lambda g: (g, 0, 0)),
        compiler_params=pltpu.CompilerParams(
            dimension_semantics=("parallel",),
            vmem_limit_bytes=_VMEM_LIMIT),
    )(qkv, bias_arg)


# ----------------------------------------------------------------------------
# Swin components (glue around the kernels)
# ----------------------------------------------------------------------------
def _relative_position_index(ws):
    coords_h = np.arange(ws[0])
    coords_w = np.arange(ws[1])
    coords = np.stack(np.meshgrid(coords_h, coords_w, indexing="ij"))
    coords_flat = coords.reshape(2, -1)
    rel = coords_flat[:, :, None] - coords_flat[:, None, :]
    rel = rel.transpose(1, 2, 0).astype(np.int64)
    rel[:, :, 0] += ws[0] - 1
    rel[:, :, 1] += ws[1] - 1
    rel[:, :, 0] *= 2 * ws[1] - 1
    return jnp.asarray(rel.sum(-1).reshape(-1), dtype=jnp.int32)


def shifted_window_attention(x, p, norm_g, norm_b, window_size, shift_size,
                             num_heads):
    B, H, W, C = x.shape
    ws = list(window_size)
    pad_b = (-H) % ws[0]
    pad_r = (-W) % ws[1]

    if pad_b or pad_r:
        # padded (zero) tokens must enter qkv un-normalized -> LN separately
        h = pallas_layernorm(x, norm_g, norm_b)
        h = jnp.pad(h, ((0, 0), (0, pad_b), (0, pad_r), (0, 0)))
        fuse_ln = False
    else:
        h = x
        fuse_ln = True
    pH, pW = H + pad_b, W + pad_r

    shift = list(shift_size)
    if ws[0] >= pH:
        shift[0] = 0
    if ws[1] >= pW:
        shift[1] = 0

    if sum(shift) > 0:
        h = jnp.roll(h, shift=(-shift[0], -shift[1]), axis=(1, 2))

    nwh, nww = pH // ws[0], pW // ws[1]
    NW = nwh * nww
    S = ws[0] * ws[1]
    hw = h.reshape(B, nwh, ws[0], nww, ws[1], C)
    hw = hw.transpose(0, 1, 3, 2, 4, 5).reshape(B * NW * S, C)

    # fused (LayerNorm) + qkv projection (bf16 output halves HBM traffic)
    qkv = fused_linear(hw, p["qkv_w"], p["qkv_b"],
                       ln=(norm_g, norm_b) if fuse_ln else None,
                       out_dtype=jnp.bfloat16)
    qkv = qkv.reshape(B * NW, S, 3 * C)

    # per-window bias = rel-pos bias (+ shift mask): (1 | NW, heads, S, S)
    rel = p["rel_table"][p["rel_index"]].reshape(S, S, num_heads)
    rel = rel.transpose(2, 0, 1)                              # (heads, S, S)
    if sum(shift) > 0:
        mask = np.zeros((pH, pW), dtype=np.float32)
        cnt = 0
        for hs in ((0, pH - ws[0]), (pH - ws[0], pH - shift[0]),
                   (pH - shift[0], pH)):
            for wsl in ((0, pW - ws[1]), (pW - ws[1], pW - shift[1]),
                        (pW - shift[1], pW)):
                mask[hs[0]:hs[1], wsl[0]:wsl[1]] = cnt
                cnt += 1
        mask = mask.reshape(nwh, ws[0], nww, ws[1]).transpose(0, 2, 1, 3)
        mask = mask.reshape(NW, S)
        diff = mask[:, None, :] - mask[:, :, None]
        attn_mask = jnp.asarray(
            np.where(diff != 0, -100.0, 0.0).astype(np.float32))
        bias_win = rel[None, :, :, :] + attn_mask[:, None, :, :]
    else:
        bias_win = rel[None]          # (1, heads, S, S) -- no NW broadcast

    head_dim = C // num_heads
    attn = pallas_window_attention(qkv, bias_win.astype(jnp.float32),
                                   num_heads, head_dim ** -0.5)  # bf16

    # output projection (bias fused)
    # TODO(synk): the attention-branch residual is added in JAX because window
    # reversal / roll permutations sit between the projection and the residual.
    out = fused_linear(attn.reshape(B * NW * S, C), p["proj_w"], p["proj_b"])
    out = out.reshape(B, nwh, nww, ws[0], ws[1], C)
    out = out.transpose(0, 1, 3, 2, 4, 5).reshape(B, pH, pW, C)
    if sum(shift) > 0:
        out = jnp.roll(out, shift=(shift[0], shift[1]), axis=(1, 2))
    if pad_b or pad_r:
        out = out[:, :H, :W, :]
    return out


def swin_block(x, p, window_size, shift_size, num_heads):
    # x + attn(norm1(x))   (norm1 fused into the qkv matmul)
    x = x + shifted_window_attention(x, p["attn"], p["norm1_g"], p["norm1_b"],
                                     window_size, shift_size, num_heads)
    # x + mlp(norm2(x))    (norm2+GELU fused into mlp1, residual into mlp2)
    B, H, W, C = x.shape
    x2 = x.reshape(B * H * W, C)
    hidden = fused_linear(x2, p["mlp_w1"], p["mlp_b1"],
                          ln=(p["norm2_g"], p["norm2_b"]), act="gelu",
                          out_dtype=jnp.bfloat16)
    out = fused_linear(hidden, p["mlp_w2"], p["mlp_b2"], residual=x2)
    return out.reshape(B, H, W, C)


def patch_merging(x, p):
    B, H, W, C = x.shape
    x = jnp.pad(x, ((0, 0), (0, H % 2), (0, W % 2), (0, 0)))
    x0 = x[:, 0::2, 0::2, :]
    x1 = x[:, 1::2, 0::2, :]
    x2 = x[:, 0::2, 1::2, :]
    x3 = x[:, 1::2, 1::2, :]
    x = jnp.concatenate([x0, x1, x2, x3], axis=-1)
    Bo, Ho, Wo, C4 = x.shape
    # LayerNorm fused into the (bias-free) reduction matmul
    out = fused_linear(x.reshape(-1, C4), p["red_w"], None,
                       ln=(p["norm_g"], p["norm_b"]))
    return out.reshape(Bo, Ho, Wo, C4 // 2)


def patch_embed(x_nchw, p, patch_size, embed_dim):
    # Conv2d(1, embed_dim, k=patch, s=patch) == patchify + matmul,
    # with the trailing LayerNorm fused as an output-side epilogue.
    B, Cin, H, W = x_nchw.shape
    ph, pw = patch_size
    nh, nw = H // ph, W // pw
    x = x_nchw.reshape(B, Cin, nh, ph, nw, pw)
    x = x.transpose(0, 2, 4, 1, 3, 5).reshape(B * nh * nw, Cin * ph * pw)
    out = fused_linear(x, p["conv_w"], p["conv_b"],
                       ln_out=(p["ln_g"], p["ln_b"]))
    return out.reshape(B, nh, nw, embed_dim)


def swin_forward(x, params, cfg):
    x = patch_embed(x, params["patch_embed"], cfg["patch_size"],
                    cfg["embed_dim"])
    for i_stage in range(len(cfg["depths"])):
        for i_layer in range(cfg["depths"][i_stage]):
            shift = [0 if i_layer % 2 == 0 else w // 2
                     for w in cfg["window_size"]]
            x = swin_block(x, params["stages"][i_stage]["blocks"][i_layer],
                           cfg["window_size"], shift,
                           cfg["num_heads"][i_stage])
        if i_stage < len(cfg["depths"]) - 1:
            x = patch_merging(x, params["stages"][i_stage]["merge"])
    x = pallas_layernorm(x, params["norm_g"], params["norm_b"])
    # Permute([0,3,1,2]) + AdaptiveAvgPool2d(1) + Flatten == mean over H, W
    x = jnp.mean(x, axis=(1, 2))
    return fused_linear(x, params["head_w"], params["head_b"])


# ----------------------------------------------------------------------------
# deterministic parameter initialization (shapes follow the torch __init__);
# matmul weights are stored pre-transposed (in, out) and pre-cast to bf16.
# ----------------------------------------------------------------------------
def init_params(key, cfg):
    keys = iter(jax.random.split(key, 256))

    def w_t(in_dim, out_dim, std=0.02):
        w = std * jax.random.normal(next(keys), (in_dim, out_dim),
                                    jnp.float32)
        return w.astype(jnp.bfloat16)

    def w_f32(shape, std=0.02):
        return std * jax.random.normal(next(keys), shape, jnp.float32)

    ws = cfg["window_size"]
    rel_index = _relative_position_index(ws)
    num_rel = (2 * ws[0] - 1) * (2 * ws[1] - 1)
    ph, pw = cfg["patch_size"]
    ed = cfg["embed_dim"]

    params = {
        "patch_embed": {
            "conv_w": w_t(1 * ph * pw, ed),          # (Cin*ph*pw, embed_dim)
            "conv_b": jnp.zeros((ed,), jnp.float32),
            "ln_g": jnp.ones((ed,), jnp.float32),
            "ln_b": jnp.zeros((ed,), jnp.float32),
        },
        "stages": [],
    }

    for i_stage in range(len(cfg["depths"])):
        dim = ed * 2 ** i_stage
        heads = cfg["num_heads"][i_stage]
        hidden = int(dim * cfg["mlp_ratio"])
        blocks = []
        for _ in range(cfg["depths"][i_stage]):
            blocks.append({
                "norm1_g": jnp.ones((dim,), jnp.float32),
                "norm1_b": jnp.zeros((dim,), jnp.float32),
                "attn": {
                    "qkv_w": w_t(dim, 3 * dim),
                    "qkv_b": jnp.zeros((3 * dim,), jnp.float32),
                    "proj_w": w_t(dim, dim),
                    "proj_b": jnp.zeros((dim,), jnp.float32),
                    "rel_table": w_f32((num_rel, heads)),
                    "rel_index": rel_index,
                },
                "norm2_g": jnp.ones((dim,), jnp.float32),
                "norm2_b": jnp.zeros((dim,), jnp.float32),
                "mlp_w1": w_t(dim, hidden),
                "mlp_b1": jnp.zeros((hidden,), jnp.float32),
                "mlp_w2": w_t(hidden, dim),
                "mlp_b2": jnp.zeros((dim,), jnp.float32),
            })
        stage = {"blocks": blocks}
        if i_stage < len(cfg["depths"]) - 1:
            stage["merge"] = {
                "norm_g": jnp.ones((4 * dim,), jnp.float32),
                "norm_b": jnp.zeros((4 * dim,), jnp.float32),
                # Linear(4*dim, 2*dim, bias=False), pre-transposed
                "red_w": w_t(4 * dim, 2 * dim),
            }
        params["stages"].append(stage)

    num_features = ed * 2 ** (len(cfg["depths"]) - 1)
    params["norm_g"] = jnp.ones((num_features,), jnp.float32)
    params["norm_b"] = jnp.zeros((num_features,), jnp.float32)
    params["head_w"] = w_t(num_features, cfg["num_outputs"])
    params["head_b"] = jnp.zeros((cfg["num_outputs"],), jnp.float32)
    return params


# ----------------------------------------------------------------------------
if __name__ == "__main__":
    cfg = dict(
        patch_size=[4, 4],
        embed_dim=16,
        depths=[2, 2],
        num_heads=[2, 4],
        window_size=[4, 4],
        mlp_ratio=4.0,
        num_outputs=10,
    )
    key = jax.random.PRNGKey(0)
    pkey, xkey = jax.random.split(key)
    params = init_params(pkey, cfg)

    # NCHW input, single channel, spatial divisible by patch size.
    x = jax.random.normal(xkey, (2, 1, 32, 32), jnp.float32)

    fwd = jax.jit(lambda xx, pp: swin_forward(xx, pp, cfg))
    out = jax.block_until_ready(fwd(x, params))
    assert out.shape == (2, cfg["num_outputs"]), out.shape
    assert bool(jnp.all(jnp.isfinite(out)))
    print("KERNEL_OK")
</pallas_src>

<mosaic_0001>
module attributes {stable_mosaic.version = 11 : i64} {
  func.func @_fused_linear_kernel(%arg0: i32, %arg1: i32, %arg2: memref<128x16xf32, #tpu.memory_space<vmem>>, %arg3: memref<16x16xbf16, #tpu.memory_space<vmem>>, %arg4: memref<1x16xf32, #tpu.memory_space<vmem>>, %arg5: memref<1x16xf32, #tpu.memory_space<vmem>>, %arg6: memref<1x16xf32, #tpu.memory_space<vmem>>, %arg7: memref<128x16xf32, #tpu.memory_space<vmem>>) attributes {dimension_semantics = [#tpu.dimension_semantics<parallel>, #tpu.dimension_semantics<parallel>], iteration_bounds = array<i64: 1, 1>, scalar_prefetch = 0 : i64, scratch_operands = 0 : i64, tpu.core_type = #tpu.core_type<tc>, window_params = [{transform_indices = @transform_0, window_bounds = array<i64: 128, 16>}, {transform_indices = @transform_1, window_bounds = array<i64: 16, 16>}, {transform_indices = @transform_2, window_bounds = array<i64: 1, 16>}, {pipeline_mode = #tpu.pipeline_mode<synchronous>, transform_indices = @transform_3, window_bounds = array<i64: 1, 16>}, {pipeline_mode = #tpu.pipeline_mode<synchronous>, transform_indices = @transform_4, window_bounds = array<i64: 1, 16>}, {transform_indices = @transform_5, window_bounds = array<i64: 128, 16>}]} {
    %c0 = arith.constant 0 : index
    %c0_0 = arith.constant 0 : index
    %0 = vector.load %arg2[%c0, %c0_0] : memref<128x16xf32, #tpu.memory_space<vmem>>, vector<128x16xf32>
    %1 = arith.truncf %0 : vector<128x16xf32> to vector<128x16xbf16>
    %c0_1 = arith.constant 0 : index
    %c0_2 = arith.constant 0 : index
    %2 = vector.load %arg3[%c0_1, %c0_2] : memref<16x16xbf16, #tpu.memory_space<vmem>>, vector<16x16xbf16>
    %cst = arith.constant dense<0.000000e+00> : vector<128x16xf32>
    %3 = tpu.matmul %1, %2, %cst {dimension_numbers = #tpu.dot_dimension_numbers<[1], [0], [0], [1], [0, 0, 1, 1], [], []>} : vector<128x16xbf16>, vector<16x16xbf16>, vector<128x16xf32> -> vector<128x16xf32>
    %c0_3 = arith.constant 0 : index
    %c0_4 = arith.constant 0 : index
    %4 = vector.load %arg4[%c0_3, %c0_4] : memref<1x16xf32, #tpu.memory_space<vmem>>, vector<1x16xf32>
    %5 = vector.broadcast %4 : vector<1x16xf32> to vector<128x16xf32>
    %6 = arith.addf %3, %5 : vector<128x16xf32>
    %cst_5 = arith.constant dense<0.000000e+00> : vector<128xf32>
    %7 = vector.multi_reduction <add>, %6, %cst_5 [1] : vector<128x16xf32> to vector<128xf32>
    %8 = vector.shape_cast %7 : vector<128xf32> to vector<128x1xf32>
    %cst_6 = arith.constant 1.600000e+01 : f32
    %9 = vector.broadcast %cst_6 : f32 to vector<128x1xf32>
    %10 = arith.divf %8, %9 : vector<128x1xf32>
    %11 = vector.broadcast %10 : vector<128x1xf32> to vector<128x16xf32>
    %12 = arith.subf %6, %11 : vector<128x16xf32>
    %13 = arith.mulf %12, %12 : vector<128x16xf32>
    %cst_7 = arith.constant dense<0.000000e+00> : vector<128xf32>
    %14 = vector.multi_reduction <add>, %13, %cst_7 [1] : vector<128x16xf32> to vector<128xf32>
    %15 = vector.shape_cast %14 : vector<128xf32> to vector<128x1xf32>
    %cst_8 = arith.constant 1.600000e+01 : f32
    %16 = vector.broadcast %cst_8 : f32 to vector<128x1xf32>
    %17 = arith.divf %15, %16 : vector<128x1xf32>
    %18 = vector.broadcast %10 : vector<128x1xf32> to vector<128x16xf32>
    %19 = arith.subf %6, %18 : vector<128x16xf32>
    %cst_9 = arith.constant 9.99999974E-6 : f32
    %20 = vector.broadcast %cst_9 : f32 to vector<128x1xf32>
    %21 = arith.addf %17, %20 : vector<128x1xf32>
    %22 = math.rsqrt %21 : vector<128x1xf32>
    %23 = vector.broadcast %22 : vector<128x1xf32> to vector<128x16xf32>
    %24 = arith.mulf %19, %23 : vector<128x16xf32>
    %c0_10 = arith.constant 0 : index
    %c0_11 = arith.constant 0 : index
    %25 = vector.load %arg5[%c0_10, %c0_11] : memref<1x16xf32, #tpu.memory_space<vmem>>, vector<1x16xf32>
    %26 = vector.broadcast %25 : vector<1x16xf32> to vector<128x16xf32>
    %27 = arith.mulf %24, %26 : vector<128x16xf32>
    %c0_12 = arith.constant 0 : index
    %c0_13 = arith.constant 0 : index
    %28 = vector.load %arg6[%c0_12, %c0_13] : memref<1x16xf32, #tpu.memory_space<vmem>>, vector<1x16xf32>
    %29 = vector.broadcast %28 : vector<1x16xf32> to vector<128x16xf32>
    %30 = arith.addf %27, %29 : vector<128x16xf32>
    %c0_14 = arith.constant 0 : index
    %c0_15 = arith.constant 0 : index
    %31 = vector.load %arg7[%c0_14, %c0_15] : memref<128x16xf32, #tpu.memory_space<vmem>>, vector<128x16xf32>
    tpu.vector_store %arg7[%c0_14, %c0_15], %30 {strides = array<i32>} : memref<128x16xf32, #tpu.memory_space<vmem>>, vector<128x16xf32>,
    return
  }
  func.func @transform_0(%arg0: i32, %arg1: i32) -> (i32, i32) {
    %c0_i32 = arith.constant 0 : i32
    %c0_i32_0 = arith.constant 0 : i32
    return %arg0, %c0_i32 : i32, i32
  }
  func.func @transform_1(%arg0: i32, %arg1: i32) -> (i32, i32) {
    %c0_i32 = arith.constant 0 : i32
    %c0_i32_0 = arith.constant 0 : i32
    return %c0_i32, %arg1 : i32, i32
  }
  func.func @transform_2(%arg0: i32, %arg1: i32) -> (i32, i32) {
    %c0_i32 = arith.constant 0 : i32
    %c0_i32_0 = arith.constant 0 : i32
    return %c0_i32, %arg1 : i32, i32
  }
  func.func @transform_3(%arg0: i32, %arg1: i32) -> (i32, i32) {
    %c0_i32 = arith.constant 0 : i32
    %c0_i32_0 = arith.constant 0 : i32
    %c0_i32_1 = arith.constant 0 : i32
    return %c0_i32, %c0_i32_0 : i32, i32
  }
  func.func @transform_4(%arg0: i32, %arg1: i32) -> (i32, i32) {
    %c0_i32 = arith.constant 0 : i32
    %c0_i32_0 = arith.constant 0 : i32
    %c0_i32_1 = arith.constant 0 : i32
    return %c0_i32, %c0_i32_0 : i32, i32
  }
  func.func @transform_5(%arg0: i32, %arg1: i32) -> (i32, i32) {
    %c0_i32 = arith.constant 0 : i32
    return %arg0, %arg1 : i32, i32
  }
}

module attributes {stable_mosaic.version = 11 : i64} {
  func.func @_fused_linear_kernel(%arg0: i32, %arg1: i32, %arg2: memref<128x16xf32, #tpu.memory_space<vmem>>, %arg3: memref<1x16xf32, #tpu.memory_space<vmem>>, %arg4: memref<1x16xf32, #tpu.memory_space<vmem>>, %arg5: memref<16x48xbf16, #tpu.memory_space<vmem>>, %arg6: memref<1x48xf32, #tpu.memory_space<vmem>>, %arg7: memref<128x48xbf16, #tpu.memory_space<vmem>>) attributes {dimension_semantics = [#tpu.dimension_semantics<parallel>, #tpu.dimension_semantics<parallel>], iteration_bounds = array<i64: 1, 1>, scalar_prefetch = 0 : i64, scratch_operands = 0 : i64, tpu.core_type = #tpu.core_type<tc>, window_params = [{transform_indices = @transform_0, window_bounds = array<i64: 128, 16>}, {pipeline_mode = #tpu.pipeline_mode<synchronous>, transform_indices = @transform_1, window_bounds = array<i64: 1, 16>}, {pipeline_mode = #tpu.pipeline_mode<synchronous>, transform_indices = @transform_2, window_bounds = array<i64: 1, 16>}, {transform_indices = @transform_3, window_bounds = array<i64: 16, 48>}, {transform_indices = @transform_4, window_bounds = array<i64: 1, 48>}, {transform_indices = @transform_5, window_bounds = array<i64: 128, 48>}]} {
    %c0 = arith.constant 0 : index
    %c0_0 = arith.constant 0 : index
    %0 = vector.load %arg2[%c0, %c0_0] : memref<128x16xf32, #tpu.memory_space<vmem>>, vector<128x16xf32>
    %cst = arith.constant dense<0.000000e+00> : vector<128xf32>
    %1 = vector.multi_reduction <add>, %0, %cst [1] : vector<128x16xf32> to vector<128xf32>
    %2 = vector.shape_cast %1 : vector<128xf32> to vector<128x1xf32>
    %cst_1 = arith.constant 1.600000e+01 : f32
    %3 = vector.broadcast %cst_1 : f32 to vector<128x1xf32>
    %4 = arith.divf %2, %3 : vector<128x1xf32>
    %5 = vector.broadcast %4 : vector<128x1xf32> to vector<128x16xf32>
    %6 = arith.subf %0, %5 : vector<128x16xf32>
    %7 = arith.mulf %6, %6 : vector<128x16xf32>
    %cst_2 = arith.constant dense<0.000000e+00> : vector<128xf32>
    %8 = vector.multi_reduction <add>, %7, %cst_2 [1] : vector<128x16xf32> to vector<128xf32>
    %9 = vector.shape_cast %8 : vector<128xf32> to vector<128x1xf32>
    %cst_3 = arith.constant 1.600000e+01 : f32
    %10 = vector.broadcast %cst_3 : f32 to vector<128x1xf32>
    %11 = arith.divf %9, %10 : vector<128x1xf32>
    %12 = vector.broadcast %4 : vector<128x1xf32> to vector<128x16xf32>
    %13 = arith.subf %0, %12 : vector<128x16xf32>
    %cst_4 = arith.constant 9.99999974E-6 : f32
    %14 = vector.broadcast %cst_4 : f32 to vector<128x1xf32>
    %15 = arith.addf %11, %14 : vector<128x1xf32>
    %16 = math.rsqrt %15 : vector<128x1xf32>
    %17 = vector.broadcast %16 : vector<128x1xf32> to vector<128x16xf32>
    %18 = arith.mulf %13, %17 : vector<128x16xf32>
    %c0_5 = arith.constant 0 : index
    %c0_6 = arith.constant 0 : index
    %19 = vector.load %arg3[%c0_5, %c0_6] : memref<1x16xf32, #tpu.memory_space<vmem>>, vector<1x16xf32>
    %20 = vector.broadcast %19 : vector<1x16xf32> to vector<128x16xf32>
    %21 = arith.mulf %18, %20 : vector<128x16xf32>
    %c0_7 = arith.constant 0 : index
    %c0_8 = arith.constant 0 : index
    %22 = vector.load %arg4[%c0_7, %c0_8] : memref<1x16xf32, #tpu.memory_space<vmem>>, vector<1x16xf32>
    %23 = vector.broadcast %22 : vector<1x16xf32> to vector<128x16xf32>
    %24 = arith.addf %21, %23 : vector<128x16xf32>
    %25 = arith.truncf %24 : vector<128x16xf32> to vector<128x16xbf16>
    %c0_9 = arith.constant 0 : index
    %c0_10 = arith.constant 0 : index
    %26 = vector.load %arg5[%c0_9, %c0_10] : memref<16x48xbf16, #tpu.memory_space<vmem>>, vector<16x48xbf16>
    %cst_11 = arith.constant dense<0.000000e+00> : vector<128x48xf32>
    %27 = tpu.matmul %25, %26, %cst_11 {dimension_numbers = #tpu.dot_dimension_numbers<[1], [0], [0], [1], [0, 0, 1, 1], [], []>} : vector<128x16xbf16>, vector<16x48xbf16>, vector<128x48xf32> -> vector<128x48xf32>
    %c0_12 = arith.constant 0 : index
    %c0_13 = arith.constant 0 : index
    %28 = vector.load %arg6[%c0_12, %c0_13] : memref<1x48xf32, #tpu.memory_space<vmem>>, vector<1x48xf32>
    %29 = vector.broadcast %28 : vector<1x48xf32> to vector<128x48xf32>
    %30 = arith.addf %27, %29 : vector<128x48xf32>
    %31 = arith.truncf %30 : vector<128x48xf32> to vector<128x48xbf16>
    %c0_14 = arith.constant 0 : index
    %c0_15 = arith.constant 0 : index
    %32 = vector.load %arg7[%c0_14, %c0_15] : memref<128x48xbf16, #tpu.memory_space<vmem>>, vector<128x48xbf16>
    tpu.vector_store %arg7[%c0_14, %c0_15], %31 {strides = array<i32>} : memref<128x48xbf16, #tpu.memory_space<vmem>>, vector<128x48xbf16>,
    return
  }
  func.func @transform_0(%arg0: i32, %arg1: i32) -> (i32, i32) {
    %c0_i32 = arith.constant 0 : i32
    %c0_i32_0 = arith.constant 0 : i32
    return %arg0, %c0_i32 : i32, i32
  }
  func.func @transform_1(%arg0: i32, %arg1: i32) -> (i32, i32) {
    %c0_i32 = arith.constant 0 : i32
    %c0_i32_0 = arith.constant 0 : i32
    %c0_i32_1 = arith.constant 0 : i32
    return %c0_i32, %c0_i32_0 : i32, i32
  }
  func.func @transform_2(%arg0: i32, %arg1: i32) -> (i32, i32) {
    %c0_i32 = arith.constant 0 : i32
    %c0_i32_0 = arith.constant 0 : i32
    %c0_i32_1 = arith.constant 0 : i32
    return %c0_i32, %c0_i32_0 : i32, i32
  }
  func.func @transform_3(%arg0: i32, %arg1: i32) -> (i32, i32) {
    %c0_i32 = arith.constant 0 : i32
    %c0_i32_0 = arith.constant 0 : i32
    return %c0_i32, %arg1 : i32, i32
  }
  func.func @transform_4(%arg0: i32, %arg1: i32) -> (i32, i32) {
    %c0_i32 = arith.constant 0 : i32
    %c0_i32_0 = arith.constant 0 : i32
    return %c0_i32, %arg1 : i32, i32
  }
  func.func @transform_5(%arg0: i32, %arg1: i32) -> (i32, i32) {
    %c0_i32 = arith.constant 0 : i32
    return %arg0, %arg1 : i32, i32
  }
}

module attributes {stable_mosaic.version = 11 : i64} {
  func.func @_window_attn_kernel(%arg0: i32, %arg1: memref<8x16x48xbf16, #tpu.memory_space<vmem>>, %arg2: memref<1x2x16x16xf32, #tpu.memory_space<vmem>>, %arg3: memref<8x16x16xbf16, #tpu.memory_space<vmem>>) attributes {dimension_semantics = [#tpu.dimension_semantics<parallel>], iteration_bounds = array<i64: 1>, scalar_prefetch = 0 : i64, scratch_operands = 0 : i64, tpu.core_type = #tpu.core_type<tc>, window_params = [{transform_indices = @transform_0, window_bounds = array<i64: 8, 16, 48>}, {pipeline_mode = #tpu.pipeline_mode<synchronous>, transform_indices = @transform_1, window_bounds = array<i64: 1, 2, 16, 16>}, {transform_indices = @transform_2, window_bounds = array<i64: 8, 16, 16>}]} {
    %c0 = arith.constant 0 : index
    %c0_0 = arith.constant 0 : index
    %c0_1 = arith.constant 0 : index
    %0 = vector.load %arg1[%c0, %c0_0, %c0_1] : memref<8x16x48xbf16, #tpu.memory_space<vmem>>, vector<8x16x48xbf16>
    %c0_2 = arith.constant 0 : index
    %c0_3 = arith.constant 0 : index
    %c0_4 = arith.constant 0 : index
    %c0_5 = arith.constant 0 : index
    %1 = vector.load %arg2[%c0_2, %c0_3, %c0_4, %c0_5] : memref<1x2x16x16xf32, #tpu.memory_space<vmem>>, vector<1x2x16x16xf32>
    %2 = vector.extract_strided_slice %0 {offsets = [0, 0, 0], sizes = [8, 16, 8], strides = [1, 1, 1]} : vector<8x16x48xbf16> to vector<8x16x8xbf16>
    %3 = vector.extract_strided_slice %0 {offsets = [0, 0, 16], sizes = [8, 16, 8], strides = [1, 1, 1]} : vector<8x16x48xbf16> to vector<8x16x8xbf16>
    %4 = vector.extract_strided_slice %0 {offsets = [0, 0, 32], sizes = [8, 16, 8], strides = [1, 1, 1]} : vector<8x16x48xbf16> to vector<8x16x8xbf16>
    "tpu.trace_start"() <{level = 10 : i32, message = "gqd,gkd->gqk"}> : () -> ()
    %cst = arith.constant dense<0.000000e+00> : vector<8x16x16xf32>
    %5 = tpu.matmul %2, %3, %cst {dimension_numbers = #tpu.dot_dimension_numbers<[2], [2], [1], [1], [0, 0, 0, 1, 1, 1], [0], [0]>} : vector<8x16x8xbf16>, vector<8x16x8xbf16>, vector<8x16x16xf32> -> vector<8x16x16xf32>
    "tpu.trace_stop"() : () -> ()
    %cst_6 = arith.constant 0.353553385 : f32
    %6 = vector.broadcast %cst_6 : f32 to vector<8x16x16xf32>
    %7 = arith.mulf %5, %6 : vector<8x16x16xf32>
    %8 = vector.extract_strided_slice %1 {offsets = [0, 0, 0, 0], sizes = [1, 1, 16, 16], strides = [1, 1, 1, 1]} : vector<1x2x16x16xf32> to vector<1x1x16x16xf32>
    %9 = vector.shape_cast %8 : vector<1x1x16x16xf32> to vector<1x16x16xf32>
    %10 = vector.broadcast %9 : vector<1x16x16xf32> to vector<8x16x16xf32>
    %11 = arith.addf %7, %10 : vector<8x16x16xf32>
    %cst_7 = arith.constant dense<0xFF800000> : vector<8x16xf32>
    %12 = vector.multi_reduction <maximumf>, %11, %cst_7 [2] : vector<8x16x16xf32> to vector<8x16xf32>
    %13 = vector.shape_cast %12 : vector<8x16xf32> to vector<8x16x1xf32>
    %14 = vector.broadcast %13 : vector<8x16x1xf32> to vector<8x16x16xf32>
    %15 = arith.subf %11, %14 : vector<8x16x16xf32>
    %16 = math.exp %15 : vector<8x16x16xf32>
    %cst_8 = arith.constant dense<0.000000e+00> : vector<8x16xf32>
    %17 = vector.multi_reduction <add>, %16, %cst_8 [2] : vector<8x16x16xf32> to vector<8x16xf32>
    %18 = vector.shape_cast %17 : vector<8x16xf32> to vector<8x16x1xf32>
    %19 = tpu.reciprocal %18 {approx = true} : vector<8x16x1xf32> -> vector<8x16x1xf32>
    %20 = vector.broadcast %19 : vector<8x16x1xf32> to vector<8x16x16xf32>
    %21 = arith.mulf %16, %20 : vector<8x16x16xf32>
    %22 = arith.truncf %21 : vector<8x16x16xf32> to vector<8x16x16xbf16>
    "tpu.trace_start"() <{level = 10 : i32, message = "gqk,gkd->gqd"}> : () -> ()
    %cst_9 = arith.constant dense<0.000000e+00> : vector<8x16x8xf32>
    %23 = tpu.matmul %22, %4, %cst_9 {dimension_numbers = #tpu.dot_dimension_numbers<[2], [1], [1], [2], [0, 0, 0, 1, 1, 2], [0], [0]>} : vector<8x16x16xbf16>, vector<8x16x8xbf16>, vector<8x16x8xf32> -> vector<8x16x8xf32>
    "tpu.trace_stop"() : () -> ()
    %24 = vector.extract_strided_slice %0 {offsets = [0, 0, 8], sizes = [8, 16, 8], strides = [1, 1, 1]} : vector<8x16x48xbf16> to vector<8x16x8xbf16>
    %25 = vector.extract_strided_slice %0 {offsets = [0, 0, 24], sizes = [8, 16, 8], strides = [1, 1, 1]} : vector<8x16x48xbf16> to vector<8x16x8xbf16>
    %26 = vector.extract_strided_slice %0 {offsets = [0, 0, 40], sizes = [8, 16, 8], strides = [1, 1, 1]} : vector<8x16x48xbf16> to vector<8x16x8xbf16>
    "tpu.trace_start"() <{level = 10 : i32, message = "gqd,gkd->gqk"}> : () -> ()
    %cst_10 = arith.constant dense<0.000000e+00> : vector<8x16x16xf32>
    %27 = tpu.matmul %24, %25, %cst_10 {dimension_numbers = #tpu.dot_dimension_numbers<[2], [2], [1], [1], [0, 0, 0, 1, 1, 1], [0], [0]>} : vector<8x16x8xbf16>, vector<8x16x8xbf16>, vector<8x16x16xf32> -> vector<8x16x16xf32>
    "tpu.trace_stop"() : () -> ()
    %cst_11 = arith.constant 0.353553385 : f32
    %28 = vector.broadcast %cst_11 : f32 to vector<8x16x16xf32>
    %29 = arith.mulf %27, %28 : vector<8x16x16xf32>
    %30 = vector.extract_strided_slice %1 {offsets = [0, 1, 0, 0], sizes = [1, 1, 16, 16], strides = [1, 1, 1, 1]} : vector<1x2x16x16xf32> to vector<1x1x16x16xf32>
    %31 = vector.shape_cast %30 : vector<1x1x16x16xf32> to vector<1x16x16xf32>
    %32 = vector.broadcast %31 : vector<1x16x16xf32> to vector<8x16x16xf32>
    %33 = arith.addf %29, %32 : vector<8x16x16xf32>
    %cst_12 = arith.constant dense<0xFF800000> : vector<8x16xf32>
    %34 = vector.multi_reduction <maximumf>, %33, %cst_12 [2] : vector<8x16x16xf32> to vector<8x16xf32>
    %35 = vector.shape_cast %34 : vector<8x16xf32> to vector<8x16x1xf32>
    %36 = vector.broadcast %35 : vector<8x16x1xf32> to vector<8x16x16xf32>
    %37 = arith.subf %33, %36 : vector<8x16x16xf32>
    %38 = math.exp %37 : vector<8x16x16xf32>
    %cst_13 = arith.constant dense<0.000000e+00> : vector<8x16xf32>
    %39 = vector.multi_reduction <add>, %38, %cst_13 [2] : vector<8x16x16xf32> to vector<8x16xf32>
    %40 = vector.shape_cast %39 : vector<8x16xf32> to vector<8x16x1xf32>
    %41 = tpu.reciprocal %40 {approx = true} : vector<8x16x1xf32> -> vector<8x16x1xf32>
    %42 = vector.broadcast %41 : vector<8x16x1xf32> to vector<8x16x16xf32>
    %43 = arith.mulf %38, %42 : vector<8x16x16xf32>
    %44 = arith.truncf %43 : vector<8x16x16xf32> to vector<8x16x16xbf16>
    "tpu.trace_start"() <{level = 10 : i32, message = "gqk,gkd->gqd"}> : () -> ()
    %cst_14 = arith.constant dense<0.000000e+00> : vector<8x16x8xf32>
    %45 = tpu.matmul %44, %26, %cst_14 {dimension_numbers = #tpu.dot_dimension_numbers<[2], [1], [1], [2], [0, 0, 0, 1, 1, 2], [0], [0]>} : vector<8x16x16xbf16>, vector<8x16x8xbf16>, vector<8x16x8xf32> -> vector<8x16x8xf32>
    "tpu.trace_stop"() : () -> ()
    %46 = tpu.concatenate %23, %45 in 2 : vector<8x16x8xf32>, vector<8x16x8xf32> -> vector<8x16x16xf32>
    %47 = arith.truncf %46 : vector<8x16x16xf32> to vector<8x16x16xbf16>
    %c0_15 = arith.constant 0 : index
    %c0_16 = arith.constant 0 : index
    %c0_17 = arith.constant 0 : index
    %48 = vector.load %arg3[%c0_15, %c0_16, %c0_17] : memref<8x16x16xbf16, #tpu.memory_space<vmem>>, vector<8x16x16xbf16>
    tpu.vector_store %arg3[%c0_15, %c0_16, %c0_17], %47 {strides = array<i32>} : memref<8x16x16xbf16, #tpu.memory_space<vmem>>, vector<8x16x16xbf16>,
    return
  }
  func.func @transform_0(%arg0: i32) -> (i32, i32, i32) {
    %c0_i32 = arith.constant 0 : i32
    %c0_i32_0 = arith.constant 0 : i32
    %c0_i32_1 = arith.constant 0 : i32
    return %arg0, %c0_i32, %c0_i32_0 : i32, i32, i32
  }
  func.func @transform_1(%arg0: i32) -> (i32, i32, i32, i32) {
    %c0_i32 = arith.constant 0 : i32
    %c0_i32_0 = arith.constant 0 : i32
    %c0_i32_1 = arith.constant 0 : i32
    %c0_i32_2 = arith.constant 0 : i32
    %c0_i32_3 = arith.constant 0 : i32
    return %c0_i32, %c0_i32_0, %c0_i32_1, %c0_i32_2 : i32, i32, i32, i32
  }
  func.func @transform_2(%arg0: i32) -> (i32, i32, i32) {
    %c0_i32 = arith.constant 0 : i32
    %c0_i32_0 = arith.constant 0 : i32
    %c0_i32_1 = arith.constant 0 : i32
    return %arg0, %c0_i32, %c0_i32_0 : i32, i32, i32
  }
}

module attributes {stable_mosaic.version = 11 : i64} {
  func.func @_fused_linear_kernel(%arg0: i32, %arg1: i32, %arg2: memref<128x16xbf16, #tpu.memory_space<vmem>>, %arg3: memref<16x16xbf16, #tpu.memory_space<vmem>>, %arg4: memref<1x16xf32, #tpu.memory_space<vmem>>, %arg5: memref<128x16xf32, #tpu.memory_space<vmem>>) attributes {dimension_semantics = [#tpu.dimension_semantics<parallel>, #tpu.dimension_semantics<parallel>], iteration_bounds = array<i64: 1, 1>, scalar_prefetch = 0 : i64, scratch_operands = 0 : i64, tpu.core_type = #tpu.core_type<tc>, window_params = [{transform_indices = @transform_0, window_bounds = array<i64: 128, 16>}, {transform_indices = @transform_1, window_bounds = array<i64: 16, 16>}, {transform_indices = @transform_2, window_bounds = array<i64: 1, 16>}, {transform_indices = @transform_3, window_bounds = array<i64: 128, 16>}]} {
    %c0 = arith.constant 0 : index
    %c0_0 = arith.constant 0 : index
    %0 = vector.load %arg2[%c0, %c0_0] : memref<128x16xbf16, #tpu.memory_space<vmem>>, vector<128x16xbf16>
    %c0_1 = arith.constant 0 : index
    %c0_2 = arith.constant 0 : index
    %1 = vector.load %arg3[%c0_1, %c0_2] : memref<16x16xbf16, #tpu.memory_space<vmem>>, vector<16x16xbf16>
    %cst = arith.constant dense<0.000000e+00> : vector<128x16xf32>
    %2 = tpu.matmul %0, %1, %cst {dimension_numbers = #tpu.dot_dimension_numbers<[1], [0], [0], [1], [0, 0, 1, 1], [], []>} : vector<128x16xbf16>, vector<16x16xbf16>, vector<128x16xf32> -> vector<128x16xf32>
    %c0_3 = arith.constant 0 : index
    %c0_4 = arith.constant 0 : index
    %3 = vector.load %arg4[%c0_3, %c0_4] : memref<1x16xf32, #tpu.memory_space<vmem>>, vector<1x16xf32>
    %4 = vector.broadcast %3 : vector<1x16xf32> to vector<128x16xf32>
    %5 = arith.addf %2, %4 : vector<128x16xf32>
    %c0_5 = arith.constant 0 : index
    %c0_6 = arith.constant 0 : index
    %6 = vector.load %arg5[%c0_5, %c0_6] : memref<128x16xf32, #tpu.memory_space<vmem>>, vector<128x16xf32>
    tpu.vector_store %arg5[%c0_5, %c0_6], %5 {strides = array<i32>} : memref<128x16xf32, #tpu.memory_space<vmem>>, vector<128x16xf32>,
    return
  }
  func.func @transform_0(%arg0: i32, %arg1: i32) -> (i32, i32) {
    %c0_i32 = arith.constant 0 : i32
    %c0_i32_0 = arith.constant 0 : i32
    return %arg0, %c0_i32 : i32, i32
  }
  func.func @transform_1(%arg0: i32, %arg1: i32) -> (i32, i32) {
    %c0_i32 = arith.constant 0 : i32
    %c0_i32_0 = arith.constant 0 : i32
    return %c0_i32, %arg1 : i32, i32
  }
  func.func @transform_2(%arg0: i32, %arg1: i32) -> (i32, i32) {
    %c0_i32 = arith.constant 0 : i32
    %c0_i32_0 = arith.constant 0 : i32
    return %c0_i32, %arg1 : i32, i32
  }
  func.func @transform_3(%arg0: i32, %arg1: i32) -> (i32, i32) {
    %c0_i32 = arith.constant 0 : i32
    return %arg0, %arg1 : i32, i32
  }
}

module attributes {stable_mosaic.version = 11 : i64} {
  func.func @_fused_linear_kernel(%arg0: i32, %arg1: i32, %arg2: memref<128x16xf32, #tpu.memory_space<vmem>>, %arg3: memref<1x16xf32, #tpu.memory_space<vmem>>, %arg4: memref<1x16xf32, #tpu.memory_space<vmem>>, %arg5: memref<16x64xbf16, #tpu.memory_space<vmem>>, %arg6: memref<1x64xf32, #tpu.memory_space<vmem>>, %arg7: memref<128x64xbf16, #tpu.memory_space<vmem>>) attributes {dimension_semantics = [#tpu.dimension_semantics<parallel>, #tpu.dimension_semantics<parallel>], iteration_bounds = array<i64: 1, 1>, scalar_prefetch = 0 : i64, scratch_operands = 0 : i64, tpu.core_type = #tpu.core_type<tc>, window_params = [{transform_indices = @transform_0, window_bounds = array<i64: 128, 16>}, {pipeline_mode = #tpu.pipeline_mode<synchronous>, transform_indices = @transform_1, window_bounds = array<i64: 1, 16>}, {pipeline_mode = #tpu.pipeline_mode<synchronous>, transform_indices = @transform_2, window_bounds = array<i64: 1, 16>}, {transform_indices = @transform_3, window_bounds = array<i64: 16, 64>}, {transform_indices = @transform_4, window_bounds = array<i64: 1, 64>}, {transform_indices = @transform_5, window_bounds = array<i64: 128, 64>}]} {
    %c0 = arith.constant 0 : index
    %c0_0 = arith.constant 0 : index
    %0 = vector.load %arg2[%c0, %c0_0] : memref<128x16xf32, #tpu.memory_space<vmem>>, vector<128x16xf32>
    %cst = arith.constant dense<0.000000e+00> : vector<128xf32>
    %1 = vector.multi_reduction <add>, %0, %cst [1] : vector<128x16xf32> to vector<128xf32>
    %2 = vector.shape_cast %1 : vector<128xf32> to vector<128x1xf32>
    %cst_1 = arith.constant 1.600000e+01 : f32
    %3 = vector.broadcast %cst_1 : f32 to vector<128x1xf32>
    %4 = arith.divf %2, %3 : vector<128x1xf32>
    %5 = vector.broadcast %4 : vector<128x1xf32> to vector<128x16xf32>
    %6 = arith.subf %0, %5 : vector<128x16xf32>
    %7 = arith.mulf %6, %6 : vector<128x16xf32>
    %cst_2 = arith.constant dense<0.000000e+00> : vector<128xf32>
    %8 = vector.multi_reduction <add>, %7, %cst_2 [1] : vector<128x16xf32> to vector<128xf32>
    %9 = vector.shape_cast %8 : vector<128xf32> to vector<128x1xf32>
    %cst_3 = arith.constant 1.600000e+01 : f32
    %10 = vector.broadcast %cst_3 : f32 to vector<128x1xf32>
    %11 = arith.divf %9, %10 : vector<128x1xf32>
    %12 = vector.broadcast %4 : vector<128x1xf32> to vector<128x16xf32>
    %13 = arith.subf %0, %12 : vector<128x16xf32>
    %cst_4 = arith.constant 9.99999974E-6 : f32
    %14 = vector.broadcast %cst_4 : f32 to vector<128x1xf32>
    %15 = arith.addf %11, %14 : vector<128x1xf32>
    %16 = math.rsqrt %15 : vector<128x1xf32>
    %17 = vector.broadcast %16 : vector<128x1xf32> to vector<128x16xf32>
    %18 = arith.mulf %13, %17 : vector<128x16xf32>
    %c0_5 = arith.constant 0 : index
    %c0_6 = arith.constant 0 : index
    %19 = vector.load %arg3[%c0_5, %c0_6] : memref<1x16xf32, #tpu.memory_space<vmem>>, vector<1x16xf32>
    %20 = vector.broadcast %19 : vector<1x16xf32> to vector<128x16xf32>
    %21 = arith.mulf %18, %20 : vector<128x16xf32>
    %c0_7 = arith.constant 0 : index
    %c0_8 = arith.constant 0 : index
    %22 = vector.load %arg4[%c0_7, %c0_8] : memref<1x16xf32, #tpu.memory_space<vmem>>, vector<1x16xf32>
    %23 = vector.broadcast %22 : vector<1x16xf32> to vector<128x16xf32>
    %24 = arith.addf %21, %23 : vector<128x16xf32>
    %25 = arith.truncf %24 : vector<128x16xf32> to vector<128x16xbf16>
    %c0_9 = arith.constant 0 : index
    %c0_10 = arith.constant 0 : index
    %26 = vector.load %arg5[%c0_9, %c0_10] : memref<16x64xbf16, #tpu.memory_space<vmem>>, vector<16x64xbf16>
    %cst_11 = arith.constant dense<0.000000e+00> : vector<128x64xf32>
    %27 = tpu.matmul %25, %26, %cst_11 {dimension_numbers = #tpu.dot_dimension_numbers<[1], [0], [0], [1], [0, 0, 1, 1], [], []>} : vector<128x16xbf16>, vector<16x64xbf16>, vector<128x64xf32> -> vector<128x64xf32>
    %c0_12 = arith.constant 0 : index
    %c0_13 = arith.constant 0 : index
    %28 = vector.load %arg6[%c0_12, %c0_13] : memref<1x64xf32, #tpu.memory_space<vmem>>, vector<1x64xf32>
    %29 = vector.broadcast %28 : vector<1x64xf32> to vector<128x64xf32>
    %30 = arith.addf %27, %29 : vector<128x64xf32>
    %cst_14 = arith.constant 0.707106769 : f32
    %31 = vector.broadcast %cst_14 : f32 to vector<128x64xf32>
    %32 = arith.mulf %30, %31 : vector<128x64xf32>
    %33 = math.absf %32 : vector<128x64xf32>
    %cst_15 = arith.constant 0.327591091 : f32
    %34 = vector.broadcast %cst_15 : f32 to vector<128x64xf32>
    %35 = arith.mulf %34, %33 : vector<128x64xf32>
    %cst_16 = arith.constant 1.000000e+00 : f32
    %36 = vector.broadcast %cst_16 : f32 to vector<128x64xf32>
    %37 = arith.addf %36, %35 : vector<128x64xf32>
    %cst_17 = arith.constant 1.000000e+00 : f32
    %38 = vector.broadcast %cst_17 : f32 to vector<128x64xf32>
    %39 = arith.divf %38, %37 : vector<128x64xf32>
    %cst_18 = arith.constant 1.06140542 : f32
    %40 = vector.broadcast %cst_18 : f32 to vector<128x64xf32>
    %41 = arith.mulf %39, %40 : vector<128x64xf32>
    %cst_19 = arith.constant -1.45315206 : f32
    %42 = vector.broadcast %cst_19 : f32 to vector<128x64xf32>
    %43 = arith.addf %42, %41 : vector<128x64xf32>
    %44 = arith.mulf %39, %43 : vector<128x64xf32>
    %cst_20 = arith.constant 1.42141378 : f32
    %45 = vector.broadcast %cst_20 : f32 to vector<128x64xf32>
    %46 = arith.addf %45, %44 : vector<128x64xf32>
    %47 = arith.mulf %39, %46 : vector<128x64xf32>
    %cst_21 = arith.constant -0.284496725 : f32
    %48 = vector.broadcast %cst_21 : f32 to vector<128x64xf32>
    %49 = arith.addf %48, %47 : vector<128x64xf32>
    %50 = arith.mulf %39, %49 : vector<128x64xf32>
    %cst_22 = arith.constant 0.254829586 : f32
    %51 = vector.broadcast %cst_22 : f32 to vector<128x64xf32>
    %52 = arith.addf %51, %50 : vector<128x64xf32>
    %53 = arith.mulf %39, %52 : vector<128x64xf32>
    %cst_23 = arith.constant 0.000000e+00 : f32
    %54 = vector.broadcast %cst_23 : f32 to vector<128x64xf32>
    %55 = arith.subf %54, %33 : vector<128x64xf32>
    %56 = arith.mulf %55, %33 : vector<128x64xf32>
    %57 = math.exp %56 : vector<128x64xf32>
    %58 = arith.mulf %53, %57 : vector<128x64xf32>
    %cst_24 = arith.constant 1.000000e+00 : f32
    %59 = vector.broadcast %cst_24 : f32 to vector<128x64xf32>
    %60 = arith.subf %59, %58 : vector<128x64xf32>
    %cst_25 = arith.constant 0.000000e+00 : f32
    %61 = vector.broadcast %cst_25 : f32 to vector<128x64xf32>
    %62 = arith.cmpf oge, %32, %61 : vector<128x64xf32>
    %cst_26 = arith.constant 0.000000e+00 : f32
    %63 = vector.broadcast %cst_26 : f32 to vector<128x64xf32>
    %64 = arith.subf %63, %60 : vector<128x64xf32>
    %65 = arith.select %62, %60, %64 : vector<128x64xi1>, vector<128x64xf32>
    %cst_27 = arith.constant 5.000000e-01 : f32
    %66 = vector.broadcast %cst_27 : f32 to vector<128x64xf32>
    %67 = arith.mulf %66, %30 : vector<128x64xf32>
    %cst_28 = arith.constant 1.000000e+00 : f32
    %68 = vector.broadcast %cst_28 : f32 to vector<128x64xf32>
    %69 = arith.addf %68, %65 : vector<128x64xf32>
    %70 = arith.mulf %67, %69 : vector<128x64xf32>
    %71 = arith.truncf %70 : vector<128x64xf32> to vector<128x64xbf16>
    %c0_29 = arith.constant 0 : index
    %c0_30 = arith.constant 0 : index
    %72 = vector.load %arg7[%c0_29, %c0_30] : memref<128x64xbf16, #tpu.memory_space<vmem>>, vector<128x64xbf16>
    tpu.vector_store %arg7[%c0_29, %c0_30], %71 {strides = array<i32>} : memref<128x64xbf16, #tpu.memory_space<vmem>>, vector<128x64xbf16>,
    return
  }
  func.func @transform_0(%arg0: i32, %arg1: i32) -> (i32, i32) {
    %c0_i32 = arith.constant 0 : i32
    %c0_i32_0 = arith.constant 0 : i32
    return %arg0, %c0_i32 : i32, i32
  }
  func.func @transform_1(%arg0: i32, %arg1: i32) -> (i32, i32) {
    %c0_i32 = arith.constant 0 : i32
    %c0_i32_0 = arith.constant 0 : i32
    %c0_i32_1 = arith.constant 0 : i32
    return %c0_i32, %c0_i32_0 : i32, i32
  }
  func.func @transform_2(%arg0: i32, %arg1: i32) -> (i32, i32) {
    %c0_i32 = arith.constant 0 : i32
    %c0_i32_0 = arith.constant 0 : i32
    %c0_i32_1 = arith.constant 0 : i32
    return %c0_i32, %c0_i32_0 : i32, i32
  }
  func.func @transform_3(%arg0: i32, %arg1: i32) -> (i32, i32) {
    %c0_i32 = arith.constant 0 : i32
    %c0_i32_0 = arith.constant 0 : i32
    return %c0_i32, %arg1 : i32, i32
  }
  func.func @transform_4(%arg0: i32, %arg1: i32) -> (i32, i32) {
    %c0_i32 = arith.constant 0 : i32
    %c0_i32_0 = arith.constant 0 : i32
    return %c0_i32, %arg1 : i32, i32
  }
  func.func @transform_5(%arg0: i32, %arg1: i32) -> (i32, i32) {
    %c0_i32 = arith.constant 0 : i32
    return %arg0, %arg1 : i32, i32
  }
}

module attributes {stable_mosaic.version = 11 : i64} {
  func.func @_fused_linear_kernel(%arg0: i32, %arg1: i32, %arg2: memref<128x64xbf16, #tpu.memory_space<vmem>>, %arg3: memref<64x16xbf16, #tpu.memory_space<vmem>>, %arg4: memref<1x16xf32, #tpu.memory_space<vmem>>, %arg5: memref<128x16xf32, #tpu.memory_space<vmem>>, %arg6: memref<128x16xf32, #tpu.memory_space<vmem>>) attributes {dimension_semantics = [#tpu.dimension_semantics<parallel>, #tpu.dimension_semantics<parallel>], iteration_bounds = array<i64: 1, 1>, scalar_prefetch = 0 : i64, scratch_operands = 0 : i64, tpu.core_type = #tpu.core_type<tc>, window_params = [{transform_indices = @transform_0, window_bounds = array<i64: 128, 64>}, {transform_indices = @transform_1, window_bounds = array<i64: 64, 16>}, {transform_indices = @transform_2, window_bounds = array<i64: 1, 16>}, {transform_indices = @transform_3, window_bounds = array<i64: 128, 16>}, {transform_indices = @transform_4, window_bounds = array<i64: 128, 16>}]} {
    %c0 = arith.constant 0 : index
    %c0_0 = arith.constant 0 : index
    %0 = vector.load %arg2[%c0, %c0_0] : memref<128x64xbf16, #tpu.memory_space<vmem>>, vector<128x64xbf16>
    %c0_1 = arith.constant 0 : index
    %c0_2 = arith.constant 0 : index
    %1 = vector.load %arg3[%c0_1, %c0_2] : memref<64x16xbf16, #tpu.memory_space<vmem>>, vector<64x16xbf16>
    %cst = arith.constant dense<0.000000e+00> : vector<128x16xf32>
    %2 = tpu.matmul %0, %1, %cst {dimension_numbers = #tpu.dot_dimension_numbers<[1], [0], [0], [1], [0, 0, 1, 1], [], []>} : vector<128x64xbf16>, vector<64x16xbf16>, vector<128x16xf32> -> vector<128x16xf32>
    %c0_3 = arith.constant 0 : index
    %c0_4 = arith.constant 0 : index
    %3 = vector.load %arg4[%c0_3, %c0_4] : memref<1x16xf32, #tpu.memory_space<vmem>>, vector<1x16xf32>
    %4 = vector.broadcast %3 : vector<1x16xf32> to vector<128x16xf32>
    %5 = arith.addf %2, %4 : vector<128x16xf32>
    %c0_5 = arith.constant 0 : index
    %c0_6 = arith.constant 0 : index
    %6 = vector.load %arg5[%c0_5, %c0_6] : memref<128x16xf32, #tpu.memory_space<vmem>>, vector<128x16xf32>
    %7 = arith.addf %5, %6 : vector<128x16xf32>
    %c0_7 = arith.constant 0 : index
    %c0_8 = arith.constant 0 : index
    %8 = vector.load %arg6[%c0_7, %c0_8] : memref<128x16xf32, #tpu.memory_space<vmem>>, vector<128x16xf32>
    tpu.vector_store %arg6[%c0_7, %c0_8], %7 {strides = array<i32>} : memref<128x16xf32, #tpu.memory_space<vmem>>, vector<128x16xf32>,
    return
  }
  func.func @transform_0(%arg0: i32, %arg1: i32) -> (i32, i32) {
    %c0_i32 = arith.constant 0 : i32
    %c0_i32_0 = arith.constant 0 : i32
    return %arg0, %c0_i32 : i32, i32
  }
  func.func @transform_1(%arg0: i32, %arg1: i32) -> (i32, i32) {
    %c0_i32 = arith.constant 0 : i32
    %c0_i32_0 = arith.constant 0 : i32
    return %c0_i32, %arg1 : i32, i32
  }
  func.func @transform_2(%arg0: i32, %arg1: i32) -> (i32, i32) {
    %c0_i32 = arith.constant 0 : i32
    %c0_i32_0 = arith.constant 0 : i32
    return %c0_i32, %arg1 : i32, i32
  }
  func.func @transform_3(%arg0: i32, %arg1: i32) -> (i32, i32) {
    %c0_i32 = arith.constant 0 : i32
    return %arg0, %arg1 : i32, i32
  }
  func.func @transform_4(%arg0: i32, %arg1: i32) -> (i32, i32) {
    %c0_i32 = arith.constant 0 : i32
    return %arg0, %arg1 : i32, i32
  }
}

module attributes {stable_mosaic.version = 11 : i64} {
  func.func @_window_attn_kernel(%arg0: i32, %arg1: memref<8x16x48xbf16, #tpu.memory_space<vmem>>, %arg2: memref<8x2x16x16xf32, #tpu.memory_space<vmem>>, %arg3: memref<8x16x16xbf16, #tpu.memory_space<vmem>>) attributes {dimension_semantics = [#tpu.dimension_semantics<parallel>], iteration_bounds = array<i64: 1>, scalar_prefetch = 0 : i64, scratch_operands = 0 : i64, tpu.core_type = #tpu.core_type<tc>, window_params = [{transform_indices = @transform_0, window_bounds = array<i64: 8, 16, 48>}, {pipeline_mode = #tpu.pipeline_mode<synchronous>, transform_indices = @transform_1, window_bounds = array<i64: 8, 2, 16, 16>}, {transform_indices = @transform_2, window_bounds = array<i64: 8, 16, 16>}]} {
    %c0 = arith.constant 0 : index
    %c0_0 = arith.constant 0 : index
    %c0_1 = arith.constant 0 : index
    %0 = vector.load %arg1[%c0, %c0_0, %c0_1] : memref<8x16x48xbf16, #tpu.memory_space<vmem>>, vector<8x16x48xbf16>
    %c0_2 = arith.constant 0 : index
    %c0_3 = arith.constant 0 : index
    %c0_4 = arith.constant 0 : index
    %c0_5 = arith.constant 0 : index
    %1 = vector.load %arg2[%c0_2, %c0_3, %c0_4, %c0_5] : memref<8x2x16x16xf32, #tpu.memory_space<vmem>>, vector<8x2x16x16xf32>
    %2 = vector.extract_strided_slice %0 {offsets = [0, 0, 0], sizes = [8, 16, 8], strides = [1, 1, 1]} : vector<8x16x48xbf16> to vector<8x16x8xbf16>
    %3 = vector.extract_strided_slice %0 {offsets = [0, 0, 16], sizes = [8, 16, 8], strides = [1, 1, 1]} : vector<8x16x48xbf16> to vector<8x16x8xbf16>
    %4 = vector.extract_strided_slice %0 {offsets = [0, 0, 32], sizes = [8, 16, 8], strides = [1, 1, 1]} : vector<8x16x48xbf16> to vector<8x16x8xbf16>
    "tpu.trace_start"() <{level = 10 : i32, message = "gqd,gkd->gqk"}> : () -> ()
    %cst = arith.constant dense<0.000000e+00> : vector<8x16x16xf32>
    %5 = tpu.matmul %2, %3, %cst {dimension_numbers = #tpu.dot_dimension_numbers<[2], [2], [1], [1], [0, 0, 0, 1, 1, 1], [0], [0]>} : vector<8x16x8xbf16>, vector<8x16x8xbf16>, vector<8x16x16xf32> -> vector<8x16x16xf32>
    "tpu.trace_stop"() : () -> ()
    %cst_6 = arith.constant 0.353553385 : f32
    %6 = vector.broadcast %cst_6 : f32 to vector<8x16x16xf32>
    %7 = arith.mulf %5, %6 : vector<8x16x16xf32>
    %8 = vector.extract_strided_slice %1 {offsets = [0, 0, 0, 0], sizes = [8, 1, 16, 16], strides = [1, 1, 1, 1]} : vector<8x2x16x16xf32> to vector<8x1x16x16xf32>
    %9 = vector.shape_cast %8 : vector<8x1x16x16xf32> to vector<8x16x16xf32>
    %10 = arith.addf %7, %9 : vector<8x16x16xf32>
    %cst_7 = arith.constant dense<0xFF800000> : vector<8x16xf32>
    %11 = vector.multi_reduction <maximumf>, %10, %cst_7 [2] : vector<8x16x16xf32> to vector<8x16xf32>
    %12 = vector.shape_cast %11 : vector<8x16xf32> to vector<8x16x1xf32>
    %13 = vector.broadcast %12 : vector<8x16x1xf32> to vector<8x16x16xf32>
    %14 = arith.subf %10, %13 : vector<8x16x16xf32>
    %15 = math.exp %14 : vector<8x16x16xf32>
    %cst_8 = arith.constant dense<0.000000e+00> : vector<8x16xf32>
    %16 = vector.multi_reduction <add>, %15, %cst_8 [2] : vector<8x16x16xf32> to vector<8x16xf32>
    %17 = vector.shape_cast %16 : vector<8x16xf32> to vector<8x16x1xf32>
    %18 = tpu.reciprocal %17 {approx = true} : vector<8x16x1xf32> -> vector<8x16x1xf32>
    %19 = vector.broadcast %18 : vector<8x16x1xf32> to vector<8x16x16xf32>
    %20 = arith.mulf %15, %19 : vector<8x16x16xf32>
    %21 = arith.truncf %20 : vector<8x16x16xf32> to vector<8x16x16xbf16>
    "tpu.trace_start"() <{level = 10 : i32, message = "gqk,gkd->gqd"}> : () -> ()
    %cst_9 = arith.constant dense<0.000000e+00> : vector<8x16x8xf32>
    %22 = tpu.matmul %21, %4, %cst_9 {dimension_numbers = #tpu.dot_dimension_numbers<[2], [1], [1], [2], [0, 0, 0, 1, 1, 2], [0], [0]>} : vector<8x16x16xbf16>, vector<8x16x8xbf16>, vector<8x16x8xf32> -> vector<8x16x8xf32>
    "tpu.trace_stop"() : () -> ()
    %23 = vector.extract_strided_slice %0 {offsets = [0, 0, 8], sizes = [8, 16, 8], strides = [1, 1, 1]} : vector<8x16x48xbf16> to vector<8x16x8xbf16>
    %24 = vector.extract_strided_slice %0 {offsets = [0, 0, 24], sizes = [8, 16, 8], strides = [1, 1, 1]} : vector<8x16x48xbf16> to vector<8x16x8xbf16>
    %25 = vector.extract_strided_slice %0 {offsets = [0, 0, 40], sizes = [8, 16, 8], strides = [1, 1, 1]} : vector<8x16x48xbf16> to vector<8x16x8xbf16>
    "tpu.trace_start"() <{level = 10 : i32, message = "gqd,gkd->gqk"}> : () -> ()
    %cst_10 = arith.constant dense<0.000000e+00> : vector<8x16x16xf32>
    %26 = tpu.matmul %23, %24, %cst_10 {dimension_numbers = #tpu.dot_dimension_numbers<[2], [2], [1], [1], [0, 0, 0, 1, 1, 1], [0], [0]>} : vector<8x16x8xbf16>, vector<8x16x8xbf16>, vector<8x16x16xf32> -> vector<8x16x16xf32>
    "tpu.trace_stop"() : () -> ()
    %cst_11 = arith.constant 0.353553385 : f32
    %27 = vector.broadcast %cst_11 : f32 to vector<8x16x16xf32>
    %28 = arith.mulf %26, %27 : vector<8x16x16xf32>
    %29 = vector.extract_strided_slice %1 {offsets = [0, 1, 0, 0], sizes = [8, 1, 16, 16], strides = [1, 1, 1, 1]} : vector<8x2x16x16xf32> to vector<8x1x16x16xf32>
    %30 = vector.shape_cast %29 : vector<8x1x16x16xf32> to vector<8x16x16xf32>
    %31 = arith.addf %28, %30 : vector<8x16x16xf32>
    %cst_12 = arith.constant dense<0xFF800000> : vector<8x16xf32>
    %32 = vector.multi_reduction <maximumf>, %31, %cst_12 [2] : vector<8x16x16xf32> to vector<8x16xf32>
    %33 = vector.shape_cast %32 : vector<8x16xf32> to vector<8x16x1xf32>
    %34 = vector.broadcast %33 : vector<8x16x1xf32> to vector<8x16x16xf32>
    %35 = arith.subf %31, %34 : vector<8x16x16xf32>
    %36 = math.exp %35 : vector<8x16x16xf32>
    %cst_13 = arith.constant dense<0.000000e+00> : vector<8x16xf32>
    %37 = vector.multi_reduction <add>, %36, %cst_13 [2] : vector<8x16x16xf32> to vector<8x16xf32>
    %38 = vector.shape_cast %37 : vector<8x16xf32> to vector<8x16x1xf32>
    %39 = tpu.reciprocal %38 {approx = true} : vector<8x16x1xf32> -> vector<8x16x1xf32>
    %40 = vector.broadcast %39 : vector<8x16x1xf32> to vector<8x16x16xf32>
    %41 = arith.mulf %36, %40 : vector<8x16x16xf32>
    %42 = arith.truncf %41 : vector<8x16x16xf32> to vector<8x16x16xbf16>
    "tpu.trace_start"() <{level = 10 : i32, message = "gqk,gkd->gqd"}> : () -> ()
    %cst_14 = arith.constant dense<0.000000e+00> : vector<8x16x8xf32>
    %43 = tpu.matmul %42, %25, %cst_14 {dimension_numbers = #tpu.dot_dimension_numbers<[2], [1], [1], [2], [0, 0, 0, 1, 1, 2], [0], [0]>} : vector<8x16x16xbf16>, vector<8x16x8xbf16>, vector<8x16x8xf32> -> vector<8x16x8xf32>
    "tpu.trace_stop"() : () -> ()
    %44 = tpu.concatenate %22, %43 in 2 : vector<8x16x8xf32>, vector<8x16x8xf32> -> vector<8x16x16xf32>
    %45 = arith.truncf %44 : vector<8x16x16xf32> to vector<8x16x16xbf16>
    %c0_15 = arith.constant 0 : index
    %c0_16 = arith.constant 0 : index
    %c0_17 = arith.constant 0 : index
    %46 = vector.load %arg3[%c0_15, %c0_16, %c0_17] : memref<8x16x16xbf16, #tpu.memory_space<vmem>>, vector<8x16x16xbf16>
    tpu.vector_store %arg3[%c0_15, %c0_16, %c0_17], %45 {strides = array<i32>} : memref<8x16x16xbf16, #tpu.memory_space<vmem>>, vector<8x16x16xbf16>,
    return
  }
  func.func @transform_0(%arg0: i32) -> (i32, i32, i32) {
    %c0_i32 = arith.constant 0 : i32
    %c0_i32_0 = arith.constant 0 : i32
    %c0_i32_1 = arith.constant 0 : i32
    return %arg0, %c0_i32, %c0_i32_0 : i32, i32, i32
  }
  func.func @transform_1(%arg0: i32) -> (i32, i32, i32, i32) {
    %c0_i32 = arith.constant 0 : i32
    %c0_i32_0 = arith.constant 0 : i32
    %c0_i32_1 = arith.constant 0 : i32
    %c0_i32_2 = arith.constant 0 : i32
    %c0_i32_3 = arith.constant 0 : i32
    return %c0_i32, %c0_i32_0, %c0_i32_1, %c0_i32_2 : i32, i32, i32, i32
  }
  func.func @transform_2(%arg0: i32) -> (i32, i32, i32) {
    %c0_i32 = arith.constant 0 : i32
    %c0_i32_0 = arith.constant 0 : i32
    %c0_i32_1 = arith.constant 0 : i32
    return %arg0, %c0_i32, %c0_i32_0 : i32, i32, i32
  }
}

module attributes {stable_mosaic.version = 11 : i64} {
  func.func @_fused_linear_kernel(%arg0: i32, %arg1: i32, %arg2: memref<32x64xf32, #tpu.memory_space<vmem>>, %arg3: memref<1x64xf32, #tpu.memory_space<vmem>>, %arg4: memref<1x64xf32, #tpu.memory_space<vmem>>, %arg5: memref<64x32xbf16, #tpu.memory_space<vmem>>, %arg6: memref<1x32xf32, #tpu.memory_space<vmem>>, %arg7: memref<32x32xf32, #tpu.memory_space<vmem>>) attributes {dimension_semantics = [#tpu.dimension_semantics<parallel>, #tpu.dimension_semantics<parallel>], iteration_bounds = array<i64: 1, 1>, scalar_prefetch = 0 : i64, scratch_operands = 0 : i64, tpu.core_type = #tpu.core_type<tc>, window_params = [{transform_indices = @transform_0, window_bounds = array<i64: 32, 64>}, {pipeline_mode = #tpu.pipeline_mode<synchronous>, transform_indices = @transform_1, window_bounds = array<i64: 1, 64>}, {pipeline_mode = #tpu.pipeline_mode<synchronous>, transform_indices = @transform_2, window_bounds = array<i64: 1, 64>}, {transform_indices = @transform_3, window_bounds = array<i64: 64, 32>}, {transform_indices = @transform_4, window_bounds = array<i64: 1, 32>}, {transform_indices = @transform_5, window_bounds = array<i64: 32, 32>}]} {
    %c0 = arith.constant 0 : index
    %c0_0 = arith.constant 0 : index
    %0 = vector.load %arg2[%c0, %c0_0] : memref<32x64xf32, #tpu.memory_space<vmem>>, vector<32x64xf32>
    %cst = arith.constant dense<0.000000e+00> : vector<32xf32>
    %1 = vector.multi_reduction <add>, %0, %cst [1] : vector<32x64xf32> to vector<32xf32>
    %2 = vector.shape_cast %1 : vector<32xf32> to vector<32x1xf32>
    %cst_1 = arith.constant 6.400000e+01 : f32
    %3 = vector.broadcast %cst_1 : f32 to vector<32x1xf32>
    %4 = arith.divf %2, %3 : vector<32x1xf32>
    %5 = vector.broadcast %4 : vector<32x1xf32> to vector<32x64xf32>
    %6 = arith.subf %0, %5 : vector<32x64xf32>
    %7 = arith.mulf %6, %6 : vector<32x64xf32>
    %cst_2 = arith.constant dense<0.000000e+00> : vector<32xf32>
    %8 = vector.multi_reduction <add>, %7, %cst_2 [1] : vector<32x64xf32> to vector<32xf32>
    %9 = vector.shape_cast %8 : vector<32xf32> to vector<32x1xf32>
    %cst_3 = arith.constant 6.400000e+01 : f32
    %10 = vector.broadcast %cst_3 : f32 to vector<32x1xf32>
    %11 = arith.divf %9, %10 : vector<32x1xf32>
    %12 = vector.broadcast %4 : vector<32x1xf32> to vector<32x64xf32>
    %13 = arith.subf %0, %12 : vector<32x64xf32>
    %cst_4 = arith.constant 9.99999974E-6 : f32
    %14 = vector.broadcast %cst_4 : f32 to vector<32x1xf32>
    %15 = arith.addf %11, %14 : vector<32x1xf32>
    %16 = math.rsqrt %15 : vector<32x1xf32>
    %17 = vector.broadcast %16 : vector<32x1xf32> to vector<32x64xf32>
    %18 = arith.mulf %13, %17 : vector<32x64xf32>
    %c0_5 = arith.constant 0 : index
    %c0_6 = arith.constant 0 : index
    %19 = vector.load %arg3[%c0_5, %c0_6] : memref<1x64xf32, #tpu.memory_space<vmem>>, vector<1x64xf32>
    %20 = vector.broadcast %19 : vector<1x64xf32> to vector<32x64xf32>
    %21 = arith.mulf %18, %20 : vector<32x64xf32>
    %c0_7 = arith.constant 0 : index
    %c0_8 = arith.constant 0 : index
    %22 = vector.load %arg4[%c0_7, %c0_8] : memref<1x64xf32, #tpu.memory_space<vmem>>, vector<1x64xf32>
    %23 = vector.broadcast %22 : vector<1x64xf32> to vector<32x64xf32>
    %24 = arith.addf %21, %23 : vector<32x64xf32>
    %25 = arith.truncf %24 : vector<32x64xf32> to vector<32x64xbf16>
    %c0_9 = arith.constant 0 : index
    %c0_10 = arith.constant 0 : index
    %26 = vector.load %arg5[%c0_9, %c0_10] : memref<64x32xbf16, #tpu.memory_space<vmem>>, vector<64x32xbf16>
    %cst_11 = arith.constant dense<0.000000e+00> : vector<32x32xf32>
    %27 = tpu.matmul %25, %26, %cst_11 {dimension_numbers = #tpu.dot_dimension_numbers<[1], [0], [0], [1], [0, 0, 1, 1], [], []>} : vector<32x64xbf16>, vector<64x32xbf16>, vector<32x32xf32> -> vector<32x32xf32>
    %c0_12 = arith.constant 0 : index
    %c0_13 = arith.constant 0 : index
    %28 = vector.load %arg6[%c0_12, %c0_13] : memref<1x32xf32, #tpu.memory_space<vmem>>, vector<1x32xf32>
    %29 = vector.broadcast %28 : vector<1x32xf32> to vector<32x32xf32>
    %30 = arith.addf %27, %29 : vector<32x32xf32>
    %c0_14 = arith.constant 0 : index
    %c0_15 = arith.constant 0 : index
    %31 = vector.load %arg7[%c0_14, %c0_15] : memref<32x32xf32, #tpu.memory_space<vmem>>, vector<32x32xf32>
    tpu.vector_store %arg7[%c0_14, %c0_15], %30 {strides = array<i32>} : memref<32x32xf32, #tpu.memory_space<vmem>>, vector<32x32xf32>,
    return
  }
  func.func @transform_0(%arg0: i32, %arg1: i32) -> (i32, i32) {
    %c0_i32 = arith.constant 0 : i32
    %c0_i32_0 = arith.constant 0 : i32
    return %arg0, %c0_i32 : i32, i32
  }
  func.func @transform_1(%arg0: i32, %arg1: i32) -> (i32, i32) {
    %c0_i32 = arith.constant 0 : i32
    %c0_i32_0 = arith.constant 0 : i32
    %c0_i32_1 = arith.constant 0 : i32
    return %c0_i32, %c0_i32_0 : i32, i32
  }
  func.func @transform_2(%arg0: i32, %arg1: i32) -> (i32, i32) {
    %c0_i32 = arith.constant 0 : i32
    %c0_i32_0 = arith.constant 0 : i32
    %c0_i32_1 = arith.constant 0 : i32
    return %c0_i32, %c0_i32_0 : i32, i32
  }
  func.func @transform_3(%arg0: i32, %arg1: i32) -> (i32, i32) {
    %c0_i32 = arith.constant 0 : i32
    %c0_i32_0 = arith.constant 0 : i32
    return %c0_i32, %arg1 : i32, i32
  }
  func.func @transform_4(%arg0: i32, %arg1: i32) -> (i32, i32) {
    %c0_i32 = arith.constant 0 : i32
    %c0_i32_0 = arith.constant 0 : i32
    return %c0_i32, %arg1 : i32, i32
  }
  func.func @transform_5(%arg0: i32, %arg1: i32) -> (i32, i32) {
    %c0_i32 = arith.constant 0 : i32
    return %arg0, %arg1 : i32, i32
  }
}

module attributes {stable_mosaic.version = 11 : i64} {
  func.func @_fused_linear_kernel(%arg0: i32, %arg1: i32, %arg2: memref<32x32xf32, #tpu.memory_space<vmem>>, %arg3: memref<1x32xf32, #tpu.memory_space<vmem>>, %arg4: memref<1x32xf32, #tpu.memory_space<vmem>>, %arg5: memref<32x96xbf16, #tpu.memory_space<vmem>>, %arg6: memref<1x96xf32, #tpu.memory_space<vmem>>, %arg7: memref<32x96xbf16, #tpu.memory_space<vmem>>) attributes {dimension_semantics = [#tpu.dimension_semantics<parallel>, #tpu.dimension_semantics<parallel>], iteration_bounds = array<i64: 1, 1>, scalar_prefetch = 0 : i64, scratch_operands = 0 : i64, tpu.core_type = #tpu.core_type<tc>, window_params = [{transform_indices = @transform_0, window_bounds = array<i64: 32, 32>}, {pipeline_mode = #tpu.pipeline_mode<synchronous>, transform_indices = @transform_1, window_bounds = array<i64: 1, 32>}, {pipeline_mode = #tpu.pipeline_mode<synchronous>, transform_indices = @transform_2, window_bounds = array<i64: 1, 32>}, {transform_indices = @transform_3, window_bounds = array<i64: 32, 96>}, {transform_indices = @transform_4, window_bounds = array<i64: 1, 96>}, {transform_indices = @transform_5, window_bounds = array<i64: 32, 96>}]} {
    %c0 = arith.constant 0 : index
    %c0_0 = arith.constant 0 : index
    %0 = vector.load %arg2[%c0, %c0_0] : memref<32x32xf32, #tpu.memory_space<vmem>>, vector<32x32xf32>
    %cst = arith.constant dense<0.000000e+00> : vector<32xf32>
    %1 = vector.multi_reduction <add>, %0, %cst [1] : vector<32x32xf32> to vector<32xf32>
    %2 = vector.shape_cast %1 : vector<32xf32> to vector<32x1xf32>
    %cst_1 = arith.constant 3.200000e+01 : f32
    %3 = vector.broadcast %cst_1 : f32 to vector<32x1xf32>
    %4 = arith.divf %2, %3 : vector<32x1xf32>
    %5 = vector.broadcast %4 : vector<32x1xf32> to vector<32x32xf32>
    %6 = arith.subf %0, %5 : vector<32x32xf32>
    %7 = arith.mulf %6, %6 : vector<32x32xf32>
    %cst_2 = arith.constant dense<0.000000e+00> : vector<32xf32>
    %8 = vector.multi_reduction <add>, %7, %cst_2 [1] : vector<32x32xf32> to vector<32xf32>
    %9 = vector.shape_cast %8 : vector<32xf32> to vector<32x1xf32>
    %cst_3 = arith.constant 3.200000e+01 : f32
    %10 = vector.broadcast %cst_3 : f32 to vector<32x1xf32>
    %11 = arith.divf %9, %10 : vector<32x1xf32>
    %12 = vector.broadcast %4 : vector<32x1xf32> to vector<32x32xf32>
    %13 = arith.subf %0, %12 : vector<32x32xf32>
    %cst_4 = arith.constant 9.99999974E-6 : f32
    %14 = vector.broadcast %cst_4 : f32 to vector<32x1xf32>
    %15 = arith.addf %11, %14 : vector<32x1xf32>
    %16 = math.rsqrt %15 : vector<32x1xf32>
    %17 = vector.broadcast %16 : vector<32x1xf32> to vector<32x32xf32>
    %18 = arith.mulf %13, %17 : vector<32x32xf32>
    %c0_5 = arith.constant 0 : index
    %c0_6 = arith.constant 0 : index
    %19 = vector.load %arg3[%c0_5, %c0_6] : memref<1x32xf32, #tpu.memory_space<vmem>>, vector<1x32xf32>
    %20 = vector.broadcast %19 : vector<1x32xf32> to vector<32x32xf32>
    %21 = arith.mulf %18, %20 : vector<32x32xf32>
    %c0_7 = arith.constant 0 : index
    %c0_8 = arith.constant 0 : index
    %22 = vector.load %arg4[%c0_7, %c0_8] : memref<1x32xf32, #tpu.memory_space<vmem>>, vector<1x32xf32>
    %23 = vector.broadcast %22 : vector<1x32xf32> to vector<32x32xf32>
    %24 = arith.addf %21, %23 : vector<32x32xf32>
    %25 = arith.truncf %24 : vector<32x32xf32> to vector<32x32xbf16>
    %c0_9 = arith.constant 0 : index
    %c0_10 = arith.constant 0 : index
    %26 = vector.load %arg5[%c0_9, %c0_10] : memref<32x96xbf16, #tpu.memory_space<vmem>>, vector<32x96xbf16>
    %cst_11 = arith.constant dense<0.000000e+00> : vector<32x96xf32>
    %27 = tpu.matmul %25, %26, %cst_11 {dimension_numbers = #tpu.dot_dimension_numbers<[1], [0], [0], [1], [0, 0, 1, 1], [], []>} : vector<32x32xbf16>, vector<32x96xbf16>, vector<32x96xf32> -> vector<32x96xf32>
    %c0_12 = arith.constant 0 : index
    %c0_13 = arith.constant 0 : index
    %28 = vector.load %arg6[%c0_12, %c0_13] : memref<1x96xf32, #tpu.memory_space<vmem>>, vector<1x96xf32>
    %29 = vector.broadcast %28 : vector<1x96xf32> to vector<32x96xf32>
    %30 = arith.addf %27, %29 : vector<32x96xf32>
    %31 = arith.truncf %30 : vector<32x96xf32> to vector<32x96xbf16>
    %c0_14 = arith.constant 0 : index
    %c0_15 = arith.constant 0 : index
    %32 = vector.load %arg7[%c0_14, %c0_15] : memref<32x96xbf16, #tpu.memory_space<vmem>>, vector<32x96xbf16>
    tpu.vector_store %arg7[%c0_14, %c0_15], %31 {strides = array<i32>} : memref<32x96xbf16, #tpu.memory_space<vmem>>, vector<32x96xbf16>,
    return
  }
  func.func @transform_0(%arg0: i32, %arg1: i32) -> (i32, i32) {
    %c0_i32 = arith.constant 0 : i32
    %c0_i32_0 = arith.constant 0 : i32
    return %arg0, %c0_i32 : i32, i32
  }
  func.func @transform_1(%arg0: i32, %arg1: i32) -> (i32, i32) {
    %c0_i32 = arith.constant 0 : i32
    %c0_i32_0 = arith.constant 0 : i32
    %c0_i32_1 = arith.constant 0 : i32
    return %c0_i32, %c0_i32_0 : i32, i32
  }
  func.func @transform_2(%arg0: i32, %arg1: i32) -> (i32, i32) {
    %c0_i32 = arith.constant 0 : i32
    %c0_i32_0 = arith.constant 0 : i32
    %c0_i32_1 = arith.constant 0 : i32
    return %c0_i32, %c0_i32_0 : i32, i32
  }
  func.func @transform_3(%arg0: i32, %arg1: i32) -> (i32, i32) {
    %c0_i32 = arith.constant 0 : i32
    %c0_i32_0 = arith.constant 0 : i32
    return %c0_i32, %arg1 : i32, i32
  }
  func.func @transform_4(%arg0: i32, %arg1: i32) -> (i32, i32) {
    %c0_i32 = arith.constant 0 : i32
    %c0_i32_0 = arith.constant 0 : i32
    return %c0_i32, %arg1 : i32, i32
  }
  func.func @transform_5(%arg0: i32, %arg1: i32) -> (i32, i32) {
    %c0_i32 = arith.constant 0 : i32
    return %arg0, %arg1 : i32, i32
  }
}

module attributes {stable_mosaic.version = 11 : i64} {
  func.func @_fused_linear_kernel(%arg0: i32, %arg1: i32, %arg2: memref<32x32xbf16, #tpu.memory_space<vmem>>, %arg3: memref<32x32xbf16, #tpu.memory_space<vmem>>, %arg4: memref<1x32xf32, #tpu.memory_space<vmem>>, %arg5: memref<32x32xf32, #tpu.memory_space<vmem>>) attributes {dimension_semantics = [#tpu.dimension_semantics<parallel>, #tpu.dimension_semantics<parallel>], iteration_bounds = array<i64: 1, 1>, scalar_prefetch = 0 : i64, scratch_operands = 0 : i64, tpu.core_type = #tpu.core_type<tc>, window_params = [{transform_indices = @transform_0, window_bounds = array<i64: 32, 32>}, {transform_indices = @transform_1, window_bounds = array<i64: 32, 32>}, {transform_indices = @transform_2, window_bounds = array<i64: 1, 32>}, {transform_indices = @transform_3, window_bounds = array<i64: 32, 32>}]} {
    %c0 = arith.constant 0 : index
    %c0_0 = arith.constant 0 : index
    %0 = vector.load %arg2[%c0, %c0_0] : memref<32x32xbf16, #tpu.memory_space<vmem>>, vector<32x32xbf16>
    %c0_1 = arith.constant 0 : index
    %c0_2 = arith.constant 0 : index
    %1 = vector.load %arg3[%c0_1, %c0_2] : memref<32x32xbf16, #tpu.memory_space<vmem>>, vector<32x32xbf16>
    %cst = arith.constant dense<0.000000e+00> : vector<32x32xf32>
    %2 = tpu.matmul %0, %1, %cst {dimension_numbers = #tpu.dot_dimension_numbers<[1], [0], [0], [1], [0, 0, 1, 1], [], []>} : vector<32x32xbf16>, vector<32x32xbf16>, vector<32x32xf32> -> vector<32x32xf32>
    %c0_3 = arith.constant 0 : index
    %c0_4 = arith.constant 0 : index
    %3 = vector.load %arg4[%c0_3, %c0_4] : memref<1x32xf32, #tpu.memory_space<vmem>>, vector<1x32xf32>
    %4 = vector.broadcast %3 : vector<1x32xf32> to vector<32x32xf32>
    %5 = arith.addf %2, %4 : vector<32x32xf32>
    %c0_5 = arith.constant 0 : index
    %c0_6 = arith.constant 0 : index
    %6 = vector.load %arg5[%c0_5, %c0_6] : memref<32x32xf32, #tpu.memory_space<vmem>>, vector<32x32xf32>
    tpu.vector_store %arg5[%c0_5, %c0_6], %5 {strides = array<i32>} : memref<32x32xf32, #tpu.memory_space<vmem>>, vector<32x32xf32>,
    return
  }
  func.func @transform_0(%arg0: i32, %arg1: i32) -> (i32, i32) {
    %c0_i32 = arith.constant 0 : i32
    %c0_i32_0 = arith.constant 0 : i32
    return %arg0, %c0_i32 : i32, i32
  }
  func.func @transform_1(%arg0: i32, %arg1: i32) -> (i32, i32) {
    %c0_i32 = arith.constant 0 : i32
    %c0_i32_0 = arith.constant 0 : i32
    return %c0_i32, %arg1 : i32, i32
  }
  func.func @transform_2(%arg0: i32, %arg1: i32) -> (i32, i32) {
    %c0_i32 = arith.constant 0 : i32
    %c0_i32_0 = arith.constant 0 : i32
    return %c0_i32, %arg1 : i32, i32
  }
  func.func @transform_3(%arg0: i32, %arg1: i32) -> (i32, i32) {
    %c0_i32 = arith.constant 0 : i32
    return %arg0, %arg1 : i32, i32
  }
}

module attributes {stable_mosaic.version = 11 : i64} {
  func.func @_window_attn_kernel(%arg0: i32, %arg1: memref<2x16x96xbf16, #tpu.memory_space<vmem>>, %arg2: memref<1x4x16x16xf32, #tpu.memory_space<vmem>>, %arg3: memref<2x16x32xbf16, #tpu.memory_space<vmem>>) attributes {dimension_semantics = [#tpu.dimension_semantics<parallel>], iteration_bounds = array<i64: 1>, scalar_prefetch = 0 : i64, scratch_operands = 0 : i64, tpu.core_type = #tpu.core_type<tc>, window_params = [{transform_indices = @transform_0, window_bounds = array<i64: 2, 16, 96>}, {pipeline_mode = #tpu.pipeline_mode<synchronous>, transform_indices = @transform_1, window_bounds = array<i64: 1, 4, 16, 16>}, {transform_indices = @transform_2, window_bounds = array<i64: 2, 16, 32>}]} {
    %c0 = arith.constant 0 : index
    %c0_0 = arith.constant 0 : index
    %c0_1 = arith.constant 0 : index
    %0 = vector.load %arg1[%c0, %c0_0, %c0_1] : memref<2x16x96xbf16, #tpu.memory_space<vmem>>, vector<2x16x96xbf16>
    %c0_2 = arith.constant 0 : index
    %c0_3 = arith.constant 0 : index
    %c0_4 = arith.constant 0 : index
    %c0_5 = arith.constant 0 : index
    %1 = vector.load %arg2[%c0_2, %c0_3, %c0_4, %c0_5] : memref<1x4x16x16xf32, #tpu.memory_space<vmem>>, vector<1x4x16x16xf32>
    %2 = vector.extract_strided_slice %0 {offsets = [0, 0, 0], sizes = [2, 16, 8], strides = [1, 1, 1]} : vector<2x16x96xbf16> to vector<2x16x8xbf16>
    %3 = vector.extract_strided_slice %0 {offsets = [0, 0, 32], sizes = [2, 16, 8], strides = [1, 1, 1]} : vector<2x16x96xbf16> to vector<2x16x8xbf16>
    %4 = vector.extract_strided_slice %0 {offsets = [0, 0, 64], sizes = [2, 16, 8], strides = [1, 1, 1]} : vector<2x16x96xbf16> to vector<2x16x8xbf16>
    "tpu.trace_start"() <{level = 10 : i32, message = "gqd,gkd->gqk"}> : () -> ()
    %cst = arith.constant dense<0.000000e+00> : vector<2x16x16xf32>
    %5 = tpu.matmul %2, %3, %cst {dimension_numbers = #tpu.dot_dimension_numbers<[2], [2], [1], [1], [0, 0, 0, 1, 1, 1], [0], [0]>} : vector<2x16x8xbf16>, vector<2x16x8xbf16>, vector<2x16x16xf32> -> vector<2x16x16xf32>
    "tpu.trace_stop"() : () -> ()
    %cst_6 = arith.constant 0.353553385 : f32
    %6 = vector.broadcast %cst_6 : f32 to vector<2x16x16xf32>
    %7 = arith.mulf %5, %6 : vector<2x16x16xf32>
    %8 = vector.extract_strided_slice %1 {offsets = [0, 0, 0, 0], sizes = [1, 1, 16, 16], strides = [1, 1, 1, 1]} : vector<1x4x16x16xf32> to vector<1x1x16x16xf32>
    %9 = vector.shape_cast %8 : vector<1x1x16x16xf32> to vector<1x16x16xf32>
    %10 = vector.broadcast %9 : vector<1x16x16xf32> to vector<2x16x16xf32>
    %11 = arith.addf %7, %10 : vector<2x16x16xf32>
    %cst_7 = arith.constant dense<0xFF800000> : vector<2x16xf32>
    %12 = vector.multi_reduction <maximumf>, %11, %cst_7 [2] : vector<2x16x16xf32> to vector<2x16xf32>
    %13 = vector.shape_cast %12 : vector<2x16xf32> to vector<2x16x1xf32>
    %14 = vector.broadcast %13 : vector<2x16x1xf32> to vector<2x16x16xf32>
    %15 = arith.subf %11, %14 : vector<2x16x16xf32>
    %16 = math.exp %15 : vector<2x16x16xf32>
    %cst_8 = arith.constant dense<0.000000e+00> : vector<2x16xf32>
    %17 = vector.multi_reduction <add>, %16, %cst_8 [2] : vector<2x16x16xf32> to vector<2x16xf32>
    %18 = vector.shape_cast %17 : vector<2x16xf32> to vector<2x16x1xf32>
    %19 = tpu.reciprocal %18 {approx = true} : vector<2x16x1xf32> -> vector<2x16x1xf32>
    %20 = vector.broadcast %19 : vector<2x16x1xf32> to vector<2x16x16xf32>
    %21 = arith.mulf %16, %20 : vector<2x16x16xf32>
    %22 = arith.truncf %21 : vector<2x16x16xf32> to vector<2x16x16xbf16>
    "tpu.trace_start"() <{level = 10 : i32, message = "gqk,gkd->gqd"}> : () -> ()
    %cst_9 = arith.constant dense<0.000000e+00> : vector<2x16x8xf32>
    %23 = tpu.matmul %22, %4, %cst_9 {dimension_numbers = #tpu.dot_dimension_numbers<[2], [1], [1], [2], [0, 0, 0, 1, 1, 2], [0], [0]>} : vector<2x16x16xbf16>, vector<2x16x8xbf16>, vector<2x16x8xf32> -> vector<2x16x8xf32>
    "tpu.trace_stop"() : () -> ()
    %24 = vector.extract_strided_slice %0 {offsets = [0, 0, 8], sizes = [2, 16, 8], strides = [1, 1, 1]} : vector<2x16x96xbf16> to vector<2x16x8xbf16>
    %25 = vector.extract_strided_slice %0 {offsets = [0, 0, 40], sizes = [2, 16, 8], strides = [1, 1, 1]} : vector<2x16x96xbf16> to vector<2x16x8xbf16>
    %26 = vector.extract_strided_slice %0 {offsets = [0, 0, 72], sizes = [2, 16, 8], strides = [1, 1, 1]} : vector<2x16x96xbf16> to vector<2x16x8xbf16>
    "tpu.trace_start"() <{level = 10 : i32, message = "gqd,gkd->gqk"}> : () -> ()
    %cst_10 = arith.constant dense<0.000000e+00> : vector<2x16x16xf32>
    %27 = tpu.matmul %24, %25, %cst_10 {dimension_numbers = #tpu.dot_dimension_numbers<[2], [2], [1], [1], [0, 0, 0, 1, 1, 1], [0], [0]>} : vector<2x16x8xbf16>, vector<2x16x8xbf16>, vector<2x16x16xf32> -> vector<2x16x16xf32>
    "tpu.trace_stop"() : () -> ()
    %cst_11 = arith.constant 0.353553385 : f32
    %28 = vector.broadcast %cst_11 : f32 to vector<2x16x16xf32>
    %29 = arith.mulf %27, %28 : vector<2x16x16xf32>
    %30 = vector.extract_strided_slice %1 {offsets = [0, 1, 0, 0], sizes = [1, 1, 16, 16], strides = [1, 1, 1, 1]} : vector<1x4x16x16xf32> to vector<1x1x16x16xf32>
    %31 = vector.shape_cast %30 : vector<1x1x16x16xf32> to vector<1x16x16xf32>
    %32 = vector.broadcast %31 : vector<1x16x16xf32> to vector<2x16x16xf32>
    %33 = arith.addf %29, %32 : vector<2x16x16xf32>
    %cst_12 = arith.constant dense<0xFF800000> : vector<2x16xf32>
    %34 = vector.multi_reduction <maximumf>, %33, %cst_12 [2] : vector<2x16x16xf32> to vector<2x16xf32>
    %35 = vector.shape_cast %34 : vector<2x16xf32> to vector<2x16x1xf32>
    %36 = vector.broadcast %35 : vector<2x16x1xf32> to vector<2x16x16xf32>
    %37 = arith.subf %33, %36 : vector<2x16x16xf32>
    %38 = math.exp %37 : vector<2x16x16xf32>
    %cst_13 = arith.constant dense<0.000000e+00> : vector<2x16xf32>
    %39 = vector.multi_reduction <add>, %38, %cst_13 [2] : vector<2x16x16xf32> to vector<2x16xf32>
    %40 = vector.shape_cast %39 : vector<2x16xf32> to vector<2x16x1xf32>
    %41 = tpu.reciprocal %40 {approx = true} : vector<2x16x1xf32> -> vector<2x16x1xf32>
    %42 = vector.broadcast %41 : vector<2x16x1xf32> to vector<2x16x16xf32>
    %43 = arith.mulf %38, %42 : vector<2x16x16xf32>
    %44 = arith.truncf %43 : vector<2x16x16xf32> to vector<2x16x16xbf16>
    "tpu.trace_start"() <{level = 10 : i32, message = "gqk,gkd->gqd"}> : () -> ()
    %cst_14 = arith.constant dense<0.000000e+00> : vector<2x16x8xf32>
    %45 = tpu.matmul %44, %26, %cst_14 {dimension_numbers = #tpu.dot_dimension_numbers<[2], [1], [1], [2], [0, 0, 0, 1, 1, 2], [0], [0]>} : vector<2x16x16xbf16>, vector<2x16x8xbf16>, vector<2x16x8xf32> -> vector<2x16x8xf32>
    "tpu.trace_stop"() : () -> ()
    %46 = vector.extract_strided_slice %0 {offsets = [0, 0, 16], sizes = [2, 16, 8], strides = [1, 1, 1]} : vector<2x16x96xbf16> to vector<2x16x8xbf16>
    %47 = vector.extract_strided_slice %0 {offsets = [0, 0, 48], sizes = [2, 16, 8], strides = [1, 1, 1]} : vector<2x16x96xbf16> to vector<2x16x8xbf16>
    %48 = vector.extract_strided_slice %0 {offsets = [0, 0, 80], sizes = [2, 16, 8], strides = [1, 1, 1]} : vector<2x16x96xbf16> to vector<2x16x8xbf16>
    "tpu.trace_start"() <{level = 10 : i32, message = "gqd,gkd->gqk"}> : () -> ()
    %cst_15 = arith.constant dense<0.000000e+00> : vector<2x16x16xf32>
    %49 = tpu.matmul %46, %47, %cst_15 {dimension_numbers = #tpu.dot_dimension_numbers<[2], [2], [1], [1], [0, 0, 0, 1, 1, 1], [0], [0]>} : vector<2x16x8xbf16>, vector<2x16x8xbf16>, vector<2x16x16xf32> -> vector<2x16x16xf32>
    "tpu.trace_stop"() : () -> ()
    %cst_16 = arith.constant 0.353553385 : f32
    %50 = vector.broadcast %cst_16 : f32 to vector<2x16x16xf32>
    %51 = arith.mulf %49, %50 : vector<2x16x16xf32>
    %52 = vector.extract_strided_slice %1 {offsets = [0, 2, 0, 0], sizes = [1, 1, 16, 16], strides = [1, 1, 1, 1]} : vector<1x4x16x16xf32> to vector<1x1x16x16xf32>
    %53 = vector.shape_cast %52 : vector<1x1x16x16xf32> to vector<1x16x16xf32>
    %54 = vector.broadcast %53 : vector<1x16x16xf32> to vector<2x16x16xf32>
    %55 = arith.addf %51, %54 : vector<2x16x16xf32>
    %cst_17 = arith.constant dense<0xFF800000> : vector<2x16xf32>
    %56 = vector.multi_reduction <maximumf>, %55, %cst_17 [2] : vector<2x16x16xf32> to vector<2x16xf32>
    %57 = vector.shape_cast %56 : vector<2x16xf32> to vector<2x16x1xf32>
    %58 = vector.broadcast %57 : vector<2x16x1xf32> to vector<2x16x16xf32>
    %59 = arith.subf %55, %58 : vector<2x16x16xf32>
    %60 = math.exp %59 : vector<2x16x16xf32>
    %cst_18 = arith.constant dense<0.000000e+00> : vector<2x16xf32>
    %61 = vector.multi_reduction <add>, %60, %cst_18 [2] : vector<2x16x16xf32> to vector<2x16xf32>
    %62 = vector.shape_cast %61 : vector<2x16xf32> to vector<2x16x1xf32>
    %63 = tpu.reciprocal %62 {approx = true} : vector<2x16x1xf32> -> vector<2x16x1xf32>
    %64 = vector.broadcast %63 : vector<2x16x1xf32> to vector<2x16x16xf32>
    %65 = arith.mulf %60, %64 : vector<2x16x16xf32>
    %66 = arith.truncf %65 : vector<2x16x16xf32> to vector<2x16x16xbf16>
    "tpu.trace_start"() <{level = 10 : i32, message = "gqk,gkd->gqd"}> : () -> ()
    %cst_19 = arith.constant dense<0.000000e+00> : vector<2x16x8xf32>
    %67 = tpu.matmul %66, %48, %cst_19 {dimension_numbers = #tpu.dot_dimension_numbers<[2], [1], [1], [2], [0, 0, 0, 1, 1, 2], [0], [0]>} : vector<2x16x16xbf16>, vector<2x16x8xbf16>, vector<2x16x8xf32> -> vector<2x16x8xf32>
    "tpu.trace_stop"() : () -> ()
    %68 = vector.extract_strided_slice %0 {offsets = [0, 0, 24], sizes = [2, 16, 8], strides = [1, 1, 1]} : vector<2x16x96xbf16> to vector<2x16x8xbf16>
    %69 = vector.extract_strided_slice %0 {offsets = [0, 0, 56], sizes = [2, 16, 8], strides = [1, 1, 1]} : vector<2x16x96xbf16> to vector<2x16x8xbf16>
    %70 = vector.extract_strided_slice %0 {offsets = [0, 0, 88], sizes = [2, 16, 8], strides = [1, 1, 1]} : vector<2x16x96xbf16> to vector<2x16x8xbf16>
    "tpu.trace_start"() <{level = 10 : i32, message = "gqd,gkd->gqk"}> : () -> ()
    %cst_20 = arith.constant dense<0.000000e+00> : vector<2x16x16xf32>
    %71 = tpu.matmul %68, %69, %cst_20 {dimension_numbers = #tpu.dot_dimension_numbers<[2], [2], [1], [1], [0, 0, 0, 1, 1, 1], [0], [0]>} : vector<2x16x8xbf16>, vector<2x16x8xbf16>, vector<2x16x16xf32> -> vector<2x16x16xf32>
    "tpu.trace_stop"() : () -> ()
    %cst_21 = arith.constant 0.353553385 : f32
    %72 = vector.broadcast %cst_21 : f32 to vector<2x16x16xf32>
    %73 = arith.mulf %71, %72 : vector<2x16x16xf32>
    %74 = vector.extract_strided_slice %1 {offsets = [0, 3, 0, 0], sizes = [1, 1, 16, 16], strides = [1, 1, 1, 1]} : vector<1x4x16x16xf32> to vector<1x1x16x16xf32>
    %75 = vector.shape_cast %74 : vector<1x1x16x16xf32> to vector<1x16x16xf32>
    %76 = vector.broadcast %75 : vector<1x16x16xf32> to vector<2x16x16xf32>
    %77 = arith.addf %73, %76 : vector<2x16x16xf32>
    %cst_22 = arith.constant dense<0xFF800000> : vector<2x16xf32>
    %78 = vector.multi_reduction <maximumf>, %77, %cst_22 [2] : vector<2x16x16xf32> to vector<2x16xf32>
    %79 = vector.shape_cast %78 : vector<2x16xf32> to vector<2x16x1xf32>
    %80 = vector.broadcast %79 : vector<2x16x1xf32> to vector<2x16x16xf32>
    %81 = arith.subf %77, %80 : vector<2x16x16xf32>
    %82 = math.exp %81 : vector<2x16x16xf32>
    %cst_23 = arith.constant dense<0.000000e+00> : vector<2x16xf32>
    %83 = vector.multi_reduction <add>, %82, %cst_23 [2] : vector<2x16x16xf32> to vector<2x16xf32>
    %84 = vector.shape_cast %83 : vector<2x16xf32> to vector<2x16x1xf32>
    %85 = tpu.reciprocal %84 {approx = true} : vector<2x16x1xf32> -> vector<2x16x1xf32>
    %86 = vector.broadcast %85 : vector<2x16x1xf32> to vector<2x16x16xf32>
    %87 = arith.mulf %82, %86 : vector<2x16x16xf32>
    %88 = arith.truncf %87 : vector<2x16x16xf32> to vector<2x16x16xbf16>
    "tpu.trace_start"() <{level = 10 : i32, message = "gqk,gkd->gqd"}> : () -> ()
    %cst_24 = arith.constant dense<0.000000e+00> : vector<2x16x8xf32>
    %89 = tpu.matmul %88, %70, %cst_24 {dimension_numbers = #tpu.dot_dimension_numbers<[2], [1], [1], [2], [0, 0, 0, 1, 1, 2], [0], [0]>} : vector<2x16x16xbf16>, vector<2x16x8xbf16>, vector<2x16x8xf32> -> vector<2x16x8xf32>
    "tpu.trace_stop"() : () -> ()
    %90 = tpu.concatenate %23, %45, %67, %89 in 2 : vector<2x16x8xf32>, vector<2x16x8xf32>, vector<2x16x8xf32>, vector<2x16x8xf32> -> vector<2x16x32xf32>
    %91 = arith.truncf %90 : vector<2x16x32xf32> to vector<2x16x32xbf16>
    %c0_25 = arith.constant 0 : index
    %c0_26 = arith.constant 0 : index
    %c0_27 = arith.constant 0 : index
    %92 = vector.load %arg3[%c0_25, %c0_26, %c0_27] : memref<2x16x32xbf16, #tpu.memory_space<vmem>>, vector<2x16x32xbf16>
    tpu.vector_store %arg3[%c0_25, %c0_26, %c0_27], %91 {strides = array<i32>} : memref<2x16x32xbf16, #tpu.memory_space<vmem>>, vector<2x16x32xbf16>,
    return
  }
  func.func @transform_0(%arg0: i32) -> (i32, i32, i32) {
    %c0_i32 = arith.constant 0 : i32
    %c0_i32_0 = arith.constant 0 : i32
    %c0_i32_1 = arith.constant 0 : i32
    return %arg0, %c0_i32, %c0_i32_0 : i32, i32, i32
  }
  func.func @transform_1(%arg0: i32) -> (i32, i32, i32, i32) {
    %c0_i32 = arith.constant 0 : i32
    %c0_i32_0 = arith.constant 0 : i32
    %c0_i32_1 = arith.constant 0 : i32
    %c0_i32_2 = arith.constant 0 : i32
    %c0_i32_3 = arith.constant 0 : i32
    return %c0_i32, %c0_i32_0, %c0_i32_1, %c0_i32_2 : i32, i32, i32, i32
  }
  func.func @transform_2(%arg0: i32) -> (i32, i32, i32) {
    %c0_i32 = arith.constant 0 : i32
    %c0_i32_0 = arith.constant 0 : i32
    %c0_i32_1 = arith.constant 0 : i32
    return %arg0, %c0_i32, %c0_i32_0 : i32, i32, i32
  }
}

module attributes {stable_mosaic.version = 11 : i64} {
  func.func @_fused_linear_kernel(%arg0: i32, %arg1: i32, %arg2: memref<32x32xf32, #tpu.memory_space<vmem>>, %arg3: memref<1x32xf32, #tpu.memory_space<vmem>>, %arg4: memref<1x32xf32, #tpu.memory_space<vmem>>, %arg5: memref<32x128xbf16, #tpu.memory_space<vmem>>, %arg6: memref<1x128xf32, #tpu.memory_space<vmem>>, %arg7: memref<32x128xbf16, #tpu.memory_space<vmem>>) attributes {dimension_semantics = [#tpu.dimension_semantics<parallel>, #tpu.dimension_semantics<parallel>], iteration_bounds = array<i64: 1, 1>, scalar_prefetch = 0 : i64, scratch_operands = 0 : i64, tpu.core_type = #tpu.core_type<tc>, window_params = [{transform_indices = @transform_0, window_bounds = array<i64: 32, 32>}, {pipeline_mode = #tpu.pipeline_mode<synchronous>, transform_indices = @transform_1, window_bounds = array<i64: 1, 32>}, {pipeline_mode = #tpu.pipeline_mode<synchronous>, transform_indices = @transform_2, window_bounds = array<i64: 1, 32>}, {transform_indices = @transform_3, window_bounds = array<i64: 32, 128>}, {transform_indices = @transform_4, window_bounds = array<i64: 1, 128>}, {transform_indices = @transform_5, window_bounds = array<i64: 32, 128>}]} {
    %c0 = arith.constant 0 : index
    %c0_0 = arith.constant 0 : index
    %0 = vector.load %arg2[%c0, %c0_0] : memref<32x32xf32, #tpu.memory_space<vmem>>, vector<32x32xf32>
    %cst = arith.constant dense<0.000000e+00> : vector<32xf32>
    %1 = vector.multi_reduction <add>, %0, %cst [1] : vector<32x32xf32> to vector<32xf32>
    %2 = vector.shape_cast %1 : vector<32xf32> to vector<32x1xf32>
    %cst_1 = arith.constant 3.200000e+01 : f32
    %3 = vector.broadcast %cst_1 : f32 to vector<32x1xf32>
    %4 = arith.divf %2, %3 : vector<32x1xf32>
    %5 = vector.broadcast %4 : vector<32x1xf32> to vector<32x32xf32>
    %6 = arith.subf %0, %5 : vector<32x32xf32>
    %7 = arith.mulf %6, %6 : vector<32x32xf32>
    %cst_2 = arith.constant dense<0.000000e+00> : vector<32xf32>
    %8 = vector.multi_reduction <add>, %7, %cst_2 [1] : vector<32x32xf32> to vector<32xf32>
    %9 = vector.shape_cast %8 : vector<32xf32> to vector<32x1xf32>
    %cst_3 = arith.constant 3.200000e+01 : f32
    %10 = vector.broadcast %cst_3 : f32 to vector<32x1xf32>
    %11 = arith.divf %9, %10 : vector<32x1xf32>
    %12 = vector.broadcast %4 : vector<32x1xf32> to vector<32x32xf32>
    %13 = arith.subf %0, %12 : vector<32x32xf32>
    %cst_4 = arith.constant 9.99999974E-6 : f32
    %14 = vector.broadcast %cst_4 : f32 to vector<32x1xf32>
    %15 = arith.addf %11, %14 : vector<32x1xf32>
    %16 = math.rsqrt %15 : vector<32x1xf32>
    %17 = vector.broadcast %16 : vector<32x1xf32> to vector<32x32xf32>
    %18 = arith.mulf %13, %17 : vector<32x32xf32>
    %c0_5 = arith.constant 0 : index
    %c0_6 = arith.constant 0 : index
    %19 = vector.load %arg3[%c0_5, %c0_6] : memref<1x32xf32, #tpu.memory_space<vmem>>, vector<1x32xf32>
    %20 = vector.broadcast %19 : vector<1x32xf32> to vector<32x32xf32>
    %21 = arith.mulf %18, %20 : vector<32x32xf32>
    %c0_7 = arith.constant 0 : index
    %c0_8 = arith.constant 0 : index
    %22 = vector.load %arg4[%c0_7, %c0_8] : memref<1x32xf32, #tpu.memory_space<vmem>>, vector<1x32xf32>
    %23 = vector.broadcast %22 : vector<1x32xf32> to vector<32x32xf32>
    %24 = arith.addf %21, %23 : vector<32x32xf32>
    %25 = arith.truncf %24 : vector<32x32xf32> to vector<32x32xbf16>
    %c0_9 = arith.constant 0 : index
    %c0_10 = arith.constant 0 : index
    %26 = vector.load %arg5[%c0_9, %c0_10] : memref<32x128xbf16, #tpu.memory_space<vmem>>, vector<32x128xbf16>
    %cst_11 = arith.constant dense<0.000000e+00> : vector<32x128xf32>
    %27 = tpu.matmul %25, %26, %cst_11 {dimension_numbers = #tpu.dot_dimension_numbers<[1], [0], [0], [1], [0, 0, 1, 1], [], []>} : vector<32x32xbf16>, vector<32x128xbf16>, vector<32x128xf32> -> vector<32x128xf32>
    %c0_12 = arith.constant 0 : index
    %c0_13 = arith.constant 0 : index
    %28 = vector.load %arg6[%c0_12, %c0_13] : memref<1x128xf32, #tpu.memory_space<vmem>>, vector<1x128xf32>
    %29 = vector.broadcast %28 : vector<1x128xf32> to vector<32x128xf32>
    %30 = arith.addf %27, %29 : vector<32x128xf32>
    %cst_14 = arith.constant 0.707106769 : f32
    %31 = vector.broadcast %cst_14 : f32 to vector<32x128xf32>
    %32 = arith.mulf %30, %31 : vector<32x128xf32>
    %33 = math.absf %32 : vector<32x128xf32>
    %cst_15 = arith.constant 0.327591091 : f32
    %34 = vector.broadcast %cst_15 : f32 to vector<32x128xf32>
    %35 = arith.mulf %34, %33 : vector<32x128xf32>
    %cst_16 = arith.constant 1.000000e+00 : f32
    %36 = vector.broadcast %cst_16 : f32 to vector<32x128xf32>
    %37 = arith.addf %36, %35 : vector<32x128xf32>
    %cst_17 = arith.constant 1.000000e+00 : f32
    %38 = vector.broadcast %cst_17 : f32 to vector<32x128xf32>
    %39 = arith.divf %38, %37 : vector<32x128xf32>
    %cst_18 = arith.constant 1.06140542 : f32
    %40 = vector.broadcast %cst_18 : f32 to vector<32x128xf32>
    %41 = arith.mulf %39, %40 : vector<32x128xf32>
    %cst_19 = arith.constant -1.45315206 : f32
    %42 = vector.broadcast %cst_19 : f32 to vector<32x128xf32>
    %43 = arith.addf %42, %41 : vector<32x128xf32>
    %44 = arith.mulf %39, %43 : vector<32x128xf32>
    %cst_20 = arith.constant 1.42141378 : f32
    %45 = vector.broadcast %cst_20 : f32 to vector<32x128xf32>
    %46 = arith.addf %45, %44 : vector<32x128xf32>
    %47 = arith.mulf %39, %46 : vector<32x128xf32>
    %cst_21 = arith.constant -0.284496725 : f32
    %48 = vector.broadcast %cst_21 : f32 to vector<32x128xf32>
    %49 = arith.addf %48, %47 : vector<32x128xf32>
    %50 = arith.mulf %39, %49 : vector<32x128xf32>
    %cst_22 = arith.constant 0.254829586 : f32
    %51 = vector.broadcast %cst_22 : f32 to vector<32x128xf32>
    %52 = arith.addf %51, %50 : vector<32x128xf32>
    %53 = arith.mulf %39, %52 : vector<32x128xf32>
    %cst_23 = arith.constant 0.000000e+00 : f32
    %54 = vector.broadcast %cst_23 : f32 to vector<32x128xf32>
    %55 = arith.subf %54, %33 : vector<32x128xf32>
    %56 = arith.mulf %55, %33 : vector<32x128xf32>
    %57 = math.exp %56 : vector<32x128xf32>
    %58 = arith.mulf %53, %57 : vector<32x128xf32>
    %cst_24 = arith.constant 1.000000e+00 : f32
    %59 = vector.broadcast %cst_24 : f32 to vector<32x128xf32>
    %60 = arith.subf %59, %58 : vector<32x128xf32>
    %cst_25 = arith.constant 0.000000e+00 : f32
    %61 = vector.broadcast %cst_25 : f32 to vector<32x128xf32>
    %62 = arith.cmpf oge, %32, %61 : vector<32x128xf32>
    %cst_26 = arith.constant 0.000000e+00 : f32
    %63 = vector.broadcast %cst_26 : f32 to vector<32x128xf32>
    %64 = arith.subf %63, %60 : vector<32x128xf32>
    %65 = arith.select %62, %60, %64 : vector<32x128xi1>, vector<32x128xf32>
    %cst_27 = arith.constant 5.000000e-01 : f32
    %66 = vector.broadcast %cst_27 : f32 to vector<32x128xf32>
    %67 = arith.mulf %66, %30 : vector<32x128xf32>
    %cst_28 = arith.constant 1.000000e+00 : f32
    %68 = vector.broadcast %cst_28 : f32 to vector<32x128xf32>
    %69 = arith.addf %68, %65 : vector<32x128xf32>
    %70 = arith.mulf %67, %69 : vector<32x128xf32>
    %71 = arith.truncf %70 : vector<32x128xf32> to vector<32x128xbf16>
    %c0_29 = arith.constant 0 : index
    %c0_30 = arith.constant 0 : index
    %72 = vector.load %arg7[%c0_29, %c0_30] : memref<32x128xbf16, #tpu.memory_space<vmem>>, vector<32x128xbf16>
    tpu.vector_store %arg7[%c0_29, %c0_30], %71 {strides = array<i32>} : memref<32x128xbf16, #tpu.memory_space<vmem>>, vector<32x128xbf16>,
    return
  }
  func.func @transform_0(%arg0: i32, %arg1: i32) -> (i32, i32) {
    %c0_i32 = arith.constant 0 : i32
    %c0_i32_0 = arith.constant 0 : i32
    return %arg0, %c0_i32 : i32, i32
  }
  func.func @transform_1(%arg0: i32, %arg1: i32) -> (i32, i32) {
    %c0_i32 = arith.constant 0 : i32
    %c0_i32_0 = arith.constant 0 : i32
    %c0_i32_1 = arith.constant 0 : i32
    return %c0_i32, %c0_i32_0 : i32, i32
  }
  func.func @transform_2(%arg0: i32, %arg1: i32) -> (i32, i32) {
    %c0_i32 = arith.constant 0 : i32
    %c0_i32_0 = arith.constant 0 : i32
    %c0_i32_1 = arith.constant 0 : i32
    return %c0_i32, %c0_i32_0 : i32, i32
  }
  func.func @transform_3(%arg0: i32, %arg1: i32) -> (i32, i32) {
    %c0_i32 = arith.constant 0 : i32
    %c0_i32_0 = arith.constant 0 : i32
    return %c0_i32, %arg1 : i32, i32
  }
  func.func @transform_4(%arg0: i32, %arg1: i32) -> (i32, i32) {
    %c0_i32 = arith.constant 0 : i32
    %c0_i32_0 = arith.constant 0 : i32
    return %c0_i32, %arg1 : i32, i32
  }
  func.func @transform_5(%arg0: i32, %arg1: i32) -> (i32, i32) {
    %c0_i32 = arith.constant 0 : i32
    return %arg0, %arg1 : i32, i32
  }
}

module attributes {stable_mosaic.version = 11 : i64} {
  func.func @_layernorm_kernel(%arg0: i32, %arg1: memref<32x32xf32, #tpu.memory_space<vmem>>, %arg2: memref<1x32xf32, #tpu.memory_space<vmem>>, %arg3: memref<1x32xf32, #tpu.memory_space<vmem>>, %arg4: memref<32x32xf32, #tpu.memory_space<vmem>>) attributes {dimension_semantics = [#tpu.dimension_semantics<parallel>], iteration_bounds = array<i64: 1>, scalar_prefetch = 0 : i64, scratch_operands = 0 : i64, tpu.core_type = #tpu.core_type<tc>, window_params = [{transform_indices = @transform_0, window_bounds = array<i64: 32, 32>}, {pipeline_mode = #tpu.pipeline_mode<synchronous>, transform_indices = @transform_1, window_bounds = array<i64: 1, 32>}, {pipeline_mode = #tpu.pipeline_mode<synchronous>, transform_indices = @transform_2, window_bounds = array<i64: 1, 32>}, {transform_indices = @transform_3, window_bounds = array<i64: 32, 32>}]} {
    %c0 = arith.constant 0 : index
    %c0_0 = arith.constant 0 : index
    %0 = vector.load %arg1[%c0, %c0_0] : memref<32x32xf32, #tpu.memory_space<vmem>>, vector<32x32xf32>
    %cst = arith.constant dense<0.000000e+00> : vector<32xf32>
    %1 = vector.multi_reduction <add>, %0, %cst [1] : vector<32x32xf32> to vector<32xf32>
    %2 = vector.shape_cast %1 : vector<32xf32> to vector<32x1xf32>
    %cst_1 = arith.constant 3.200000e+01 : f32
    %3 = vector.broadcast %cst_1 : f32 to vector<32x1xf32>
    %4 = arith.divf %2, %3 : vector<32x1xf32>
    %5 = vector.broadcast %4 : vector<32x1xf32> to vector<32x32xf32>
    %6 = arith.subf %0, %5 : vector<32x32xf32>
    %7 = arith.mulf %6, %6 : vector<32x32xf32>
    %cst_2 = arith.constant dense<0.000000e+00> : vector<32xf32>
    %8 = vector.multi_reduction <add>, %7, %cst_2 [1] : vector<32x32xf32> to vector<32xf32>
    %9 = vector.shape_cast %8 : vector<32xf32> to vector<32x1xf32>
    %cst_3 = arith.constant 3.200000e+01 : f32
    %10 = vector.broadcast %cst_3 : f32 to vector<32x1xf32>
    %11 = arith.divf %9, %10 : vector<32x1xf32>
    %12 = vector.broadcast %4 : vector<32x1xf32> to vector<32x32xf32>
    %13 = arith.subf %0, %12 : vector<32x32xf32>
    %cst_4 = arith.constant 9.99999974E-6 : f32
    %14 = vector.broadcast %cst_4 : f32 to vector<32x1xf32>
    %15 = arith.addf %11, %14 : vector<32x1xf32>
    %16 = math.rsqrt %15 : vector<32x1xf32>
    %17 = vector.broadcast %16 : vector<32x1xf32> to vector<32x32xf32>
    %18 = arith.mulf %13, %17 : vector<32x32xf32>
    %c0_5 = arith.constant 0 : index
    %c0_6 = arith.constant 0 : index
    %19 = vector.load %arg2[%c0_5, %c0_6] : memref<1x32xf32, #tpu.memory_space<vmem>>, vector<1x32xf32>
    %20 = vector.broadcast %19 : vector<1x32xf32> to vector<32x32xf32>
    %21 = arith.mulf %18, %20 : vector<32x32xf32>
    %c0_7 = arith.constant 0 : index
    %c0_8 = arith.constant 0 : index
    %22 = vector.load %arg3[%c0_7, %c0_8] : memref<1x32xf32, #tpu.memory_space<vmem>>, vector<1x32xf32>
    %23 = vector.broadcast %22 : vector<1x32xf32> to vector<32x32xf32>
    %24 = arith.addf %21, %23 : vector<32x32xf32>
    %c0_9 = arith.constant 0 : index
    %c0_10 = arith.constant 0 : index
    %25 = vector.load %arg4[%c0_9, %c0_10] : memref<32x32xf32, #tpu.memory_space<vmem>>, vector<32x32xf32>
    tpu.vector_store %arg4[%c0_9, %c0_10], %24 {strides = array<i32>} : memref<32x32xf32, #tpu.memory_space<vmem>>, vector<32x32xf32>,
    return
  }
  func.func @transform_0(%arg0: i32) -> (i32, i32) {
    %c0_i32 = arith.constant 0 : i32
    %c0_i32_0 = arith.constant 0 : i32
    return %arg0, %c0_i32 : i32, i32
  }
  func.func @transform_1(%arg0: i32) -> (i32, i32) {
    %c0_i32 = arith.constant 0 : i32
    %c0_i32_0 = arith.constant 0 : i32
    %c0_i32_1 = arith.constant 0 : i32
    return %c0_i32, %c0_i32_0 : i32, i32
  }
  func.func @transform_2(%arg0: i32) -> (i32, i32) {
    %c0_i32 = arith.constant 0 : i32
    %c0_i32_0 = arith.constant 0 : i32
    %c0_i32_1 = arith.constant 0 : i32
    return %c0_i32, %c0_i32_0 : i32, i32
  }
  func.func @transform_3(%arg0: i32) -> (i32, i32) {
    %c0_i32 = arith.constant 0 : i32
    %c0_i32_0 = arith.constant 0 : i32
    return %arg0, %c0_i32 : i32, i32
  }
}

module attributes {stable_mosaic.version = 11 : i64} {
  func.func @_fused_linear_kernel(%arg0: i32, %arg1: i32, %arg2: memref<32x128xbf16, #tpu.memory_space<vmem>>, %arg3: memref<128x32xbf16, #tpu.memory_space<vmem>>, %arg4: memref<1x32xf32, #tpu.memory_space<vmem>>, %arg5: memref<32x32xf32, #tpu.memory_space<vmem>>, %arg6: memref<32x32xf32, #tpu.memory_space<vmem>>) attributes {dimension_semantics = [#tpu.dimension_semantics<parallel>, #tpu.dimension_semantics<parallel>], iteration_bounds = array<i64: 1, 1>, scalar_prefetch = 0 : i64, scratch_operands = 0 : i64, tpu.core_type = #tpu.core_type<tc>, window_params = [{transform_indices = @transform_0, window_bounds = array<i64: 32, 128>}, {transform_indices = @transform_1, window_bounds = array<i64: 128, 32>}, {transform_indices = @transform_2, window_bounds = array<i64: 1, 32>}, {transform_indices = @transform_3, window_bounds = array<i64: 32, 32>}, {transform_indices = @transform_4, window_bounds = array<i64: 32, 32>}]} {
    %c0 = arith.constant 0 : index
    %c0_0 = arith.constant 0 : index
    %0 = vector.load %arg2[%c0, %c0_0] : memref<32x128xbf16, #tpu.memory_space<vmem>>, vector<32x128xbf16>
    %c0_1 = arith.constant 0 : index
    %c0_2 = arith.constant 0 : index
    %1 = vector.load %arg3[%c0_1, %c0_2] : memref<128x32xbf16, #tpu.memory_space<vmem>>, vector<128x32xbf16>
    %cst = arith.constant dense<0.000000e+00> : vector<32x32xf32>
    %2 = tpu.matmul %0, %1, %cst {dimension_numbers = #tpu.dot_dimension_numbers<[1], [0], [0], [1], [0, 0, 1, 1], [], []>} : vector<32x128xbf16>, vector<128x32xbf16>, vector<32x32xf32> -> vector<32x32xf32>
    %c0_3 = arith.constant 0 : index
    %c0_4 = arith.constant 0 : index
    %3 = vector.load %arg4[%c0_3, %c0_4] : memref<1x32xf32, #tpu.memory_space<vmem>>, vector<1x32xf32>
    %4 = vector.broadcast %3 : vector<1x32xf32> to vector<32x32xf32>
    %5 = arith.addf %2, %4 : vector<32x32xf32>
    %c0_5 = arith.constant 0 : index
    %c0_6 = arith.constant 0 : index
    %6 = vector.load %arg5[%c0_5, %c0_6] : memref<32x32xf32, #tpu.memory_space<vmem>>, vector<32x32xf32>
    %7 = arith.addf %5, %6 : vector<32x32xf32>
    %c0_7 = arith.constant 0 : index
    %c0_8 = arith.constant 0 : index
    %8 = vector.load %arg6[%c0_7, %c0_8] : memref<32x32xf32, #tpu.memory_space<vmem>>, vector<32x32xf32>
    tpu.vector_store %arg6[%c0_7, %c0_8], %7 {strides = array<i32>} : memref<32x32xf32, #tpu.memory_space<vmem>>, vector<32x32xf32>,
    return
  }
  func.func @transform_0(%arg0: i32, %arg1: i32) -> (i32, i32) {
    %c0_i32 = arith.constant 0 : i32
    %c0_i32_0 = arith.constant 0 : i32
    return %arg0, %c0_i32 : i32, i32
  }
  func.func @transform_1(%arg0: i32, %arg1: i32) -> (i32, i32) {
    %c0_i32 = arith.constant 0 : i32
    %c0_i32_0 = arith.constant 0 : i32
    return %c0_i32, %arg1 : i32, i32
  }
  func.func @transform_2(%arg0: i32, %arg1: i32) -> (i32, i32) {
    %c0_i32 = arith.constant 0 : i32
    %c0_i32_0 = arith.constant 0 : i32
    return %c0_i32, %arg1 : i32, i32
  }
  func.func @transform_3(%arg0: i32, %arg1: i32) -> (i32, i32) {
    %c0_i32 = arith.constant 0 : i32
    return %arg0, %arg1 : i32, i32
  }
  func.func @transform_4(%arg0: i32, %arg1: i32) -> (i32, i32) {
    %c0_i32 = arith.constant 0 : i32
    return %arg0, %arg1 : i32, i32
  }
}

module attributes {stable_mosaic.version = 11 : i64} {
  func.func @_fused_linear_kernel(%arg0: i32, %arg1: i32, %arg2: memref<8x32xf32, #tpu.memory_space<vmem>>, %arg3: memref<32x10xbf16, #tpu.memory_space<vmem>>, %arg4: memref<1x10xf32, #tpu.memory_space<vmem>>, %arg5: memref<8x10xf32, #tpu.memory_space<vmem>>) attributes {dimension_semantics = [#tpu.dimension_semantics<parallel>, #tpu.dimension_semantics<parallel>], iteration_bounds = array<i64: 1, 1>, scalar_prefetch = 0 : i64, scratch_operands = 0 : i64, tpu.core_type = #tpu.core_type<tc>, window_params = [{transform_indices = @transform_0, window_bounds = array<i64: 8, 32>}, {transform_indices = @transform_1, window_bounds = array<i64: 32, 10>}, {transform_indices = @transform_2, window_bounds = array<i64: 1, 10>}, {transform_indices = @transform_3, window_bounds = array<i64: 8, 10>}]} {
    %c0 = arith.constant 0 : index
    %c0_0 = arith.constant 0 : index
    %0 = vector.load %arg2[%c0, %c0_0] : memref<8x32xf32, #tpu.memory_space<vmem>>, vector<8x32xf32>
    %1 = arith.truncf %0 : vector<8x32xf32> to vector<8x32xbf16>
    %c0_1 = arith.constant 0 : index
    %c0_2 = arith.constant 0 : index
    %2 = vector.load %arg3[%c0_1, %c0_2] : memref<32x10xbf16, #tpu.memory_space<vmem>>, vector<32x10xbf16>
    %cst = arith.constant dense<0.000000e+00> : vector<8x10xf32>
    %3 = tpu.matmul %1, %2, %cst {dimension_numbers = #tpu.dot_dimension_numbers<[1], [0], [0], [1], [0, 0, 1, 1], [], []>} : vector<8x32xbf16>, vector<32x10xbf16>, vector<8x10xf32> -> vector<8x10xf32>
    %c0_3 = arith.constant 0 : index
    %c0_4 = arith.constant 0 : index
    %4 = vector.load %arg4[%c0_3, %c0_4] : memref<1x10xf32, #tpu.memory_space<vmem>>, vector<1x10xf32>
    %5 = vector.broadcast %4 : vector<1x10xf32> to vector<8x10xf32>
    %6 = arith.addf %3, %5 : vector<8x10xf32>
    %c0_5 = arith.constant 0 : index
    %c0_6 = arith.constant 0 : index
    %7 = vector.load %arg5[%c0_5, %c0_6] : memref<8x10xf32, #tpu.memory_space<vmem>>, vector<8x10xf32>
    tpu.vector_store %arg5[%c0_5, %c0_6], %6 {strides = array<i32>} : memref<8x10xf32, #tpu.memory_space<vmem>>, vector<8x10xf32>,
    return
  }
  func.func @transform_0(%arg0: i32, %arg1: i32) -> (i32, i32) {
    %c0_i32 = arith.constant 0 : i32
    %c0_i32_0 = arith.constant 0 : i32
    return %arg0, %c0_i32 : i32, i32
  }
  func.func @transform_1(%arg0: i32, %arg1: i32) -> (i32, i32) {
    %c0_i32 = arith.constant 0 : i32
    %c0_i32_0 = arith.constant 0 : i32
    return %c0_i32, %arg1 : i32, i32
  }
  func.func @transform_2(%arg0: i32, %arg1: i32) -> (i32, i32) {
    %c0_i32 = arith.constant 0 : i32
    %c0_i32_0 = arith.constant 0 : i32
    return %c0_i32, %arg1 : i32, i32
  }
  func.func @transform_3(%arg0: i32, %arg1: i32) -> (i32, i32) {
    %c0_i32 = arith.constant 0 : i32
    return %arg0, %arg1 : i32, i32
  }
}

</mosaic_0001>

<bundles_post_ra>
// kernel: _lambda_.24
= control target key start
LH: loop header
LB: loop body
LE: loop exit
PB: predicated region body
PF: predicated region fallthrough
CT: control target
= control target key end

     0   :  { %vm60_vm0 = vcmask 130048   ;;  %s901_s1 = inlined_call_operand.vmem [shape: bf16[16,16], index: 1, kind: input, shape index: {}]   ;;  %s902_s0 = inlined_call_operand.vmem [shape: f32[128,16], index: 0, kind: input, shape index: {}]   ;;  %s903_s2 = inlined_call_operand.vmem [shape: f32[1,16], index: 2, kind: input, shape index: {}]   ;;  %s904_s3 = inlined_call_operand.vmem [shape: f32[1,16], index: 3, kind: input, shape index: {}]   ;;  %s905_s4 = inlined_call_operand.vmem [shape: f32[1,16], index: 4, kind: input, shape index: {}]   ;;  %s906_s5 = inlined_call_operand.vmem [shape: f32[128,16], index: 5, kind: output, shape index: {}]  }
   0x1   :  { %v498_v0 = vld [vmem:[%s901_s1] sm:$0xff]   ;;  %v22_v2 = vld [vmem:[%s902_s0 + $0x8] sm:$0xff]  ;;  %v23_v6 = vld [vmem:[%s902_s0 + $0x10] sm:$0xff] }
   0x2   :  { %v21_v1 = vld [vmem:[%s902_s0] sm:$0xff]  ;;  %478 = vmatprep.subr.bf16.mxu0 %v498_v0  ;;  %496 = vmatprep.subr.bf16.mxu1 %v498_v0  ;;  %v30_v5 = vld [vmem:[%s902_s0 + $0x48] sm:$0xff]  ;;  %v24_v7 = vld [vmem:[%s902_s0 + $0x18] sm:$0xff] }
   0x3   :  { %v29_v3 = vld [vmem:[%s902_s0 + $0x40] sm:$0xff]  ;;  %v37_v4 = vpack.c.bf16 %v22_v2, %v21_v1  ;;  %479 = vmatpush3.bf16.msra.mxu0 %v498_v0  ;;  %497 = vmatpush3.bf16.msra.mxu1 %v498_v0  ;;  %v38_v9 = vpack.c.bf16 %v24_v7, %v23_v6  ;;  %v31_v10 = vld [vmem:[%s902_s0 + $0x50] sm:$0xff]  ;;  %v32_v11 = vld [vmem:[%s902_s0 + $0x58] sm:$0xff] }
   0x4   :  { %v41_v8 = vpack.c.bf16 %v30_v5, %v29_v3  ;;  %v25_v12 = vld [vmem:[%s902_s0 + $0x20] sm:$0xff]  ;;  %v42_v13 = vpack.c.bf16 %v32_v11, %v31_v10  ;;  %v26_v14 = vld [vmem:[%s902_s0 + $0x28] sm:$0xff]  ;;  %v27_v18 = vld [vmem:[%s902_s0 + $0x30] sm:$0xff] }
   0x5   :  { %480 = vmatprep.mubr.msk.bf16.mxu0 %vm60_vm0, %v37_v4  ;;  %v39_v15 = vpack.c.bf16 %v26_v14, %v25_v12  ;;  %v33_v16 = vld [vmem:[%s902_s0 + $0x60] sm:$0xff]  ;;  %v34_v17 = vld [vmem:[%s902_s0 + $0x68] sm:$0xff]  ;;  %v28_v20 = vld [vmem:[%s902_s0 + $0x38] sm:$0xff] }
   0x6   :  { %488 = vmatprep.mubr.msk.bf16.mxu1 %vm60_vm0, %v41_v8  ;;  %481 = vmatmul.mubr.msk.bf16.vlgmr.msra.gmra.mxu0 %vm60_vm0, %v38_v9  ;;  %v43_v19 = vpack.c.bf16 %v34_v17, %v33_v16  ;;  %v35_v21 = vld [vmem:[%s902_s0 + $0x70] sm:$0xff]  ;;  %v36_v22 = vld [vmem:[%s902_s0 + $0x78] sm:$0xff]  ;;  %v40_v23 = vpack.c.bf16 %v28_v20, %v27_v18  ;;  %v457_v25 = vld [vmem:[%s903_s2] ss:$0 sm:$0xff] }
   0x7   :  { %489 = vmatmul.mubr.msk.bf16.vlgmr.msra.gmra.mxu1 %vm60_vm0, %v42_v13  ;;  %484 = vmatprep.mubr.msk.bf16.mxu0 %vm60_vm0, %v39_v15  ;;  %v44_v24 = vpack.c.bf16 %v36_v22, %v35_v21 }
   0x8   :  { %492 = vmatprep.mubr.msk.bf16.mxu1 %vm60_vm0, %v43_v19 }
   0xe   :  { %485 = vmatmul.mubr.msk.bf16.gmra.mxu0 %vm60_vm0, %v40_v23 }
   0xf   :  { %493 = vmatmul.mubr.msk.bf16.gmra.mxu1 %vm60_vm0, %v44_v24 }
  0xc6   :  { %v482_v26 = vpop.f32.mrf.mxu0 }
  0xc7   :  { %v490_v27 = vpop.f32.mrf.mxu1  ;;  %v623_v28 = vadd.f32 %v482_v26, %v457_v25 }
  0xc8   :  { %v625_v29 = vadd.f32 %v490_v27, %v457_v25  ;;  %v119_v30 = vpop.f32.mrf.mxu0 }
  0xc9   :  { %v151_v31 = vpop.f32.mrf.mxu1  ;;  %v627_v32 = vadd.f32 %v457_v25, %v119_v30  ;;  %v188_v34 = vsel %vm60_vm0, %v623_v28, 0.0 }
  0xca   :  { %v212_v33 = vsel %vm60_vm0, %v625_v29, 0.0  ;;  %189 = vadd.xlane.f32.xlu1 %v188_v34  ;;  %v483_v36 = vpop.f32.mrf.mxu0  ;;  %v633_v40 = vadd.f32 %v457_v25, %v151_v31 }
  0xcb   :  { %213 = vadd.xlane.f32.xlu0 %v212_v33  ;;  %v491_v35 = vpop.f32.mrf.mxu1  ;;  %v131_v37 = vadd.f32 %v483_v36, %v457_v25  ;;  %v182_v43 = vsel %vm60_vm0, %v627_v32, 0.0 }
  0xcc   :  { %v122_v38 = vpop.f32.mrf.mxu0  ;;  %v635_v41 = vadd.f32 %v491_v35, %v457_v25  ;;  %v206_v50 = vsel %vm60_vm0, %v633_v40, 0.0 }
  0xcd   :  { %v154_v39 = vpop.f32.mrf.mxu1  ;;  %v191_v42 = vsel %vm60_vm0, %v131_v37, 0.0  ;;  %v640_v47 = vadd.f32 %v457_v25, %v122_v38 }
  0xce   :  { %192 = vadd.xlane.f32.xlu1 %v191_v42  ;;  %v486_v44 = vpop.f32.mrf.mxu0  ;;  %v642_v48 = vadd.f32 %v457_v25, %v154_v39  ;;  %v215_v49 = vsel %vm60_vm0, %v635_v41, 0.0 }
  0xcf   :  { %183 = vadd.xlane.f32.xlu0 %v182_v43  ;;  %v494_v45 = vpop.f32.mrf.mxu1  ;;  %v648_v53 = vadd.f32 %v486_v44, %v457_v25  ;;  %v185_v56 = vsel %vm60_vm0, %v640_v47, 0.0 }
  0xd0   :  { %v135_v46 = vpop.f32.mrf.mxu0  ;;  %v209_v55 = vsel %vm60_vm0, %v642_v48, 0.0  ;;  %v672_v4 = vadd.f32 %v494_v45, %v457_v25 }
  0xd1   :  { %v167_v52 = vpop.f32.mrf.mxu1  ;;  %v200_v60 = vsel %vm60_vm0, %v648_v53, 0.0  ;;  %v660_v61 = vadd.f32 %v457_v25, %v135_v46 }
  0xd2   :  { %216 = vadd.xlane.f32.xlu1 %v215_v49  ;;  %v487_v51 = vpop.f32.mrf.mxu0  ;;  %v664_v0 = vadd.f32 %v457_v25, %v167_v52  ;;  %v224_v9 = vsel %vm60_vm0, %v672_v4, 0.0 }
  0xd3   :  { %207 = vadd.xlane.f32.xlu0 %v206_v50  ;;  %v650_v54 = vadd.f32 %v487_v51, %v457_v25  ;;  %v495_v58 = vpop.f32.mrf.mxu1  ;;  %v194_v3 = vsel %vm60_vm0, %v660_v61, 0.0 }
  0xd4   :  { %v138_v57 = vpop.f32.mrf.mxu0  ;;  %v674_v5 = vadd.f32 %v495_v58, %v457_v25  ;;  %v218_v7 = vsel %vm60_vm0, %v664_v0, 0.0 }
  0xd5   :  { %v203_v59 = vsel %vm60_vm0, %v650_v54, 0.0  ;;  %v662_v62 = vadd.f32 %v457_v25, %v138_v57  ;;  %v170_v63 = vpop.f32.mrf.mxu1 }
  0xd6   :  { %210 = vadd.xlane.f32.xlu1 %v209_v55  ;;  %v666_v1 = vadd.f32 %v457_v25, %v170_v63  ;;  %v227_v8 = vsel %vm60_vm0, %v674_v5, 0.0 }
  0xd7   :  { %186 = vadd.xlane.f32.xlu0 %v185_v56  ;;  %v197_v2 = vsel %vm60_vm0, %v662_v62, 0.0 }
  0xd8   :  { %v221_v6 = vsel %vm60_vm0, %v666_v1, 0.0 }
  0xda   :  { %204 = vadd.xlane.f32.xlu1 %v203_v59 }
  0xdb   :  { %201 = vadd.xlane.f32.xlu0 %v200_v60 }
  0xde   :  { %198 = vadd.xlane.f32.xlu1 %v197_v2 }
  0xdf   :  { %195 = vadd.xlane.f32.xlu0 %v194_v3 }
  0xe2   :  { %222 = vadd.xlane.f32.xlu1 %v221_v6 }
  0xe3   :  { %219 = vadd.xlane.f32.xlu0 %v218_v7 }
  0xe6   :  { %228 = vadd.xlane.f32.xlu1 %v227_v8 }
  0xe7   :  { %225 = vadd.xlane.f32.xlu0 %v224_v9 }
 0x153   :  { %v190_v11 = vpop.xlane.xlu1 %189 }
 0x154   :  { %v214_v10 = vpop.xlane.xlu0 %213  ;;  %v233_v13 = vmul.f32 0.0625, %v190_v11 }
 0x155   :  { %v241_v12 = vmul.f32 0.0625, %v214_v10 }
 0x156   :  { %v688_v15 = vsub.f32 %v623_v28, %v233_v13 }
 0x157   :  { %v685_v14 = vsub.f32 %v625_v29, %v241_v12  ;;  %v193_v16 = vpop.xlane.xlu1 %192 }
 0x158   :  { %v184_v17 = vpop.xlane.xlu0 %183  ;;  %v234_v18 = vmul.f32 0.0625, %v193_v16  ;;  %v265_v20 = vmul.f32 %v688_v15, %v688_v15 }
 0x159   :  { %v231_v19 = vmul.f32 0.0625, %v184_v17  ;;  %v273_v24 = vmul.f32 %v685_v14, %v685_v14 }
 0x15a   :  { %v692_v21 = vsub.f32 %v131_v37, %v234_v18  ;;  %v285_v23 = vsel %vm60_vm0, %v265_v20, 0.0 }
 0x15b   :  { %v695_v22 = vsub.f32 %v627_v32, %v231_v19  ;;  %v217_v25 = vpop.xlane.xlu1 %216  ;;  %286 = vadd.xlane.f32.xlu0 %v285_v23  ;;  %v309_v34 = vsel %vm60_vm0, %v273_v24, 0.0 }
 0x15c   :  { %v208_v26 = vpop.xlane.xlu0 %207  ;;  %v242_v27 = vmul.f32 0.0625, %v217_v25  ;;  %v266_v29 = vmul.f32 %v692_v21, %v692_v21 }
 0x15d   :  { %v239_v28 = vmul.f32 0.0625, %v208_v26  ;;  %v263_v30 = vmul.f32 %v695_v22, %v695_v22 }
 0x15e   :  { %v705_v31 = vsub.f32 %v635_v41, %v242_v27  ;;  %v288_v33 = vsel %vm60_vm0, %v266_v29, 0.0 }
 0x15f   :  { %v708_v32 = vsub.f32 %v633_v40, %v239_v28  ;;  %v211_v35 = vpop.xlane.xlu1 %210  ;;  %289 = vadd.xlane.f32.xlu1 %v288_v33  ;;  %310 = vadd.xlane.f32.xlu0 %v309_v34  ;;  %v279_v42 = vsel %vm60_vm0, %v263_v30, 0.0 }
 0x160   :  { %v187_v36 = vpop.xlane.xlu0 %186  ;;  %v240_v37 = vmul.f32 0.0625, %v211_v35  ;;  %v274_v39 = vmul.f32 %v705_v31, %v705_v31 }
 0x161   :  { %v232_v38 = vmul.f32 0.0625, %v187_v36  ;;  %v271_v44 = vmul.f32 %v708_v32, %v708_v32 }
 0x162   :  { %v716_v41 = vsub.f32 %v642_v48, %v240_v37  ;;  %v312_v43 = vsel %vm60_vm0, %v274_v39, 0.0 }
 0x163   :  { %v719_v40 = vsub.f32 %v640_v47, %v232_v38  ;;  %v205_v45 = vpop.xlane.xlu1 %204  ;;  %313 = vadd.xlane.f32.xlu1 %v312_v43  ;;  %280 = vadd.xlane.f32.xlu0 %v279_v42  ;;  %v303_v55 = vsel %vm60_vm0, %v271_v44, 0.0 }
 0x164   :  { %v202_v46 = vpop.xlane.xlu0 %201  ;;  %v238_v49 = vmul.f32 0.0625, %v205_v45  ;;  %v272_v48 = vmul.f32 %v716_v41, %v716_v41 }
 0x165   :  { %v237_v50 = vmul.f32 0.0625, %v202_v46  ;;  %v264_v51 = vmul.f32 %v719_v40, %v719_v40 }
 0x166   :  { %v729_v47 = vsub.f32 %v650_v54, %v238_v49  ;;  %v306_v2 = vsel %vm60_vm0, %v272_v48, 0.0 }
 0x167   :  { %v732_v52 = vsub.f32 %v648_v53, %v237_v50  ;;  %v282_v56 = vsel %vm60_vm0, %v264_v51, 0.0  ;;  %v199_v57 = vpop.xlane.xlu1 %198  ;;  %304 = vadd.xlane.f32.xlu0 %v303_v55 }
 0x168   :  { %283 = vadd.xlane.f32.xlu1 %v282_v56  ;;  %v196_v58 = vpop.xlane.xlu0 %195  ;;  %v236_v59 = vmul.f32 0.0625, %v199_v57  ;;  %v270_v6 = vmul.f32 %v729_v47, %v729_v47 }
 0x169   :  { %v235_v60 = vmul.f32 0.0625, %v196_v58  ;;  %v269_v63 = vmul.f32 %v732_v52, %v732_v52 }
 0x16a   :  { %v740_v54 = vsub.f32 %v662_v62, %v236_v59  ;;  %v300_v13 = vsel %vm60_vm0, %v270_v6, 0.0  ;;  %v782_v6 = vld [vmem:[%s904_s3] ss:$0 sm:$0xff] }
 0x16b   :  { %v743_v53 = vsub.f32 %v660_v61, %v235_v60  ;;  %v297_v3 = vsel %vm60_vm0, %v269_v63, 0.0  ;;  %v223_v7 = vpop.xlane.xlu1 %222 }
 0x16c   :  { %307 = vadd.xlane.f32.xlu1 %v306_v2  ;;  %298 = vadd.xlane.f32.xlu0 %v297_v3  ;;  %v220_v8 = vpop.xlane.xlu0 %219  ;;  %v244_v9 = vmul.f32 0.0625, %v223_v7  ;;  %v268_v62 = vmul.f32 %v740_v54, %v740_v54 }
 0x16d   :  { %v243_v10 = vmul.f32 0.0625, %v220_v8  ;;  %v267_v11 = vmul.f32 %v743_v53, %v743_v53 }
 0x16e   :  { %v753_v61 = vsub.f32 %v666_v1, %v244_v9  ;;  %v294_v24 = vsel %vm60_vm0, %v268_v62, 0.0 }
 0x16f   :  { %v756_v12 = vsub.f32 %v664_v0, %v243_v10  ;;  %v291_v16 = vsel %vm60_vm0, %v267_v11, 0.0  ;;  %v229_v17 = vpop.xlane.xlu1 %228  ;;  %v788_v10 = vld [vmem:[%s905_s4] ss:$0 sm:$0xff] }
 0x170   :  { %301 = vadd.xlane.f32.xlu1 %v300_v13  ;;  %292 = vadd.xlane.f32.xlu0 %v291_v16  ;;  %v226_v18 = vpop.xlane.xlu0 %225  ;;  %v246_v19 = vmul.f32 0.0625, %v229_v17  ;;  %v276_v26 = vmul.f32 %v753_v61, %v753_v61 }
 0x171   :  { %v245_v20 = vmul.f32 0.0625, %v226_v18  ;;  %v275_v23 = vmul.f32 %v756_v12, %v756_v12 }
 0x172   :  { %v764_v1 = vsub.f32 %v674_v5, %v246_v19  ;;  %v318_v28 = vsel %vm60_vm0, %v276_v26, 0.0 }
 0x173   :  { %v767_v0 = vsub.f32 %v672_v4, %v245_v20  ;;  %v315_v25 = vsel %vm60_vm0, %v275_v23, 0.0 }
 0x174   :  { %295 = vadd.xlane.f32.xlu1 %v294_v24  ;;  %316 = vadd.xlane.f32.xlu0 %v315_v25  ;;  %v278_v5 = vmul.f32 %v764_v1, %v764_v1 }
 0x175   :  { %v277_v27 = vmul.f32 %v767_v0, %v767_v0 }
 0x176   :  { %v324_v4 = vsel %vm60_vm0, %v278_v5, 0.0 }
 0x177   :  { %v321_v29 = vsel %vm60_vm0, %v277_v27, 0.0 }
 0x178   :  { %319 = vadd.xlane.f32.xlu1 %v318_v28  ;;  %322 = vadd.xlane.f32.xlu0 %v321_v29 }
 0x17c   :  { %325 = vadd.xlane.f32.xlu1 %v324_v4 }
 0x1e4   :  { %v287_v30 = vpop.xlane.xlu0 %286 }
 0x1e5   :  { %v329_v33 = vmul.f32 0.0625, %v287_v30 }
 0x1e7   :  { %v345_v34 = vadd.f32 1e-05, %v329_v33 }
 0x1e8   :  { %v290_v35 = vpop.xlane.xlu1 %289  ;;  %v311_v36 = vpop.xlane.xlu0 %310 }
 0x1e9   :  { %499 = vrsqrt.f32 %v345_v34  ;;  %v330_v37 = vmul.f32 0.0625, %v290_v35  ;;  %v337_v38 = vmul.f32 0.0625, %v311_v36 }
 0x1eb   :  { %v346_v39 = vadd.f32 1e-05, %v330_v37  ;;  %v353_v42 = vadd.f32 1e-05, %v337_v38 }
 0x1ec   :  { %v314_v43 = vpop.xlane.xlu1 %313  ;;  %v281_v44 = vpop.xlane.xlu0 %280 }
 0x1ed   :  { %501 = vrsqrt.f32 %v346_v39  ;;  %v338_v45 = vmul.f32 0.0625, %v314_v43  ;;  %v327_v46 = vmul.f32 0.0625, %v281_v44 }
 0x1ee   :  { %503 = vrsqrt.f32 %v353_v42 }
 0x1ef   :  { %v354_v49 = vadd.f32 1e-05, %v338_v45  ;;  %v343_v50 = vadd.f32 1e-05, %v327_v46 }
 0x1f0   :  { %v305_v48 = vpop.xlane.xlu0 %304 }
 0x1f1   :  { %v284_v51 = vpop.xlane.xlu1 %283  ;;  %505 = vrsqrt.f32 %v354_v49  ;;  %v335_v56 = vmul.f32 0.0625, %v305_v48 }
 0x1f2   :  { %v328_v55 = vmul.f32 0.0625, %v284_v51  ;;  %507 = vrsqrt.f32 %v343_v50 }
 0x1f3   :  { %v351_v58 = vadd.f32 1e-05, %v335_v56 }
 0x1f4   :  { %v344_v57 = vadd.f32 1e-05, %v328_v55 }
 0x1f5   :  { %v308_v59 = vpop.xlane.xlu1 %307  ;;  %v299_v60 = vpop.xlane.xlu0 %298 }
 0x1f6   :  { %509 = vrsqrt.f32 %v344_v57  ;;  %v336_v63 = vmul.f32 0.0625, %v308_v59  ;;  %v333_v2 = vmul.f32 0.0625, %v299_v60  ;;  %v500_v3 = vpop.eup %499 }
 0x1f7   :  { %511 = vrsqrt.f32 %v351_v58  ;;  %v377_v7 = vmul.f32 %v500_v3, %v688_v15 }
 0x1f8   :  { %v352_v8 = vadd.f32 1e-05, %v336_v63  ;;  %v349_v9 = vadd.f32 1e-05, %v333_v2 }
 0x1f9   :  { %v302_v11 = vpop.xlane.xlu1 %301  ;;  %v293_v62 = vpop.xlane.xlu0 %292  ;;  %v400_v13 = vmul.f32 %v782_v6, %v377_v7 }
 0x1fa   :  { %513 = vrsqrt.f32 %v352_v8  ;;  %v334_v16 = vmul.f32 0.0625, %v302_v11  ;;  %v331_v17 = vmul.f32 0.0625, %v293_v62  ;;  %v502_v18 = vpop.eup %501 }
 0x1fb   :  { %515 = vrsqrt.f32 %v349_v9  ;;  %v504_v19 = vpop.eup %503  ;;  %v423_v20 = vadd.f32 %v788_v10, %v400_v13  ;;  %v378_v15 = vmul.f32 %v502_v18, %v692_v21 }
 0x1fc   :  { %v350_v23 = vadd.f32 1e-05, %v334_v16  ;;  %v347_v24 = vadd.f32 1e-05, %v331_v17  ;;  %v385_v25 = vmul.f32 %v504_v19, %v685_v14 }
 0x1fd   :  { %v296_v26 = vpop.xlane.xlu1 %295  ;;  %v317_v27 = vpop.xlane.xlu0 %316  ;;  %439 = vst.msk [vmem:[%s906_s5 + $0x10] sm:$0xff] %vm60_vm0, %v423_v20  ;;  %v401_v28 = vmul.f32 %v782_v6, %v378_v15 }
 0x1fe   :  { %517 = vrsqrt.f32 %v350_v23  ;;  %v332_v29 = vmul.f32 0.0625, %v296_v26  ;;  %v339_v5 = vmul.f32 0.0625, %v317_v27  ;;  %v506_v4 = vpop.eup %505  ;;  %v408_v30 = vmul.f32 %v782_v6, %v385_v25 }
 0x1ff   :  { %519 = vrsqrt.f32 %v347_v24  ;;  %v508_v21 = vpop.eup %507  ;;  %v424_v33 = vadd.f32 %v788_v10, %v401_v28  ;;  %v386_v14 = vmul.f32 %v506_v4, %v705_v31 }
 0x200   :  { %v348_v34 = vadd.f32 1e-05, %v332_v29  ;;  %v355_v35 = vadd.f32 1e-05, %v339_v5  ;;  %v431_v36 = vadd.f32 %v788_v10, %v408_v30  ;;  %v375_v37 = vmul.f32 %v508_v21, %v695_v22 }
 0x201   :  { %v320_v38 = vpop.xlane.xlu1 %319  ;;  %v323_v39 = vpop.xlane.xlu0 %322  ;;  %440 = vst.msk [vmem:[%s906_s5 + $0x18] sm:$0xff] %vm60_vm0, %v424_v33  ;;  %v409_v42 = vmul.f32 %v782_v6, %v386_v14 }
 0x202   :  { %521 = vrsqrt.f32 %v348_v34  ;;  %v340_v43 = vmul.f32 0.0625, %v320_v38  ;;  %v341_v44 = vmul.f32 0.0625, %v323_v39  ;;  %447 = vst.msk [vmem:[%s906_s5 + $0x50] sm:$0xff] %vm60_vm0, %v431_v36  ;;  %v398_v22 = vmul.f32 %v782_v6, %v375_v37 }
 0x203   :  { %v510_v45 = vpop.eup %509  ;;  %523 = vrsqrt.f32 %v355_v35  ;;  %v432_v46 = vadd.f32 %v788_v10, %v409_v42 }
 0x204   :  { %v512_v31 = vpop.eup %511  ;;  %v376_v49 = vmul.f32 %v510_v45, %v719_v40  ;;  %v356_v50 = vadd.f32 1e-05, %v340_v43  ;;  %v357_v51 = vadd.f32 1e-05, %v341_v44  ;;  %v421_v48 = vadd.f32 %v788_v10, %v398_v22 }
 0x205   :  { %v383_v55 = vmul.f32 %v512_v31, %v708_v32  ;;  %v326_v56 = vpop.xlane.xlu1 %325  ;;  %448 = vst.msk [vmem:[%s906_s5 + $0x58] sm:$0xff] %vm60_vm0, %v432_v46 }
 0x206   :  { %v399_v57 = vmul.f32 %v782_v6, %v376_v49  ;;  %525 = vrsqrt.f32 %v356_v50  ;;  %v342_v58 = vmul.f32 0.0625, %v326_v56  ;;  %437 = vst.msk [vmem:[%s906_s5] sm:$0xff] %vm60_vm0, %v421_v48 }
 0x207   :  { %v514_v59 = vpop.eup %513  ;;  %v406_v40 = vmul.f32 %v782_v6, %v383_v55  ;;  %527 = vrsqrt.f32 %v357_v51 }
 0x208   :  { %v516_v32 = vpop.eup %515  ;;  %v422_v60 = vadd.f32 %v788_v10, %v399_v57  ;;  %v384_v63 = vmul.f32 %v514_v59, %v716_v41  ;;  %v358_v2 = vadd.f32 1e-05, %v342_v58 }
 0x209   :  { %v429_v3 = vadd.f32 %v788_v10, %v406_v40  ;;  %v381_v7 = vmul.f32 %v516_v32, %v732_v52 }
 0x20a   :  { %438 = vst.msk [vmem:[%s906_s5 + $0x8] sm:$0xff] %vm60_vm0, %v422_v60  ;;  %v407_v8 = vmul.f32 %v782_v6, %v384_v63  ;;  %529 = vrsqrt.f32 %v358_v2 }
 0x20b   :  { %v518_v9 = vpop.eup %517  ;;  %445 = vst.msk [vmem:[%s906_s5 + $0x40] sm:$0xff] %vm60_vm0, %v429_v3  ;;  %v404_v41 = vmul.f32 %v782_v6, %v381_v7 }
 0x20c   :  { %v520_v11 = vpop.eup %519  ;;  %v430_v62 = vadd.f32 %v788_v10, %v407_v8  ;;  %v382_v52 = vmul.f32 %v518_v9, %v729_v47 }
 0x20d   :  { %v427_v13 = vadd.f32 %v788_v10, %v404_v41  ;;  %v379_v16 = vmul.f32 %v520_v11, %v743_v53 }
 0x20e   :  { %446 = vst.msk [vmem:[%s906_s5 + $0x48] sm:$0xff] %vm60_vm0, %v430_v62  ;;  %v405_v17 = vmul.f32 %v782_v6, %v382_v52 }
 0x20f   :  { %v522_v18 = vpop.eup %521  ;;  %443 = vst.msk [vmem:[%s906_s5 + $0x30] sm:$0xff] %vm60_vm0, %v427_v13  ;;  %v402_v19 = vmul.f32 %v782_v6, %v379_v16 }
 0x210   :  { %v524_v47 = vpop.eup %523  ;;  %v428_v20 = vadd.f32 %v788_v10, %v405_v17  ;;  %v380_v53 = vmul.f32 %v522_v18, %v740_v54 }
 0x211   :  { %v425_v15 = vadd.f32 %v788_v10, %v402_v19  ;;  %v387_v23 = vmul.f32 %v524_v47, %v756_v12 }
 0x212   :  { %444 = vst.msk [vmem:[%s906_s5 + $0x38] sm:$0xff] %vm60_vm0, %v428_v20  ;;  %v403_v24 = vmul.f32 %v782_v6, %v380_v53 }
 0x213   :  { %v526_v25 = vpop.eup %525  ;;  %441 = vst.msk [vmem:[%s906_s5 + $0x20] sm:$0xff] %vm60_vm0, %v425_v15  ;;  %v410_v26 = vmul.f32 %v782_v6, %v387_v23 }
 0x214   :  { %v528_v54 = vpop.eup %527  ;;  %v426_v27 = vadd.f32 %v788_v10, %v403_v24  ;;  %v388_v12 = vmul.f32 %v526_v25, %v753_v61 }
 0x215   :  { %v433_v28 = vadd.f32 %v788_v10, %v410_v26  ;;  %v389_v29 = vmul.f32 %v528_v54, %v767_v0 }
 0x216   :  { %442 = vst.msk [vmem:[%s906_s5 + $0x28] sm:$0xff] %vm60_vm0, %v426_v27  ;;  %v411_v5 = vmul.f32 %v782_v6, %v388_v12 }
 0x217   :  { %v530_v4 = vpop.eup %529  ;;  %449 = vst.msk [vmem:[%s906_s5 + $0x60] sm:$0xff] %vm60_vm0, %v433_v28  ;;  %v412_v30 = vmul.f32 %v782_v6, %v389_v29 }
 0x218   :  { %v434_v61 = vadd.f32 %v788_v10, %v411_v5  ;;  %v390_v21 = vmul.f32 %v530_v4, %v764_v1 }
 0x219   :  { %v435_v0 = vadd.f32 %v788_v10, %v412_v30 }
 0x21a   :  { %450 = vst.msk [vmem:[%s906_s5 + $0x68] sm:$0xff] %vm60_vm0, %v434_v61  ;;  %v413_v33 = vmul.f32 %v782_v6, %v390_v21 }
 0x21b   :  { %451 = vst.msk [vmem:[%s906_s5 + $0x70] sm:$0xff] %vm60_vm0, %v435_v0 }
 0x21c   :  { %v436_v14 = vadd.f32 %v788_v10, %v413_v33 }
 0x21e   :  { %452 = vst.msk [vmem:[%s906_s5 + $0x78] sm:$0xff] %vm60_vm0, %v436_v14 }

// kernel: _lambda_.25
= control target key start
LH: loop header
LB: loop body
LE: loop exit
PB: predicated region body
PF: predicated region fallthrough
CT: control target
= control target key end

     0   :  { %vm37_vm0 = vcmask 130048   ;;  %vm501_vm1 = vcmask 388096   ;;  %s996_s0 = inlined_call_operand.vmem [shape: f32[128,16], index: 0, kind: input, shape index: {}]   ;;  %s997_s3 = inlined_call_operand.vmem [shape: bf16[16,48], index: 3, kind: input, shape index: {}]   ;;  %s998_s1 = inlined_call_operand.vmem [shape: f32[1,16], index: 1, kind: input, shape index: {}]   ;;  %s999_s2 = inlined_call_operand.vmem [shape: f32[1,16], index: 2, kind: input, shape index: {}]   ;;  %s1000_s4 = inlined_call_operand.vmem [shape: f32[1,48], index: 4, kind: input, shape index: {}]   ;;  %s1001_s5 = inlined_call_operand.vmem [shape: bf16[128,48], index: 5, kind: output, shape index: {}]  }
   0x1   :  { %v21_v0 = vld [vmem:[%s996_s0] sm:$0xff]  ;;  %v22_v2 = vld [vmem:[%s996_s0 + $0x8] sm:$0xff]  ;;  %v23_v8 = vld [vmem:[%s996_s0 + $0x10] sm:$0xff] }
   0x2   :  { %v29_v1 = vld [vmem:[%s996_s0 + $0x40] sm:$0xff]  ;;  %v38_v3 = vsel %vm37_vm0, %v21_v0, 0.0  ;;  %v30_v5 = vld [vmem:[%s996_s0 + $0x48] sm:$0xff]  ;;  %v41_v6 = vsel %vm37_vm0, %v22_v2, 0.0  ;;  %v24_v9 = vld [vmem:[%s996_s0 + $0x18] sm:$0xff]  ;;  %v44_v10 = vsel %vm37_vm0, %v23_v8, 0.0 }
   0x3   :  { %v62_v4 = vsel %vm37_vm0, %v29_v1, 0.0  ;;  %39 = vadd.xlane.f32.xlu0 %v38_v3  ;;  %v65_v7 = vsel %vm37_vm0, %v30_v5, 0.0  ;;  %v47_v11 = vsel %vm37_vm0, %v24_v9, 0.0  ;;  %v685_v12 = vld [vmem:[%s996_s0 + $0x50] sm:$0xff]  ;;  %v690_v13 = vld [vmem:[%s996_s0 + $0x58] sm:$0xff]  ;;  %v699_v16 = vld [vmem:[%s996_s0 + $0x20] sm:$0xff] }
   0x4   :  { %63 = vadd.xlane.f32.xlu1 %v62_v4  ;;  %v68_v14 = vsel %vm37_vm0, %v685_v12, 0.0  ;;  %v71_v15 = vsel %vm37_vm0, %v690_v13, 0.0  ;;  %v704_v17 = vld [vmem:[%s996_s0 + $0x28] sm:$0xff]  ;;  %v50_v18 = vsel %vm37_vm0, %v699_v16, 0.0  ;;  %v713_v20 = vld [vmem:[%s996_s0 + $0x60] sm:$0xff]  ;;  %v727_v24 = vld [vmem:[%s996_s0 + $0x30] sm:$0xff] }
   0x5   :  { %v53_v19 = vsel %vm37_vm0, %v704_v17, 0.0  ;;  %v718_v21 = vld [vmem:[%s996_s0 + $0x68] sm:$0xff]  ;;  %v74_v22 = vsel %vm37_vm0, %v713_v20, 0.0  ;;  %v732_v25 = vld [vmem:[%s996_s0 + $0x38] sm:$0xff]  ;;  %v56_v26 = vsel %vm37_vm0, %v727_v24, 0.0  ;;  %v741_v28 = vld [vmem:[%s996_s0 + $0x70] sm:$0xff] }
   0x6   :  { %v77_v23 = vsel %vm37_vm0, %v718_v21, 0.0  ;;  %v59_v27 = vsel %vm37_vm0, %v732_v25, 0.0  ;;  %v746_v29 = vld [vmem:[%s996_s0 + $0x78] sm:$0xff]  ;;  %v80_v30 = vsel %vm37_vm0, %v741_v28, 0.0 }
   0x7   :  { %42 = vadd.xlane.f32.xlu0 %v41_v6  ;;  %v83_v31 = vsel %vm37_vm0, %v746_v29, 0.0 }
   0x8   :  { %66 = vadd.xlane.f32.xlu1 %v65_v7 }
   0xb   :  { %45 = vadd.xlane.f32.xlu0 %v44_v10 }
   0xc   :  { %48 = vadd.xlane.f32.xlu1 %v47_v11 }
   0xf   :  { %69 = vadd.xlane.f32.xlu0 %v68_v14 }
  0x10   :  { %72 = vadd.xlane.f32.xlu1 %v71_v15 }
  0x13   :  { %51 = vadd.xlane.f32.xlu0 %v50_v18 }
  0x14   :  { %54 = vadd.xlane.f32.xlu1 %v53_v19 }
  0x17   :  { %75 = vadd.xlane.f32.xlu0 %v74_v22 }
  0x18   :  { %78 = vadd.xlane.f32.xlu1 %v77_v23 }
  0x1b   :  { %57 = vadd.xlane.f32.xlu0 %v56_v26 }
  0x1c   :  { %60 = vadd.xlane.f32.xlu1 %v59_v27 }
  0x1f   :  { %81 = vadd.xlane.f32.xlu0 %v80_v30 }
  0x20   :  { %84 = vadd.xlane.f32.xlu1 %v83_v31 }
  0x8c   :  { %v40_v32 = vpop.xlane.xlu0 %39 }
  0x8d   :  { %v64_v33 = vpop.xlane.xlu1 %63  ;;  %v87_v34 = vmul.f32 0.0625, %v40_v32 }
  0x8e   :  { %v95_v35 = vmul.f32 0.0625, %v64_v33 }
  0x8f   :  { %v752_v36 = vsub.f32 %v21_v0, %v87_v34 }
  0x90   :  { %v754_v37 = vsub.f32 %v29_v1, %v95_v35  ;;  %v43_v38 = vpop.xlane.xlu0 %42 }
  0x91   :  { %v67_v39 = vpop.xlane.xlu1 %66  ;;  %v88_v40 = vmul.f32 0.0625, %v43_v38  ;;  %v119_v42 = vmul.f32 %v752_v36, %v752_v36 }
  0x92   :  { %v96_v41 = vmul.f32 0.0625, %v67_v39  ;;  %v127_v43 = vmul.f32 %v754_v37, %v754_v37 }
  0x93   :  { %v760_v44 = vsub.f32 %v22_v2, %v88_v40  ;;  %v135_v46 = vsel %vm37_vm0, %v119_v42, 0.0 }
  0x94   :  { %v762_v45 = vsub.f32 %v30_v5, %v96_v41  ;;  %136 = vadd.xlane.f32.xlu0 %v135_v46  ;;  %v46_v47 = vpop.xlane.xlu0 %45  ;;  %v159_v49 = vsel %vm37_vm0, %v127_v43, 0.0 }
  0x95   :  { %v49_v48 = vpop.xlane.xlu1 %48  ;;  %v89_v50 = vmul.f32 0.0625, %v46_v47  ;;  %v120_v52 = vmul.f32 %v760_v44, %v760_v44 }
  0x96   :  { %v90_v51 = vmul.f32 0.0625, %v49_v48  ;;  %v128_v53 = vmul.f32 %v762_v45, %v762_v45 }
  0x97   :  { %v770_v54 = vsub.f32 %v23_v8, %v89_v50  ;;  %v138_v56 = vsel %vm37_vm0, %v120_v52, 0.0 }
  0x98   :  { %v772_v55 = vsub.f32 %v24_v9, %v90_v51  ;;  %160 = vadd.xlane.f32.xlu0 %v159_v49  ;;  %139 = vadd.xlane.f32.xlu1 %v138_v56  ;;  %v70_v57 = vpop.xlane.xlu0 %69  ;;  %v162_v59 = vsel %vm37_vm0, %v128_v53, 0.0 }
  0x99   :  { %v73_v58 = vpop.xlane.xlu1 %72  ;;  %v97_v60 = vmul.f32 0.0625, %v70_v57  ;;  %v121_v62 = vmul.f32 %v770_v54, %v770_v54 }
  0x9a   :  { %v98_v61 = vmul.f32 0.0625, %v73_v58  ;;  %v122_v63 = vmul.f32 %v772_v55, %v772_v55 }
  0x9b   :  { %v781_v0 = vsub.f32 %v685_v12, %v97_v60  ;;  %v141_v2 = vsel %vm37_vm0, %v121_v62, 0.0 }
  0x9c   :  { %v784_v1 = vsub.f32 %v690_v13, %v98_v61  ;;  %163 = vadd.xlane.f32.xlu1 %v162_v59  ;;  %142 = vadd.xlane.f32.xlu0 %v141_v2  ;;  %v52_v3 = vpop.xlane.xlu0 %51  ;;  %v144_v5 = vsel %vm37_vm0, %v122_v63, 0.0 }
  0x9d   :  { %v55_v4 = vpop.xlane.xlu1 %54  ;;  %v91_v6 = vmul.f32 0.0625, %v52_v3  ;;  %v129_v8 = vmul.f32 %v781_v0, %v781_v0 }
  0x9e   :  { %v92_v7 = vmul.f32 0.0625, %v55_v4  ;;  %v130_v9 = vmul.f32 %v784_v1, %v784_v1 }
  0x9f   :  { %v793_v10 = vsub.f32 %v699_v16, %v91_v6  ;;  %v165_v12 = vsel %vm37_vm0, %v129_v8, 0.0 }
  0xa0   :  { %v796_v11 = vsub.f32 %v704_v17, %v92_v7  ;;  %145 = vadd.xlane.f32.xlu1 %v144_v5  ;;  %166 = vadd.xlane.f32.xlu0 %v165_v12  ;;  %v76_v13 = vpop.xlane.xlu0 %75  ;;  %v168_v15 = vsel %vm37_vm0, %v130_v9, 0.0 }
  0xa1   :  { %v79_v14 = vpop.xlane.xlu1 %78  ;;  %v99_v18 = vmul.f32 0.0625, %v76_v13  ;;  %v123_v22 = vmul.f32 %v793_v10, %v793_v10 }
  0xa2   :  { %v100_v19 = vmul.f32 0.0625, %v79_v14  ;;  %v124_v16 = vmul.f32 %v796_v11, %v796_v11 }
  0xa3   :  { %v805_v23 = vsub.f32 %v713_v20, %v99_v18  ;;  %v147_v26 = vsel %vm37_vm0, %v123_v22, 0.0 }
  0xa4   :  { %v808_v17 = vsub.f32 %v718_v21, %v100_v19  ;;  %169 = vadd.xlane.f32.xlu1 %v168_v15  ;;  %148 = vadd.xlane.f32.xlu0 %v147_v26  ;;  %v58_v27 = vpop.xlane.xlu0 %57  ;;  %v150_v31 = vsel %vm37_vm0, %v124_v16, 0.0 }
  0xa5   :  { %v61_v30 = vpop.xlane.xlu1 %60  ;;  %v93_v32 = vmul.f32 0.0625, %v58_v27  ;;  %v131_v34 = vmul.f32 %v805_v23, %v805_v23 }
  0xa6   :  { %v94_v33 = vmul.f32 0.0625, %v61_v30  ;;  %v132_v20 = vmul.f32 %v808_v17, %v808_v17 }
  0xa7   :  { %v817_v35 = vsub.f32 %v727_v24, %v93_v32  ;;  %v171_v38 = vsel %vm37_vm0, %v131_v34, 0.0  ;;  %v849_v32 = vld [vmem:[%s998_s1] ss:$0 sm:$0xff] }
  0xa8   :  { %v820_v21 = vsub.f32 %v732_v25, %v94_v33  ;;  %151 = vadd.xlane.f32.xlu1 %v150_v31  ;;  %172 = vadd.xlane.f32.xlu0 %v171_v38  ;;  %v82_v39 = vpop.xlane.xlu0 %81  ;;  %v174_v41 = vsel %vm37_vm0, %v132_v20, 0.0 }
  0xa9   :  { %v85_v40 = vpop.xlane.xlu1 %84  ;;  %v101_v42 = vmul.f32 0.0625, %v82_v39  ;;  %v125_v46 = vmul.f32 %v817_v35, %v817_v35 }
  0xaa   :  { %v102_v43 = vmul.f32 0.0625, %v85_v40  ;;  %v126_v24 = vmul.f32 %v820_v21, %v820_v21 }
  0xab   :  { %v829_v47 = vsub.f32 %v741_v28, %v101_v42  ;;  %v153_v48 = vsel %vm37_vm0, %v125_v46, 0.0 }
  0xac   :  { %v832_v25 = vsub.f32 %v746_v29, %v102_v43  ;;  %175 = vadd.xlane.f32.xlu1 %v174_v41  ;;  %154 = vadd.xlane.f32.xlu0 %v153_v48  ;;  %v156_v49 = vsel %vm37_vm0, %v126_v24, 0.0  ;;  %v595_v29 = vld [vmem:[%s997_s3] sm:$0xff]  }
  0xad   :  { %v133_v50 = vmul.f32 %v829_v47, %v829_v47  ;;  %575 = vmatprep.subr.bf16.mxu0 %v595_v29  ;;  %593 = vmatprep.subr.bf16.mxu1 %v595_v29 }
  0xae   :  { %v134_v51 = vmul.f32 %v832_v25, %v832_v25  ;;  %576 = vmatpush3.bf16.msra.mxu0 %v595_v29  ;;  %594 = vmatpush3.bf16.msra.mxu1 %v595_v29 }
  0xaf   :  { %v177_v52 = vsel %vm37_vm0, %v133_v50, 0.0 }
  0xb0   :  { %157 = vadd.xlane.f32.xlu1 %v156_v49  ;;  %178 = vadd.xlane.f32.xlu0 %v177_v52  ;;  %v180_v28 = vsel %vm37_vm0, %v134_v51, 0.0 }
  0xb4   :  { %181 = vadd.xlane.f32.xlu1 %v180_v28 }
 0x11d   :  { %v137_v53 = vpop.xlane.xlu0 %136 }
 0x11e   :  { %v183_v56 = vmul.f32 0.0625, %v137_v53 }
 0x120   :  { %v199_v57 = vadd.f32 1e-05, %v183_v56 }
 0x121   :  { %v140_v58 = vpop.xlane.xlu1 %139  ;;  %v161_v59 = vpop.xlane.xlu0 %160 }
 0x122   :  { %596 = vrsqrt.f32 %v199_v57  ;;  %v184_v60 = vmul.f32 0.0625, %v140_v58  ;;  %v191_v61 = vmul.f32 0.0625, %v161_v59 }
 0x124   :  { %v200_v62 = vadd.f32 1e-05, %v184_v60  ;;  %v207_v63 = vadd.f32 1e-05, %v191_v61 }
 0x125   :  { %v164_v2 = vpop.xlane.xlu1 %163  ;;  %v143_v3 = vpop.xlane.xlu0 %142 }
 0x126   :  { %598 = vrsqrt.f32 %v200_v62  ;;  %v192_v4 = vmul.f32 0.0625, %v164_v2  ;;  %v185_v5 = vmul.f32 0.0625, %v143_v3 }
 0x127   :  { %600 = vrsqrt.f32 %v207_v63 }
 0x128   :  { %v208_v6 = vadd.f32 1e-05, %v192_v4  ;;  %v201_v7 = vadd.f32 1e-05, %v185_v5 }
 0x129   :  { %v146_v8 = vpop.xlane.xlu1 %145  ;;  %v167_v9 = vpop.xlane.xlu0 %166 }
 0x12a   :  { %602 = vrsqrt.f32 %v208_v6  ;;  %v186_v12 = vmul.f32 0.0625, %v146_v8  ;;  %v193_v13 = vmul.f32 0.0625, %v167_v9 }
 0x12b   :  { %604 = vrsqrt.f32 %v201_v7 }
 0x12c   :  { %v202_v14 = vadd.f32 1e-05, %v186_v12  ;;  %v209_v15 = vadd.f32 1e-05, %v193_v13 }
 0x12d   :  { %v170_v18 = vpop.xlane.xlu1 %169  ;;  %v149_v19 = vpop.xlane.xlu0 %148 }
 0x12e   :  { %606 = vrsqrt.f32 %v202_v14  ;;  %v194_v22 = vmul.f32 0.0625, %v170_v18  ;;  %v187_v16 = vmul.f32 0.0625, %v149_v19 }
 0x12f   :  { %v597_v26 = vpop.eup %596  ;;  %608 = vrsqrt.f32 %v209_v15 }
 0x130   :  { %v210_v27 = vadd.f32 1e-05, %v194_v22  ;;  %v203_v30 = vadd.f32 1e-05, %v187_v16  ;;  %v231_v31 = vmul.f32 %v597_v26, %v752_v36  ;;  %v856_v36 = vld [vmem:[%s999_s2] ss:$0 sm:$0xff] }
 0x131   :  { %v152_v33 = vpop.xlane.xlu1 %151  ;;  %v173_v34 = vpop.xlane.xlu0 %172 }
 0x132   :  { %610 = vrsqrt.f32 %v210_v27  ;;  %v188_v20 = vmul.f32 0.0625, %v152_v33  ;;  %v195_v38 = vmul.f32 0.0625, %v173_v34  ;;  %v254_v40 = vmul.f32 %v849_v32, %v231_v31 }
 0x133   :  { %v599_v39 = vpop.eup %598  ;;  %612 = vrsqrt.f32 %v203_v30 }
 0x134   :  { %v601_v41 = vpop.eup %600  ;;  %v204_v42 = vadd.f32 1e-05, %v188_v20  ;;  %v211_v43 = vadd.f32 1e-05, %v195_v38  ;;  %v232_v46 = vmul.f32 %v599_v39, %v760_v44  ;;  %v277_v29 = vadd.f32 %v856_v36, %v254_v40 }
 0x135   :  { %v176_v24 = vpop.xlane.xlu1 %175  ;;  %v155_v48 = vpop.xlane.xlu0 %154  ;;  %v239_v49 = vmul.f32 %v601_v41, %v754_v37 }
 0x136   :  { %614 = vrsqrt.f32 %v204_v42  ;;  %v196_v50 = vmul.f32 0.0625, %v176_v24  ;;  %v189_v51 = vmul.f32 0.0625, %v155_v48  ;;  %v255_v52 = vmul.f32 %v849_v32, %v232_v46 }
 0x137   :  { %v603_v28 = vpop.eup %602  ;;  %616 = vrsqrt.f32 %v211_v43  ;;  %v262_v37 = vmul.f32 %v849_v32, %v239_v49 }
 0x138   :  { %v605_v53 = vpop.eup %604  ;;  %v212_v44 = vadd.f32 1e-05, %v196_v50  ;;  %v205_v56 = vadd.f32 1e-05, %v189_v51  ;;  %v278_v57 = vadd.f32 %v856_v36, %v255_v52  ;;  %v240_v58 = vmul.f32 %v603_v28, %v762_v45 }
 0x139   :  { %v158_v59 = vpop.xlane.xlu1 %157  ;;  %v179_v60 = vpop.xlane.xlu0 %178  ;;  %v233_v61 = vmul.f32 %v605_v53, %v770_v54  ;;  %v285_v54 = vadd.f32 %v856_v36, %v262_v37 }
 0x13a   :  { %618 = vrsqrt.f32 %v212_v44  ;;  %v190_v62 = vmul.f32 0.0625, %v158_v59  ;;  %v197_v63 = vmul.f32 0.0625, %v179_v60  ;;  %v293_v2 = vpack.c.bf16 %v278_v57, %v277_v29 }
 0x13b   :  { %v607_v3 = vpop.eup %606  ;;  %620 = vrsqrt.f32 %v205_v56  ;;  %v263_v4 = vmul.f32 %v849_v32, %v240_v58  ;;  %v256_v5 = vmul.f32 %v849_v32, %v233_v61 }
 0x13c   :  { %v609_v6 = vpop.eup %608  ;;  %v206_v7 = vadd.f32 1e-05, %v190_v62  ;;  %v213_v8 = vadd.f32 1e-05, %v197_v63  ;;  %577 = vmatprep.mubr.msk.bf16.mxu0 %vm37_vm0, %v293_v2  ;;  %v234_v45 = vmul.f32 %v607_v3, %v772_v55  ;;  %v914_v3 = vld [vmem:[%s1000_s4] ss:$0 sm:$0xff] }
 0x13d   :  { %v182_v9 = vpop.xlane.xlu1 %181  ;;  %v286_v12 = vadd.f32 %v856_v36, %v263_v4  ;;  %v241_v13 = vmul.f32 %v609_v6, %v781_v0  ;;  %v279_v22 = vadd.f32 %v856_v36, %v256_v5 }
 0x13e   :  { %622 = vrsqrt.f32 %v206_v7  ;;  %v198_v14 = vmul.f32 0.0625, %v182_v9  ;;  %v257_v15 = vmul.f32 %v849_v32, %v234_v45 }
 0x13f   :  { %v611_v18 = vpop.eup %610  ;;  %624 = vrsqrt.f32 %v213_v8  ;;  %v297_v19 = vpack.c.bf16 %v286_v12, %v285_v54  ;;  %v264_v30 = vmul.f32 %v849_v32, %v241_v13 }
 0x140   :  { %v613_v16 = vpop.eup %612  ;;  %v214_v26 = vadd.f32 1e-05, %v198_v14  ;;  %v280_v55 = vadd.f32 %v856_v36, %v257_v15  ;;  %v242_v27 = vmul.f32 %v611_v18, %v784_v1 }
 0x141   :  { %585 = vmatprep.mubr.msk.bf16.mxu1 %vm37_vm0, %v297_v19  ;;  %v235_v0 = vmul.f32 %v613_v16, %v793_v10  ;;  %v287_v38 = vadd.f32 %v856_v36, %v264_v30 }
 0x142   :  { %626 = vrsqrt.f32 %v214_v26  ;;  %v294_v31 = vpack.c.bf16 %v280_v55, %v279_v22  ;;  %v265_v33 = vmul.f32 %v849_v32, %v242_v27 }
 0x143   :  { %v615_v34 = vpop.eup %614  ;;  %v258_v40 = vmul.f32 %v849_v32, %v235_v0 }
 0x144   :  { %v617_v20 = vpop.eup %616  ;;  %578 = vmatmul.mubr.msk.bf16.vlgmr.msra.gmra.mxu0 %vm37_vm0, %v294_v31  ;;  %v288_v39 = vadd.f32 %v856_v36, %v265_v33  ;;  %v236_v1 = vmul.f32 %v615_v34, %v796_v11 }
 0x145   :  { %v243_v41 = vmul.f32 %v617_v20, %v805_v23  ;;  %v281_v24 = vadd.f32 %v856_v36, %v258_v40 }
 0x146   :  { %v298_v42 = vpack.c.bf16 %v288_v39, %v287_v38  ;;  %v259_v10 = vmul.f32 %v849_v32, %v236_v1 }
 0x147   :  { %v619_v43 = vpop.eup %618  ;;  %v266_v50 = vmul.f32 %v849_v32, %v243_v41 }
 0x148   :  { %v621_v46 = vpop.eup %620  ;;  %586 = vmatmul.mubr.msk.bf16.vlgmr.msra.gmra.mxu1 %vm37_vm0, %v298_v42  ;;  %v282_v48 = vadd.f32 %v856_v36, %v259_v10  ;;  %v244_v49 = vmul.f32 %v619_v43, %v808_v17 }
 0x149   :  { %v237_v11 = vmul.f32 %v621_v46, %v817_v35  ;;  %v289_v29 = vadd.f32 %v856_v36, %v266_v50 }
 0x14a   :  { %v295_v51 = vpack.c.bf16 %v282_v48, %v281_v24  ;;  %v267_v23 = vmul.f32 %v849_v32, %v244_v49 }
 0x14b   :  { %v623_v52 = vpop.eup %622  ;;  %v260_v56 = vmul.f32 %v849_v32, %v237_v11 }
 0x14c   :  { %v625_v28 = vpop.eup %624  ;;  %581 = vmatprep.mubr.msk.bf16.mxu0 %vm37_vm0, %v295_v51  ;;  %v290_v53 = vadd.f32 %v856_v36, %v267_v23  ;;  %v238_v44 = vmul.f32 %v623_v52, %v820_v21 }
 0x14d   :  { %v245_v17 = vmul.f32 %v625_v28, %v829_v47  ;;  %v283_v59 = vadd.f32 %v856_v36, %v260_v56 }
 0x14e   :  { %v299_v57 = vpack.c.bf16 %v290_v53, %v289_v29  ;;  %v261_v35 = vmul.f32 %v849_v32, %v238_v44 }
 0x14f   :  { %v627_v58 = vpop.eup %626  ;;  %v268_v61 = vmul.f32 %v849_v32, %v245_v17 }
 0x150   :  { %589 = vmatprep.mubr.msk.bf16.mxu1 %vm37_vm0, %v299_v57  ;;  %v284_v60 = vadd.f32 %v856_v36, %v261_v35  ;;  %v246_v37 = vmul.f32 %v627_v58, %v832_v25 }
 0x151   :  { %v291_v47 = vadd.f32 %v856_v36, %v268_v61 }
 0x152   :  { %v296_v62 = vpack.c.bf16 %v284_v60, %v283_v59  ;;  %v269_v21 = vmul.f32 %v849_v32, %v246_v37 }
 0x154   :  { %582 = vmatmul.mubr.msk.bf16.gmra.mxu0 %vm37_vm0, %v296_v62  ;;  %v292_v63 = vadd.f32 %v856_v36, %v269_v21 }
 0x156   :  { %v300_v2 = vpack.c.bf16 %v292_v63, %v291_v47 }
 0x158   :  { %590 = vmatmul.mubr.msk.bf16.gmra.mxu1 %vm37_vm0, %v300_v2 }
 0x204   :  { %v579_v25 = vpop.f32.mrf.mxu0 }
 0x205   :  { %v383_v4 = vadd.f32 %v579_v25, %v914_v3 }
 0x206   :  { %v374_v5 = vpop.f32.mrf.mxu0 }
 0x207   :  { %v552_v32 = vpack.c.bf16 %v383_v4, %v383_v4  ;;  %v375_v6 = vadd.f32 %v914_v3, %v374_v5 }
 0x208   :  { %v580_v7 = vpop.f32.mrf.mxu0  ;;  %v587_v8 = vpop.f32.mrf.mxu1 }
 0x209   :  { %504 = vst.msk [vmem:[%s1001_s5 + $0x8] sm:$0xf] %vm501_vm1, %v552_v32  ;;  %v550_v36 = vpack.c.bf16 %v375_v6, %v375_v6  ;;  %v386_v45 = vadd.f32 %v580_v7, %v914_v3  ;;  %v415_v9 = vadd.f32 %v587_v8, %v914_v3 }
 0x20a   :  { %v377_v54 = vpop.f32.mrf.mxu0  ;;  %v406_v12 = vpop.f32.mrf.mxu1 }
 0x20b   :  { %502 = vst.msk [vmem:[%s1001_s5] sm:$0xf] %vm501_vm1, %v550_v36  ;;  %v553_v13 = vpack.c.bf16 %v386_v45, %v386_v45  ;;  %v560_v14 = vpack.c.bf16 %v415_v9, %v415_v9  ;;  %v378_v15 = vadd.f32 %v914_v3, %v377_v54  ;;  %v407_v18 = vadd.f32 %v914_v3, %v406_v12 }
 0x20c   :  { %v588_v19 = vpop.f32.mrf.mxu1 }
 0x20d   :  { %505 = vst.msk [vmem:[%s1001_s5 + $0xc] sm:$0xf] %vm501_vm1, %v553_v13  ;;  %512 = vst.msk [vmem:[%s1001_s5 + $0x28] sm:$0xf] %vm501_vm1, %v560_v14  ;;  %v551_v22 = vpack.c.bf16 %v378_v15, %v378_v15  ;;  %v558_v16 = vpack.c.bf16 %v407_v18, %v407_v18  ;;  %v418_v26 = vadd.f32 %v588_v19, %v914_v3 }
 0x20e   :  { %v409_v55 = vpop.f32.mrf.mxu1 }
 0x20f   :  { %503 = vst.msk [vmem:[%s1001_s5 + $0x4] sm:$0xf] %vm501_vm1, %v551_v22  ;;  %510 = vst.msk [vmem:[%s1001_s5 + $0x20] sm:$0xf] %vm501_vm1, %v558_v16  ;;  %v561_v27 = vpack.c.bf16 %v418_v26, %v418_v26  ;;  %v410_v30 = vadd.f32 %v914_v3, %v409_v55 }
 0x211   :  { %513 = vst.msk [vmem:[%s1001_s5 + $0x2c] sm:$0xf] %vm501_vm1, %v561_v27  ;;  %v559_v0 = vpack.c.bf16 %v410_v30, %v410_v30 }
 0x213   :  { %511 = vst.msk [vmem:[%s1001_s5 + $0x24] sm:$0xf] %vm501_vm1, %v559_v0 }
 0x214   :  { %v583_v31 = vpop.f32.mrf.mxu0 }
 0x215   :  { %v399_v33 = vadd.f32 %v583_v31, %v914_v3 }
 0x216   :  { %v390_v34 = vpop.f32.mrf.mxu0 }
 0x217   :  { %v556_v20 = vpack.c.bf16 %v399_v33, %v399_v33  ;;  %v391_v38 = vadd.f32 %v914_v3, %v390_v34 }
 0x218   :  { %v584_v39 = vpop.f32.mrf.mxu0  ;;  %v591_v1 = vpop.f32.mrf.mxu1 }
 0x219   :  { %508 = vst.msk [vmem:[%s1001_s5 + $0x18] sm:$0xf] %vm501_vm1, %v556_v20  ;;  %v554_v40 = vpack.c.bf16 %v391_v38, %v391_v38  ;;  %v402_v41 = vadd.f32 %v584_v39, %v914_v3  ;;  %v431_v42 = vadd.f32 %v591_v1, %v914_v3 }
 0x21a   :  { %v393_v10 = vpop.f32.mrf.mxu0  ;;  %v422_v43 = vpop.f32.mrf.mxu1 }
 0x21b   :  { %506 = vst.msk [vmem:[%s1001_s5 + $0x10] sm:$0xf] %vm501_vm1, %v554_v40  ;;  %v557_v46 = vpack.c.bf16 %v402_v41, %v402_v41  ;;  %v564_v24 = vpack.c.bf16 %v431_v42, %v431_v42  ;;  %v394_v48 = vadd.f32 %v914_v3, %v393_v10  ;;  %v423_v49 = vadd.f32 %v914_v3, %v422_v43 }
 0x21c   :  { %v592_v50 = vpop.f32.mrf.mxu1 }
 0x21d   :  { %509 = vst.msk [vmem:[%s1001_s5 + $0x1c] sm:$0xf] %vm501_vm1, %v557_v46  ;;  %516 = vst.msk [vmem:[%s1001_s5 + $0x38] sm:$0xf] %vm501_vm1, %v564_v24  ;;  %v555_v11 = vpack.c.bf16 %v394_v48, %v394_v48  ;;  %v562_v51 = vpack.c.bf16 %v423_v49, %v423_v49  ;;  %v434_v23 = vadd.f32 %v592_v50, %v914_v3 }
 0x21e   :  { %v425_v52 = vpop.f32.mrf.mxu1 }
 0x21f   :  { %507 = vst.msk [vmem:[%s1001_s5 + $0x14] sm:$0xf] %vm501_vm1, %v555_v11  ;;  %514 = vst.msk [vmem:[%s1001_s5 + $0x30] sm:$0xf] %vm501_vm1, %v562_v51  ;;  %v565_v28 = vpack.c.bf16 %v434_v23, %v434_v23  ;;  %v426_v29 = vadd.f32 %v914_v3, %v425_v52 }
 0x221   :  { %517 = vst.msk [vmem:[%s1001_s5 + $0x3c] sm:$0xf] %vm501_vm1, %v565_v28  ;;  %v563_v53 = vpack.c.bf16 %v426_v29, %v426_v29 }
 0x223   :  { %515 = vst.msk [vmem:[%s1001_s5 + $0x34] sm:$0xf] %vm501_vm1, %v563_v53 }

// kernel: _lambda_.27
= control target key start
LH: loop header
LB: loop body
LE: loop exit
PB: predicated region body
PF: predicated region fallthrough
CT: control target
= control target key end

     0   :  { %vm86_vm0 = vcmask 130048   ;;  %s406_s1 = inlined_call_operand.vmem [shape: bf16[16,16], index: 1, kind: input, shape index: {}]   ;;  %s407_s0 = inlined_call_operand.vmem [shape: bf16[128,16], index: 0, kind: input, shape index: {}]   ;;  %s408_s2 = inlined_call_operand.vmem [shape: f32[1,16], index: 2, kind: input, shape index: {}]   ;;  %s409_s3 = inlined_call_operand.vmem [shape: f32[128,16], index: 3, kind: output, shape index: {}]  }
   0x1   :  { %v275_v0 = vld [vmem:[%s406_s1] sm:$0xff]   ;;  %v278_v3 = vld [vmem:[%s407_s0 + $0x8] sm:$0xff]   ;;  %v280_v5 = vld [vmem:[%s407_s0 + $0x10] sm:$0xff]  }
   0x2   :  { %v276_v1 = vld [vmem:[%s407_s0] sm:$0xff]   ;;  %255 = vmatprep.subr.bf16.mxu0 %v275_v0  ;;  %273 = vmatprep.subr.bf16.mxu1 %v275_v0  ;;  %v279_v4 = vld [vmem:[%s407_s0 + $0x28] sm:$0xff]   ;;  %v281_v6 = vld [vmem:[%s407_s0 + $0x30] sm:$0xff]  }
   0x3   :  { %v277_v2 = vld [vmem:[%s407_s0 + $0x20] sm:$0xff]   ;;  %256 = vmatpush3.bf16.msra.mxu0 %v275_v0  ;;  %274 = vmatpush3.bf16.msra.mxu1 %v275_v0  ;;  %v282_v7 = vld [vmem:[%s407_s0 + $0x18] sm:$0xff]  }
   0x4   :  { %257 = vmatprep.mubr.msk.bf16.mxu0 %vm86_vm0, %v276_v1  ;;  %265 = vmatprep.mubr.msk.bf16.mxu1 %vm86_vm0, %v277_v2  ;;  %v283_v8 = vld [vmem:[%s407_s0 + $0x38] sm:$0xff]   ;;  %v228_v9 = vld [vmem:[%s408_s2] ss:$0 sm:$0xff] }
   0x6   :  { %258 = vmatmul.mubr.msk.bf16.vlgmr.msra.gmra.mxu0 %vm86_vm0, %v278_v3  ;;  %266 = vmatmul.mubr.msk.bf16.vlgmr.msra.gmra.mxu1 %vm86_vm0, %v279_v4 }
   0x7   :  { %261 = vmatprep.mubr.msk.bf16.mxu0 %vm86_vm0, %v280_v5  ;;  %269 = vmatprep.mubr.msk.bf16.mxu1 %vm86_vm0, %v281_v6 }
   0xe   :  { %262 = vmatmul.mubr.msk.bf16.gmra.mxu0 %vm86_vm0, %v282_v7  ;;  %270 = vmatmul.mubr.msk.bf16.gmra.mxu1 %vm86_vm0, %v283_v8 }
  0xc6   :  { %v259_v10 = vpop.f32.mrf.mxu0  ;;  %v267_v11 = vpop.f32.mrf.mxu1 }
  0xc7   :  { %v154_v12 = vadd.f32 %v259_v10, %v228_v9  ;;  %v186_v13 = vadd.f32 %v267_v11, %v228_v9 }
  0xc8   :  { %v145_v14 = vpop.f32.mrf.mxu0  ;;  %v177_v15 = vpop.f32.mrf.mxu1 }
  0xc9   :  { %210 = vst.msk [vmem:[%s409_s3 + $0x10] sm:$0xff] %vm86_vm0, %v154_v12  ;;  %218 = vst.msk [vmem:[%s409_s3 + $0x50] sm:$0xff] %vm86_vm0, %v186_v13  ;;  %v146_v16 = vadd.f32 %v228_v9, %v145_v14  ;;  %v178_v17 = vadd.f32 %v228_v9, %v177_v15 }
  0xca   :  { %v260_v18 = vpop.f32.mrf.mxu0  ;;  %v268_v19 = vpop.f32.mrf.mxu1 }
  0xcb   :  { %208 = vst.msk [vmem:[%s409_s3] sm:$0xff] %vm86_vm0, %v146_v16  ;;  %216 = vst.msk [vmem:[%s409_s3 + $0x40] sm:$0xff] %vm86_vm0, %v178_v17  ;;  %v157_v20 = vadd.f32 %v260_v18, %v228_v9  ;;  %v189_v21 = vadd.f32 %v268_v19, %v228_v9 }
  0xcc   :  { %v148_v22 = vpop.f32.mrf.mxu0  ;;  %v180_v23 = vpop.f32.mrf.mxu1 }
  0xcd   :  { %211 = vst.msk [vmem:[%s409_s3 + $0x18] sm:$0xff] %vm86_vm0, %v157_v20  ;;  %219 = vst.msk [vmem:[%s409_s3 + $0x58] sm:$0xff] %vm86_vm0, %v189_v21  ;;  %v149_v24 = vadd.f32 %v228_v9, %v148_v22  ;;  %v181_v25 = vadd.f32 %v228_v9, %v180_v23 }
  0xce   :  { %v263_v26 = vpop.f32.mrf.mxu0  ;;  %v271_v27 = vpop.f32.mrf.mxu1 }
  0xcf   :  { %209 = vst.msk [vmem:[%s409_s3 + $0x8] sm:$0xff] %vm86_vm0, %v149_v24  ;;  %217 = vst.msk [vmem:[%s409_s3 + $0x48] sm:$0xff] %vm86_vm0, %v181_v25  ;;  %v170_v28 = vadd.f32 %v263_v26, %v228_v9  ;;  %v202_v29 = vadd.f32 %v271_v27, %v228_v9 }
  0xd0   :  { %v161_v30 = vpop.f32.mrf.mxu0  ;;  %v193_v31 = vpop.f32.mrf.mxu1 }
  0xd1   :  { %214 = vst.msk [vmem:[%s409_s3 + $0x30] sm:$0xff] %vm86_vm0, %v170_v28  ;;  %222 = vst.msk [vmem:[%s409_s3 + $0x70] sm:$0xff] %vm86_vm0, %v202_v29  ;;  %v162_v32 = vadd.f32 %v228_v9, %v161_v30  ;;  %v194_v33 = vadd.f32 %v228_v9, %v193_v31 }
  0xd2   :  { %v264_v34 = vpop.f32.mrf.mxu0  ;;  %v272_v35 = vpop.f32.mrf.mxu1 }
  0xd3   :  { %212 = vst.msk [vmem:[%s409_s3 + $0x20] sm:$0xff] %vm86_vm0, %v162_v32  ;;  %220 = vst.msk [vmem:[%s409_s3 + $0x60] sm:$0xff] %vm86_vm0, %v194_v33  ;;  %v173_v36 = vadd.f32 %v264_v34, %v228_v9  ;;  %v205_v37 = vadd.f32 %v272_v35, %v228_v9 }
  0xd4   :  { %v164_v38 = vpop.f32.mrf.mxu0  ;;  %v196_v39 = vpop.f32.mrf.mxu1 }
  0xd5   :  { %215 = vst.msk [vmem:[%s409_s3 + $0x38] sm:$0xff] %vm86_vm0, %v173_v36  ;;  %223 = vst.msk [vmem:[%s409_s3 + $0x78] sm:$0xff] %vm86_vm0, %v205_v37  ;;  %v165_v40 = vadd.f32 %v228_v9, %v164_v38  ;;  %v197_v41 = vadd.f32 %v228_v9, %v196_v39 }
  0xd7   :  { %213 = vst.msk [vmem:[%s409_s3 + $0x28] sm:$0xff] %vm86_vm0, %v165_v40  ;;  %221 = vst.msk [vmem:[%s409_s3 + $0x68] sm:$0xff] %vm86_vm0, %v197_v41 }

// kernel: _lambda_.26
= control target key start
LH: loop header
LB: loop body
LE: loop exit
PB: predicated region body
PF: predicated region fallthrough
CT: control target
= control target key end

     0   :  { %v2742_v1 = vmov 0.0   ;;  %vm2743_vm0 = vmmov 0   ;;  %s2744_s13 = smov 112   ;;  %s2745_s26 = smov 96   ;;  %vm39_vm1 = vcmask 64512   ;;  %vm497_vm2 = vcmask 130048   ;;  %s3547_s0 = inlined_call_operand.vmem [shape: bf16[8,16,48], index: 0, kind: input, shape index: {}]   ;;  %s3548_s1 = inlined_call_operand.vmem [shape: f32[1,2,16,16], index: 1, kind: input, shape index: {}]   ;;  %s3549_s2 = inlined_call_operand.vmem [shape: bf16[8,16,16], index: 2, kind: output, shape index: {}]  }
   0x1   :  { %v2768_v0 = vld [vmem:[%s3547_s0] sm:$0xff]   ;;  %2359 = vmatprep.subr.bf16.mxu0 %v2742_v1  ;;  %2365 = vmatprep.subr.bf16.mxu1 %v2742_v1  ;;  %v2775_v2 = vld [vmem:[%s3547_s0 + $0x8] sm:$0xff]   ;;  %v2785_v3 = vld [vmem:[%s3547_s0 + $0x10] sm:$0xff]   ;;  %s2746_s3 = smov 104   ;;  %s2747_s4 = smov 120   ;;  %vm2202_vm3 = vcmask 125952  }
   0x2   :  { %2361 = vmatprep.mubr.msk.bf16.mxu0 %vm2743_vm0, %v2742_v1  ;;  %2367 = vmatprep.mubr.msk.bf16.mxu1 %vm2743_vm0, %v2742_v1  ;;  %v2791_v4 = vld [vmem:[%s3547_s0 + $0x18] sm:$0xff]   ;;  %v2797_v5 = vld [vmem:[%s3547_s0 + $0x20] sm:$0xff]   ;;  %v2803_v6 = vld [vmem:[%s3547_s0 + $0x28] sm:$0xff]   ;;  %s2748_s5 = smov 88  }
   0x3   :  { %37 = vrot.lane.b32.xlu0 %v2768_v0, %s2744_s13  ;;  %146 = vrot.lane.b32.xlu1 %v2785_v3, %s2744_s13  ;;  %v2809_v7 = vld [vmem:[%s3547_s0 + $0x30] sm:$0xff]   ;;  %v2815_v8 = vld [vmem:[%s3547_s0 + $0x38] sm:$0xff]  }
   0x4   :  { %v2873_v27 = vld [vmem:[%s3548_s1] sm:$0xff]  ;;  %v2881_v33 = vld [vmem:[%s3548_s1 + $0x8] sm:$0xff] }
   0x7   :  { %92 = vrot.lane.b32.xlu0 %v2775_v2, %s2744_s13  ;;  %200 = vrot.lane.b32.xlu1 %v2791_v4, %s2744_s13 }
   0xb   :  { %254 = vrot.lane.b32.xlu0 %v2797_v5, %s2744_s13  ;;  %308 = vrot.lane.b32.xlu1 %v2803_v6, %s2744_s13 }
   0xf   :  { %362 = vrot.lane.b32.xlu0 %v2809_v7, %s2744_s13  ;;  %416 = vrot.lane.b32.xlu1 %v2815_v8, %s2744_s13 }
  0x13   :  { %682 = vrot.lane.b32.xlu1 %v2768_v0, %s2745_s26 }
  0x75   :  { %v38_v9 = vpop.permute.xlu0 %37  ;;  %v147_v11 = vpop.permute.xlu1 %146 }
  0x76   :  { %v44_v10 = vsel %vm39_vm1, %v38_v9, 0  ;;  %v152_v14 = vsel %vm39_vm1, %v147_v11, 0 }
  0x77   :  { %2360 = vmatpush3.bf16.xpose.msra.mxu0 %v44_v10 }
  0x78   :  { %2371 = vmatprep.subr.bf16.mxu0 %v2742_v1 }
  0x79   :  { %v93_v12 = vpop.permute.xlu0 %92  ;;  %v201_v15 = vpop.permute.xlu1 %200 }
  0x7a   :  { %v98_v13 = vsel %vm39_vm1, %v93_v12, 0  ;;  %v206_v16 = vsel %vm39_vm1, %v201_v15, 0 }
  0x7b   :  { %2366 = vmatpush3.bf16.xpose.msra.mxu1 %v98_v13 }
  0x7c   :  { %2377 = vmatprep.subr.bf16.mxu1 %v2742_v1 }
  0x7d   :  { %v255_v17 = vpop.permute.xlu0 %254  ;;  %v309_v19 = vpop.permute.xlu1 %308 }
  0x7e   :  { %2362 = vmatmul.mubr.msk.bf16.vlgmr.msra.gmra.mxu0 %vm39_vm1, %v2768_v0  ;;  %v260_v18 = vsel %vm39_vm1, %v255_v17, 0  ;;  %v314_v20 = vsel %vm39_vm1, %v309_v19, 0 }
  0x7f   :  { %2372 = vmatpush3.bf16.xpose.msra.mxu0 %v152_v14  ;;  %2373 = vmatprep.mubr.msk.bf16.mxu0 %vm2743_vm0, %v2742_v1 }
  0x80   :  { %2383 = vmatprep.subr.bf16.mxu0 %v2742_v1 }
  0x81   :  { %v363_v21 = vpop.permute.xlu0 %362  ;;  %v417_v23 = vpop.permute.xlu1 %416 }
  0x82   :  { %2368 = vmatmul.mubr.msk.bf16.vlgmr.msra.gmra.mxu1 %vm39_vm1, %v2775_v2  ;;  %v368_v22 = vsel %vm39_vm1, %v363_v21, 0  ;;  %v422_v24 = vsel %vm39_vm1, %v417_v23, 0 }
  0x83   :  { %2378 = vmatpush3.bf16.xpose.msra.mxu1 %v206_v16  ;;  %2379 = vmatprep.mubr.msk.bf16.mxu1 %vm2743_vm0, %v2742_v1 }
  0x84   :  { %2389 = vmatprep.subr.bf16.mxu1 %v2742_v1 }
  0x85   :  { %v683_v25 = vpop.permute.xlu1 %682 }
  0x86   :  { %2374 = vmatmul.mubr.msk.bf16.vlgmr.msra.gmra.mxu0 %vm39_vm1, %v2785_v3 }
  0x87   :  { %2384 = vmatpush3.bf16.xpose.msra.mxu0 %v260_v18  ;;  %2385 = vmatprep.mubr.msk.bf16.mxu0 %vm2743_vm0, %v2742_v1 }
  0x88   :  { %2395 = vmatprep.subr.bf16.mxu0 %v2742_v1 }
  0x8a   :  { %2380 = vmatmul.mubr.msk.bf16.vlgmr.msra.gmra.mxu1 %vm39_vm1, %v2791_v4 }
  0x8b   :  { %2390 = vmatpush3.bf16.xpose.msra.mxu1 %v314_v20  ;;  %2391 = vmatprep.mubr.msk.bf16.mxu1 %vm2743_vm0, %v2742_v1 }
  0x8c   :  { %2401 = vmatprep.subr.bf16.mxu1 %v2742_v1 }
  0x8e   :  { %2386 = vmatmul.mubr.msk.bf16.vlgmr.msra.gmra.mxu0 %vm39_vm1, %v2797_v5 }
  0x8f   :  { %2396 = vmatpush3.bf16.xpose.msra.mxu0 %v368_v22  ;;  %2397 = vmatprep.mubr.msk.bf16.mxu0 %vm2743_vm0, %v2742_v1 }
  0x90   :  { %2407 = vmatprep.subr.bf16.mxu0 %v2742_v1 }
  0x92   :  { %2392 = vmatmul.mubr.msk.bf16.vlgmr.msra.gmra.mxu1 %vm39_vm1, %v2803_v6 }
  0x93   :  { %2402 = vmatpush3.bf16.xpose.msra.mxu1 %v422_v24  ;;  %2403 = vmatprep.mubr.msk.bf16.mxu1 %vm2743_vm0, %v2742_v1 }
  0x94   :  { %2413 = vmatprep.subr.bf16.mxu1 %v2742_v1 }
  0x96   :  { %2398 = vmatmul.mubr.msk.bf16.vlgmr.msra.gmra.mxu0 %vm39_vm1, %v2809_v7 }
  0x97   :  { %2409 = vmatprep.mubr.msk.bf16.mxu0 %vm2743_vm0, %v2742_v1  ;;  %2408 = vmatpush3.bf16.msra.mxu0 %v683_v25 }
  0x98   :  { %2419 = vmatprep.subr.bf16.mxu0 %v2742_v1 }
  0x9a   :  { %2404 = vmatmul.mubr.msk.bf16.vlgmr.msra.gmra.mxu1 %vm39_vm1, %v2815_v8 }
  0x9b   :  { %2415 = vmatprep.mubr.msk.bf16.mxu1 %vm2743_vm0, %v2742_v1 }
 0x13e   :  { %v80_v26 = vpop.f32.mrf.mxu0 }
 0x13f   :  { %v465_v28 = vmul.f32 0.35355338, %v80_v26 }
 0x140   :  { %v2363_v29 = vpop.f32.mrf.mxu0 }
 0x141   :  { %v2876_v30 = vadd.f32 %v465_v28, %v2873_v27 }
 0x142   :  { %v83_v31 = vpop.f32.mrf.mxu0  ;;  %v134_v32 = vpop.f32.mrf.mxu1 }
 0x143   :  { %v466_v34 = vmul.f32 0.35355338, %v83_v31  ;;  %v467_v35 = vmul.f32 0.35355338, %v134_v32  ;;  %v498_v36 = vsel %vm497_vm2, %v2876_v30, -inf }
 0x144   :  { %499 = vmax.xlane.f32.xlu0 %v498_v36  ;;  %v2364_v37 = vpop.f32.mrf.mxu0  ;;  %v2369_v38 = vpop.f32.mrf.mxu1 }
 0x145   :  { %v2886_v39 = vadd.f32 %v466_v34, %v2881_v33  ;;  %v2889_v40 = vadd.f32 %v467_v35, %v2873_v27 }
 0x146   :  { %v137_v41 = vpop.f32.mrf.mxu1  ;;  %v188_v42 = vpop.f32.mrf.mxu0 }
 0x147   :  { %v468_v43 = vmul.f32 0.35355338, %v137_v41  ;;  %v469_v44 = vmul.f32 0.35355338, %v188_v42  ;;  %v501_v45 = vsel %vm497_vm2, %v2886_v39, -inf  ;;  %v504_v46 = vsel %vm497_vm2, %v2889_v40, -inf }
 0x148   :  { %502 = vmax.xlane.f32.xlu1 %v501_v45  ;;  %v2375_v47 = vpop.f32.mrf.mxu0  ;;  %505 = vmax.xlane.f32.xlu0 %v504_v46  ;;  %v2370_v48 = vpop.f32.mrf.mxu1 }
 0x149   :  { %v2896_v49 = vadd.f32 %v469_v44, %v2873_v27  ;;  %v2899_v50 = vadd.f32 %v468_v43, %v2881_v33 }
 0x14a   :  { %v191_v51 = vpop.f32.mrf.mxu0  ;;  %v242_v52 = vpop.f32.mrf.mxu1 }
 0x14b   :  { %v470_v53 = vmul.f32 0.35355338, %v191_v51  ;;  %v471_v54 = vmul.f32 0.35355338, %v242_v52  ;;  %v510_v55 = vsel %vm497_vm2, %v2896_v49, -inf  ;;  %v507_v56 = vsel %vm497_vm2, %v2899_v50, -inf }
 0x14c   :  { %511 = vmax.xlane.f32.xlu1 %v510_v55  ;;  %v2376_v57 = vpop.f32.mrf.mxu0  ;;  %508 = vmax.xlane.f32.xlu0 %v507_v56  ;;  %v2381_v58 = vpop.f32.mrf.mxu1 }
 0x14d   :  { %v2906_v59 = vadd.f32 %v470_v53, %v2881_v33  ;;  %v2909_v60 = vadd.f32 %v471_v54, %v2873_v27 }
 0x14e   :  { %v245_v61 = vpop.f32.mrf.mxu1  ;;  %v296_v62 = vpop.f32.mrf.mxu0 }
 0x14f   :  { %v472_v63 = vmul.f32 0.35355338, %v245_v61  ;;  %v473_v9 = vmul.f32 0.35355338, %v296_v62  ;;  %v513_v10 = vsel %vm497_vm2, %v2906_v59, -inf  ;;  %v516_v11 = vsel %vm497_vm2, %v2909_v60, -inf }
 0x150   :  { %514 = vmax.xlane.f32.xlu0 %v513_v10  ;;  %517 = vmax.xlane.f32.xlu1 %v516_v11  ;;  %v2382_v12 = vpop.f32.mrf.mxu1  ;;  %v2387_v13 = vpop.f32.mrf.mxu0 }
 0x151   :  { %v2916_v14 = vadd.f32 %v472_v63, %v2881_v33  ;;  %v2919_v15 = vadd.f32 %v473_v9, %v2873_v27 }
 0x152   :  { %v299_v16 = vpop.f32.mrf.mxu0  ;;  %v350_v17 = vpop.f32.mrf.mxu1 }
 0x153   :  { %v474_v18 = vmul.f32 0.35355338, %v299_v16  ;;  %v475_v19 = vmul.f32 0.35355338, %v350_v17  ;;  %v519_v20 = vsel %vm497_vm2, %v2916_v14, -inf  ;;  %v522_v21 = vsel %vm497_vm2, %v2919_v15, -inf }
 0x154   :  { %520 = vmax.xlane.f32.xlu0 %v519_v20  ;;  %v2393_v22 = vpop.f32.mrf.mxu1  ;;  %523 = vmax.xlane.f32.xlu1 %v522_v21  ;;  %v2388_v23 = vpop.f32.mrf.mxu0 }
 0x155   :  { %v2926_v24 = vadd.f32 %v475_v19, %v2873_v27  ;;  %v2929_v25 = vadd.f32 %v474_v18, %v2881_v33 }
 0x156   :  { %v353_v26 = vpop.f32.mrf.mxu1  ;;  %v404_v28 = vpop.f32.mrf.mxu0 }
 0x157   :  { %v476_v29 = vmul.f32 0.35355338, %v353_v26  ;;  %v477_v31 = vmul.f32 0.35355338, %v404_v28  ;;  %v528_v32 = vsel %vm497_vm2, %v2926_v24, -inf  ;;  %v525_v34 = vsel %vm497_vm2, %v2929_v25, -inf }
 0x158   :  { %v2394_v35 = vpop.f32.mrf.mxu1  ;;  %529 = vmax.xlane.f32.xlu1 %v528_v32  ;;  %526 = vmax.xlane.f32.xlu0 %v525_v34  ;;  %v2399_v36 = vpop.f32.mrf.mxu0 }
 0x159   :  { %v2936_v37 = vadd.f32 %v476_v29, %v2881_v33  ;;  %v2939_v38 = vadd.f32 %v477_v31, %v2873_v27 }
 0x15a   :  { %v407_v41 = vpop.f32.mrf.mxu0  ;;  %v458_v42 = vpop.f32.mrf.mxu1 }
 0x15b   :  { %v478_v43 = vmul.f32 0.35355338, %v407_v41  ;;  %v479_v44 = vmul.f32 0.35355338, %v458_v42  ;;  %v531_v45 = vsel %vm497_vm2, %v2936_v37, -inf  ;;  %v534_v46 = vsel %vm497_vm2, %v2939_v38, -inf }
 0x15c   :  { %v2405_v47 = vpop.f32.mrf.mxu1  ;;  %532 = vmax.xlane.f32.xlu0 %v531_v45  ;;  %535 = vmax.xlane.f32.xlu1 %v534_v46  ;;  %v2400_v48 = vpop.f32.mrf.mxu0 }
 0x15d   :  { %v2946_v51 = vadd.f32 %v479_v44, %v2873_v27  ;;  %v2949_v52 = vadd.f32 %v478_v43, %v2881_v33 }
 0x15e   :  { %v461_v53 = vpop.f32.mrf.mxu1 }
 0x15f   :  { %v480_v54 = vmul.f32 0.35355338, %v461_v53  ;;  %v540_v55 = vsel %vm497_vm2, %v2946_v51, -inf  ;;  %v537_v56 = vsel %vm497_vm2, %v2949_v52, -inf }
 0x160   :  { %v2406_v57 = vpop.f32.mrf.mxu1  ;;  %541 = vmax.xlane.f32.xlu1 %v540_v55  ;;  %538 = vmax.xlane.f32.xlu0 %v537_v56 }
 0x161   :  { %v2956_v58 = vadd.f32 %v480_v54, %v2881_v33 }
 0x163   :  { %v543_v27 = vsel %vm497_vm2, %v2956_v58, -inf }
 0x164   :  { %544 = vmax.xlane.f32.xlu0 %v543_v27 }
 0x171   :  { %776 = vrot.lane.b32.xlu1 %v2785_v3, %s2745_s26 }
 0x175   :  { %823 = vrot.lane.b32.xlu1 %v2791_v4, %s2745_s26 }
 0x179   :  { %917 = vrot.lane.b32.xlu1 %v2803_v6, %s2745_s26 }
 0x17a   :  { %729 = vrot.lane.b32.xlu0 %v2775_v2, %s2745_s26 }
 0x17d   :  { %1011 = vrot.lane.b32.xlu1 %v2815_v8, %s2745_s26 }
 0x17e   :  { %870 = vrot.lane.b32.xlu0 %v2797_v5, %s2745_s26 }
 0x182   :  { %964 = vrot.lane.b32.xlu0 %v2809_v7, %s2745_s26 }
 0x1cd   :  { %v500_v33 = vpop.xlane.xlu0 %499 }
 0x1ce   :  { %v546_v61 = vsub.f32 %v2876_v30, %v500_v33 }
 0x1d0   :  { %v562_v62 = vmul.f32 1.442695, %v546_v61 }
 0x1d1   :  { %v503_v63 = vpop.xlane.xlu1 %502  ;;  %v506_v9 = vpop.xlane.xlu0 %505 }
 0x1d2   :  { %2607 = vpow2.f32 %v562_v62  ;;  %v547_v10 = vsub.f32 %v2886_v39, %v503_v63  ;;  %v548_v11 = vsub.f32 %v2889_v40, %v506_v9 }
 0x1d4   :  { %v564_v12 = vmul.f32 1.442695, %v547_v10  ;;  %v566_v13 = vmul.f32 1.442695, %v548_v11 }
 0x1d5   :  { %v512_v16 = vpop.xlane.xlu1 %511  ;;  %v509_v17 = vpop.xlane.xlu0 %508 }
 0x1d6   :  { %2609 = vpow2.f32 %v564_v12  ;;  %v550_v18 = vsub.f32 %v2896_v49, %v512_v16  ;;  %v549_v19 = vsub.f32 %v2899_v50, %v509_v17 }
 0x1d7   :  { %2611 = vpow2.f32 %v566_v13 }
 0x1d8   :  { %v570_v20 = vmul.f32 1.442695, %v550_v18  ;;  %v568_v30 = vmul.f32 1.442695, %v549_v19 }
 0x1d9   :  { %v518_v21 = vpop.xlane.xlu1 %517  ;;  %v515_v22 = vpop.xlane.xlu0 %514 }
 0x1da   :  { %2613 = vpow2.f32 %v570_v20  ;;  %v552_v23 = vsub.f32 %v2909_v60, %v518_v21  ;;  %v551_v39 = vsub.f32 %v2906_v59, %v515_v22 }
 0x1db   :  { %2615 = vpow2.f32 %v568_v30 }
 0x1dc   :  { %v574_v40 = vmul.f32 1.442695, %v552_v23  ;;  %v572_v26 = vmul.f32 1.442695, %v551_v39 }
 0x1dd   :  { %v524_v28 = vpop.xlane.xlu1 %523  ;;  %v521_v29 = vpop.xlane.xlu0 %520 }
 0x1de   :  { %2617 = vpow2.f32 %v574_v40  ;;  %v554_v49 = vsub.f32 %v2919_v15, %v524_v28  ;;  %v553_v50 = vsub.f32 %v2916_v14, %v521_v29 }
 0x1df   :  { %v2983_v31 = vpop.eup %2607  ;;  %2619 = vpow2.f32 %v572_v26 }
 0x1e0   :  { %v578_v32 = vmul.f32 1.442695, %v554_v49  ;;  %v576_v34 = vmul.f32 1.442695, %v553_v50  ;;  %v594_v60 = vsel %vm497_vm2, %v2983_v31, 0.0 }
 0x1e1   :  { %v530_v35 = vpop.xlane.xlu1 %529  ;;  %595 = vadd.xlane.f32.xlu1 %v594_v60  ;;  %v527_v59 = vpop.xlane.xlu0 %526 }
 0x1e2   :  { %2621 = vpow2.f32 %v578_v32  ;;  %v556_v36 = vsub.f32 %v2926_v24, %v530_v35  ;;  %v555_v41 = vsub.f32 %v2929_v25, %v527_v59 }
 0x1e3   :  { %v2989_v42 = vpop.eup %2609  ;;  %2623 = vpow2.f32 %v576_v34 }
 0x1e4   :  { %v2991_v14 = vpop.eup %2611  ;;  %v582_v15 = vmul.f32 1.442695, %v556_v36  ;;  %v580_v43 = vmul.f32 1.442695, %v555_v41  ;;  %v597_v44 = vsel %vm497_vm2, %v2989_v42, 0.0 }
 0x1e5   :  { %v536_v45 = vpop.xlane.xlu1 %535  ;;  %598 = vadd.xlane.f32.xlu0 %v597_v44  ;;  %v600_v46 = vsel %vm497_vm2, %v2991_v14, 0.0  ;;  %v533_v47 = vpop.xlane.xlu0 %532 }
 0x1e6   :  { %2625 = vpow2.f32 %v582_v15  ;;  %v558_v24 = vsub.f32 %v2939_v38, %v536_v45  ;;  %601 = vadd.xlane.f32.xlu1 %v600_v46  ;;  %v557_v25 = vsub.f32 %v2936_v37, %v533_v47 }
 0x1e7   :  { %v2999_v48 = vpop.eup %2613  ;;  %2627 = vpow2.f32 %v580_v43 }
 0x1e8   :  { %v3001_v53 = vpop.eup %2615  ;;  %v586_v54 = vmul.f32 1.442695, %v558_v24  ;;  %v584_v55 = vmul.f32 1.442695, %v557_v25  ;;  %v606_v56 = vsel %vm497_vm2, %v2999_v48, 0.0 }
 0x1e9   :  { %v542_v57 = vpop.xlane.xlu1 %541  ;;  %v603_v27 = vsel %vm497_vm2, %v3001_v53, 0.0  ;;  %v539_v33 = vpop.xlane.xlu0 %538 }
 0x1ea   :  { %2629 = vpow2.f32 %v586_v54  ;;  %v560_v38 = vsub.f32 %v2946_v51, %v542_v57  ;;  %607 = vadd.xlane.f32.xlu1 %v606_v56  ;;  %604 = vadd.xlane.f32.xlu0 %v603_v27  ;;  %v559_v37 = vsub.f32 %v2949_v52, %v539_v33 }
 0x1eb   :  { %v3009_v61 = vpop.eup %2617  ;;  %2631 = vpow2.f32 %v584_v55 }
 0x1ec   :  { %v3011_v62 = vpop.eup %2619  ;;  %v590_v63 = vmul.f32 1.442695, %v560_v38  ;;  %v588_v9 = vmul.f32 1.442695, %v559_v37  ;;  %v612_v10 = vsel %vm497_vm2, %v3009_v61, 0.0 }
 0x1ed   :  { %v609_v11 = vsel %vm497_vm2, %v3011_v62, 0.0  ;;  %v545_v12 = vpop.xlane.xlu0 %544 }
 0x1ee   :  { %2633 = vpow2.f32 %v590_v63  ;;  %613 = vadd.xlane.f32.xlu1 %v612_v10  ;;  %610 = vadd.xlane.f32.xlu0 %v609_v11  ;;  %v561_v51 = vsub.f32 %v2956_v58, %v545_v12 }
 0x1ef   :  { %v3018_v52 = vpop.eup %2621  ;;  %2635 = vpow2.f32 %v588_v9 }
 0x1f0   :  { %v3020_v13 = vpop.eup %2623  ;;  %v592_v16 = vmul.f32 1.442695, %v561_v51  ;;  %v618_v17 = vsel %vm497_vm2, %v3018_v52, 0.0 }
 0x1f1   :  { %v615_v18 = vsel %vm497_vm2, %v3020_v13, 0.0  ;;  %v730_v19 = vpop.permute.xlu0 %729 }
 0x1f2   :  { %2637 = vpow2.f32 %v592_v16  ;;  %619 = vadd.xlane.f32.xlu1 %v618_v17  ;;  %616 = vadd.xlane.f32.xlu0 %v615_v18 }
 0x1f3   :  { %v3026_v20 = vpop.eup %2625  ;;  %2414 = vmatpush3.bf16.msra.mxu1 %v730_v19 }
 0x1f4   :  { %v3028_v58 = vpop.eup %2627  ;;  %v624_v30 = vsel %vm497_vm2, %v3026_v20, 0.0  ;;  %2425 = vmatprep.subr.bf16.mxu1 %v2742_v1 }
 0x1f5   :  { %v621_v21 = vsel %vm497_vm2, %v3028_v58, 0.0  ;;  %v871_v60 = vpop.permute.xlu0 %870 }
 0x1f6   :  { %625 = vadd.xlane.f32.xlu1 %v624_v30  ;;  %622 = vadd.xlane.f32.xlu0 %v621_v21 }
 0x1f7   :  { %v3035_v22 = vpop.eup %2629 }
 0x1f8   :  { %v3037_v23 = vpop.eup %2631  ;;  %v630_v39 = vsel %vm497_vm2, %v3035_v22, 0.0 }
 0x1f9   :  { %v627_v40 = vsel %vm497_vm2, %v3037_v23, 0.0 }
 0x1fa   :  { %631 = vadd.xlane.f32.xlu1 %v630_v39  ;;  %628 = vadd.xlane.f32.xlu0 %v627_v40 }
 0x1fb   :  { %v3043_v26 = vpop.eup %2633 }
 0x1fc   :  { %v3045_v28 = vpop.eup %2635  ;;  %v636_v29 = vsel %vm497_vm2, %v3043_v26, 0.0 }
 0x1fd   :  { %v633_v49 = vsel %vm497_vm2, %v3045_v28, 0.0 }
 0x1fe   :  { %637 = vadd.xlane.f32.xlu1 %v636_v29  ;;  %634 = vadd.xlane.f32.xlu0 %v633_v49 }
 0x1ff   :  { %v3051_v50 = vpop.eup %2637 }
 0x200   :  { %v639_v32 = vsel %vm497_vm2, %v3051_v50, 0.0 }
 0x202   :  { %640 = vadd.xlane.f32.xlu0 %v639_v32 }
 0x20f   :  { %1111 = vrot.lane.b32.xlu1 %v2775_v2, %s2746_s3 }
 0x213   :  { %1109 = vrot.lane.b32.xlu1 %v2775_v2, %s2747_s4  ;;  %v777_v2 = vpop.permute.xlu1 %776 }
 0x217   :  { %1213 = vrot.lane.b32.xlu1 %v2791_v4, %s2746_s3 }
 0x218   :  { %1060 = vrot.lane.b32.xlu0 %v2768_v0, %s2746_s3 }
 0x21b   :  { %1211 = vrot.lane.b32.xlu1 %v2791_v4, %s2747_s4  ;;  %v824_v4 = vpop.permute.xlu1 %823 }
 0x21c   :  { %1058 = vrot.lane.b32.xlu0 %v2768_v0, %s2747_s4 }
 0x21f   :  { %1315 = vrot.lane.b32.xlu1 %v2803_v6, %s2746_s3  ;;  %v3071_v34 = vpop.permute.xlu1 %917 }
 0x220   :  { %1162 = vrot.lane.b32.xlu0 %v2785_v3, %s2746_s3 }
 0x223   :  { %1313 = vrot.lane.b32.xlu1 %v2803_v6, %s2747_s4  ;;  %v3073_v6 = vpop.permute.xlu1 %1011 }
 0x224   :  { %1160 = vrot.lane.b32.xlu0 %v2785_v3, %s2747_s4  ;;  %v3075_v3 = vpop.permute.xlu0 %964 }
 0x227   :  { %1417 = vrot.lane.b32.xlu1 %v2815_v8, %s2746_s3 }
 0x228   :  { %1264 = vrot.lane.b32.xlu0 %v2797_v5, %s2746_s3 }
 0x22b   :  { %1415 = vrot.lane.b32.xlu1 %v2815_v8, %s2747_s4 }
 0x22c   :  { %1262 = vrot.lane.b32.xlu0 %v2797_v5, %s2747_s4 }
 0x22f   :  { %1682 = vrot.lane.b32.xlu1 %v2768_v0, %s2748_s5 }
 0x230   :  { %1366 = vrot.lane.b32.xlu0 %v2809_v7, %s2746_s3 }
 0x234   :  { %1364 = vrot.lane.b32.xlu0 %v2809_v7, %s2747_s4 }
 0x26a   :  { %v596_v35 = vpop.xlane.xlu1 %595 }
 0x26b   :  { %2639 = vrcp.f32 %v596_v35 }
 0x26e   :  { %v599_v59 = vpop.xlane.xlu0 %598 }
 0x26f   :  { %v602_v36 = vpop.xlane.xlu1 %601  ;;  %2641 = vrcp.f32 %v599_v59 }
 0x270   :  { %2643 = vrcp.f32 %v602_v36 }
 0x273   :  { %v608_v5 = vpop.xlane.xlu1 %607  ;;  %v605_v8 = vpop.xlane.xlu0 %604 }
 0x274   :  { %2645 = vrcp.f32 %v605_v8 }
 0x275   :  { %2647 = vrcp.f32 %v608_v5 }
 0x277   :  { %v614_v7 = vpop.xlane.xlu1 %613  ;;  %v611_v41 = vpop.xlane.xlu0 %610 }
 0x278   :  { %2649 = vrcp.f32 %v611_v41  ;;  %v2640_v15 = vpop.eup %2639 }
 0x279   :  { %2651 = vrcp.f32 %v614_v7  ;;  %v658_v46 = vmul.f32 %v2640_v15, %v2983_v31 }
 0x27b   :  { %v620_v43 = vpop.xlane.xlu1 %619  ;;  %v617_v44 = vpop.xlane.xlu0 %616 }
 0x27c   :  { %v2642_v45 = vpop.eup %2641  ;;  %2653 = vrcp.f32 %v617_v44 }
 0x27d   :  { %v659_v47 = vmul.f32 %v2642_v45, %v2989_v42  ;;  %2655 = vrcp.f32 %v620_v43  ;;  %v2644_v55 = vpop.eup %2643 }
 0x27e   :  { %v660_v31 = vmul.f32 %v2644_v55, %v2991_v14 }
 0x27f   :  { %v626_v24 = vpop.xlane.xlu1 %625  ;;  %v623_v25 = vpop.xlane.xlu0 %622  ;;  %v674_v54 = vpack.c.bf16 %v659_v47, %v658_v46 }
 0x280   :  { %2657 = vrcp.f32 %v623_v25 }
 0x281   :  { %2410 = vmatmul.mubr.msk.bf16.vlgmr.msra.gmra.mxu0 %vm497_vm2, %v674_v54  ;;  %v2646_v56 = vpop.eup %2645  ;;  %2659 = vrcp.f32 %v626_v24 }
 0x282   :  { %2420 = vmatpush3.bf16.msra.mxu0 %v777_v2  ;;  %2421 = vmatprep.mubr.msk.bf16.mxu0 %vm2743_vm0, %v2742_v1  ;;  %v661_v42 = vmul.f32 %v2646_v56, %v3001_v53  ;;  %v2648_v33 = vpop.eup %2647 }
 0x283   :  { %v632_v57 = vpop.xlane.xlu1 %631  ;;  %v629_v27 = vpop.xlane.xlu0 %628  ;;  %2431 = vmatprep.subr.bf16.mxu0 %v2742_v1  ;;  %v662_v10 = vmul.f32 %v2648_v33, %v2999_v48 }
 0x284   :  { %2661 = vrcp.f32 %v629_v27  ;;  %v675_v38 = vpack.c.bf16 %v661_v42, %v660_v31 }
 0x285   :  { %v2650_v37 = vpop.eup %2649  ;;  %2663 = vrcp.f32 %v632_v57 }
 0x286   :  { %2416 = vmatmul.mubr.msk.bf16.vlgmr.msra.gmra.mxu1 %vm497_vm2, %v675_v38  ;;  %v663_v11 = vmul.f32 %v2650_v37, %v3011_v62  ;;  %v2652_v12 = vpop.eup %2651 }
 0x287   :  { %v638_v63 = vpop.xlane.xlu1 %637  ;;  %v635_v9 = vpop.xlane.xlu0 %634  ;;  %2426 = vmatpush3.bf16.msra.mxu1 %v824_v4  ;;  %2427 = vmatprep.mubr.msk.bf16.mxu1 %vm2743_vm0, %v2742_v1  ;;  %v664_v16 = vmul.f32 %v2652_v12, %v3009_v61 }
 0x288   :  { %2665 = vrcp.f32 %v635_v9  ;;  %v676_v14 = vpack.c.bf16 %v663_v11, %v662_v10  ;;  %2437 = vmatprep.subr.bf16.mxu1 %v2742_v1 }
 0x289   :  { %v2654_v53 = vpop.eup %2653  ;;  %2667 = vrcp.f32 %v638_v63 }
 0x28a   :  { %2422 = vmatmul.mubr.msk.bf16.vlgmr.msra.gmra.mxu0 %vm497_vm2, %v676_v14  ;;  %v665_v48 = vmul.f32 %v2654_v53, %v3020_v13  ;;  %v2656_v17 = vpop.eup %2655 }
 0x28b   :  { %v641_v51 = vpop.xlane.xlu0 %640  ;;  %2432 = vmatpush3.bf16.msra.mxu0 %v871_v60  ;;  %2433 = vmatprep.mubr.msk.bf16.mxu0 %vm2743_vm0, %v2742_v1  ;;  %v1112_v19 = vpop.permute.xlu1 %1111  ;;  %v666_v30 = vmul.f32 %v2656_v17, %v3018_v52 }
 0x28c   :  { %2669 = vrcp.f32 %v641_v51  ;;  %v677_v62 = vpack.c.bf16 %v665_v48, %v664_v16  ;;  %2443 = vmatprep.subr.bf16.mxu0 %v2742_v1 }
 0x28d   :  { %v2658_v18 = vpop.eup %2657 }
 0x28e   :  { %2428 = vmatmul.mubr.msk.bf16.vlgmr.msra.gmra.mxu1 %vm497_vm2, %v677_v62  ;;  %v667_v21 = vmul.f32 %v2658_v18, %v3028_v58  ;;  %v2660_v39 = vpop.eup %2659 }
 0x28f   :  { %v1061_v61 = vpop.permute.xlu0 %1060  ;;  %2438 = vmatpush3.bf16.msra.mxu1 %v3071_v34  ;;  %2439 = vmatprep.mubr.msk.bf16.mxu1 %vm2743_vm0, %v2742_v1  ;;  %v668_v29 = vmul.f32 %v2660_v39, %v3026_v20  ;;  %v1110_v58 = vpop.permute.xlu1 %1109 }
 0x290   :  { %v678_v13 = vpack.c.bf16 %v667_v21, %v666_v30  ;;  %2449 = vmatprep.subr.bf16.mxu1 %v2742_v1  ;;  %v1066_v35 = vsel %vm39_vm1, %v1061_v61, 0 }
 0x291   :  { %v2662_v40 = vpop.eup %2661 }
 0x292   :  { %2434 = vmatmul.mubr.msk.bf16.vlgmr.msra.gmra.mxu0 %vm497_vm2, %v678_v13  ;;  %v669_v49 = vmul.f32 %v2662_v40, %v3037_v23  ;;  %v2664_v32 = vpop.eup %2663 }
 0x293   :  { %v1059_v52 = vpop.permute.xlu0 %1058  ;;  %2444 = vmatpush3.bf16.msra.mxu0 %v3075_v3  ;;  %2445 = vmatprep.mubr.msk.bf16.mxu0 %vm2743_vm0, %v2742_v1  ;;  %v670_v60 = vmul.f32 %v2664_v32, %v3035_v22  ;;  %v1214_v8 = vpop.permute.xlu1 %1213 }
 0x294   :  { %v679_v2 = vpack.c.bf16 %v669_v49, %v668_v29  ;;  %2455 = vmatprep.subr.bf16.mxu0 %v2742_v1  ;;  %v1219_v41 = vsel %vm39_vm1, %v1214_v8, 0 }
 0x295   :  { %v2666_v4 = vpop.eup %2665 }
 0x296   :  { %v2668_v34 = vpop.eup %2667  ;;  %2440 = vmatmul.mubr.msk.bf16.vlgmr.msra.gmra.mxu1 %vm497_vm2, %v679_v2  ;;  %v671_v20 = vmul.f32 %v2666_v4, %v3045_v28  ;;  %v3204_v2 = vld [vmem:[%s3548_s1 + $0x10] sm:$0xff] }
 0x297   :  { %v1163_v23 = vpop.permute.xlu0 %1162  ;;  %2450 = vmatpush3.bf16.msra.mxu1 %v3073_v6  ;;  %2451 = vmatprep.mubr.msk.bf16.mxu1 %vm2743_vm0, %v2742_v1  ;;  %v672_v36 = vmul.f32 %v2668_v34, %v3043_v26  ;;  %v1117_v6 = vsel %vm39_vm1, %v1112_v19, 0  ;;  %v1212_v26 = vpop.permute.xlu1 %1211 }
 0x298   :  { %v680_v59 = vpack.c.bf16 %v671_v20, %v670_v60  ;;  %2461 = vmatprep.subr.bf16.mxu1 %v2742_v1 }
 0x299   :  { %v2670_v3 = vpop.eup %2669 }
 0x29a   :  { %v673_v5 = vmul.f32 %v2670_v3, %v3051_v50  ;;  %2446 = vmatmul.mubr.msk.bf16.vlgmr.msra.gmra.mxu0 %vm497_vm2, %v680_v59  ;;  %v1168_v50 = vsel %vm39_vm1, %v1163_v23, 0 }
 0x29b   :  { %2456 = vmatpush3.bf16.xpose.msra.mxu0 %v1066_v35  ;;  %2457 = vmatprep.mubr.msk.bf16.mxu0 %vm2743_vm0, %v2742_v1  ;;  %v1161_v28 = vpop.permute.xlu0 %1160  ;;  %v1316_v15 = vpop.permute.xlu1 %1315  ;;  %v3212_v35 = vld [vmem:[%s3548_s1 + $0x18] sm:$0xff] }
 0x29c   :  { %v681_v22 = vpack.c.bf16 %v673_v5, %v672_v36  ;;  %2467 = vmatprep.subr.bf16.mxu0 %v2742_v1  ;;  %v1321_v46 = vsel %vm39_vm1, %v1316_v15, 0 }
 0x29e   :  { %2452 = vmatmul.mubr.msk.bf16.vlgmr.msra.gmra.mxu1 %vm497_vm2, %v681_v22 }
 0x29f   :  { %2462 = vmatpush3.bf16.xpose.msra.mxu1 %v1117_v6  ;;  %2463 = vmatprep.mubr.msk.bf16.mxu1 %vm2743_vm0, %v2742_v1  ;;  %v1265_v7 = vpop.permute.xlu0 %1264  ;;  %v1314_v45 = vpop.permute.xlu1 %1313 }
 0x2a0   :  { %2473 = vmatprep.subr.bf16.mxu1 %v2742_v1  ;;  %v1270_v44 = vsel %vm39_vm1, %v1265_v7, 0 }
 0x2a2   :  { %2458 = vmatmul.mubr.msk.bf16.vlgmr.msra.gmra.mxu0 %vm39_vm1, %v1059_v52 }
 0x2a3   :  { %2468 = vmatpush3.bf16.xpose.msra.mxu0 %v1168_v50  ;;  %2469 = vmatprep.mubr.msk.bf16.mxu0 %vm2743_vm0, %v2742_v1  ;;  %v1263_v43 = vpop.permute.xlu0 %1262  ;;  %v1418_v25 = vpop.permute.xlu1 %1417 }
 0x2a4   :  { %2479 = vmatprep.subr.bf16.mxu0 %v2742_v1  ;;  %v1423_v54 = vsel %vm39_vm1, %v1418_v25, 0 }
 0x2a6   :  { %2464 = vmatmul.mubr.msk.bf16.vlgmr.msra.gmra.mxu1 %vm39_vm1, %v1110_v58 }
 0x2a7   :  { %2474 = vmatpush3.bf16.xpose.msra.mxu1 %v1219_v41  ;;  %2475 = vmatprep.mubr.msk.bf16.mxu1 %vm2743_vm0, %v2742_v1  ;;  %v1367_v47 = vpop.permute.xlu0 %1366  ;;  %v1416_v56 = vpop.permute.xlu1 %1415 }
 0x2a8   :  { %2485 = vmatprep.subr.bf16.mxu1 %v2742_v1  ;;  %v1372_v24 = vsel %vm39_vm1, %v1367_v47, 0 }
 0x2aa   :  { %2470 = vmatmul.mubr.msk.bf16.vlgmr.msra.gmra.mxu0 %vm39_vm1, %v1161_v28 }
 0x2ab   :  { %2480 = vmatpush3.bf16.xpose.msra.mxu0 %v1270_v44  ;;  %2481 = vmatprep.mubr.msk.bf16.mxu0 %vm2743_vm0, %v2742_v1  ;;  %v1365_v55 = vpop.permute.xlu0 %1364  ;;  %v1683_v57 = vpop.permute.xlu1 %1682 }
 0x2ac   :  { %2491 = vmatprep.subr.bf16.mxu0 %v2742_v1 }
 0x2ae   :  { %2476 = vmatmul.mubr.msk.bf16.vlgmr.msra.gmra.mxu1 %vm39_vm1, %v1212_v26 }
 0x2af   :  { %2486 = vmatpush3.bf16.xpose.msra.mxu1 %v1321_v46  ;;  %2487 = vmatprep.mubr.msk.bf16.mxu1 %vm2743_vm0, %v2742_v1 }
 0x2b0   :  { %2497 = vmatprep.subr.bf16.mxu1 %v2742_v1 }
 0x2b2   :  { %2482 = vmatmul.mubr.msk.bf16.vlgmr.msra.gmra.mxu0 %vm39_vm1, %v1263_v43 }
 0x2b3   :  { %2492 = vmatpush3.bf16.xpose.msra.mxu0 %v1372_v24  ;;  %2493 = vmatprep.mubr.msk.bf16.mxu0 %vm2743_vm0, %v2742_v1 }
 0x2b4   :  { %2503 = vmatprep.subr.bf16.mxu0 %v2742_v1 }
 0x2b6   :  { %2488 = vmatmul.mubr.msk.bf16.vlgmr.msra.gmra.mxu1 %vm39_vm1, %v1314_v45 }
 0x2b7   :  { %2498 = vmatpush3.bf16.xpose.msra.mxu1 %v1423_v54  ;;  %2499 = vmatprep.mubr.msk.bf16.mxu1 %vm2743_vm0, %v2742_v1 }
 0x2b8   :  { %2509 = vmatprep.subr.bf16.mxu1 %v2742_v1 }
 0x2ba   :  { %2494 = vmatmul.mubr.msk.bf16.vlgmr.msra.gmra.mxu0 %vm39_vm1, %v1365_v55 }
 0x2bb   :  { %2505 = vmatprep.mubr.msk.bf16.mxu0 %vm2743_vm0, %v2742_v1  ;;  %2504 = vmatpush3.bf16.msra.mxu0 %v1683_v57 }
 0x2bc   :  { %2515 = vmatprep.subr.bf16.mxu0 %v2742_v1 }
 0x2be   :  { %2500 = vmatmul.mubr.msk.bf16.vlgmr.msra.gmra.mxu1 %vm39_vm1, %v1416_v56 }
 0x2bf   :  { %2511 = vmatprep.mubr.msk.bf16.mxu1 %vm2743_vm0, %v2742_v1 }
 0x341   :  { %v3169_v27 = vpop.f32.mrf.mxu0 }
 0x343   :  { %v2411_v31 = vpop.f32.mrf.mxu0 }
 0x345   :  { %v3171_v42 = vpop.f32.mrf.mxu0 }
 0x346   :  { %v3173_v33 = vpop.f32.mrf.mxu1 }
 0x347   :  { %v2412_v38 = vpop.f32.mrf.mxu0 }
 0x348   :  { %v2417_v37 = vpop.f32.mrf.mxu1 }
 0x34a   :  { %v3175_v63 = vpop.f32.mrf.mxu1  ;;  %v3177_v9 = vpop.f32.mrf.mxu0 }
 0x34c   :  { %v2418_v10 = vpop.f32.mrf.mxu1  ;;  %v2423_v11 = vpop.f32.mrf.mxu0 }
 0x34e   :  { %v3179_v0 = vpop.f32.mrf.mxu0  ;;  %v3181_v12 = vpop.f32.mrf.mxu1 }
 0x350   :  { %v2424_v14 = vpop.f32.mrf.mxu0  ;;  %v2429_v53 = vpop.f32.mrf.mxu1 }
 0x352   :  { %v3183_v51 = vpop.f32.mrf.mxu1  ;;  %v3185_v16 = vpop.f32.mrf.mxu0 }
 0x354   :  { %v2430_v48 = vpop.f32.mrf.mxu1  ;;  %v2435_v17 = vpop.f32.mrf.mxu0 }
 0x356   :  { %v3187_v62 = vpop.f32.mrf.mxu0  ;;  %v3189_v18 = vpop.f32.mrf.mxu1 }
 0x358   :  { %v2436_v19 = vpop.f32.mrf.mxu0  ;;  %v2441_v30 = vpop.f32.mrf.mxu1 }
 0x35a   :  { %v3191_v21 = vpop.f32.mrf.mxu1  ;;  %v3193_v61 = vpop.f32.mrf.mxu0 }
 0x35c   :  { %v2442_v39 = vpop.f32.mrf.mxu1  ;;  %v2447_v13 = vpop.f32.mrf.mxu0 }
 0x35e   :  { %v3195_v40 = vpop.f32.mrf.mxu0  ;;  %v3197_v29 = vpop.f32.mrf.mxu1 }
 0x360   :  { %v2448_v49 = vpop.f32.mrf.mxu0  ;;  %v2453_v52 = vpop.f32.mrf.mxu1 }
 0x362   :  { %v3199_v32 = vpop.f32.mrf.mxu1  ;;  %v1102_v58 = vpop.f32.mrf.mxu0 }
 0x363   :  { %v1466_v4 = vmul.f32 0.35355338, %v1102_v58 }
 0x364   :  { %v2454_v34 = vpop.f32.mrf.mxu1  ;;  %v2459_v60 = vpop.f32.mrf.mxu0 }
 0x365   :  { %v3207_v20 = vadd.f32 %v1466_v4, %v3204_v2 }
 0x366   :  { %v1105_v23 = vpop.f32.mrf.mxu0  ;;  %v1153_v3 = vpop.f32.mrf.mxu1 }
 0x367   :  { %v1467_v59 = vmul.f32 0.35355338, %v1105_v23  ;;  %v1468_v36 = vmul.f32 0.35355338, %v1153_v3  ;;  %v1498_v5 = vsel %vm497_vm2, %v3207_v20, -inf }
 0x368   :  { %v2465_v8 = vpop.f32.mrf.mxu1  ;;  %1499 = vmax.xlane.f32.xlu0 %v1498_v5  ;;  %v2460_v22 = vpop.f32.mrf.mxu0 }
 0x369   :  { %v3217_v28 = vadd.f32 %v1468_v36, %v3204_v2  ;;  %v3220_v6 = vadd.f32 %v1467_v59, %v3212_v35 }
 0x36a   :  { %v1156_v26 = vpop.f32.mrf.mxu1  ;;  %v1204_v50 = vpop.f32.mrf.mxu0 }
 0x36b   :  { %v1469_v7 = vmul.f32 0.35355338, %v1156_v26  ;;  %v1470_v41 = vmul.f32 0.35355338, %v1204_v50  ;;  %v1504_v15 = vsel %vm497_vm2, %v3217_v28, -inf  ;;  %v1501_v43 = vsel %vm497_vm2, %v3220_v6, -inf }
 0x36c   :  { %v2466_v44 = vpop.f32.mrf.mxu1  ;;  %1505 = vmax.xlane.f32.xlu0 %v1504_v15  ;;  %1502 = vmax.xlane.f32.xlu1 %v1501_v43  ;;  %v2471_v45 = vpop.f32.mrf.mxu0 }
 0x36d   :  { %v3227_v46 = vadd.f32 %v1469_v7, %v3212_v35  ;;  %v3230_v47 = vadd.f32 %v1470_v41, %v3204_v2 }
 0x36e   :  { %v1207_v24 = vpop.f32.mrf.mxu0  ;;  %v1255_v25 = vpop.f32.mrf.mxu1 }
 0x36f   :  { %v1471_v54 = vmul.f32 0.35355338, %v1207_v24  ;;  %v1472_v55 = vmul.f32 0.35355338, %v1255_v25  ;;  %v1507_v56 = vsel %vm497_vm2, %v3227_v46, -inf  ;;  %v1510_v57 = vsel %vm497_vm2, %v3230_v47, -inf }
 0x370   :  { %v2477_v31 = vpop.f32.mrf.mxu1  ;;  %1508 = vmax.xlane.f32.xlu0 %v1507_v56  ;;  %1511 = vmax.xlane.f32.xlu1 %v1510_v57  ;;  %v2472_v38 = vpop.f32.mrf.mxu0 }
 0x371   :  { %v3237_v37 = vadd.f32 %v1472_v55, %v3204_v2  ;;  %v3240_v10 = vadd.f32 %v1471_v54, %v3212_v35 }
 0x372   :  { %v1258_v11 = vpop.f32.mrf.mxu1  ;;  %v1306_v14 = vpop.f32.mrf.mxu0 }
 0x373   :  { %v1473_v53 = vmul.f32 0.35355338, %v1258_v11  ;;  %v1474_v48 = vmul.f32 0.35355338, %v1306_v14  ;;  %v1516_v17 = vsel %vm497_vm2, %v3237_v37, -inf  ;;  %v1513_v19 = vsel %vm497_vm2, %v3240_v10, -inf }
 0x374   :  { %v2478_v30 = vpop.f32.mrf.mxu1  ;;  %1517 = vmax.xlane.f32.xlu1 %v1516_v17  ;;  %1514 = vmax.xlane.f32.xlu0 %v1513_v19  ;;  %v2483_v39 = vpop.f32.mrf.mxu0 }
 0x375   :  { %v3247_v13 = vadd.f32 %v1473_v53, %v3212_v35  ;;  %v3250_v49 = vadd.f32 %v1474_v48, %v3204_v2 }
 0x376   :  { %v1309_v52 = vpop.f32.mrf.mxu0  ;;  %v1357_v58 = vpop.f32.mrf.mxu1 }
 0x377   :  { %v1475_v4 = vmul.f32 0.35355338, %v1309_v52  ;;  %v1476_v34 = vmul.f32 0.35355338, %v1357_v58  ;;  %v1519_v60 = vsel %vm497_vm2, %v3247_v13, -inf  ;;  %v1522_v23 = vsel %vm497_vm2, %v3250_v49, -inf }
 0x378   :  { %v2489_v3 = vpop.f32.mrf.mxu1  ;;  %1520 = vmax.xlane.f32.xlu0 %v1519_v60  ;;  %1523 = vmax.xlane.f32.xlu1 %v1522_v23  ;;  %v2484_v59 = vpop.f32.mrf.mxu0  ;;  %v2735_v52 = vld [vmem:[%s3547_s0 + $0x10] sm:$0xff]   ;;  %v2736_v58 = vld [vmem:[%s3547_s0 + $0x18] sm:$0xff]  }
 0x379   :  { %v3257_v36 = vadd.f32 %v1476_v34, %v3204_v2  ;;  %v3260_v5 = vadd.f32 %v1475_v4, %v3212_v35  ;;  %v2738_v4 = vld [vmem:[%s3547_s0 + $0x8] sm:$0xff]   ;;  %v2739_v34 = vld [vmem:[%s3547_s0 + $0x20] sm:$0xff]  }
 0x37a   :  { %v1360_v8 = vpop.f32.mrf.mxu1  ;;  %v1408_v22 = vpop.f32.mrf.mxu0 }
 0x37b   :  { %v1477_v26 = vmul.f32 0.35355338, %v1360_v8  ;;  %v1478_v50 = vmul.f32 0.35355338, %v1408_v22  ;;  %v1528_v7 = vsel %vm497_vm2, %v3257_v36, -inf  ;;  %v1525_v41 = vsel %vm497_vm2, %v3260_v5, -inf }
 0x37c   :  { %v2490_v15 = vpop.f32.mrf.mxu1  ;;  %1529 = vmax.xlane.f32.xlu1 %v1528_v7  ;;  %1526 = vmax.xlane.f32.xlu0 %v1525_v41  ;;  %v2495_v43 = vpop.f32.mrf.mxu0 }
 0x37d   :  { %v3267_v44 = vadd.f32 %v1477_v26, %v3212_v35  ;;  %v3270_v45 = vadd.f32 %v1478_v50, %v3204_v2 }
 0x37e   :  { %v1411_v24 = vpop.f32.mrf.mxu0  ;;  %v1459_v25 = vpop.f32.mrf.mxu1 }
 0x37f   :  { %v1479_v54 = vmul.f32 0.35355338, %v1411_v24  ;;  %v1480_v55 = vmul.f32 0.35355338, %v1459_v25  ;;  %v1531_v56 = vsel %vm497_vm2, %v3267_v44, -inf  ;;  %v1534_v57 = vsel %vm497_vm2, %v3270_v45, -inf }
 0x380   :  { %v2501_v31 = vpop.f32.mrf.mxu1  ;;  %1532 = vmax.xlane.f32.xlu0 %v1531_v56  ;;  %1535 = vmax.xlane.f32.xlu1 %v1534_v57  ;;  %v2496_v38 = vpop.f32.mrf.mxu0 }
 0x381   :  { %v3277_v11 = vadd.f32 %v1480_v55, %v3204_v2  ;;  %v3280_v14 = vadd.f32 %v1479_v54, %v3212_v35 }
 0x382   :  { %v1462_v53 = vpop.f32.mrf.mxu1 }
 0x383   :  { %v1481_v48 = vmul.f32 0.35355338, %v1462_v53  ;;  %v1540_v17 = vsel %vm497_vm2, %v3277_v11, -inf  ;;  %v1537_v19 = vsel %vm497_vm2, %v3280_v14, -inf }
 0x384   :  { %v2502_v30 = vpop.f32.mrf.mxu1  ;;  %1541 = vmax.xlane.f32.xlu1 %v1540_v17  ;;  %1538 = vmax.xlane.f32.xlu0 %v1537_v19 }
 0x385   :  { %v3287_v39 = vadd.f32 %v1481_v48, %v3212_v35  ;;  %v2737_v35 = vld [vmem:[%s3547_s0 + $0x28] sm:$0xff]  }
 0x387   :  { %v1543_v2 = vsel %vm497_vm2, %v3287_v39, -inf }
 0x388   :  { %1544 = vmax.xlane.f32.xlu0 %v1543_v2 }
 0x395   :  { %1776 = vrot.lane.b32.xlu1 %v2735_v52, %s2748_s5 }
 0x399   :  { %1823 = vrot.lane.b32.xlu1 %v2736_v58, %s2748_s5 }
 0x39d   :  { %1917 = vrot.lane.b32.xlu1 %v2737_v35, %s2748_s5 }
 0x39e   :  { %1729 = vrot.lane.b32.xlu0 %v2738_v4, %s2748_s5 }
 0x3a2   :  { %1870 = vrot.lane.b32.xlu0 %v2739_v34, %s2748_s5 }
 0x3f1   :  { %v1500_v60 = vpop.xlane.xlu0 %1499 }
 0x3f2   :  { %v1546_v23 = vsub.f32 %v3207_v20, %v1500_v60 }
 0x3f4   :  { %v1562_v3 = vmul.f32 1.442695, %v1546_v23 }
 0x3f5   :  { %v1503_v59 = vpop.xlane.xlu1 %1502  ;;  %v1506_v8 = vpop.xlane.xlu0 %1505 }
 0x3f6   :  { %2671 = vpow2.f32 %v1562_v3  ;;  %v1547_v22 = vsub.f32 %v3220_v6, %v1503_v59  ;;  %v1548_v26 = vsub.f32 %v3217_v28, %v1506_v8 }
 0x3f8   :  { %v1564_v50 = vmul.f32 1.442695, %v1547_v22  ;;  %v1566_v7 = vmul.f32 1.442695, %v1548_v26 }
 0x3f9   :  { %v1512_v41 = vpop.xlane.xlu1 %1511  ;;  %v1509_v15 = vpop.xlane.xlu0 %1508 }
 0x3fa   :  { %2673 = vpow2.f32 %v1564_v50  ;;  %v1550_v43 = vsub.f32 %v3230_v47, %v1512_v41  ;;  %v1549_v24 = vsub.f32 %v3227_v46, %v1509_v15 }
 0x3fb   :  { %2675 = vpow2.f32 %v1566_v7 }
 0x3fc   :  { %v1570_v25 = vmul.f32 1.442695, %v1550_v43  ;;  %v1568_v20 = vmul.f32 1.442695, %v1549_v24 }
 0x3fd   :  { %v1518_v54 = vpop.xlane.xlu1 %1517  ;;  %v1515_v55 = vpop.xlane.xlu0 %1514 }
 0x3fe   :  { %2677 = vpow2.f32 %v1570_v25  ;;  %v1552_v56 = vsub.f32 %v3237_v37, %v1518_v54  ;;  %v1551_v6 = vsub.f32 %v3240_v10, %v1515_v55 }
 0x3ff   :  { %2679 = vpow2.f32 %v1568_v20 }
 0x400   :  { %v1574_v28 = vmul.f32 1.442695, %v1552_v56  ;;  %v1572_v57 = vmul.f32 1.442695, %v1551_v6 }
 0x401   :  { %v1524_v31 = vpop.xlane.xlu1 %1523  ;;  %v1521_v38 = vpop.xlane.xlu0 %1520 }
 0x402   :  { %2681 = vpow2.f32 %v1574_v28  ;;  %v1554_v47 = vsub.f32 %v3250_v49, %v1524_v31  ;;  %v1553_v46 = vsub.f32 %v3247_v13, %v1521_v38 }
 0x403   :  { %v3320_v53 = vpop.eup %2671  ;;  %2683 = vpow2.f32 %v1572_v57 }
 0x404   :  { %v1578_v48 = vmul.f32 1.442695, %v1554_v47  ;;  %v1576_v17 = vmul.f32 1.442695, %v1553_v46  ;;  %v1594_v37 = vsel %vm497_vm2, %v3320_v53, 0.0 }
 0x405   :  { %v1530_v19 = vpop.xlane.xlu1 %1529  ;;  %1595 = vadd.xlane.f32.xlu1 %v1594_v37  ;;  %v1527_v10 = vpop.xlane.xlu0 %1526 }
 0x406   :  { %2685 = vpow2.f32 %v1578_v48  ;;  %v1556_v30 = vsub.f32 %v3257_v36, %v1530_v19  ;;  %v1555_v2 = vsub.f32 %v3260_v5, %v1527_v10 }
 0x407   :  { %v3326_v52 = vpop.eup %2673  ;;  %2687 = vpow2.f32 %v1576_v17 }
 0x408   :  { %v3328_v13 = vpop.eup %2675  ;;  %v1582_v49 = vmul.f32 1.442695, %v1556_v30  ;;  %v1580_v58 = vmul.f32 1.442695, %v1555_v2  ;;  %v1597_v35 = vsel %vm497_vm2, %v3326_v52, 0.0 }
 0x409   :  { %v1536_v4 = vpop.xlane.xlu1 %1535  ;;  %1598 = vadd.xlane.f32.xlu0 %v1597_v35  ;;  %v1600_v34 = vsel %vm497_vm2, %v3328_v13, 0.0  ;;  %v1533_v60 = vpop.xlane.xlu0 %1532  ;;  %v2740_v35 = vld [vmem:[%s3547_s0 + $0x38] sm:$0xff]  }
 0x40a   :  { %2689 = vpow2.f32 %v1582_v49  ;;  %v1558_v36 = vsub.f32 %v3270_v45, %v1536_v4  ;;  %1601 = vadd.xlane.f32.xlu1 %v1600_v34  ;;  %v1557_v5 = vsub.f32 %v3267_v44, %v1533_v60  ;;  %v2741_v4 = vld [vmem:[%s3547_s0 + $0x30] sm:$0xff]   ;;  %s2749_s0 = smov 8  }
 0x40b   :  { %v3336_v23 = vpop.eup %2677  ;;  %2691 = vpow2.f32 %v1580_v58 }
 0x40c   :  { %v3338_v3 = vpop.eup %2679  ;;  %v1586_v59 = vmul.f32 1.442695, %v1558_v36  ;;  %v1584_v8 = vmul.f32 1.442695, %v1557_v5  ;;  %v1606_v22 = vsel %vm497_vm2, %v3336_v23, 0.0 }
 0x40d   :  { %v1542_v26 = vpop.xlane.xlu1 %1541  ;;  %v1603_v50 = vsel %vm497_vm2, %v3338_v3, 0.0  ;;  %v1539_v7 = vpop.xlane.xlu0 %1538 }
 0x40e   :  { %2693 = vpow2.f32 %v1586_v59  ;;  %v1560_v45 = vsub.f32 %v3277_v11, %v1542_v26  ;;  %1607 = vadd.xlane.f32.xlu1 %v1606_v22  ;;  %1604 = vadd.xlane.f32.xlu0 %v1603_v50  ;;  %v1559_v44 = vsub.f32 %v3280_v14, %v1539_v7 }
 0x40f   :  { %v3346_v41 = vpop.eup %2681  ;;  %2695 = vpow2.f32 %v1584_v8 }
 0x410   :  { %v3348_v15 = vpop.eup %2683  ;;  %v1590_v43 = vmul.f32 1.442695, %v1560_v45  ;;  %v1588_v24 = vmul.f32 1.442695, %v1559_v44  ;;  %v1612_v25 = vsel %vm497_vm2, %v3346_v41, 0.0 }
 0x411   :  { %v1609_v20 = vsel %vm497_vm2, %v3348_v15, 0.0  ;;  %v1545_v54 = vpop.xlane.xlu0 %1544  ;;  %v1777_v34 = vpop.permute.xlu1 %1776 }
 0x412   :  { %2697 = vpow2.f32 %v1590_v43  ;;  %1613 = vadd.xlane.f32.xlu1 %v1612_v25  ;;  %1610 = vadd.xlane.f32.xlu0 %v1609_v20  ;;  %v1561_v11 = vsub.f32 %v3287_v39, %v1545_v54 }
 0x413   :  { %v3355_v14 = vpop.eup %2685  ;;  %2699 = vpow2.f32 %v1588_v24 }
 0x414   :  { %v3357_v55 = vpop.eup %2687  ;;  %v1592_v56 = vmul.f32 1.442695, %v1561_v11  ;;  %v1618_v6 = vsel %vm497_vm2, %v3355_v14, 0.0 }
 0x415   :  { %v1615_v28 = vsel %vm497_vm2, %v3357_v55, 0.0  ;;  %v1730_v57 = vpop.permute.xlu0 %1729  ;;  %v1824_v60 = vpop.permute.xlu1 %1823 }
 0x416   :  { %2701 = vpow2.f32 %v1592_v56  ;;  %1619 = vadd.xlane.f32.xlu1 %v1618_v6  ;;  %1616 = vadd.xlane.f32.xlu0 %v1615_v28 }
 0x417   :  { %v3363_v31 = vpop.eup %2689  ;;  %2510 = vmatpush3.bf16.msra.mxu1 %v1730_v57 }
 0x418   :  { %v3365_v39 = vpop.eup %2691  ;;  %v1624_v38 = vsel %vm497_vm2, %v3363_v31, 0.0  ;;  %2521 = vmatprep.subr.bf16.mxu1 %v2742_v1 }
 0x419   :  { %v1621_v47 = vsel %vm497_vm2, %v3365_v39, 0.0  ;;  %v3400_v36 = vpop.permute.xlu1 %1917  ;;  %v1871_v5 = vpop.permute.xlu0 %1870 }
 0x41a   :  { %1625 = vadd.xlane.f32.xlu1 %v1624_v38  ;;  %1622 = vadd.xlane.f32.xlu0 %v1621_v47 }
 0x41b   :  { %v3372_v46 = vpop.eup %2693 }
 0x41c   :  { %v3374_v48 = vpop.eup %2695  ;;  %v1630_v17 = vsel %vm497_vm2, %v3372_v46, 0.0 }
 0x41d   :  { %v1627_v37 = vsel %vm497_vm2, %v3374_v48, 0.0 }
 0x41e   :  { %1631 = vadd.xlane.f32.xlu1 %v1630_v17  ;;  %1628 = vadd.xlane.f32.xlu0 %v1627_v37 }
 0x41f   :  { %v3380_v19 = vpop.eup %2697 }
 0x420   :  { %v3382_v10 = vpop.eup %2699  ;;  %v1636_v30 = vsel %vm497_vm2, %v3380_v19, 0.0 }
 0x421   :  { %v1633_v2 = vsel %vm497_vm2, %v3382_v10, 0.0 }
 0x422   :  { %1637 = vadd.xlane.f32.xlu1 %v1636_v30  ;;  %1634 = vadd.xlane.f32.xlu0 %v1633_v2 }
 0x423   :  { %v3388_v49 = vpop.eup %2701 }
 0x424   :  { %v1639_v58 = vsel %vm497_vm2, %v3388_v49, 0.0 }
 0x426   :  { %1640 = vadd.xlane.f32.xlu0 %v1639_v58 }
 0x433   :  { %2011 = vrot.lane.b32.xlu1 %v2740_v35, %s2748_s5 }
 0x43c   :  { %1964 = vrot.lane.b32.xlu0 %v2741_v4, %s2748_s5 }
 0x48e   :  { %v1596_v59 = vpop.xlane.xlu1 %1595 }
 0x48f   :  { %2703 = vrcp.f32 %v1596_v59 }
 0x492   :  { %v1599_v8 = vpop.xlane.xlu0 %1598 }
 0x493   :  { %v1602_v22 = vpop.xlane.xlu1 %1601  ;;  %2705 = vrcp.f32 %v1599_v8 }
 0x494   :  { %2707 = vrcp.f32 %v1602_v22 }
 0x497   :  { %v1608_v26 = vpop.xlane.xlu1 %1607  ;;  %v1605_v50 = vpop.xlane.xlu0 %1604 }
 0x498   :  { %2709 = vrcp.f32 %v1605_v50 }
 0x499   :  { %2711 = vrcp.f32 %v1608_v26 }
 0x49b   :  { %v1614_v7 = vpop.xlane.xlu1 %1613  ;;  %v1611_v45 = vpop.xlane.xlu0 %1610 }
 0x49c   :  { %2713 = vrcp.f32 %v1611_v45  ;;  %v2704_v44 = vpop.eup %2703 }
 0x49d   :  { %2715 = vrcp.f32 %v1614_v7  ;;  %v1658_v20 = vmul.f32 %v2704_v44, %v3320_v53 }
 0x49f   :  { %v1620_v43 = vpop.xlane.xlu1 %1619  ;;  %v1617_v24 = vpop.xlane.xlu0 %1616 }
 0x4a0   :  { %v2706_v25 = vpop.eup %2705  ;;  %2717 = vrcp.f32 %v1617_v24 }
 0x4a1   :  { %v1659_v54 = vmul.f32 %v2706_v25, %v3326_v52  ;;  %2719 = vrcp.f32 %v1620_v43  ;;  %v2708_v28 = vpop.eup %2707 }
 0x4a2   :  { %v1660_v53 = vmul.f32 %v2708_v28, %v3328_v13 }
 0x4a3   :  { %v1626_v11 = vpop.xlane.xlu1 %1625  ;;  %v1623_v56 = vpop.xlane.xlu0 %1622  ;;  %v1674_v6 = vpack.c.bf16 %v1659_v54, %v1658_v20 }
 0x4a4   :  { %2721 = vrcp.f32 %v1623_v56 }
 0x4a5   :  { %2506 = vmatmul.mubr.msk.bf16.vlgmr.msra.gmra.mxu0 %vm497_vm2, %v1674_v6  ;;  %v2710_v57 = vpop.eup %2709  ;;  %2723 = vrcp.f32 %v1626_v11 }
 0x4a6   :  { %2516 = vmatpush3.bf16.msra.mxu0 %v1777_v34  ;;  %2517 = vmatprep.mubr.msk.bf16.mxu0 %vm2743_vm0, %v2742_v1  ;;  %v1661_v52 = vmul.f32 %v2710_v57, %v3338_v3  ;;  %v2712_v17 = vpop.eup %2711 }
 0x4a7   :  { %v1632_v38 = vpop.xlane.xlu1 %1631  ;;  %v1629_v47 = vpop.xlane.xlu0 %1628  ;;  %2527 = vmatprep.subr.bf16.mxu0 %v2742_v1  ;;  %v1662_v35 = vmul.f32 %v2712_v17, %v3336_v23 }
 0x4a8   :  { %2725 = vrcp.f32 %v1629_v47  ;;  %v1675_v37 = vpack.c.bf16 %v1661_v52, %v1660_v53 }
 0x4a9   :  { %v2714_v30 = vpop.eup %2713  ;;  %2727 = vrcp.f32 %v1632_v38 }
 0x4aa   :  { %2512 = vmatmul.mubr.msk.bf16.vlgmr.msra.gmra.mxu1 %vm497_vm2, %v1675_v37  ;;  %v1663_v4 = vmul.f32 %v2714_v30, %v3348_v15  ;;  %v2716_v34 = vpop.eup %2715 }
 0x4ab   :  { %v1638_v2 = vpop.xlane.xlu1 %1637  ;;  %v1635_v58 = vpop.xlane.xlu0 %1634  ;;  %2522 = vmatpush3.bf16.msra.mxu1 %v1824_v60  ;;  %2523 = vmatprep.mubr.msk.bf16.mxu1 %vm2743_vm0, %v2742_v1  ;;  %v1664_v8 = vmul.f32 %v2716_v34, %v3346_v41 }
 0x4ac   :  { %2729 = vrcp.f32 %v1635_v58  ;;  %v1676_v13 = vpack.c.bf16 %v1663_v4, %v1662_v35  ;;  %2533 = vmatprep.subr.bf16.mxu1 %v2742_v1 }
 0x4ad   :  { %v2718_v3 = vpop.eup %2717  ;;  %2731 = vrcp.f32 %v1638_v2 }
 0x4ae   :  { %2518 = vmatmul.mubr.msk.bf16.vlgmr.msra.gmra.mxu0 %vm497_vm2, %v1676_v13  ;;  %v1665_v23 = vmul.f32 %v2718_v3, %v3357_v55  ;;  %v2720_v22 = vpop.eup %2719 }
 0x4af   :  { %v1641_v59 = vpop.xlane.xlu0 %1640  ;;  %2528 = vmatpush3.bf16.msra.mxu0 %v1871_v5  ;;  %2529 = vmatprep.mubr.msk.bf16.mxu0 %vm2743_vm0, %v2742_v1  ;;  %v1666_v26 = vmul.f32 %v2720_v22, %v3355_v14 }
 0x4b0   :  { %2733 = vrcp.f32 %v1641_v59  ;;  %v1677_v15 = vpack.c.bf16 %v1665_v23, %v1664_v8  ;;  %2539 = vmatprep.subr.bf16.mxu0 %v2742_v1 }
 0x4b1   :  { %v2722_v60 = vpop.eup %2721 }
 0x4b2   :  { %2524 = vmatmul.mubr.msk.bf16.vlgmr.msra.gmra.mxu1 %vm497_vm2, %v1677_v15  ;;  %v1667_v50 = vmul.f32 %v2722_v60, %v3365_v39  ;;  %v2724_v7 = vpop.eup %2723  ;;  %v2012_v39 = vpop.permute.xlu1 %2011 }
 0x4b3   :  { %2534 = vmatpush3.bf16.msra.mxu1 %v3400_v36  ;;  %2535 = vmatprep.mubr.msk.bf16.mxu1 %vm2743_vm0, %v2742_v1  ;;  %v1965_v55 = vpop.permute.xlu0 %1964  ;;  %v1668_v45 = vmul.f32 %v2724_v7, %v3363_v31 }
 0x4b4   :  { %v1678_v41 = vpack.c.bf16 %v1667_v50, %v1666_v26  ;;  %2545 = vmatprep.subr.bf16.mxu1 %v2742_v1 }
 0x4b5   :  { %v2726_v5 = vpop.eup %2725 }
 0x4b6   :  { %2530 = vmatmul.mubr.msk.bf16.vlgmr.msra.gmra.mxu0 %vm497_vm2, %v1678_v41  ;;  %v1669_v44 = vmul.f32 %v2726_v5, %v3374_v48  ;;  %v2728_v14 = vpop.eup %2727 }
 0x4b7   :  { %2540 = vmatpush3.bf16.msra.mxu0 %v1965_v55  ;;  %2541 = vmatprep.mubr.msk.bf16.mxu0 %vm2743_vm0, %v2742_v1  ;;  %v1670_v25 = vmul.f32 %v2728_v14, %v3372_v46 }
 0x4b8   :  { %v1679_v36 = vpack.c.bf16 %v1669_v44, %v1668_v45 }
 0x4b9   :  { %v2730_v43 = vpop.eup %2729 }
 0x4ba   :  { %v2732_v24 = vpop.eup %2731  ;;  %2536 = vmatmul.mubr.msk.bf16.vlgmr.msra.gmra.mxu1 %vm497_vm2, %v1679_v36  ;;  %v1671_v20 = vmul.f32 %v2730_v43, %v3382_v10 }
 0x4bb   :  { %2546 = vmatpush3.bf16.msra.mxu1 %v2012_v39  ;;  %2547 = vmatprep.mubr.msk.bf16.mxu1 %vm2743_vm0, %v2742_v1  ;;  %v1672_v54 = vmul.f32 %v2732_v24, %v3380_v19 }
 0x4bc   :  { %v1680_v48 = vpack.c.bf16 %v1671_v20, %v1670_v25 }
 0x4bd   :  { %v2734_v31 = vpop.eup %2733 }
 0x4be   :  { %v1673_v11 = vmul.f32 %v2734_v31, %v3388_v49  ;;  %2542 = vmatmul.mubr.msk.bf16.vlgmr.msra.gmra.mxu0 %vm497_vm2, %v1680_v48 }
 0x4c0   :  { %v1681_v56 = vpack.c.bf16 %v1673_v11, %v1672_v54 }
 0x4c2   :  { %2548 = vmatmul.mubr.msk.bf16.vlgmr.msra.gmra.mxu1 %vm497_vm2, %v1681_v56 }
 0x565   :  { %v1722_v6 = vpop.f32.mrf.mxu0 }
 0x567   :  { %v2507_v28 = vpop.f32.mrf.mxu0 }
 0x569   :  { %v1725_v46 = vpop.f32.mrf.mxu0 }
 0x56a   :  { %v2559_v57 = vpack.i.bf16 %v1725_v46, %v1722_v6  ;;  %v1769_v10 = vpop.f32.mrf.mxu1 }
 0x56b   :  { %v2508_v38 = vpop.f32.mrf.mxu0 }
 0x56c   :  { %2560 = vrot.lane.b32.xlu0 %v2559_v57, %s2749_s0  ;;  %v2513_v1 = vpop.f32.mrf.mxu1 }
 0x56e   :  { %v1772_v47 = vpop.f32.mrf.mxu1  ;;  %v1816_v53 = vpop.f32.mrf.mxu0 }
 0x56f   :  { %v2564_v19 = vpack.i.bf16 %v1772_v47, %v1769_v10 }
 0x570   :  { %v2514_v52 = vpop.f32.mrf.mxu1  ;;  %v2519_v49 = vpop.f32.mrf.mxu0 }
 0x571   :  { %2565 = vrot.lane.b32.xlu1 %v2564_v19, %s2749_s0 }
 0x572   :  { %v1819_v17 = vpop.f32.mrf.mxu0  ;;  %v1863_v37 = vpop.f32.mrf.mxu1 }
 0x573   :  { %v2569_v30 = vpack.i.bf16 %v1819_v17, %v1816_v53 }
 0x574   :  { %v2520_v2 = vpop.f32.mrf.mxu0  ;;  %v2525_v58 = vpop.f32.mrf.mxu1 }
 0x575   :  { %2570 = vrot.lane.b32.xlu0 %v2569_v30, %s2749_s0 }
 0x576   :  { %v1866_v35 = vpop.f32.mrf.mxu1  ;;  %v1910_v4 = vpop.f32.mrf.mxu0 }
 0x577   :  { %v2574_v34 = vpack.i.bf16 %v1866_v35, %v1863_v37 }
 0x578   :  { %v2526_v13 = vpop.f32.mrf.mxu1  ;;  %v2531_v3 = vpop.f32.mrf.mxu0 }
 0x579   :  { %2575 = vrot.lane.b32.xlu1 %v2574_v34, %s2749_s0 }
 0x57a   :  { %v1913_v59 = vpop.f32.mrf.mxu0  ;;  %v1957_v8 = vpop.f32.mrf.mxu1 }
 0x57b   :  { %v2579_v23 = vpack.i.bf16 %v1913_v59, %v1910_v4 }
 0x57c   :  { %v2532_v22 = vpop.f32.mrf.mxu0  ;;  %v2537_v15 = vpop.f32.mrf.mxu1 }
 0x57d   :  { %2580 = vrot.lane.b32.xlu0 %v2579_v23, %s2749_s0 }
 0x57e   :  { %v1960_v60 = vpop.f32.mrf.mxu1  ;;  %v2004_v26 = vpop.f32.mrf.mxu0 }
 0x57f   :  { %v2584_v50 = vpack.i.bf16 %v1960_v60, %v1957_v8 }
 0x580   :  { %v2538_v7 = vpop.f32.mrf.mxu1  ;;  %v2543_v41 = vpop.f32.mrf.mxu0 }
 0x581   :  { %2585 = vrot.lane.b32.xlu1 %v2584_v50, %s2749_s0 }
 0x582   :  { %v2007_v55 = vpop.f32.mrf.mxu0  ;;  %v2051_v5 = vpop.f32.mrf.mxu1 }
 0x583   :  { %v2589_v45 = vpack.i.bf16 %v2007_v55, %v2004_v26 }
 0x584   :  { %v2544_v44 = vpop.f32.mrf.mxu0  ;;  %v2549_v14 = vpop.f32.mrf.mxu1 }
 0x585   :  { %2590 = vrot.lane.b32.xlu0 %v2589_v45, %s2749_s0 }
 0x586   :  { %v2054_v39 = vpop.f32.mrf.mxu1 }
 0x587   :  { %v2594_v36 = vpack.i.bf16 %v2054_v39, %v2051_v5 }
 0x588   :  { %v2550_v43 = vpop.f32.mrf.mxu1 }
 0x589   :  { %2595 = vrot.lane.b32.xlu1 %v2594_v36, %s2749_s0 }
 0x5de   :  { %v2561_v24 = vpop.permute.xlu0 %2560 }
 0x5df   :  { %v2563_v25 = vunpack.i.h.bf16 %v2561_v24  ;;  %v2562_v20 = vunpack.i.l.bf16 %v2561_v24 }
 0x5e1   :  { %v2123_v31 = vsel %vm39_vm1, %v3171_v42, %v2563_v25  ;;  %v2122_v48 = vsel %vm39_vm1, %v3169_v27, %v2562_v20 }
 0x5e2   :  { %v2280_v54 = vpack.c.bf16 %v2123_v31, %v2123_v31  ;;  %v2279_v11 = vpack.c.bf16 %v2122_v48, %v2122_v48 }
 0x5e3   :  { %v2566_v56 = vpop.permute.xlu1 %2565 }
 0x5e4   :  { %2204 = vst.msk [vmem:[%s3549_s2 + $0x4] sm:$0xf] %vm2202_vm3, %v2280_v54  ;;  %2203 = vst.msk [vmem:[%s3549_s2] sm:$0xf] %vm2202_vm3, %v2279_v11  ;;  %v2568_v6 = vunpack.i.h.bf16 %v2566_v56  ;;  %v2567_v28 = vunpack.i.l.bf16 %v2566_v56 }
 0x5e6   :  { %v2125_v42 = vsel %vm39_vm1, %v3175_v63, %v2568_v6  ;;  %v2124_v27 = vsel %vm39_vm1, %v3173_v33, %v2567_v28 }
 0x5e7   :  { %v2282_v46 = vpack.c.bf16 %v2125_v42, %v2125_v42  ;;  %v2281_v57 = vpack.c.bf16 %v2124_v27, %v2124_v27  ;;  %v2571_v10 = vpop.permute.xlu0 %2570 }
 0x5e8   :  { %v2573_v38 = vunpack.i.h.bf16 %v2571_v10  ;;  %v2572_v1 = vunpack.i.l.bf16 %v2571_v10 }
 0x5e9   :  { %2206 = vst.msk [vmem:[%s3549_s2 + $0xc] sm:$0xf] %vm2202_vm3, %v2282_v46  ;;  %2205 = vst.msk [vmem:[%s3549_s2 + $0x8] sm:$0xf] %vm2202_vm3, %v2281_v57 }
 0x5ea   :  { %v2127_v63 = vsel %vm39_vm1, %v3179_v0, %v2573_v38  ;;  %v2126_v33 = vsel %vm39_vm1, %v3177_v9, %v2572_v1 }
 0x5eb   :  { %v2284_v47 = vpack.c.bf16 %v2127_v63, %v2127_v63  ;;  %v2283_v53 = vpack.c.bf16 %v2126_v33, %v2126_v33  ;;  %v2576_v19 = vpop.permute.xlu1 %2575 }
 0x5ec   :  { %v2578_v52 = vunpack.i.h.bf16 %v2576_v19  ;;  %v2577_v49 = vunpack.i.l.bf16 %v2576_v19 }
 0x5ed   :  { %2208 = vst.msk [vmem:[%s3549_s2 + $0x14] sm:$0xf] %vm2202_vm3, %v2284_v47  ;;  %2207 = vst.msk [vmem:[%s3549_s2 + $0x10] sm:$0xf] %vm2202_vm3, %v2283_v53 }
 0x5ee   :  { %v2129_v0 = vsel %vm39_vm1, %v3183_v51, %v2578_v52  ;;  %v2128_v9 = vsel %vm39_vm1, %v3181_v12, %v2577_v49 }
 0x5ef   :  { %v2286_v17 = vpack.c.bf16 %v2129_v0, %v2129_v0  ;;  %v2285_v37 = vpack.c.bf16 %v2128_v9, %v2128_v9  ;;  %v2581_v30 = vpop.permute.xlu0 %2580 }
 0x5f0   :  { %v2583_v2 = vunpack.i.h.bf16 %v2581_v30  ;;  %v2582_v58 = vunpack.i.l.bf16 %v2581_v30 }
 0x5f1   :  { %2210 = vst.msk [vmem:[%s3549_s2 + $0x1c] sm:$0xf] %vm2202_vm3, %v2286_v17  ;;  %2209 = vst.msk [vmem:[%s3549_s2 + $0x18] sm:$0xf] %vm2202_vm3, %v2285_v37 }
 0x5f2   :  { %v2131_v51 = vsel %vm39_vm1, %v3187_v62, %v2583_v2  ;;  %v2130_v12 = vsel %vm39_vm1, %v3185_v16, %v2582_v58 }
 0x5f3   :  { %v2288_v35 = vpack.c.bf16 %v2131_v51, %v2131_v51  ;;  %v2287_v4 = vpack.c.bf16 %v2130_v12, %v2130_v12  ;;  %v2586_v34 = vpop.permute.xlu1 %2585 }
 0x5f4   :  { %v2588_v13 = vunpack.i.h.bf16 %v2586_v34  ;;  %v2587_v3 = vunpack.i.l.bf16 %v2586_v34 }
 0x5f5   :  { %2212 = vst.msk [vmem:[%s3549_s2 + $0x24] sm:$0xf] %vm2202_vm3, %v2288_v35  ;;  %2211 = vst.msk [vmem:[%s3549_s2 + $0x20] sm:$0xf] %vm2202_vm3, %v2287_v4 }
 0x5f6   :  { %v2133_v62 = vsel %vm39_vm1, %v3191_v21, %v2588_v13  ;;  %v2132_v16 = vsel %vm39_vm1, %v3189_v18, %v2587_v3 }
 0x5f7   :  { %v2290_v59 = vpack.c.bf16 %v2133_v62, %v2133_v62  ;;  %v2289_v8 = vpack.c.bf16 %v2132_v16, %v2132_v16  ;;  %v2591_v23 = vpop.permute.xlu0 %2590 }
 0x5f8   :  { %v2593_v22 = vunpack.i.h.bf16 %v2591_v23  ;;  %v2592_v15 = vunpack.i.l.bf16 %v2591_v23 }
 0x5f9   :  { %2214 = vst.msk [vmem:[%s3549_s2 + $0x2c] sm:$0xf] %vm2202_vm3, %v2290_v59  ;;  %2213 = vst.msk [vmem:[%s3549_s2 + $0x28] sm:$0xf] %vm2202_vm3, %v2289_v8 }
 0x5fa   :  { %v2135_v21 = vsel %vm39_vm1, %v3195_v40, %v2593_v22  ;;  %v2134_v18 = vsel %vm39_vm1, %v3193_v61, %v2592_v15 }
 0x5fb   :  { %v2292_v60 = vpack.c.bf16 %v2135_v21, %v2135_v21  ;;  %v2291_v26 = vpack.c.bf16 %v2134_v18, %v2134_v18  ;;  %v2596_v50 = vpop.permute.xlu1 %2595 }
 0x5fc   :  { %v2598_v7 = vunpack.i.h.bf16 %v2596_v50  ;;  %v2597_v41 = vunpack.i.l.bf16 %v2596_v50 }
 0x5fd   :  { %2216 = vst.msk [vmem:[%s3549_s2 + $0x34] sm:$0xf] %vm2202_vm3, %v2292_v60  ;;  %2215 = vst.msk [vmem:[%s3549_s2 + $0x30] sm:$0xf] %vm2202_vm3, %v2291_v26 }
 0x5fe   :  { %v2137_v40 = vsel %vm39_vm1, %v3199_v32, %v2598_v7  ;;  %v2136_v61 = vsel %vm39_vm1, %v3197_v29, %v2597_v41 }
 0x5ff   :  { %v2294_v55 = vpack.c.bf16 %v2137_v40, %v2137_v40  ;;  %v2293_v5 = vpack.c.bf16 %v2136_v61, %v2136_v61 }
 0x601   :  { %2218 = vst.msk [vmem:[%s3549_s2 + $0x3c] sm:$0xf] %vm2202_vm3, %v2294_v55  ;;  %2217 = vst.msk [vmem:[%s3549_s2 + $0x38] sm:$0xf] %vm2202_vm3, %v2293_v5 }

// kernel: _lambda_.29
= control target key start
LH: loop header
LB: loop body
LE: loop exit
PB: predicated region body
PF: predicated region fallthrough
CT: control target
= control target key end

     0   :  { %vm113_vm0 = vcmask 523264   ;;  %vm267_vm1 = vcmask 130048   ;;  %s567_s1 = inlined_call_operand.vmem [shape: bf16[64,16], index: 1, kind: input, shape index: {}]   ;;  %s568_s0 = inlined_call_operand.vmem [shape: bf16[128,64], index: 0, kind: input, shape index: {}]   ;;  %s569_s2 = inlined_call_operand.vmem [shape: f32[1,16], index: 2, kind: input, shape index: {}]   ;;  %s570_s3 = inlined_call_operand.vmem [shape: f32[128,16], index: 3, kind: input, shape index: {}]   ;;  %s571_s4 = inlined_call_operand.vmem [shape: f32[128,16], index: 4, kind: output, shape index: {}]  }
   0x1   :  { %v353_v0 = vld [vmem:[%s567_s1 + $0x18] sm:$0xff]   ;;  %v354_v1 = vld [vmem:[%s567_s1 + $0x10] sm:$0xff]   ;;  %v355_v2 = vld [vmem:[%s567_s1 + $0x8] sm:$0xff]  }
   0x2   :  { %321 = vmatprep.subr.bf16.mxu0 %v353_v0  ;;  %345 = vmatprep.subr.bf16.mxu1 %v353_v0  ;;  %v357_v3 = vld [vmem:[%s568_s0] sm:$0xff]   ;;  %v359_v6 = vld [vmem:[%s568_s0 + $0x8] sm:$0xff]   ;;  %v361_v8 = vld [vmem:[%s568_s0 + $0x10] sm:$0xff]  }
   0x3   :  { %322 = vmatpush3.bf16.msra.mxu0 %v353_v0  ;;  %349 = vmatpush3.bf16.msra.mxu1 %v353_v0  ;;  %v358_v4 = vld [vmem:[%s568_s0 + $0x20] sm:$0xff]   ;;  %v360_v7 = vld [vmem:[%s568_s0 + $0x28] sm:$0xff]   ;;  %v362_v9 = vld [vmem:[%s568_s0 + $0x30] sm:$0xff]  }
   0x4   :  { %323 = vmatprep.subr.bf16.mxu0 %v354_v1  ;;  %346 = vmatprep.subr.bf16.mxu1 %v354_v1  ;;  %v356_v5 = vld [vmem:[%s567_s1] sm:$0xff]   ;;  %v363_v10 = vld [vmem:[%s568_s0 + $0x18] sm:$0xff]   ;;  %v237_v14 = vld [vmem:[%s570_s3 + $0x10] sm:$0xff] }
   0x5   :  { %329 = vmatprep.mubr.msk.bf16.mxu0 %vm113_vm0, %v357_v3  ;;  %337 = vmatprep.mubr.msk.bf16.mxu1 %vm113_vm0, %v358_v4  ;;  %v364_v11 = vld [vmem:[%s568_s0 + $0x38] sm:$0xff]   ;;  %v437_v12 = vld [vmem:[%s569_s2] ss:$0 sm:$0xff]  ;;  %v245_v16 = vld [vmem:[%s570_s3 + $0x50] sm:$0xff] }
   0x6   :  { %v235_v20 = vld [vmem:[%s570_s3] sm:$0xff]  ;;  %v238_v28 = vld [vmem:[%s570_s3 + $0x18] sm:$0xff]  ;;  %v236_v36 = vld [vmem:[%s570_s3 + $0x8] sm:$0xff] }
   0x7   :  { %324 = vmatpush3.bf16.msra.mxu0 %v354_v1  ;;  %350 = vmatpush3.bf16.msra.mxu1 %v354_v1  ;;  %v243_v22 = vld [vmem:[%s570_s3 + $0x40] sm:$0xff]  ;;  %v246_v30 = vld [vmem:[%s570_s3 + $0x58] sm:$0xff]  ;;  %v244_v38 = vld [vmem:[%s570_s3 + $0x48] sm:$0xff] }
   0x8   :  { %325 = vmatprep.subr.bf16.mxu0 %v355_v2  ;;  %347 = vmatprep.subr.bf16.mxu1 %v355_v2  ;;  %v241_v44 = vld [vmem:[%s570_s3 + $0x30] sm:$0xff]  ;;  %v239_v52 = vld [vmem:[%s570_s3 + $0x20] sm:$0xff]  ;;  %v242_v60 = vld [vmem:[%s570_s3 + $0x38] sm:$0xff] }
   0x9   :  { %v249_v46 = vld [vmem:[%s570_s3 + $0x70] sm:$0xff]  ;;  %v247_v54 = vld [vmem:[%s570_s3 + $0x60] sm:$0xff]  ;;  %v250_v62 = vld [vmem:[%s570_s3 + $0x78] sm:$0xff] }
   0xa   :  { %v240_v4 = vld [vmem:[%s570_s3 + $0x28] sm:$0xff] }
   0xb   :  { %326 = vmatpush3.bf16.msra.mxu0 %v355_v2  ;;  %351 = vmatpush3.bf16.msra.mxu1 %v355_v2 }
   0xc   :  { %327 = vmatprep.subr.bf16.mxu0 %v356_v5  ;;  %348 = vmatprep.subr.bf16.mxu1 %v356_v5 }
   0xf   :  { %328 = vmatpush3.bf16.msra.mxu0 %v356_v5  ;;  %352 = vmatpush3.bf16.msra.mxu1 %v356_v5 }
  0x12   :  { %330 = vmatmul.mubr.msk.bf16.vlgmr.msra.gmra.mxu0 %vm113_vm0, %v359_v6  ;;  %338 = vmatmul.mubr.msk.bf16.vlgmr.msra.gmra.mxu1 %vm113_vm0, %v360_v7  ;;  %v248_v6 = vld [vmem:[%s570_s3 + $0x68] sm:$0xff] }
  0x13   :  { %333 = vmatprep.mubr.msk.bf16.mxu0 %vm113_vm0, %v361_v8  ;;  %341 = vmatprep.mubr.msk.bf16.mxu1 %vm113_vm0, %v362_v9 }
  0x1a   :  { %334 = vmatmul.mubr.msk.bf16.gmra.mxu0 %vm113_vm0, %v363_v10  ;;  %342 = vmatmul.mubr.msk.bf16.gmra.mxu1 %vm113_vm0, %v364_v11 }
  0xd2   :  { %v331_v13 = vpop.f32.mrf.mxu0  ;;  %v339_v15 = vpop.f32.mrf.mxu1 }
  0xd3   :  { %v181_v17 = vadd.f32 %v331_v13, %v437_v12  ;;  %v213_v18 = vadd.f32 %v339_v15, %v437_v12 }
  0xd4   :  { %v172_v19 = vpop.f32.mrf.mxu0  ;;  %v204_v21 = vpop.f32.mrf.mxu1 }
  0xd5   :  { %v253_v23 = vadd.f32 %v237_v14, %v181_v17  ;;  %v261_v24 = vadd.f32 %v245_v16, %v213_v18  ;;  %v173_v25 = vadd.f32 %v437_v12, %v172_v19  ;;  %v205_v26 = vadd.f32 %v437_v12, %v204_v21 }
  0xd6   :  { %v332_v27 = vpop.f32.mrf.mxu0  ;;  %v340_v29 = vpop.f32.mrf.mxu1 }
  0xd7   :  { %270 = vst.msk [vmem:[%s571_s4 + $0x10] sm:$0xff] %vm267_vm1, %v253_v23  ;;  %278 = vst.msk [vmem:[%s571_s4 + $0x50] sm:$0xff] %vm267_vm1, %v261_v24  ;;  %v251_v31 = vadd.f32 %v235_v20, %v173_v25  ;;  %v259_v32 = vadd.f32 %v243_v22, %v205_v26  ;;  %v184_v33 = vadd.f32 %v332_v27, %v437_v12 }
  0xd8   :  { %v216_v34 = vadd.f32 %v340_v29, %v437_v12  ;;  %v175_v35 = vpop.f32.mrf.mxu0  ;;  %v207_v37 = vpop.f32.mrf.mxu1 }
  0xd9   :  { %268 = vst.msk [vmem:[%s571_s4] sm:$0xff] %vm267_vm1, %v251_v31  ;;  %276 = vst.msk [vmem:[%s571_s4 + $0x40] sm:$0xff] %vm267_vm1, %v259_v32  ;;  %v254_v39 = vadd.f32 %v238_v28, %v184_v33  ;;  %v176_v41 = vadd.f32 %v437_v12, %v175_v35  ;;  %v208_v42 = vadd.f32 %v437_v12, %v207_v37 }
  0xda   :  { %v262_v40 = vadd.f32 %v246_v30, %v216_v34  ;;  %v335_v43 = vpop.f32.mrf.mxu0  ;;  %v343_v45 = vpop.f32.mrf.mxu1 }
  0xdb   :  { %271 = vst.msk [vmem:[%s571_s4 + $0x18] sm:$0xff] %vm267_vm1, %v254_v39  ;;  %v252_v47 = vadd.f32 %v236_v36, %v176_v41  ;;  %v260_v48 = vadd.f32 %v244_v38, %v208_v42  ;;  %v197_v49 = vadd.f32 %v335_v43, %v437_v12  ;;  %v229_v50 = vadd.f32 %v343_v45, %v437_v12 }
  0xdc   :  { %279 = vst.msk [vmem:[%s571_s4 + $0x58] sm:$0xff] %vm267_vm1, %v262_v40  ;;  %v188_v51 = vpop.f32.mrf.mxu0  ;;  %v220_v53 = vpop.f32.mrf.mxu1 }
  0xdd   :  { %269 = vst.msk [vmem:[%s571_s4 + $0x8] sm:$0xff] %vm267_vm1, %v252_v47  ;;  %277 = vst.msk [vmem:[%s571_s4 + $0x48] sm:$0xff] %vm267_vm1, %v260_v48  ;;  %v257_v55 = vadd.f32 %v241_v44, %v197_v49  ;;  %v265_v56 = vadd.f32 %v249_v46, %v229_v50  ;;  %v189_v57 = vadd.f32 %v437_v12, %v188_v51 }
  0xde   :  { %v221_v58 = vadd.f32 %v437_v12, %v220_v53  ;;  %v336_v59 = vpop.f32.mrf.mxu0  ;;  %v344_v61 = vpop.f32.mrf.mxu1 }
  0xdf   :  { %274 = vst.msk [vmem:[%s571_s4 + $0x30] sm:$0xff] %vm267_vm1, %v257_v55  ;;  %282 = vst.msk [vmem:[%s571_s4 + $0x70] sm:$0xff] %vm267_vm1, %v265_v56  ;;  %v255_v63 = vadd.f32 %v239_v52, %v189_v57  ;;  %v200_v1 = vadd.f32 %v336_v59, %v437_v12  ;;  %v232_v2 = vadd.f32 %v344_v61, %v437_v12 }
  0xe0   :  { %v263_v0 = vadd.f32 %v247_v54, %v221_v58  ;;  %v191_v3 = vpop.f32.mrf.mxu0  ;;  %v223_v5 = vpop.f32.mrf.mxu1 }
  0xe1   :  { %272 = vst.msk [vmem:[%s571_s4 + $0x20] sm:$0xff] %vm267_vm1, %v255_v63  ;;  %v258_v7 = vadd.f32 %v242_v60, %v200_v1  ;;  %v266_v8 = vadd.f32 %v250_v62, %v232_v2  ;;  %v192_v9 = vadd.f32 %v437_v12, %v191_v3  ;;  %v224_v10 = vadd.f32 %v437_v12, %v223_v5 }
  0xe2   :  { %280 = vst.msk [vmem:[%s571_s4 + $0x60] sm:$0xff] %vm267_vm1, %v263_v0 }
  0xe3   :  { %275 = vst.msk [vmem:[%s571_s4 + $0x38] sm:$0xff] %vm267_vm1, %v258_v7  ;;  %283 = vst.msk [vmem:[%s571_s4 + $0x78] sm:$0xff] %vm267_vm1, %v266_v8  ;;  %v256_v11 = vadd.f32 %v240_v4, %v192_v9  ;;  %v264_v13 = vadd.f32 %v248_v6, %v224_v10 }
  0xe5   :  { %273 = vst.msk [vmem:[%s571_s4 + $0x28] sm:$0xff] %vm267_vm1, %v256_v11  ;;  %281 = vst.msk [vmem:[%s571_s4 + $0x68] sm:$0xff] %vm267_vm1, %v264_v13 }

// kernel: _lambda_.28
= control target key start
LH: loop header
LB: loop body
LE: loop exit
PB: predicated region body
PF: predicated region fallthrough
CT: control target
= control target key end

     0   :  { %vm37_vm0 = vcmask 130048   ;;  %vm933_vm3 = vcmask 519168   ;;  %s1740_s0 = inlined_call_operand.vmem [shape: f32[128,16], index: 0, kind: input, shape index: {}]   ;;  %s1741_s3 = inlined_call_operand.vmem [shape: bf16[16,64], index: 3, kind: input, shape index: {}]   ;;  %s1742_s1 = inlined_call_operand.vmem [shape: f32[1,16], index: 1, kind: input, shape index: {}]   ;;  %s1743_s2 = inlined_call_operand.vmem [shape: f32[1,16], index: 2, kind: input, shape index: {}]   ;;  %s1744_s4 = inlined_call_operand.vmem [shape: f32[1,64], index: 4, kind: input, shape index: {}]   ;;  %s1745_s5 = inlined_call_operand.vmem [shape: bf16[128,64], index: 5, kind: output, shape index: {}]  }
   0x1   :  { %v21_v0 = vld [vmem:[%s1740_s0] sm:$0xff]  ;;  %v22_v2 = vld [vmem:[%s1740_s0 + $0x8] sm:$0xff]  ;;  %v23_v8 = vld [vmem:[%s1740_s0 + $0x10] sm:$0xff] }
   0x2   :  { %v29_v1 = vld [vmem:[%s1740_s0 + $0x40] sm:$0xff]  ;;  %v38_v3 = vsel %vm37_vm0, %v21_v0, 0.0  ;;  %v30_v5 = vld [vmem:[%s1740_s0 + $0x48] sm:$0xff]  ;;  %v41_v6 = vsel %vm37_vm0, %v22_v2, 0.0  ;;  %v24_v9 = vld [vmem:[%s1740_s0 + $0x18] sm:$0xff]  ;;  %v44_v10 = vsel %vm37_vm0, %v23_v8, 0.0 }
   0x3   :  { %v62_v4 = vsel %vm37_vm0, %v29_v1, 0.0  ;;  %39 = vadd.xlane.f32.xlu0 %v38_v3  ;;  %v65_v7 = vsel %vm37_vm0, %v30_v5, 0.0  ;;  %v47_v11 = vsel %vm37_vm0, %v24_v9, 0.0  ;;  %v1181_v12 = vld [vmem:[%s1740_s0 + $0x50] sm:$0xff]  ;;  %v1186_v13 = vld [vmem:[%s1740_s0 + $0x58] sm:$0xff]  ;;  %v1195_v16 = vld [vmem:[%s1740_s0 + $0x20] sm:$0xff] }
   0x4   :  { %63 = vadd.xlane.f32.xlu1 %v62_v4  ;;  %v68_v14 = vsel %vm37_vm0, %v1181_v12, 0.0  ;;  %v71_v15 = vsel %vm37_vm0, %v1186_v13, 0.0  ;;  %v1200_v17 = vld [vmem:[%s1740_s0 + $0x28] sm:$0xff]  ;;  %v50_v18 = vsel %vm37_vm0, %v1195_v16, 0.0  ;;  %v1209_v20 = vld [vmem:[%s1740_s0 + $0x60] sm:$0xff]  ;;  %v1223_v24 = vld [vmem:[%s1740_s0 + $0x30] sm:$0xff] }
   0x5   :  { %v53_v19 = vsel %vm37_vm0, %v1200_v17, 0.0  ;;  %v1214_v21 = vld [vmem:[%s1740_s0 + $0x68] sm:$0xff]  ;;  %v74_v22 = vsel %vm37_vm0, %v1209_v20, 0.0  ;;  %v1228_v25 = vld [vmem:[%s1740_s0 + $0x38] sm:$0xff]  ;;  %v56_v26 = vsel %vm37_vm0, %v1223_v24, 0.0  ;;  %v1237_v28 = vld [vmem:[%s1740_s0 + $0x70] sm:$0xff] }
   0x6   :  { %v77_v23 = vsel %vm37_vm0, %v1214_v21, 0.0  ;;  %v59_v27 = vsel %vm37_vm0, %v1228_v25, 0.0  ;;  %v1242_v29 = vld [vmem:[%s1740_s0 + $0x78] sm:$0xff]  ;;  %v80_v30 = vsel %vm37_vm0, %v1237_v28, 0.0 }
   0x7   :  { %42 = vadd.xlane.f32.xlu0 %v41_v6  ;;  %v83_v31 = vsel %vm37_vm0, %v1242_v29, 0.0 }
   0x8   :  { %66 = vadd.xlane.f32.xlu1 %v65_v7 }
   0xb   :  { %45 = vadd.xlane.f32.xlu0 %v44_v10 }
   0xc   :  { %48 = vadd.xlane.f32.xlu1 %v47_v11 }
   0xf   :  { %69 = vadd.xlane.f32.xlu0 %v68_v14 }
  0x10   :  { %72 = vadd.xlane.f32.xlu1 %v71_v15 }
  0x13   :  { %51 = vadd.xlane.f32.xlu0 %v50_v18 }
  0x14   :  { %54 = vadd.xlane.f32.xlu1 %v53_v19 }
  0x17   :  { %75 = vadd.xlane.f32.xlu0 %v74_v22 }
  0x18   :  { %78 = vadd.xlane.f32.xlu1 %v77_v23 }
  0x1b   :  { %57 = vadd.xlane.f32.xlu0 %v56_v26 }
  0x1c   :  { %60 = vadd.xlane.f32.xlu1 %v59_v27 }
  0x1f   :  { %81 = vadd.xlane.f32.xlu0 %v80_v30 }
  0x20   :  { %84 = vadd.xlane.f32.xlu1 %v83_v31 }
  0x8c   :  { %v40_v32 = vpop.xlane.xlu0 %39 }
  0x8d   :  { %v64_v33 = vpop.xlane.xlu1 %63  ;;  %v87_v34 = vmul.f32 0.0625, %v40_v32 }
  0x8e   :  { %v95_v35 = vmul.f32 0.0625, %v64_v33 }
  0x8f   :  { %v1248_v36 = vsub.f32 %v21_v0, %v87_v34 }
  0x90   :  { %v1250_v37 = vsub.f32 %v29_v1, %v95_v35  ;;  %v43_v38 = vpop.xlane.xlu0 %42 }
  0x91   :  { %v67_v39 = vpop.xlane.xlu1 %66  ;;  %v88_v40 = vmul.f32 0.0625, %v43_v38  ;;  %v119_v42 = vmul.f32 %v1248_v36, %v1248_v36 }
  0x92   :  { %v96_v41 = vmul.f32 0.0625, %v67_v39  ;;  %v127_v43 = vmul.f32 %v1250_v37, %v1250_v37 }
  0x93   :  { %v1256_v44 = vsub.f32 %v22_v2, %v88_v40  ;;  %v135_v46 = vsel %vm37_vm0, %v119_v42, 0.0 }
  0x94   :  { %v1258_v45 = vsub.f32 %v30_v5, %v96_v41  ;;  %136 = vadd.xlane.f32.xlu0 %v135_v46  ;;  %v46_v47 = vpop.xlane.xlu0 %45  ;;  %v159_v49 = vsel %vm37_vm0, %v127_v43, 0.0 }
  0x95   :  { %v49_v48 = vpop.xlane.xlu1 %48  ;;  %v89_v50 = vmul.f32 0.0625, %v46_v47  ;;  %v120_v52 = vmul.f32 %v1256_v44, %v1256_v44 }
  0x96   :  { %v90_v51 = vmul.f32 0.0625, %v49_v48  ;;  %v128_v53 = vmul.f32 %v1258_v45, %v1258_v45 }
  0x97   :  { %v1266_v54 = vsub.f32 %v23_v8, %v89_v50  ;;  %v138_v56 = vsel %vm37_vm0, %v120_v52, 0.0 }
  0x98   :  { %v1268_v55 = vsub.f32 %v24_v9, %v90_v51  ;;  %160 = vadd.xlane.f32.xlu0 %v159_v49  ;;  %139 = vadd.xlane.f32.xlu1 %v138_v56  ;;  %v70_v57 = vpop.xlane.xlu0 %69  ;;  %v162_v59 = vsel %vm37_vm0, %v128_v53, 0.0 }
  0x99   :  { %v73_v58 = vpop.xlane.xlu1 %72  ;;  %v97_v60 = vmul.f32 0.0625, %v70_v57  ;;  %v121_v62 = vmul.f32 %v1266_v54, %v1266_v54 }
  0x9a   :  { %v98_v61 = vmul.f32 0.0625, %v73_v58  ;;  %v122_v63 = vmul.f32 %v1268_v55, %v1268_v55 }
  0x9b   :  { %v1277_v0 = vsub.f32 %v1181_v12, %v97_v60  ;;  %v141_v2 = vsel %vm37_vm0, %v121_v62, 0.0 }
  0x9c   :  { %v1280_v1 = vsub.f32 %v1186_v13, %v98_v61  ;;  %163 = vadd.xlane.f32.xlu1 %v162_v59  ;;  %142 = vadd.xlane.f32.xlu0 %v141_v2  ;;  %v52_v3 = vpop.xlane.xlu0 %51  ;;  %v144_v5 = vsel %vm37_vm0, %v122_v63, 0.0 }
  0x9d   :  { %v55_v4 = vpop.xlane.xlu1 %54  ;;  %v91_v6 = vmul.f32 0.0625, %v52_v3  ;;  %v129_v8 = vmul.f32 %v1277_v0, %v1277_v0 }
  0x9e   :  { %v92_v7 = vmul.f32 0.0625, %v55_v4  ;;  %v130_v9 = vmul.f32 %v1280_v1, %v1280_v1 }
  0x9f   :  { %v1289_v10 = vsub.f32 %v1195_v16, %v91_v6  ;;  %v165_v12 = vsel %vm37_vm0, %v129_v8, 0.0 }
  0xa0   :  { %v1292_v11 = vsub.f32 %v1200_v17, %v92_v7  ;;  %145 = vadd.xlane.f32.xlu1 %v144_v5  ;;  %166 = vadd.xlane.f32.xlu0 %v165_v12  ;;  %v76_v13 = vpop.xlane.xlu0 %75  ;;  %v168_v15 = vsel %vm37_vm0, %v130_v9, 0.0 }
  0xa1   :  { %v79_v14 = vpop.xlane.xlu1 %78  ;;  %v99_v18 = vmul.f32 0.0625, %v76_v13  ;;  %v123_v22 = vmul.f32 %v1289_v10, %v1289_v10 }
  0xa2   :  { %v100_v19 = vmul.f32 0.0625, %v79_v14  ;;  %v124_v16 = vmul.f32 %v1292_v11, %v1292_v11 }
  0xa3   :  { %v1301_v23 = vsub.f32 %v1209_v20, %v99_v18  ;;  %v147_v26 = vsel %vm37_vm0, %v123_v22, 0.0 }
  0xa4   :  { %v1304_v17 = vsub.f32 %v1214_v21, %v100_v19  ;;  %169 = vadd.xlane.f32.xlu1 %v168_v15  ;;  %148 = vadd.xlane.f32.xlu0 %v147_v26  ;;  %v58_v27 = vpop.xlane.xlu0 %57  ;;  %v150_v31 = vsel %vm37_vm0, %v124_v16, 0.0 }
  0xa5   :  { %v61_v30 = vpop.xlane.xlu1 %60  ;;  %v93_v32 = vmul.f32 0.0625, %v58_v27  ;;  %v131_v34 = vmul.f32 %v1301_v23, %v1301_v23 }
  0xa6   :  { %v94_v33 = vmul.f32 0.0625, %v61_v30  ;;  %v132_v20 = vmul.f32 %v1304_v17, %v1304_v17 }
  0xa7   :  { %v1313_v35 = vsub.f32 %v1223_v24, %v93_v32  ;;  %v171_v38 = vsel %vm37_vm0, %v131_v34, 0.0  ;;  %v1345_v32 = vld [vmem:[%s1742_s1] ss:$0 sm:$0xff] }
  0xa8   :  { %v1316_v21 = vsub.f32 %v1228_v25, %v94_v33  ;;  %151 = vadd.xlane.f32.xlu1 %v150_v31  ;;  %172 = vadd.xlane.f32.xlu0 %v171_v38  ;;  %v82_v39 = vpop.xlane.xlu0 %81  ;;  %v174_v41 = vsel %vm37_vm0, %v132_v20, 0.0 }
  0xa9   :  { %v85_v40 = vpop.xlane.xlu1 %84  ;;  %v101_v42 = vmul.f32 0.0625, %v82_v39  ;;  %v125_v46 = vmul.f32 %v1313_v35, %v1313_v35 }
  0xaa   :  { %v102_v43 = vmul.f32 0.0625, %v85_v40  ;;  %v126_v24 = vmul.f32 %v1316_v21, %v1316_v21 }
  0xab   :  { %v1325_v47 = vsub.f32 %v1237_v28, %v101_v42  ;;  %v153_v48 = vsel %vm37_vm0, %v125_v46, 0.0 }
  0xac   :  { %v1328_v25 = vsub.f32 %v1242_v29, %v102_v43  ;;  %175 = vadd.xlane.f32.xlu1 %v174_v41  ;;  %154 = vadd.xlane.f32.xlu0 %v153_v48  ;;  %v156_v49 = vsel %vm37_vm0, %v126_v24, 0.0  ;;  %v1027_v29 = vld [vmem:[%s1741_s3] sm:$0xff]  }
  0xad   :  { %v133_v50 = vmul.f32 %v1325_v47, %v1325_v47  ;;  %1007 = vmatprep.subr.bf16.mxu0 %v1027_v29  ;;  %1025 = vmatprep.subr.bf16.mxu1 %v1027_v29 }
  0xae   :  { %v134_v51 = vmul.f32 %v1328_v25, %v1328_v25  ;;  %1008 = vmatpush3.bf16.msra.mxu0 %v1027_v29  ;;  %1026 = vmatpush3.bf16.msra.mxu1 %v1027_v29 }
  0xaf   :  { %v177_v52 = vsel %vm37_vm0, %v133_v50, 0.0 }
  0xb0   :  { %157 = vadd.xlane.f32.xlu1 %v156_v49  ;;  %178 = vadd.xlane.f32.xlu0 %v177_v52  ;;  %v180_v28 = vsel %vm37_vm0, %v134_v51, 0.0 }
  0xb4   :  { %181 = vadd.xlane.f32.xlu1 %v180_v28 }
 0x11d   :  { %v137_v53 = vpop.xlane.xlu0 %136 }
 0x11e   :  { %v183_v56 = vmul.f32 0.0625, %v137_v53 }
 0x120   :  { %v199_v57 = vadd.f32 1e-05, %v183_v56 }
 0x121   :  { %v140_v58 = vpop.xlane.xlu1 %139  ;;  %v161_v59 = vpop.xlane.xlu0 %160 }
 0x122   :  { %1028 = vrsqrt.f32 %v199_v57  ;;  %v184_v60 = vmul.f32 0.0625, %v140_v58  ;;  %v191_v61 = vmul.f32 0.0625, %v161_v59 }
 0x124   :  { %v200_v62 = vadd.f32 1e-05, %v184_v60  ;;  %v207_v63 = vadd.f32 1e-05, %v191_v61 }
 0x125   :  { %v164_v2 = vpop.xlane.xlu1 %163  ;;  %v143_v3 = vpop.xlane.xlu0 %142 }
 0x126   :  { %1030 = vrsqrt.f32 %v200_v62  ;;  %v192_v4 = vmul.f32 0.0625, %v164_v2  ;;  %v185_v5 = vmul.f32 0.0625, %v143_v3 }
 0x127   :  { %1032 = vrsqrt.f32 %v207_v63 }
 0x128   :  { %v208_v6 = vadd.f32 1e-05, %v192_v4  ;;  %v201_v7 = vadd.f32 1e-05, %v185_v5 }
 0x129   :  { %v146_v8 = vpop.xlane.xlu1 %145  ;;  %v167_v9 = vpop.xlane.xlu0 %166 }
 0x12a   :  { %1034 = vrsqrt.f32 %v208_v6  ;;  %v186_v12 = vmul.f32 0.0625, %v146_v8  ;;  %v193_v13 = vmul.f32 0.0625, %v167_v9 }
 0x12b   :  { %1036 = vrsqrt.f32 %v201_v7 }
 0x12c   :  { %v202_v14 = vadd.f32 1e-05, %v186_v12  ;;  %v209_v15 = vadd.f32 1e-05, %v193_v13 }
 0x12d   :  { %v170_v18 = vpop.xlane.xlu1 %169  ;;  %v149_v19 = vpop.xlane.xlu0 %148 }
 0x12e   :  { %1038 = vrsqrt.f32 %v202_v14  ;;  %v194_v22 = vmul.f32 0.0625, %v170_v18  ;;  %v187_v16 = vmul.f32 0.0625, %v149_v19 }
 0x12f   :  { %v1029_v26 = vpop.eup %1028  ;;  %1040 = vrsqrt.f32 %v209_v15 }
 0x130   :  { %v210_v27 = vadd.f32 1e-05, %v194_v22  ;;  %v203_v30 = vadd.f32 1e-05, %v187_v16  ;;  %v231_v31 = vmul.f32 %v1029_v26, %v1248_v36  ;;  %v1352_v36 = vld [vmem:[%s1743_s2] ss:$0 sm:$0xff] }
 0x131   :  { %v152_v33 = vpop.xlane.xlu1 %151  ;;  %v173_v34 = vpop.xlane.xlu0 %172 }
 0x132   :  { %1042 = vrsqrt.f32 %v210_v27  ;;  %v188_v20 = vmul.f32 0.0625, %v152_v33  ;;  %v195_v38 = vmul.f32 0.0625, %v173_v34  ;;  %v254_v40 = vmul.f32 %v1345_v32, %v231_v31 }
 0x133   :  { %v1031_v39 = vpop.eup %1030  ;;  %1044 = vrsqrt.f32 %v203_v30 }
 0x134   :  { %v1033_v41 = vpop.eup %1032  ;;  %v204_v42 = vadd.f32 1e-05, %v188_v20  ;;  %v211_v43 = vadd.f32 1e-05, %v195_v38  ;;  %v232_v46 = vmul.f32 %v1031_v39, %v1256_v44  ;;  %v277_v29 = vadd.f32 %v1352_v36, %v254_v40 }
 0x135   :  { %v176_v24 = vpop.xlane.xlu1 %175  ;;  %v155_v48 = vpop.xlane.xlu0 %154  ;;  %v239_v49 = vmul.f32 %v1033_v41, %v1250_v37 }
 0x136   :  { %1046 = vrsqrt.f32 %v204_v42  ;;  %v196_v50 = vmul.f32 0.0625, %v176_v24  ;;  %v189_v51 = vmul.f32 0.0625, %v155_v48  ;;  %v255_v52 = vmul.f32 %v1345_v32, %v232_v46 }
 0x137   :  { %v1035_v28 = vpop.eup %1034  ;;  %1048 = vrsqrt.f32 %v211_v43  ;;  %v262_v37 = vmul.f32 %v1345_v32, %v239_v49 }
 0x138   :  { %v1037_v53 = vpop.eup %1036  ;;  %v212_v44 = vadd.f32 1e-05, %v196_v50  ;;  %v205_v56 = vadd.f32 1e-05, %v189_v51  ;;  %v278_v57 = vadd.f32 %v1352_v36, %v255_v52  ;;  %v240_v58 = vmul.f32 %v1035_v28, %v1258_v45 }
 0x139   :  { %v158_v59 = vpop.xlane.xlu1 %157  ;;  %v179_v60 = vpop.xlane.xlu0 %178  ;;  %v233_v61 = vmul.f32 %v1037_v53, %v1266_v54  ;;  %v285_v54 = vadd.f32 %v1352_v36, %v262_v37 }
 0x13a   :  { %1050 = vrsqrt.f32 %v212_v44  ;;  %v190_v62 = vmul.f32 0.0625, %v158_v59  ;;  %v197_v63 = vmul.f32 0.0625, %v179_v60  ;;  %v293_v2 = vpack.c.bf16 %v278_v57, %v277_v29 }
 0x13b   :  { %v1039_v3 = vpop.eup %1038  ;;  %1052 = vrsqrt.f32 %v205_v56  ;;  %v263_v4 = vmul.f32 %v1345_v32, %v240_v58  ;;  %v256_v5 = vmul.f32 %v1345_v32, %v233_v61 }
 0x13c   :  { %v1041_v6 = vpop.eup %1040  ;;  %v206_v7 = vadd.f32 1e-05, %v190_v62  ;;  %v213_v8 = vadd.f32 1e-05, %v197_v63  ;;  %1009 = vmatprep.mubr.msk.bf16.mxu0 %vm37_vm0, %v293_v2  ;;  %v234_v45 = vmul.f32 %v1039_v3, %v1268_v55  ;;  %v1410_v3 = vld [vmem:[%s1744_s4] ss:$0 sm:$0xff] }
 0x13d   :  { %v182_v9 = vpop.xlane.xlu1 %181  ;;  %v286_v12 = vadd.f32 %v1352_v36, %v263_v4  ;;  %v241_v13 = vmul.f32 %v1041_v6, %v1277_v0  ;;  %v279_v22 = vadd.f32 %v1352_v36, %v256_v5 }
 0x13e   :  { %1054 = vrsqrt.f32 %v206_v7  ;;  %v198_v14 = vmul.f32 0.0625, %v182_v9  ;;  %v257_v15 = vmul.f32 %v1345_v32, %v234_v45 }
 0x13f   :  { %v1043_v18 = vpop.eup %1042  ;;  %1056 = vrsqrt.f32 %v213_v8  ;;  %v297_v19 = vpack.c.bf16 %v286_v12, %v285_v54  ;;  %v264_v30 = vmul.f32 %v1345_v32, %v241_v13 }
 0x140   :  { %v1045_v16 = vpop.eup %1044  ;;  %v214_v26 = vadd.f32 1e-05, %v198_v14  ;;  %v280_v55 = vadd.f32 %v1352_v36, %v257_v15  ;;  %v242_v27 = vmul.f32 %v1043_v18, %v1280_v1 }
 0x141   :  { %1017 = vmatprep.mubr.msk.bf16.mxu1 %vm37_vm0, %v297_v19  ;;  %v235_v0 = vmul.f32 %v1045_v16, %v1289_v10  ;;  %v287_v38 = vadd.f32 %v1352_v36, %v264_v30 }
 0x142   :  { %1058 = vrsqrt.f32 %v214_v26  ;;  %v294_v31 = vpack.c.bf16 %v280_v55, %v279_v22  ;;  %v265_v33 = vmul.f32 %v1345_v32, %v242_v27 }
 0x143   :  { %v1047_v34 = vpop.eup %1046  ;;  %v258_v40 = vmul.f32 %v1345_v32, %v235_v0 }
 0x144   :  { %v1049_v20 = vpop.eup %1048  ;;  %1010 = vmatmul.mubr.msk.bf16.vlgmr.msra.gmra.mxu0 %vm37_vm0, %v294_v31  ;;  %v288_v39 = vadd.f32 %v1352_v36, %v265_v33  ;;  %v236_v1 = vmul.f32 %v1047_v34, %v1292_v11 }
 0x145   :  { %v243_v41 = vmul.f32 %v1049_v20, %v1301_v23  ;;  %v281_v24 = vadd.f32 %v1352_v36, %v258_v40 }
 0x146   :  { %v298_v42 = vpack.c.bf16 %v288_v39, %v287_v38  ;;  %v259_v10 = vmul.f32 %v1345_v32, %v236_v1 }
 0x147   :  { %v1051_v43 = vpop.eup %1050  ;;  %v266_v50 = vmul.f32 %v1345_v32, %v243_v41 }
 0x148   :  { %v1053_v46 = vpop.eup %1052  ;;  %1018 = vmatmul.mubr.msk.bf16.vlgmr.msra.gmra.mxu1 %vm37_vm0, %v298_v42  ;;  %v282_v48 = vadd.f32 %v1352_v36, %v259_v10  ;;  %v244_v49 = vmul.f32 %v1051_v43, %v1304_v17 }
 0x149   :  { %v237_v11 = vmul.f32 %v1053_v46, %v1313_v35  ;;  %v289_v29 = vadd.f32 %v1352_v36, %v266_v50 }
 0x14a   :  { %v295_v51 = vpack.c.bf16 %v282_v48, %v281_v24  ;;  %v267_v23 = vmul.f32 %v1345_v32, %v244_v49 }
 0x14b   :  { %v1055_v52 = vpop.eup %1054  ;;  %v260_v56 = vmul.f32 %v1345_v32, %v237_v11 }
 0x14c   :  { %v1057_v28 = vpop.eup %1056  ;;  %1013 = vmatprep.mubr.msk.bf16.mxu0 %vm37_vm0, %v295_v51  ;;  %v290_v53 = vadd.f32 %v1352_v36, %v267_v23  ;;  %v238_v44 = vmul.f32 %v1055_v52, %v1316_v21 }
 0x14d   :  { %v245_v17 = vmul.f32 %v1057_v28, %v1325_v47  ;;  %v283_v59 = vadd.f32 %v1352_v36, %v260_v56 }
 0x14e   :  { %v299_v57 = vpack.c.bf16 %v290_v53, %v289_v29  ;;  %v261_v35 = vmul.f32 %v1345_v32, %v238_v44 }
 0x14f   :  { %v1059_v58 = vpop.eup %1058  ;;  %v268_v61 = vmul.f32 %v1345_v32, %v245_v17 }
 0x150   :  { %1021 = vmatprep.mubr.msk.bf16.mxu1 %vm37_vm0, %v299_v57  ;;  %v284_v60 = vadd.f32 %v1352_v36, %v261_v35  ;;  %v246_v37 = vmul.f32 %v1059_v58, %v1328_v25 }
 0x151   :  { %v291_v47 = vadd.f32 %v1352_v36, %v268_v61 }
 0x152   :  { %v296_v62 = vpack.c.bf16 %v284_v60, %v283_v59  ;;  %v269_v21 = vmul.f32 %v1345_v32, %v246_v37 }
 0x154   :  { %1014 = vmatmul.mubr.msk.bf16.gmra.mxu0 %vm37_vm0, %v296_v62  ;;  %v292_v63 = vadd.f32 %v1352_v36, %v269_v21 }
 0x156   :  { %v300_v2 = vpack.c.bf16 %v292_v63, %v291_v47 }
 0x158   :  { %1022 = vmatmul.mubr.msk.bf16.gmra.mxu1 %vm37_vm0, %v300_v2 }
 0x204   :  { %v1011_v25 = vpop.f32.mrf.mxu0 }
 0x205   :  { %v383_v4 = vadd.f32 %v1011_v25, %v1410_v3 }
 0x206   :  { %v374_v5 = vpop.f32.mrf.mxu0 }
 0x207   :  { %v1413_v6 = vmul.f32 0.70710677, %v383_v4  ;;  %v375_v32 = vadd.f32 %v1410_v3, %v374_v5  ;;  %v1430_v46 = vmul.f32 0.5, %v383_v4 }
 0x208   :  { %v1012_v7 = vpop.f32.mrf.mxu0  ;;  %v1019_v8 = vpop.f32.mrf.mxu1 }
 0x209   :  { %v455_v36 = vand.u32 2147483647, %v1413_v6  ;;  %v1417_v45 = vmul.f32 0.70710677, %v375_v32  ;;  %v386_v9 = vadd.f32 %v1012_v7, %v1410_v3  ;;  %v415_v54 = vadd.f32 %v1019_v8, %v1410_v3 }
 0x20a   :  { %v406_v19 = vpop.f32.mrf.mxu1  ;;  %v377_v30 = vpop.f32.mrf.mxu0  ;;  %v1434_v49 = vmul.f32 0.5, %v375_v32  ;;  %vm775_vm1 = vcmp.ge.f32.partialorder %v1413_v6, 0.0 }
 0x20b   :  { %v471_v12 = vmul.f32 0.3275911, %v455_v36  ;;  %v453_v13 = vand.u32 2147483647, %v1417_v45  ;;  %v679_v14 = vsub.f32 0.0, %v455_v36  ;;  %v378_v40 = vadd.f32 %v1410_v3, %v377_v30 }
 0x20c   :  { %v1422_v15 = vmul.f32 0.70710677, %v386_v9  ;;  %v1424_v18 = vmul.f32 0.70710677, %v415_v54  ;;  %v1020_v38 = vpop.f32.mrf.mxu1  ;;  %v407_v41 = vadd.f32 %v1410_v3, %v406_v19  ;;  %v1439_v29 = vmul.f32 0.5, %v386_v9 }
 0x20d   :  { %v487_v22 = vadd.f32 1.0, %v471_v12  ;;  %v469_v16 = vmul.f32 0.3275911, %v453_v13  ;;  %v677_v26 = vsub.f32 0.0, %v453_v13  ;;  %v695_v31 = vmul.f32 %v679_v14, %v455_v36 }
 0x20e   :  { %v456_v55 = vand.u32 2147483647, %v1422_v15  ;;  %v463_v27 = vand.u32 2147483647, %v1424_v18  ;;  %v1432_v24 = vmul.f32 0.70710677, %v378_v40  ;;  %v409_v11 = vpop.f32.mrf.mxu1  ;;  %v418_v44 = vadd.f32 %v1020_v38, %v1410_v3 }
 0x20f   :  { %1060 = vrcp.f32 %v487_v22  ;;  %v485_v0 = vadd.f32 1.0, %v469_v16  ;;  %v693_v39 = vmul.f32 %v677_v26, %v453_v13  ;;  %v713_v48 = vmul.f32 1.442695, %v695_v31 }
 0x210   :  { %v472_v33 = vmul.f32 0.3275911, %v456_v55  ;;  %v680_v34 = vsub.f32 0.0, %v456_v55  ;;  %v479_v20 = vmul.f32 0.3275911, %v463_v27  ;;  %v687_v1 = vsub.f32 0.0, %v463_v27 }
 0x211   :  { %1062 = vrcp.f32 %v485_v0  ;;  %v1436_v50 = vmul.f32 0.70710677, %v407_v41  ;;  %v709_v51 = vmul.f32 1.442695, %v693_v39  ;;  %v454_v52 = vand.u32 2147483647, %v1432_v24 }
 0x212   :  { %v488_v42 = vadd.f32 1.0, %v472_v33  ;;  %v696_v10 = vmul.f32 %v680_v34, %v456_v55  ;;  %v495_v43 = vadd.f32 1.0, %v479_v20  ;;  %v703_v23 = vmul.f32 %v687_v1, %v463_v27 }
 0x213   :  { %v461_v53 = vand.u32 2147483647, %v1436_v50  ;;  %v1443_v56 = vmul.f32 0.5, %v415_v54  ;;  %v470_v17 = vmul.f32 0.3275911, %v454_v52  ;;  %v678_v57 = vsub.f32 0.0, %v454_v52 }
 0x214   :  { %1064 = vrcp.f32 %v488_v42  ;;  %v715_v28 = vmul.f32 1.442695, %v696_v10  ;;  %v1446_v35 = vadd.f32 %v1410_v3, %v409_v11  ;;  %v1448_v60 = vmul.f32 0.70710677, %v418_v44  ;;  %v1015_v2 = vpop.f32.mrf.mxu0 }
 0x215   :  { %1066 = vrcp.f32 %v495_v43  ;;  %v477_v58 = vmul.f32 0.3275911, %v461_v53  ;;  %v685_v59 = vsub.f32 0.0, %v461_v53  ;;  %v729_v37 = vmul.f32 1.442695, %v703_v23 }
 0x216   :  { %1068 = vpow2.f32 %v713_v48  ;;  %v486_v61 = vadd.f32 1.0, %v470_v17  ;;  %v1451_v62 = vmul.f32 0.70710677, %v1446_v35  ;;  %v694_v21 = vmul.f32 %v678_v57, %v454_v52  ;;  %v390_v16 = vpop.f32.mrf.mxu0 }
 0x217   :  { %1070 = vpow2.f32 %v709_v51  ;;  %v493_v47 = vadd.f32 1.0, %v477_v58  ;;  %v464_v63 = vand.u32 2147483647, %v1448_v60  ;;  %v1454_v25 = vmul.f32 0.5, %v378_v40 }
 0x218   :  { %1072 = vpow2.f32 %v715_v28  ;;  %v701_v4 = vmul.f32 %v685_v59, %v461_v53  ;;  %v462_v5 = vand.u32 2147483647, %v1451_v62  ;;  %v1459_v7 = vmul.f32 0.5, %v407_v41 }
 0x219   :  { %1074 = vrcp.f32 %v486_v61  ;;  %v480_v8 = vmul.f32 0.3275911, %v464_v63  ;;  %v688_v36 = vsub.f32 0.0, %v464_v63  ;;  %v711_v13 = vmul.f32 1.442695, %v694_v21 }
 0x21a   :  { %1076 = vrcp.f32 %v493_v47  ;;  %v478_v54 = vmul.f32 0.3275911, %v462_v5  ;;  %v686_v12 = vsub.f32 0.0, %v462_v5  ;;  %v1463_v22 = vadd.f32 %v1015_v2, %v1410_v3 }
 0x21b   :  { %1078 = vpow2.f32 %v729_v37  ;;  %v496_v14 = vadd.f32 1.0, %v480_v8  ;;  %v704_v19 = vmul.f32 %v688_v36, %v464_v63  ;;  %v725_v27 = vmul.f32 1.442695, %v701_v4 }
 0x21c   :  { %v1457_v32 = vpop.eup %1060  ;;  %v494_v30 = vadd.f32 1.0, %v478_v54  ;;  %v702_v0 = vmul.f32 %v686_v12, %v462_v5  ;;  %v1468_v33 = vmul.f32 0.5, %v418_v44  ;;  %v1471_v34 = vmul.f32 0.70710677, %v1463_v22 }
 0x21d   :  { %v535_v9 = vmul.f32 1.0614054, %v1457_v32  ;;  %1080 = vrcp.f32 %v496_v14  ;;  %v731_v39 = vmul.f32 1.442695, %v704_v19  ;;  %v1477_v1 = vadd.f32 %v1410_v3, %v390_v16 }
 0x21e   :  { %v1465_v26 = vpop.eup %1062  ;;  %1082 = vrcp.f32 %v494_v30  ;;  %v459_v10 = vand.u32 2147483647, %v1471_v34  ;;  %v727_v11 = vmul.f32 1.442695, %v702_v0  ;;  %vm773_vm2 = vcmp.ge.f32.partialorder %v1417_v45, 0.0 }
 0x21f   :  { %v551_v55 = vadd.f32 -1.4531521, %v535_v9  ;;  %v533_v31 = vmul.f32 1.0614054, %v1465_v26  ;;  %1084 = vpow2.f32 %v711_v13  ;;  %v1487_v57 = vmul.f32 0.70710677, %v1477_v1 }
 0x220   :  { %1086 = vpow2.f32 %v725_v27  ;;  %v475_v52 = vmul.f32 0.3275911, %v459_v10  ;;  %v683_v28 = vsub.f32 0.0, %v459_v10  ;;  %vm776_vm4 = vcmp.ge.f32.partialorder %v1422_v15, 0.0 }
 0x221   :  { %v1473_v20 = vpop.eup %1064  ;;  %v567_v38 = vmul.f32 %v1457_v32, %v551_v55  ;;  %v549_v41 = vadd.f32 -1.4531521, %v533_v31  ;;  %1088 = vpow2.f32 %v731_v39  ;;  %v1494_v4 = vand.u32 2147483647, %v1487_v57 }
 0x222   :  { %v1479_v40 = vpop.eup %1066  ;;  %v536_v42 = vmul.f32 1.0614054, %v1473_v20  ;;  %v491_v61 = vadd.f32 1.0, %v475_v52  ;;  %v699_v21 = vmul.f32 %v683_v28, %v459_v10  ;;  %1090 = vpow2.f32 %v727_v11 }
 0x223   :  { %v583_v43 = vadd.f32 1.4214138, %v567_v38  ;;  %v543_v48 = vmul.f32 1.0614054, %v1479_v40  ;;  %v565_v51 = vmul.f32 %v1465_v26, %v549_v41  ;;  %v1069_v53 = vpop.eup %1068  ;;  %v473_v19 = vmul.f32 0.3275911, %v1494_v4 }
 0x224   :  { %v552_v23 = vadd.f32 -1.4531521, %v536_v42  ;;  %v1071_v58 = vpop.eup %1070  ;;  %1092 = vrcp.f32 %v491_v61  ;;  %v721_v9 = vmul.f32 1.442695, %v699_v21  ;;  %vm783_vm5 = vcmp.ge.f32.partialorder %v1424_v18, 0.0 }
 0x225   :  { %v599_v44 = vmul.f32 %v1457_v32, %v583_v43  ;;  %v559_v17 = vadd.f32 -1.4531521, %v543_v48  ;;  %v581_v59 = vadd.f32 1.4214138, %v565_v51  ;;  %v1490_v47 = vpop.eup %1072  ;;  %v489_v39 = vadd.f32 1.0, %v473_v19 }
 0x226   :  { %v568_v37 = vmul.f32 %v1473_v20, %v552_v23  ;;  %v1496_v5 = vpop.eup %1074  ;;  %1094 = vpow2.f32 %v721_v9  ;;  %v681_v43 = vsub.f32 0.0, %v1494_v4  ;;  %vm774_vm6 = vcmp.ge.f32.partialorder %v1432_v24, 0.0 }
 0x227   :  { %v615_v63 = vadd.f32 -0.28449672, %v599_v44  ;;  %v575_v2 = vmul.f32 %v1479_v40, %v559_v17  ;;  %v597_v8 = vmul.f32 %v1465_v26, %v581_v59  ;;  %v1499_v54 = vpop.eup %1076  ;;  %v534_v14 = vmul.f32 1.0614054, %v1496_v5 }
 0x228   :  { %v584_v36 = vadd.f32 1.4214138, %v568_v37  ;;  %v1079_v16 = vpop.eup %1078  ;;  %v541_v30 = vmul.f32 1.0614054, %v1499_v54  ;;  %1096 = vrcp.f32 %v489_v39  ;;  %vm781_vm7 = vcmp.ge.f32.partialorder %v1436_v50, 0.0 }
 0x229   :  { %v631_v12 = vmul.f32 %v1457_v32, %v615_v63  ;;  %v591_v13 = vadd.f32 1.4214138, %v575_v2  ;;  %v613_v55 = vadd.f32 -0.28449672, %v597_v8  ;;  %v550_v38 = vadd.f32 -1.4531521, %v534_v14 }
 0x22a   :  { %v600_v27 = vmul.f32 %v1473_v20, %v584_v36  ;;  %v557_v10 = vadd.f32 -1.4531521, %v541_v30  ;;  %v1510_v48 = vpop.eup %1080  ;;  %vm784_vm8 = vcmp.ge.f32.partialorder %v1448_v60, 0.0  ;;  %vm782_vm9 = vcmp.ge.f32.partialorder %v1451_v62, 0.0 }
 0x22b   :  { %v647_v0 = vadd.f32 0.2548296, %v631_v12  ;;  %v607_v31 = vmul.f32 %v1479_v40, %v591_v13  ;;  %v629_v41 = vmul.f32 %v1465_v26, %v613_v55  ;;  %v566_v23 = vmul.f32 %v1496_v5, %v550_v38  ;;  %v1514_v52 = vpop.eup %1082 }
 0x22c   :  { %v616_v42 = vadd.f32 -0.28449672, %v600_v27  ;;  %v573_v17 = vmul.f32 %v1499_v54, %v557_v10  ;;  %v544_v59 = vmul.f32 1.0614054, %v1510_v48  ;;  %v1519_v37 = vpop.eup %1084  ;;  %v542_v63 = vmul.f32 1.0614054, %v1514_v52 }
 0x22d   :  { %v663_v11 = vmul.f32 %v1457_v32, %v647_v0  ;;  %v623_v51 = vadd.f32 -0.28449672, %v607_v31  ;;  %v645_v28 = vadd.f32 0.2548296, %v629_v41  ;;  %v582_v21 = vadd.f32 1.4214138, %v566_v23  ;;  %v1087_v2 = vpop.eup %1086 }
 0x22e   :  { %v632_v44 = vmul.f32 %v1473_v20, %v616_v42  ;;  %v589_v9 = vadd.f32 1.4214138, %v573_v17  ;;  %v560_v12 = vadd.f32 -1.4531521, %v544_v59  ;;  %v558_v19 = vadd.f32 -1.4531521, %v542_v63  ;;  %v1527_v55 = vpop.eup %1088 }
 0x22f   :  { %v743_v61 = vmul.f32 %v1069_v53, %v663_v11  ;;  %v639_v32 = vmul.f32 %v1479_v40, %v623_v51  ;;  %v661_v8 = vmul.f32 %v1465_v26, %v645_v28  ;;  %v598_v53 = vmul.f32 %v1496_v5, %v582_v21  ;;  %v1535_v42 = vpop.eup %1090 }
 0x230   :  { %v648_v36 = vadd.f32 0.2548296, %v632_v44  ;;  %v605_v26 = vmul.f32 %v1499_v54, %v589_v9  ;;  %v576_v0 = vmul.f32 %v1510_v48, %v560_v12  ;;  %v574_v41 = vmul.f32 %v1514_v52, %v558_v19 }
 0x231   :  { %v759_v13 = vsub.f32 1.0, %v743_v61  ;;  %v655_v14 = vadd.f32 0.2548296, %v639_v32  ;;  %v741_v27 = vmul.f32 %v1071_v58, %v661_v8  ;;  %v614_v39 = vadd.f32 -0.28449672, %v598_v53 }
 0x232   :  { %v664_v30 = vmul.f32 %v1473_v20, %v648_v36  ;;  %v621_v58 = vadd.f32 -0.28449672, %v605_v26  ;;  %v592_v51 = vadd.f32 1.4214138, %v576_v0  ;;  %v1538_v20 = vpop.eup %1092  ;;  %v590_v17 = vadd.f32 1.4214138, %v574_v41 }
 0x233   :  { %v791_v31 = vsub.f32 0.0, %v759_v13  ;;  %v671_v38 = vmul.f32 %v1479_v40, %v655_v14  ;;  %v757_v10 = vsub.f32 1.0, %v741_v27  ;;  %v630_v44 = vmul.f32 %v1496_v5, %v614_v39  ;;  %v1544_v21 = vpop.eup %1094 }
 0x234   :  { %v744_v11 = vmul.f32 %v1490_v47, %v664_v30  ;;  %v637_v32 = vmul.f32 %v1499_v54, %v621_v58  ;;  %v608_v8 = vmul.f32 %v1510_v48, %v592_v51  ;;  %v606_v36 = vmul.f32 %v1514_v52, %v590_v17 }
 0x235   :  { %v807_v23 = vsel %vm775_vm1, %v759_v13, %v791_v31  ;;  %v751_v28 = vmul.f32 %v1079_v16, %v671_v38  ;;  %v789_v59 = vsub.f32 0.0, %v757_v10  ;;  %v646_v47 = vadd.f32 0.2548296, %v630_v44  ;;  %v1554_v27 = vpop.eup %1096 }
 0x236   :  { %v839_v40 = vadd.f32 1.0, %v807_v23  ;;  %v760_v61 = vsub.f32 1.0, %v744_v11  ;;  %v653_v12 = vadd.f32 0.2548296, %v637_v32  ;;  %v624_v19 = vadd.f32 -0.28449672, %v608_v8  ;;  %v1016_v8 = vpop.f32.mrf.mxu0 }
 0x237   :  { %v767_v63 = vsub.f32 1.0, %v751_v28  ;;  %v805_v16 = vsel %vm773_vm2, %v757_v10, %v789_v59  ;;  %v662_v53 = vmul.f32 %v1496_v5, %v646_v47  ;;  %v622_v26 = vadd.f32 -0.28449672, %v606_v36 }
 0x238   :  { %v855_v6 = vmul.f32 %v839_v40, %v1430_v46  ;;  %v792_v9 = vsub.f32 0.0, %v760_v61  ;;  %v837_v13 = vadd.f32 1.0, %v805_v16  ;;  %v669_v45 = vmul.f32 %v1499_v54, %v653_v12 }
 0x239   :  { %v799_v14 = vsub.f32 0.0, %v767_v63  ;;  %v742_v5 = vmul.f32 %v1519_v37, %v662_v53  ;;  %v640_v15 = vmul.f32 %v1510_v48, %v624_v19  ;;  %v638_v54 = vmul.f32 %v1514_v52, %v622_v26 }
 0x23a   :  { %v984_v30 = vpack.c.bf16 %v855_v6, %v855_v6  ;;  %v808_v46 = vsel %vm776_vm4, %v760_v61, %v792_v9  ;;  %v853_v0 = vmul.f32 %v837_v13, %v1434_v49  ;;  %v749_v41 = vmul.f32 %v1087_v2, %v669_v45 }
 0x23b   :  { %v840_v31 = vadd.f32 1.0, %v808_v46  ;;  %v815_v38 = vsel %vm783_vm5, %v767_v63, %v799_v14  ;;  %v758_v11 = vsub.f32 1.0, %v742_v5  ;;  %v539_v18 = vmul.f32 1.0614054, %v1538_v20 }
 0x23c   :  { %936 = vst.msk [vmem:[%s1745_s5 + $0x8] sm:$0xf] %vm933_vm3, %v984_v30  ;;  %v847_v39 = vadd.f32 1.0, %v815_v38  ;;  %v982_v10 = vpack.c.bf16 %v853_v0, %v853_v0  ;;  %v765_v37 = vsub.f32 1.0, %v749_v41  ;;  %v656_v51 = vadd.f32 0.2548296, %v640_v15  ;;  %v1023_v0 = vpop.f32.mrf.mxu1 }
 0x23d   :  { %v856_v49 = vmul.f32 %v840_v31, %v1439_v29  ;;  %v654_v23 = vadd.f32 0.2548296, %v638_v54  ;;  %v790_v28 = vsub.f32 0.0, %v758_v11  ;;  %v555_v44 = vadd.f32 -1.4531521, %v539_v18  ;;  %v393_v31 = vpop.f32.mrf.mxu0 }
 0x23e   :  { %v863_v58 = vmul.f32 %v847_v39, %v1443_v56  ;;  %934 = vst.msk [vmem:[%s1745_s5] sm:$0xf] %vm933_vm3, %v982_v10  ;;  %v537_v29 = vmul.f32 1.0614054, %v1554_v27  ;;  %v797_v40 = vsub.f32 0.0, %v765_v37  ;;  %v672_v59 = vmul.f32 %v1510_v48, %v656_v51 }
 0x23f   :  { %v985_v2 = vpack.c.bf16 %v856_v49, %v856_v49  ;;  %v670_v56 = vmul.f32 %v1514_v52, %v654_v23  ;;  %v806_v61 = vsel %vm774_vm6, %v758_v11, %v790_v28  ;;  %v571_v32 = vmul.f32 %v1538_v20, %v555_v44  ;;  %v422_v23 = vpop.f32.mrf.mxu1 }
 0x240   :  { %v992_v17 = vpack.c.bf16 %v863_v58, %v863_v58  ;;  %v553_v63 = vadd.f32 -1.4531521, %v537_v29  ;;  %v697_v47 = vmul.f32 %v681_v43, %v1494_v4  ;;  %v838_v48 = vadd.f32 1.0, %v806_v61 }
 0x241   :  { %937 = vst.msk [vmem:[%s1745_s5 + $0xc] sm:$0xf] %vm933_vm3, %v985_v2  ;;  %v813_v52 = vsel %vm781_vm7, %v765_v37, %v797_v40  ;;  %v752_v24 = vmul.f32 %v1527_v55, %v672_v59  ;;  %v750_v36 = vmul.f32 %v1535_v42, %v670_v56  ;;  %v587_v16 = vadd.f32 1.4214138, %v571_v32  ;;  %v1024_v61 = vpop.f32.mrf.mxu1 }
 0x242   :  { %944 = vst.msk [vmem:[%s1745_s5 + $0x28] sm:$0xf] %vm933_vm3, %v992_v17  ;;  %v845_v6 = vadd.f32 1.0, %v813_v52  ;;  %v569_v9 = vmul.f32 %v1554_v27, %v553_v63  ;;  %v717_v12 = vmul.f32 1.442695, %v697_v47  ;;  %v854_v4 = vmul.f32 %v838_v48, %v1454_v25 }
 0x243   :  { %v768_v43 = vsub.f32 1.0, %v752_v24  ;;  %v766_v13 = vsub.f32 1.0, %v750_v36  ;;  %v1601_v14 = vadd.f32 %v1016_v8, %v1410_v3  ;;  %v603_v50 = vmul.f32 %v1538_v20, %v587_v16 }
 0x244   :  { %v861_v53 = vmul.f32 %v845_v6, %v1459_v7  ;;  %v585_v19 = vadd.f32 1.4214138, %v569_v9  ;;  %1098 = vpow2.f32 %v717_v12  ;;  %v983_v55 = vpack.c.bf16 %v854_v4, %v854_v4 }
 0x245   :  { %v800_v42 = vsub.f32 0.0, %v768_v43  ;;  %v798_v30 = vsub.f32 0.0, %v766_v13  ;;  %v1606_v46 = vmul.f32 0.70710677, %v1601_v14  ;;  %v619_v25 = vadd.f32 -0.28449672, %v603_v50 }
 0x246   :  { %v990_v45 = vpack.c.bf16 %v861_v53, %v861_v53  ;;  %v601_v26 = vmul.f32 %v1554_v27, %v585_v19  ;;  %935 = vst.msk [vmem:[%s1745_s5 + $0x4] sm:$0xf] %vm933_vm3, %v983_v55  ;;  %v830_v5 = vmul.f32 0.5, %v1446_v35  ;;  %v1624_v49 = vadd.f32 %v1023_v0, %v1410_v3 }
 0x247   :  { %v816_v7 = vsel %vm784_vm8, %v768_v43, %v800_v42  ;;  %v814_v38 = vsel %vm782_vm9, %v766_v13, %v798_v30  ;;  %v460_v39 = vand.u32 2147483647, %v1606_v46  ;;  %v635_v15 = vmul.f32 %v1538_v20, %v619_v25  ;;  %v425_v42 = vpop.f32.mrf.mxu1 }
 0x248   :  { %942 = vst.msk [vmem:[%s1745_s5 + $0x20] sm:$0xf] %vm933_vm3, %v990_v45  ;;  %v848_v62 = vadd.f32 1.0, %v816_v7  ;;  %v846_v41 = vadd.f32 1.0, %v814_v38  ;;  %v617_v54 = vadd.f32 -0.28449672, %v601_v26  ;;  %v1627_v60 = vadd.f32 %v1410_v3, %v393_v31 }
 0x249   :  { %v476_v10 = vmul.f32 0.3275911, %v460_v39  ;;  %v651_v18 = vadd.f32 0.2548296, %v635_v15  ;;  %v1632_v51 = vmul.f32 0.70710677, %v1624_v49  ;;  %v1650_v56 = vadd.f32 %v1410_v3, %v422_v23 }
 0x24a   :  { %v864_v35 = vmul.f32 %v848_v62, %v1468_v33  ;;  %v862_v11 = vmul.f32 %v846_v41, %v830_v5  ;;  %v633_v58 = vmul.f32 %v1554_v27, %v617_v54  ;;  %vm779_vm10 = vcmp.ge.f32.partialorder %v1471_v34, 0.0 }
 0x24b   :  { %v492_v37 = vadd.f32 1.0, %v476_v10  ;;  %v667_v44 = vmul.f32 %v1538_v20, %v651_v18  ;;  %v467_v17 = vand.u32 2147483647, %v1632_v51  ;;  %v1647_v20 = vmul.f32 0.70710677, %v1627_v60 }
 0x24c   :  { %v993_v2 = vpack.c.bf16 %v864_v35, %v864_v35  ;;  %v991_v28 = vpack.c.bf16 %v862_v11, %v862_v11  ;;  %v649_v29 = vadd.f32 0.2548296, %v633_v58  ;;  %v1654_v48 = vmul.f32 0.70710677, %v1650_v56 }
 0x24d   :  { %1100 = vrcp.f32 %v492_v37  ;;  %v747_v33 = vmul.f32 %v1544_v21, %v667_v44  ;;  %v483_v59 = vmul.f32 0.3275911, %v467_v17  ;;  %v458_v63 = vand.u32 2147483647, %v1647_v20 }
 0x24e   :  { %945 = vst.msk [vmem:[%s1745_s5 + $0x2c] sm:$0xf] %vm933_vm3, %v993_v2  ;;  %943 = vst.msk [vmem:[%s1745_s5 + $0x24] sm:$0xf] %vm933_vm3, %v991_v28  ;;  %v665_v40 = vmul.f32 %v1554_v27, %v649_v29  ;;  %v1657_v27 = vadd.f32 %v1024_v61, %v1410_v3  ;;  %v684_v36 = vsub.f32 0.0, %v460_v39  ;;  %v827_v4 = vmul.f32 0.5, %v1463_v22 }
 0x24f   :  { %v763_v32 = vsub.f32 1.0, %v747_v33  ;;  %v499_v8 = vadd.f32 1.0, %v483_v59  ;;  %v474_v24 = vmul.f32 0.3275911, %v458_v63  ;;  %v465_v6 = vand.u32 2147483647, %v1654_v48 }
 0x250   :  { %v1663_v50 = vmul.f32 0.70710677, %v1657_v27  ;;  %vm777_vm11 = vcmp.ge.f32.partialorder %v1487_v57, 0.0  ;;  %v700_v34 = vmul.f32 %v684_v36, %v460_v39  ;;  %v825_v45 = vmul.f32 0.5, %v1477_v1 }
 0x251   :  { %v1099_v47 = vpop.eup %1098  ;;  %v795_v52 = vsub.f32 0.0, %v763_v32  ;;  %1102 = vrcp.f32 %v499_v8  ;;  %v490_v12 = vadd.f32 1.0, %v474_v24  ;;  %v481_v13 = vmul.f32 0.3275911, %v465_v6 }
 0x252   :  { %v745_v21 = vmul.f32 %v1099_v47, %v665_v40  ;;  %v468_v25 = vand.u32 2147483647, %v1663_v50  ;;  %v691_v0 = vsub.f32 0.0, %v467_v17  ;;  %v1669_v38 = vadd.f32 %v1410_v3, %v425_v42 }
 0x253   :  { %v811_v16 = vsel %vm779_vm10, %v763_v32, %v795_v52  ;;  %1104 = vrcp.f32 %v490_v12  ;;  %v497_v55 = vadd.f32 1.0, %v481_v13  ;;  %v723_v39 = vmul.f32 1.442695, %v700_v34 }
 0x254   :  { %v761_v9 = vsub.f32 1.0, %v745_v21  ;;  %v843_v43 = vadd.f32 1.0, %v811_v16  ;;  %v484_v7 = vmul.f32 0.3275911, %v468_v25  ;;  %v682_v1 = vsub.f32 0.0, %v458_v63 }
 0x255   :  { %1106 = vrcp.f32 %v497_v55  ;;  %v1676_v41 = vmul.f32 0.70710677, %v1669_v38  ;;  %v707_v10 = vmul.f32 %v691_v0, %v467_v17  ;;  %v689_v11 = vsub.f32 0.0, %v465_v6 }
 0x256   :  { %v793_v53 = vsub.f32 0.0, %v761_v9  ;;  %v859_v19 = vmul.f32 %v843_v43, %v827_v4  ;;  %v500_v62 = vadd.f32 1.0, %v484_v7  ;;  %v698_v58 = vmul.f32 %v682_v1, %v458_v63 }
 0x257   :  { %v466_v3 = vand.u32 2147483647, %v1676_v41  ;;  %v737_v28 = vmul.f32 1.442695, %v707_v10  ;;  %v705_v40 = vmul.f32 %v689_v11, %v465_v6  ;;  %v692_v32 = vsub.f32 0.0, %v468_v25 }
 0x258   :  { %v809_v30 = vsel %vm777_vm11, %v761_v9, %v793_v53  ;;  %v988_v26 = vpack.c.bf16 %v859_v19, %v859_v19  ;;  %1108 = vrcp.f32 %v500_v62  ;;  %v719_v61 = vmul.f32 1.442695, %v698_v58 }
 0x259   :  { %v841_v22 = vadd.f32 1.0, %v809_v30  ;;  %1110 = vpow2.f32 %v723_v39  ;;  %v482_v37 = vmul.f32 0.3275911, %v466_v3  ;;  %v733_v16 = vmul.f32 1.442695, %v705_v40 }
 0x25a   :  { %v1101_v31 = vpop.eup %1100  ;;  %940 = vst.msk [vmem:[%s1745_s5 + $0x18] sm:$0xf] %vm933_vm3, %v988_v26  ;;  %v708_v12 = vmul.f32 %v692_v32, %v468_v25  ;;  %v690_v13 = vsub.f32 0.0, %v466_v3  ;;  %vm780_vm12 = vcmp.ge.f32.partialorder %v1606_v46, 0.0  ;;  %vm787_vm13 = vcmp.ge.f32.partialorder %v1632_v51, 0.0 }
 0x25b   :  { %v857_v57 = vmul.f32 %v841_v22, %v825_v45  ;;  %v540_v5 = vmul.f32 1.0614054, %v1101_v31  ;;  %v498_v44 = vadd.f32 1.0, %v482_v37  ;;  %vm778_vm14 = vcmp.ge.f32.partialorder %v1647_v20, 0.0 }
 0x25c   :  { %v739_v22 = vmul.f32 1.442695, %v708_v12  ;;  %vm785_vm15 = vcmp.ge.f32.partialorder %v1654_v48, 0.0  ;;  %v833_v20 = vmul.f32 0.5, %v1650_v56  ;;  %vm788_vm0 = vcmp.ge.f32.partialorder %v1663_v50, 0.0 }
 0x25d   :  { %v986_v15 = vpack.c.bf16 %v857_v57, %v857_v57  ;;  %v556_v54 = vadd.f32 -1.4531521, %v540_v5  ;;  %1112 = vrcp.f32 %v498_v44  ;;  %v706_v57 = vmul.f32 %v690_v13, %v466_v3 }
 0x25e   :  { %v1103_v18 = vpop.eup %1102  ;;  %1114 = vpow2.f32 %v737_v28  ;;  %v835_v13 = vmul.f32 0.5, %v1624_v49  ;;  %v836_v56 = vmul.f32 0.5, %v1657_v27  ;;  %vm786_vm1 = vcmp.ge.f32.partialorder %v1676_v41, 0.0 }
 0x25f   :  { %938 = vst.msk [vmem:[%s1745_s5 + $0x10] sm:$0xf] %vm933_vm3, %v986_v15  ;;  %v572_v35 = vmul.f32 %v1101_v31, %v556_v54  ;;  %v547_v2 = vmul.f32 1.0614054, %v1103_v18  ;;  %1116 = vpow2.f32 %v719_v61  ;;  %v735_v37 = vmul.f32 1.442695, %v706_v57 }
 0x260   :  { %v1105_v29 = vpop.eup %1104  ;;  %1118 = vpow2.f32 %v733_v16  ;;  %v834_v27 = vmul.f32 0.5, %v1669_v38 }
 0x261   :  { %v588_v23 = vadd.f32 1.4214138, %v572_v35  ;;  %v563_v33 = vadd.f32 -1.4531521, %v547_v2  ;;  %v538_v59 = vmul.f32 1.0614054, %v1105_v29  ;;  %1120 = vpow2.f32 %v739_v22 }
 0x262   :  { %v1683_v52 = vpop.eup %1106  ;;  %1122 = vpow2.f32 %v735_v37 }
 0x263   :  { %v604_v17 = vmul.f32 %v1101_v31, %v588_v23  ;;  %v579_v8 = vmul.f32 %v1103_v18, %v563_v33  ;;  %v554_v21 = vadd.f32 -1.4531521, %v538_v59  ;;  %v545_v36 = vmul.f32 1.0614054, %v1683_v52 }
 0x265   :  { %v620_v47 = vadd.f32 -0.28449672, %v604_v17  ;;  %v595_v24 = vadd.f32 1.4214138, %v579_v8  ;;  %v570_v9 = vmul.f32 %v1105_v29, %v554_v21  ;;  %v561_v43 = vadd.f32 -1.4531521, %v545_v36  ;;  %v1686_v19 = vpop.eup %1108 }
 0x266   :  { %v1111_v30 = vpop.eup %1110  ;;  %v548_v26 = vmul.f32 1.0614054, %v1686_v19  ;;  %v828_v17 = vmul.f32 0.5, %v1601_v14 }
 0x267   :  { %v636_v63 = vmul.f32 %v1101_v31, %v620_v47  ;;  %v611_v6 = vmul.f32 %v1103_v18, %v595_v24  ;;  %v586_v53 = vadd.f32 1.4214138, %v570_v9  ;;  %v577_v42 = vmul.f32 %v1683_v52, %v561_v43 }
 0x268   :  { %v564_v39 = vadd.f32 -1.4531521, %v548_v26 }
 0x269   :  { %v652_v4 = vadd.f32 0.2548296, %v636_v63  ;;  %v627_v55 = vadd.f32 -0.28449672, %v611_v6  ;;  %v602_v45 = vmul.f32 %v1105_v29, %v586_v53  ;;  %v593_v25 = vadd.f32 1.4214138, %v577_v42 }
 0x26a   :  { %v580_v54 = vmul.f32 %v1686_v19, %v564_v39  ;;  %v1693_v10 = vpop.eup %1112 }
 0x26b   :  { %v668_v34 = vmul.f32 %v1101_v31, %v652_v4  ;;  %v643_v7 = vmul.f32 %v1103_v18, %v627_v55  ;;  %v618_v5 = vadd.f32 -0.28449672, %v602_v45  ;;  %v609_v15 = vmul.f32 %v1683_v52, %v593_v25  ;;  %v1115_v23 = vpop.eup %1114 }
 0x26c   :  { %v596_v2 = vadd.f32 1.4214138, %v580_v54  ;;  %v546_v28 = vmul.f32 1.0614054, %v1693_v10  ;;  %v1117_v47 = vpop.eup %1116 }
 0x26d   :  { %v748_v0 = vmul.f32 %v1111_v30, %v668_v34  ;;  %v659_v62 = vadd.f32 0.2548296, %v643_v7  ;;  %v634_v31 = vmul.f32 %v1105_v29, %v618_v5  ;;  %v625_v58 = vadd.f32 -0.28449672, %v609_v15  ;;  %v1119_v9 = vpop.eup %1118 }
 0x26e   :  { %v612_v61 = vmul.f32 %v1686_v19, %v596_v2  ;;  %v562_v32 = vadd.f32 -1.4531521, %v546_v28  ;;  %v1121_v49 = vpop.eup %1120 }
 0x26f   :  { %v764_v1 = vsub.f32 1.0, %v748_v0  ;;  %v675_v11 = vmul.f32 %v1103_v18, %v659_v62  ;;  %v650_v3 = vadd.f32 0.2548296, %v634_v31  ;;  %v641_v46 = vmul.f32 %v1683_v52, %v625_v58  ;;  %v1123_v54 = vpop.eup %1122 }
 0x270   :  { %v628_v24 = vadd.f32 -0.28449672, %v612_v61  ;;  %v578_v36 = vmul.f32 %v1693_v10, %v562_v32  ;;  %v826_v0 = vmul.f32 0.5, %v1627_v60 }
 0x271   :  { %v796_v35 = vsub.f32 0.0, %v764_v1  ;;  %v755_v33 = vmul.f32 %v1115_v23, %v675_v11  ;;  %v666_v59 = vmul.f32 %v1105_v29, %v650_v3  ;;  %v657_v8 = vadd.f32 0.2548296, %v641_v46 }
 0x272   :  { %v644_v4 = vmul.f32 %v1686_v19, %v628_v24  ;;  %v594_v6 = vadd.f32 1.4214138, %v578_v36 }
 0x273   :  { %v812_v44 = vsel %vm780_vm12, %v764_v1, %v796_v35  ;;  %v771_v18 = vsub.f32 1.0, %v755_v33  ;;  %v746_v63 = vmul.f32 %v1117_v47, %v666_v59  ;;  %v673_v16 = vmul.f32 %v1683_v52, %v657_v8 }
 0x274   :  { %v844_v40 = vadd.f32 1.0, %v812_v44  ;;  %v660_v55 = vadd.f32 0.2548296, %v644_v4  ;;  %v610_v52 = vmul.f32 %v1693_v10, %v594_v6 }
 0x275   :  { %v803_v14 = vsub.f32 0.0, %v771_v18  ;;  %v762_v29 = vsub.f32 1.0, %v746_v63  ;;  %v753_v53 = vmul.f32 %v1119_v9, %v673_v16 }
 0x276   :  { %v860_v21 = vmul.f32 %v844_v40, %v828_v17  ;;  %v676_v26 = vmul.f32 %v1686_v19, %v660_v55  ;;  %v626_v22 = vadd.f32 -0.28449672, %v610_v52 }
 0x277   :  { %v819_v43 = vsel %vm787_vm13, %v771_v18, %v803_v14  ;;  %v794_v51 = vsub.f32 0.0, %v762_v29  ;;  %v769_v42 = vsub.f32 1.0, %v753_v53 }
 0x278   :  { %v989_v12 = vpack.c.bf16 %v860_v21, %v860_v21  ;;  %v851_v34 = vadd.f32 1.0, %v819_v43  ;;  %v756_v5 = vmul.f32 %v1121_v49, %v676_v26  ;;  %v642_v39 = vmul.f32 %v1693_v10, %v626_v22 }
 0x279   :  { %v810_v45 = vsel %vm778_vm14, %v762_v29, %v794_v51  ;;  %v801_v25 = vsub.f32 0.0, %v769_v42 }
 0x27a   :  { %941 = vst.msk [vmem:[%s1745_s5 + $0x1c] sm:$0xf] %vm933_vm3, %v989_v12  ;;  %v867_v30 = vmul.f32 %v851_v34, %v835_v13  ;;  %v842_v7 = vadd.f32 1.0, %v810_v45  ;;  %v772_v15 = vsub.f32 1.0, %v756_v5  ;;  %v658_v60 = vadd.f32 0.2548296, %v642_v39 }
 0x27b   :  { %v817_v62 = vsel %vm785_vm15, %v769_v42, %v801_v25 }
 0x27c   :  { %v996_v57 = vpack.c.bf16 %v867_v30, %v867_v30  ;;  %v858_v1 = vmul.f32 %v842_v7, %v826_v0  ;;  %v849_v19 = vadd.f32 1.0, %v817_v62  ;;  %v804_v11 = vsub.f32 0.0, %v772_v15 }
 0x27d   :  { %v674_v48 = vmul.f32 %v1693_v10, %v658_v60 }
 0x27e   :  { %948 = vst.msk [vmem:[%s1745_s5 + $0x38] sm:$0xf] %vm933_vm3, %v996_v57  ;;  %v987_v31 = vpack.c.bf16 %v858_v1, %v858_v1  ;;  %v865_v35 = vmul.f32 %v849_v19, %v833_v20  ;;  %v820_v37 = vsel %vm788_vm0, %v772_v15, %v804_v11 }
 0x27f   :  { %v754_v23 = vmul.f32 %v1123_v54, %v674_v48  ;;  %v852_v3 = vadd.f32 1.0, %v820_v37 }
 0x280   :  { %939 = vst.msk [vmem:[%s1745_s5 + $0x14] sm:$0xf] %vm933_vm3, %v987_v31  ;;  %v994_v58 = vpack.c.bf16 %v865_v35, %v865_v35 }
 0x281   :  { %v770_v2 = vsub.f32 1.0, %v754_v23  ;;  %v868_v10 = vmul.f32 %v852_v3, %v836_v56 }
 0x282   :  { %946 = vst.msk [vmem:[%s1745_s5 + $0x30] sm:$0xf] %vm933_vm3, %v994_v58 }
 0x283   :  { %v802_v28 = vsub.f32 0.0, %v770_v2  ;;  %v997_v44 = vpack.c.bf16 %v868_v10, %v868_v10 }
 0x285   :  { %v818_v17 = vsel %vm786_vm1, %v770_v2, %v802_v28  ;;  %949 = vst.msk [vmem:[%s1745_s5 + $0x3c] sm:$0xf] %vm933_vm3, %v997_v44 }
 0x286   :  { %v850_v50 = vadd.f32 1.0, %v818_v17 }
 0x288   :  { %v866_v33 = vmul.f32 %v850_v50, %v834_v27 }
 0x28a   :  { %v995_v46 = vpack.c.bf16 %v866_v33, %v866_v33 }
 0x28c   :  { %947 = vst.msk [vmem:[%s1745_s5 + $0x34] sm:$0xf] %vm933_vm3, %v995_v46 }

// kernel: _lambda_.35
= control target key start
LH: loop header
LB: loop body
LE: loop exit
PB: predicated region body
PF: predicated region fallthrough
CT: control target
= control target key end

     0   :  { %vm25_vm0 = vcmask 523264   ;;  %vm197_vm1 = vcmask 261120   ;;  %s330_s0 = inlined_call_operand.vmem [shape: f32[32,64], index: 0, kind: input, shape index: {}]   ;;  %s331_s3 = inlined_call_operand.vmem [shape: bf16[64,32], index: 3, kind: input, shape index: {}]   ;;  %s332_s1 = inlined_call_operand.vmem [shape: f32[1,64], index: 1, kind: input, shape index: {}]   ;;  %s333_s2 = inlined_call_operand.vmem [shape: f32[1,64], index: 2, kind: input, shape index: {}]   ;;  %s334_s4 = inlined_call_operand.vmem [shape: f32[1,32], index: 4, kind: input, shape index: {}]   ;;  %s335_s5 = inlined_call_operand.vmem [shape: f32[32,32], index: 5, kind: output, shape index: {}]  }
   0x1   :  { %v21_v0 = vld [vmem:[%s330_s0] sm:$0xff]  ;;  %v23_v1 = vld [vmem:[%s330_s0 + $0x10] sm:$0xff]  ;;  %v22_v2 = vld [vmem:[%s330_s0 + $0x8] sm:$0xff] }
   0x2   :  { %v26_v3 = vsel %vm25_vm0, %v21_v0, 0.0  ;;  %v32_v4 = vsel %vm25_vm0, %v23_v1, 0.0  ;;  %v24_v5 = vld [vmem:[%s330_s0 + $0x18] sm:$0xff]  ;;  %v29_v6 = vsel %vm25_vm0, %v22_v2, 0.0  ;;  %v234_v29 = vld [vmem:[%s331_s3 + $0x10] sm:$0xff]   ;;  %v235_v30 = vld [vmem:[%s331_s3 + $0x8] sm:$0xff]  }
   0x3   :  { %27 = vadd.xlane.f32.xlu0 %v26_v3  ;;  %33 = vadd.xlane.f32.xlu1 %v32_v4  ;;  %v35_v7 = vsel %vm25_vm0, %v24_v5, 0.0  ;;  %v233_v28 = vld [vmem:[%s331_s3 + $0x18] sm:$0xff]   ;;  %v236_v31 = vld [vmem:[%s331_s3] sm:$0xff]  }
   0x4   :  { %221 = vmatprep.subr.bf16.mxu0 %v233_v28  ;;  %v206_v46 = vld [vmem:[%s332_s1] ss:$0 sm:$0xff] }
   0x5   :  { %222 = vmatpush3.bf16.msra.mxu0 %v233_v28  ;;  %v207_v51 = vld [vmem:[%s333_s2] ss:$0 sm:$0xff] }
   0x6   :  { %223 = vmatprep.subr.bf16.mxu0 %v234_v29 }
   0x7   :  { %30 = vadd.xlane.f32.xlu0 %v29_v6  ;;  %36 = vadd.xlane.f32.xlu1 %v35_v7 }
   0x9   :  { %224 = vmatpush3.bf16.msra.mxu0 %v234_v29 }
   0xa   :  { %225 = vmatprep.subr.bf16.mxu0 %v235_v30 }
   0xd   :  { %226 = vmatpush3.bf16.msra.mxu0 %v235_v30 }
   0xe   :  { %227 = vmatprep.subr.bf16.mxu0 %v236_v31 }
  0x11   :  { %228 = vmatpush3.bf16.msra.mxu0 %v236_v31 }
  0x8c   :  { %v28_v8 = vpop.xlane.xlu0 %27  ;;  %v34_v9 = vpop.xlane.xlu1 %33 }
  0x8d   :  { %v39_v10 = vmul.f32 0.015625, %v28_v8  ;;  %v41_v11 = vmul.f32 0.015625, %v34_v9 }
  0x8f   :  { %v43_v12 = vsub.f32 %v21_v0, %v39_v10  ;;  %v45_v13 = vsub.f32 %v23_v1, %v41_v11  ;;  %v208_v0 = vld [vmem:[%s334_s4] ss:$0 sm:$0xff] }
  0x90   :  { %v31_v14 = vpop.xlane.xlu0 %30  ;;  %v37_v15 = vpop.xlane.xlu1 %36 }
  0x91   :  { %v40_v16 = vmul.f32 0.015625, %v31_v14  ;;  %v42_v17 = vmul.f32 0.015625, %v37_v15  ;;  %v47_v18 = vmul.f32 %v43_v12, %v43_v12  ;;  %v49_v19 = vmul.f32 %v45_v13, %v45_v13 }
  0x93   :  { %v44_v20 = vsub.f32 %v22_v2, %v40_v16  ;;  %v46_v21 = vsub.f32 %v24_v5, %v42_v17  ;;  %v51_v22 = vsel %vm25_vm0, %v47_v18, 0.0  ;;  %v57_v23 = vsel %vm25_vm0, %v49_v19, 0.0 }
  0x94   :  { %52 = vadd.xlane.f32.xlu0 %v51_v22 }
  0x95   :  { %v48_v24 = vmul.f32 %v44_v20, %v44_v20  ;;  %v50_v25 = vmul.f32 %v46_v21, %v46_v21 }
  0x97   :  { %v54_v26 = vsel %vm25_vm0, %v48_v24, 0.0  ;;  %v60_v27 = vsel %vm25_vm0, %v50_v25, 0.0 }
  0x98   :  { %58 = vadd.xlane.f32.xlu0 %v57_v23  ;;  %55 = vadd.xlane.f32.xlu1 %v54_v26 }
  0x9c   :  { %61 = vadd.xlane.f32.xlu1 %v60_v27 }
 0x11d   :  { %v53_v32 = vpop.xlane.xlu0 %52 }
 0x11e   :  { %v63_v33 = vmul.f32 0.015625, %v53_v32 }
 0x120   :  { %v67_v34 = vadd.f32 1e-05, %v63_v33 }
 0x121   :  { %v56_v35 = vpop.xlane.xlu1 %55  ;;  %v59_v36 = vpop.xlane.xlu0 %58 }
 0x122   :  { %237 = vrsqrt.f32 %v67_v34  ;;  %v64_v37 = vmul.f32 0.015625, %v56_v35  ;;  %v65_v38 = vmul.f32 0.015625, %v59_v36 }
 0x124   :  { %v68_v39 = vadd.f32 1e-05, %v64_v37  ;;  %v69_v40 = vadd.f32 1e-05, %v65_v38 }
 0x125   :  { %v62_v41 = vpop.xlane.xlu1 %61 }
 0x126   :  { %239 = vrsqrt.f32 %v68_v39  ;;  %v66_v42 = vmul.f32 0.015625, %v62_v41 }
 0x127   :  { %241 = vrsqrt.f32 %v69_v40 }
 0x128   :  { %v70_v43 = vadd.f32 1e-05, %v66_v42 }
 0x12a   :  { %243 = vrsqrt.f32 %v70_v43 }
 0x12f   :  { %v238_v44 = vpop.eup %237 }
 0x130   :  { %v75_v45 = vmul.f32 %v238_v44, %v43_v12 }
 0x132   :  { %v86_v50 = vmul.f32 %v206_v46, %v75_v45 }
 0x133   :  { %v240_v47 = vpop.eup %239 }
 0x134   :  { %v242_v48 = vpop.eup %241  ;;  %v76_v49 = vmul.f32 %v240_v47, %v44_v20  ;;  %v97_v55 = vadd.f32 %v207_v51, %v86_v50 }
 0x135   :  { %v77_v52 = vmul.f32 %v242_v48, %v45_v13 }
 0x136   :  { %v87_v53 = vmul.f32 %v206_v46, %v76_v49 }
 0x137   :  { %v244_v54 = vpop.eup %243  ;;  %v88_v58 = vmul.f32 %v206_v46, %v77_v52 }
 0x138   :  { %v98_v56 = vadd.f32 %v207_v51, %v87_v53  ;;  %v78_v57 = vmul.f32 %v244_v54, %v46_v21 }
 0x139   :  { %v99_v61 = vadd.f32 %v207_v51, %v88_v58 }
 0x13a   :  { %v101_v59 = vpack.c.bf16 %v98_v56, %v97_v55  ;;  %v89_v60 = vmul.f32 %v206_v46, %v78_v57 }
 0x13c   :  { %229 = vmatprep.mubr.msk.bf16.mxu0 %vm25_vm0, %v101_v59  ;;  %v100_v62 = vadd.f32 %v207_v51, %v89_v60 }
 0x13e   :  { %v102_v63 = vpack.c.bf16 %v100_v62, %v99_v61 }
 0x140   :  { %230 = vmatmul.mubr.msk.bf16.vlgmr.msra.gmra.mxu0 %vm25_vm0, %v102_v63 }
 0x200   :  { %v231_v1 = vpop.f32.mrf.mxu0 }
 0x201   :  { %v191_v2 = vadd.f32 %v231_v1, %v208_v0 }
 0x202   :  { %v182_v3 = vpop.f32.mrf.mxu0 }
 0x203   :  { %200 = vst.msk [vmem:[%s335_s5 + $0x10] sm:$0xff] %vm197_vm1, %v191_v2  ;;  %v183_v4 = vadd.f32 %v208_v0, %v182_v3 }
 0x204   :  { %v232_v5 = vpop.f32.mrf.mxu0 }
 0x205   :  { %198 = vst.msk [vmem:[%s335_s5] sm:$0xff] %vm197_vm1, %v183_v4  ;;  %v194_v6 = vadd.f32 %v232_v5, %v208_v0 }
 0x206   :  { %v185_v7 = vpop.f32.mrf.mxu0 }
 0x207   :  { %201 = vst.msk [vmem:[%s335_s5 + $0x18] sm:$0xff] %vm197_vm1, %v194_v6  ;;  %v186_v8 = vadd.f32 %v208_v0, %v185_v7 }
 0x209   :  { %199 = vst.msk [vmem:[%s335_s5 + $0x8] sm:$0xff] %vm197_vm1, %v186_v8 }

// kernel: _lambda_.36
= control target key start
LH: loop header
LB: loop body
LE: loop exit
PB: predicated region body
PF: predicated region fallthrough
CT: control target
= control target key end

     0   :  { %vm25_vm0 = vcmask 261120   ;;  %vm197_vm1 = vcmask 781312   ;;  %s322_s0 = inlined_call_operand.vmem [shape: f32[32,32], index: 0, kind: input, shape index: {}]   ;;  %s323_s3 = inlined_call_operand.vmem [shape: bf16[32,96], index: 3, kind: input, shape index: {}]   ;;  %s324_s1 = inlined_call_operand.vmem [shape: f32[1,32], index: 1, kind: input, shape index: {}]   ;;  %s325_s2 = inlined_call_operand.vmem [shape: f32[1,32], index: 2, kind: input, shape index: {}]   ;;  %s326_s4 = inlined_call_operand.vmem [shape: f32[1,96], index: 4, kind: input, shape index: {}]   ;;  %s327_s5 = inlined_call_operand.vmem [shape: bf16[32,96], index: 5, kind: output, shape index: {}]  }
   0x1   :  { %v21_v0 = vld [vmem:[%s322_s0] sm:$0xff]  ;;  %v23_v1 = vld [vmem:[%s322_s0 + $0x10] sm:$0xff]  ;;  %v22_v2 = vld [vmem:[%s322_s0 + $0x8] sm:$0xff] }
   0x2   :  { %v26_v3 = vsel %vm25_vm0, %v21_v0, 0.0  ;;  %v32_v4 = vsel %vm25_vm0, %v23_v1, 0.0  ;;  %v24_v5 = vld [vmem:[%s322_s0 + $0x18] sm:$0xff]  ;;  %v29_v6 = vsel %vm25_vm0, %v22_v2, 0.0  ;;  %v233_v28 = vld [vmem:[%s323_s3 + $0x8] sm:$0xff]   ;;  %v234_v29 = vld [vmem:[%s323_s3] sm:$0xff]  }
   0x3   :  { %27 = vadd.xlane.f32.xlu0 %v26_v3  ;;  %33 = vadd.xlane.f32.xlu1 %v32_v4  ;;  %v35_v7 = vsel %vm25_vm0, %v24_v5, 0.0  ;;  %v206_v44 = vld [vmem:[%s324_s1] ss:$0 sm:$0xff] }
   0x4   :  { %225 = vmatprep.subr.bf16.mxu0 %v233_v28  ;;  %v207_v49 = vld [vmem:[%s325_s2] ss:$0 sm:$0xff] }
   0x5   :  { %226 = vmatpush3.bf16.msra.mxu0 %v233_v28  ;;  %v208_v62 = vld [vmem:[%s326_s4] ss:$0 sm:$0xff] }
   0x6   :  { %227 = vmatprep.subr.bf16.mxu0 %v234_v29 }
   0x7   :  { %30 = vadd.xlane.f32.xlu0 %v29_v6  ;;  %36 = vadd.xlane.f32.xlu1 %v35_v7 }
   0x9   :  { %228 = vmatpush3.bf16.msra.mxu0 %v234_v29 }
  0x8c   :  { %v28_v8 = vpop.xlane.xlu0 %27  ;;  %v34_v9 = vpop.xlane.xlu1 %33 }
  0x8d   :  { %v39_v10 = vmul.f32 0.03125, %v28_v8  ;;  %v41_v11 = vmul.f32 0.03125, %v34_v9 }
  0x8f   :  { %v43_v12 = vsub.f32 %v21_v0, %v39_v10  ;;  %v45_v13 = vsub.f32 %v23_v1, %v41_v11 }
  0x90   :  { %v31_v14 = vpop.xlane.xlu0 %30  ;;  %v37_v15 = vpop.xlane.xlu1 %36 }
  0x91   :  { %v40_v16 = vmul.f32 0.03125, %v31_v14  ;;  %v42_v17 = vmul.f32 0.03125, %v37_v15  ;;  %v47_v18 = vmul.f32 %v43_v12, %v43_v12  ;;  %v49_v19 = vmul.f32 %v45_v13, %v45_v13 }
  0x93   :  { %v44_v20 = vsub.f32 %v22_v2, %v40_v16  ;;  %v46_v21 = vsub.f32 %v24_v5, %v42_v17  ;;  %v51_v22 = vsel %vm25_vm0, %v47_v18, 0.0  ;;  %v57_v23 = vsel %vm25_vm0, %v49_v19, 0.0 }
  0x94   :  { %52 = vadd.xlane.f32.xlu0 %v51_v22 }
  0x95   :  { %v48_v24 = vmul.f32 %v44_v20, %v44_v20  ;;  %v50_v25 = vmul.f32 %v46_v21, %v46_v21 }
  0x97   :  { %v54_v26 = vsel %vm25_vm0, %v48_v24, 0.0  ;;  %v60_v27 = vsel %vm25_vm0, %v50_v25, 0.0 }
  0x98   :  { %58 = vadd.xlane.f32.xlu0 %v57_v23  ;;  %55 = vadd.xlane.f32.xlu1 %v54_v26 }
  0x9c   :  { %61 = vadd.xlane.f32.xlu1 %v60_v27 }
 0x11d   :  { %v53_v30 = vpop.xlane.xlu0 %52 }
 0x11e   :  { %v63_v31 = vmul.f32 0.03125, %v53_v30 }
 0x120   :  { %v67_v32 = vadd.f32 1e-05, %v63_v31 }
 0x121   :  { %v56_v33 = vpop.xlane.xlu1 %55  ;;  %v59_v34 = vpop.xlane.xlu0 %58 }
 0x122   :  { %235 = vrsqrt.f32 %v67_v32  ;;  %v64_v35 = vmul.f32 0.03125, %v56_v33  ;;  %v65_v36 = vmul.f32 0.03125, %v59_v34 }
 0x124   :  { %v68_v37 = vadd.f32 1e-05, %v64_v35  ;;  %v69_v38 = vadd.f32 1e-05, %v65_v36 }
 0x125   :  { %v62_v39 = vpop.xlane.xlu1 %61 }
 0x126   :  { %237 = vrsqrt.f32 %v68_v37  ;;  %v66_v40 = vmul.f32 0.03125, %v62_v39 }
 0x127   :  { %239 = vrsqrt.f32 %v69_v38 }
 0x128   :  { %v70_v41 = vadd.f32 1e-05, %v66_v40 }
 0x12a   :  { %241 = vrsqrt.f32 %v70_v41 }
 0x12f   :  { %v236_v42 = vpop.eup %235 }
 0x130   :  { %v75_v43 = vmul.f32 %v236_v42, %v43_v12 }
 0x132   :  { %v86_v48 = vmul.f32 %v206_v44, %v75_v43 }
 0x133   :  { %v238_v45 = vpop.eup %237 }
 0x134   :  { %v240_v46 = vpop.eup %239  ;;  %v76_v47 = vmul.f32 %v238_v45, %v44_v20  ;;  %v97_v53 = vadd.f32 %v207_v49, %v86_v48 }
 0x135   :  { %v77_v50 = vmul.f32 %v240_v46, %v45_v13 }
 0x136   :  { %v87_v51 = vmul.f32 %v206_v44, %v76_v47 }
 0x137   :  { %v242_v52 = vpop.eup %241  ;;  %v88_v56 = vmul.f32 %v206_v44, %v77_v50 }
 0x138   :  { %v98_v54 = vadd.f32 %v207_v49, %v87_v51  ;;  %v78_v55 = vmul.f32 %v242_v52, %v46_v21 }
 0x139   :  { %v99_v59 = vadd.f32 %v207_v49, %v88_v56 }
 0x13a   :  { %v101_v57 = vpack.c.bf16 %v98_v54, %v97_v53  ;;  %v89_v58 = vmul.f32 %v206_v44, %v78_v55 }
 0x13c   :  { %229 = vmatprep.mubr.msk.bf16.mxu0 %vm25_vm0, %v101_v57  ;;  %v100_v60 = vadd.f32 %v207_v49, %v89_v58 }
 0x13e   :  { %v102_v61 = vpack.c.bf16 %v100_v60, %v99_v59 }
 0x140   :  { %230 = vmatmul.mubr.msk.bf16.vlgmr.msra.gmra.mxu0 %vm25_vm0, %v102_v61 }
 0x200   :  { %v231_v63 = vpop.f32.mrf.mxu0 }
 0x201   :  { %v175_v0 = vadd.f32 %v231_v63, %v208_v62 }
 0x202   :  { %v166_v1 = vpop.f32.mrf.mxu0 }
 0x203   :  { %v219_v2 = vpack.c.bf16 %v175_v0, %v175_v0  ;;  %v167_v3 = vadd.f32 %v208_v62, %v166_v1 }
 0x204   :  { %v232_v4 = vpop.f32.mrf.mxu0 }
 0x205   :  { %200 = vst.msk [vmem:[%s327_s5 + $0x8] sm:$0xf] %vm197_vm1, %v219_v2  ;;  %v217_v5 = vpack.c.bf16 %v167_v3, %v167_v3  ;;  %v178_v6 = vadd.f32 %v232_v4, %v208_v62 }
 0x206   :  { %v169_v7 = vpop.f32.mrf.mxu0 }
 0x207   :  { %198 = vst.msk [vmem:[%s327_s5] sm:$0xf] %vm197_vm1, %v217_v5  ;;  %v220_v8 = vpack.c.bf16 %v178_v6, %v178_v6  ;;  %v170_v9 = vadd.f32 %v208_v62, %v169_v7 }
 0x209   :  { %201 = vst.msk [vmem:[%s327_s5 + $0xc] sm:$0xf] %vm197_vm1, %v220_v8  ;;  %v218_v10 = vpack.c.bf16 %v170_v9, %v170_v9 }
 0x20b   :  { %199 = vst.msk [vmem:[%s327_s5 + $0x4] sm:$0xf] %vm197_vm1, %v218_v10 }

// kernel: _lambda_.31
= control target key start
LH: loop header
LB: loop body
LE: loop exit
PB: predicated region body
PF: predicated region fallthrough
CT: control target
= control target key end

     0   :  { %v2770_v1 = vmov 0.0   ;;  %vm2771_vm0 = vmmov 0   ;;  %s2772_s13 = smov 112   ;;  %s2773_s26 = smov 96   ;;  %vm67_vm1 = vcmask 64512   ;;  %vm525_vm2 = vcmask 130048   ;;  %s3619_s0 = inlined_call_operand.vmem [shape: bf16[8,16,48], index: 0, kind: input, shape index: {}]   ;;  %s3620_s1 = inlined_call_operand.vmem [shape: f32[8,2,16,16], index: 1, kind: input, shape index: {}]   ;;  %s3621_s2 = inlined_call_operand.vmem [shape: bf16[8,16,16], index: 2, kind: output, shape index: {}]  }
   0x1   :  { %v2796_v0 = vld [vmem:[%s3619_s0] sm:$0xff]   ;;  %2387 = vmatprep.subr.bf16.mxu0 %v2770_v1  ;;  %2393 = vmatprep.subr.bf16.mxu1 %v2770_v1  ;;  %v2803_v2 = vld [vmem:[%s3619_s0 + $0x8] sm:$0xff]   ;;  %v2813_v3 = vld [vmem:[%s3619_s0 + $0x10] sm:$0xff]   ;;  %s2775_s4 = smov 120   ;;  %s2776_s5 = smov 88   ;;  %vm2230_vm3 = vcmask 125952  }
   0x2   :  { %2389 = vmatprep.mubr.msk.bf16.mxu0 %vm2771_vm0, %v2770_v1  ;;  %2395 = vmatprep.mubr.msk.bf16.mxu1 %vm2771_vm0, %v2770_v1  ;;  %v2819_v4 = vld [vmem:[%s3619_s0 + $0x18] sm:$0xff]   ;;  %v2825_v5 = vld [vmem:[%s3619_s0 + $0x20] sm:$0xff]   ;;  %v2831_v6 = vld [vmem:[%s3619_s0 + $0x28] sm:$0xff]  }
   0x3   :  { %65 = vrot.lane.b32.xlu0 %v2796_v0, %s2772_s13  ;;  %174 = vrot.lane.b32.xlu1 %v2813_v3, %s2772_s13  ;;  %v2837_v7 = vld [vmem:[%s3619_s0 + $0x30] sm:$0xff]   ;;  %v2843_v8 = vld [vmem:[%s3619_s0 + $0x38] sm:$0xff]  }
   0x4   :  { %v28_v27 = vld [vmem:[%s3620_s1] sm:$0xff]  ;;  %v29_v33 = vld [vmem:[%s3620_s1 + $0x8] sm:$0xff] }
   0x5   :  { %v32_v34 = vld [vmem:[%s3620_s1 + $0x20] sm:$0xff]  ;;  %v33_v45 = vld [vmem:[%s3620_s1 + $0x28] sm:$0xff] }
   0x6   :  { %v36_v44 = vld [vmem:[%s3620_s1 + $0x40] sm:$0xff]  ;;  %v37_v56 = vld [vmem:[%s3620_s1 + $0x48] sm:$0xff] }
   0x7   :  { %120 = vrot.lane.b32.xlu0 %v2803_v2, %s2772_s13  ;;  %228 = vrot.lane.b32.xlu1 %v2819_v4, %s2772_s13  ;;  %v40_v57 = vld [vmem:[%s3620_s1 + $0x60] sm:$0xff] }
   0xb   :  { %282 = vrot.lane.b32.xlu0 %v2825_v5, %s2772_s13  ;;  %336 = vrot.lane.b32.xlu1 %v2831_v6, %s2772_s13 }
   0xf   :  { %390 = vrot.lane.b32.xlu0 %v2837_v7, %s2772_s13  ;;  %444 = vrot.lane.b32.xlu1 %v2843_v8, %s2772_s13 }
  0x13   :  { %710 = vrot.lane.b32.xlu1 %v2796_v0, %s2773_s26 }
  0x75   :  { %v66_v9 = vpop.permute.xlu0 %65  ;;  %v175_v11 = vpop.permute.xlu1 %174 }
  0x76   :  { %v72_v10 = vsel %vm67_vm1, %v66_v9, 0  ;;  %v180_v14 = vsel %vm67_vm1, %v175_v11, 0 }
  0x77   :  { %2388 = vmatpush3.bf16.xpose.msra.mxu0 %v72_v10 }
  0x78   :  { %2399 = vmatprep.subr.bf16.mxu0 %v2770_v1 }
  0x79   :  { %v121_v12 = vpop.permute.xlu0 %120  ;;  %v229_v15 = vpop.permute.xlu1 %228 }
  0x7a   :  { %v126_v13 = vsel %vm67_vm1, %v121_v12, 0  ;;  %v234_v16 = vsel %vm67_vm1, %v229_v15, 0 }
  0x7b   :  { %2394 = vmatpush3.bf16.xpose.msra.mxu1 %v126_v13  ;;  %v41_v13 = vld [vmem:[%s3620_s1 + $0x68] sm:$0xff] }
  0x7c   :  { %2405 = vmatprep.subr.bf16.mxu1 %v2770_v1 }
  0x7d   :  { %v283_v17 = vpop.permute.xlu0 %282  ;;  %v337_v19 = vpop.permute.xlu1 %336 }
  0x7e   :  { %2390 = vmatmul.mubr.msk.bf16.vlgmr.msra.gmra.mxu0 %vm67_vm1, %v2796_v0  ;;  %v288_v18 = vsel %vm67_vm1, %v283_v17, 0  ;;  %v342_v20 = vsel %vm67_vm1, %v337_v19, 0 }
  0x7f   :  { %2400 = vmatpush3.bf16.xpose.msra.mxu0 %v180_v14  ;;  %2401 = vmatprep.mubr.msk.bf16.mxu0 %vm2771_vm0, %v2770_v1  ;;  %v44_v14 = vld [vmem:[%s3620_s1 + $0x80] sm:$0xff] }
  0x80   :  { %2411 = vmatprep.subr.bf16.mxu0 %v2770_v1 }
  0x81   :  { %v391_v21 = vpop.permute.xlu0 %390  ;;  %v445_v23 = vpop.permute.xlu1 %444 }
  0x82   :  { %2396 = vmatmul.mubr.msk.bf16.vlgmr.msra.gmra.mxu1 %vm67_vm1, %v2803_v2  ;;  %v396_v22 = vsel %vm67_vm1, %v391_v21, 0  ;;  %v450_v24 = vsel %vm67_vm1, %v445_v23, 0 }
  0x83   :  { %2406 = vmatpush3.bf16.xpose.msra.mxu1 %v234_v16  ;;  %2407 = vmatprep.mubr.msk.bf16.mxu1 %vm2771_vm0, %v2770_v1 }
  0x84   :  { %2417 = vmatprep.subr.bf16.mxu1 %v2770_v1 }
  0x85   :  { %v711_v25 = vpop.permute.xlu1 %710 }
  0x86   :  { %2402 = vmatmul.mubr.msk.bf16.vlgmr.msra.gmra.mxu0 %vm67_vm1, %v2813_v3 }
  0x87   :  { %2412 = vmatpush3.bf16.xpose.msra.mxu0 %v288_v18  ;;  %2413 = vmatprep.mubr.msk.bf16.mxu0 %vm2771_vm0, %v2770_v1 }
  0x88   :  { %2423 = vmatprep.subr.bf16.mxu0 %v2770_v1 }
  0x8a   :  { %2408 = vmatmul.mubr.msk.bf16.vlgmr.msra.gmra.mxu1 %vm67_vm1, %v2819_v4 }
  0x8b   :  { %2418 = vmatpush3.bf16.xpose.msra.mxu1 %v342_v20  ;;  %2419 = vmatprep.mubr.msk.bf16.mxu1 %vm2771_vm0, %v2770_v1 }
  0x8c   :  { %2429 = vmatprep.subr.bf16.mxu1 %v2770_v1 }
  0x8e   :  { %2414 = vmatmul.mubr.msk.bf16.vlgmr.msra.gmra.mxu0 %vm67_vm1, %v2825_v5 }
  0x8f   :  { %2424 = vmatpush3.bf16.xpose.msra.mxu0 %v396_v22  ;;  %2425 = vmatprep.mubr.msk.bf16.mxu0 %vm2771_vm0, %v2770_v1 }
  0x90   :  { %2435 = vmatprep.subr.bf16.mxu0 %v2770_v1 }
  0x92   :  { %2420 = vmatmul.mubr.msk.bf16.vlgmr.msra.gmra.mxu1 %vm67_vm1, %v2831_v6 }
  0x93   :  { %2430 = vmatpush3.bf16.xpose.msra.mxu1 %v450_v24  ;;  %2431 = vmatprep.mubr.msk.bf16.mxu1 %vm2771_vm0, %v2770_v1 }
  0x94   :  { %2441 = vmatprep.subr.bf16.mxu1 %v2770_v1 }
  0x96   :  { %2426 = vmatmul.mubr.msk.bf16.vlgmr.msra.gmra.mxu0 %vm67_vm1, %v2837_v7 }
  0x97   :  { %2437 = vmatprep.mubr.msk.bf16.mxu0 %vm2771_vm0, %v2770_v1  ;;  %2436 = vmatpush3.bf16.msra.mxu0 %v711_v25  ;;  %v48_v25 = vld [vmem:[%s3620_s1 + $0xa0] sm:$0xff] }
  0x98   :  { %2447 = vmatprep.subr.bf16.mxu0 %v2770_v1 }
  0x9a   :  { %2432 = vmatmul.mubr.msk.bf16.vlgmr.msra.gmra.mxu1 %vm67_vm1, %v2843_v8 }
  0x9b   :  { %2443 = vmatprep.mubr.msk.bf16.mxu1 %vm2771_vm0, %v2770_v1 }
 0x13e   :  { %v108_v26 = vpop.f32.mrf.mxu0 }
 0x13f   :  { %v493_v28 = vmul.f32 0.35355338, %v108_v26  ;;  %v45_v26 = vld [vmem:[%s3620_s1 + $0x88] sm:$0xff] }
 0x140   :  { %v2391_v29 = vpop.f32.mrf.mxu0 }
 0x141   :  { %v2901_v30 = vadd.f32 %v493_v28, %v28_v27 }
 0x142   :  { %v111_v31 = vpop.f32.mrf.mxu0  ;;  %v162_v32 = vpop.f32.mrf.mxu1 }
 0x143   :  { %v494_v35 = vmul.f32 0.35355338, %v111_v31  ;;  %v495_v36 = vmul.f32 0.35355338, %v162_v32  ;;  %v526_v37 = vsel %vm525_vm2, %v2901_v30, -inf }
 0x144   :  { %527 = vmax.xlane.f32.xlu0 %v526_v37  ;;  %v2392_v38 = vpop.f32.mrf.mxu0  ;;  %v2397_v39 = vpop.f32.mrf.mxu1 }
 0x145   :  { %v2911_v40 = vadd.f32 %v494_v35, %v29_v33  ;;  %v2913_v41 = vadd.f32 %v495_v36, %v32_v34  ;;  %v49_v38 = vld [vmem:[%s3620_s1 + $0xa8] sm:$0xff]  ;;  %v52_v39 = vld [vmem:[%s3620_s1 + $0xc0] sm:$0xff] }
 0x146   :  { %v165_v42 = vpop.f32.mrf.mxu1  ;;  %v216_v43 = vpop.f32.mrf.mxu0 }
 0x147   :  { %v496_v46 = vmul.f32 0.35355338, %v165_v42  ;;  %v497_v47 = vmul.f32 0.35355338, %v216_v43  ;;  %v529_v48 = vsel %vm525_vm2, %v2911_v40, -inf  ;;  %v532_v49 = vsel %vm525_vm2, %v2913_v41, -inf }
 0x148   :  { %530 = vmax.xlane.f32.xlu1 %v529_v48  ;;  %v2403_v50 = vpop.f32.mrf.mxu0  ;;  %533 = vmax.xlane.f32.xlu0 %v532_v49  ;;  %v2398_v51 = vpop.f32.mrf.mxu1 }
 0x149   :  { %v2925_v52 = vadd.f32 %v497_v47, %v36_v44  ;;  %v2927_v53 = vadd.f32 %v496_v46, %v33_v45 }
 0x14a   :  { %v219_v54 = vpop.f32.mrf.mxu0  ;;  %v270_v55 = vpop.f32.mrf.mxu1 }
 0x14b   :  { %v498_v58 = vmul.f32 0.35355338, %v219_v54  ;;  %v499_v59 = vmul.f32 0.35355338, %v270_v55  ;;  %v538_v60 = vsel %vm525_vm2, %v2925_v52, -inf  ;;  %v535_v61 = vsel %vm525_vm2, %v2927_v53, -inf }
 0x14c   :  { %539 = vmax.xlane.f32.xlu1 %v538_v60  ;;  %v2404_v62 = vpop.f32.mrf.mxu0  ;;  %536 = vmax.xlane.f32.xlu0 %v535_v61  ;;  %v2409_v63 = vpop.f32.mrf.mxu1  ;;  %v56_v54 = vld [vmem:[%s3620_s1 + $0xe0] sm:$0xff]  ;;  %v53_v55 = vld [vmem:[%s3620_s1 + $0xc8] sm:$0xff] }
 0x14d   :  { %v2939_v9 = vadd.f32 %v498_v58, %v37_v56  ;;  %v2941_v10 = vadd.f32 %v499_v59, %v40_v57 }
 0x14e   :  { %v273_v11 = vpop.f32.mrf.mxu1  ;;  %v324_v12 = vpop.f32.mrf.mxu0 }
 0x14f   :  { %v500_v15 = vmul.f32 0.35355338, %v273_v11  ;;  %v501_v16 = vmul.f32 0.35355338, %v324_v12  ;;  %v541_v17 = vsel %vm525_vm2, %v2939_v9, -inf  ;;  %v544_v18 = vsel %vm525_vm2, %v2941_v10, -inf }
 0x150   :  { %542 = vmax.xlane.f32.xlu0 %v541_v17  ;;  %545 = vmax.xlane.f32.xlu1 %v544_v18  ;;  %v2410_v19 = vpop.f32.mrf.mxu1  ;;  %v2415_v20 = vpop.f32.mrf.mxu0  ;;  %v57_v12 = vld [vmem:[%s3620_s1 + $0xe8] sm:$0xff] }
 0x151   :  { %v2953_v21 = vadd.f32 %v500_v15, %v41_v13  ;;  %v2955_v22 = vadd.f32 %v501_v16, %v44_v14 }
 0x152   :  { %v327_v23 = vpop.f32.mrf.mxu0  ;;  %v378_v24 = vpop.f32.mrf.mxu1 }
 0x153   :  { %v502_v27 = vmul.f32 0.35355338, %v327_v23  ;;  %v503_v28 = vmul.f32 0.35355338, %v378_v24  ;;  %v547_v29 = vsel %vm525_vm2, %v2953_v21, -inf  ;;  %v550_v31 = vsel %vm525_vm2, %v2955_v22, -inf }
 0x154   :  { %548 = vmax.xlane.f32.xlu0 %v547_v29  ;;  %v2421_v32 = vpop.f32.mrf.mxu1  ;;  %551 = vmax.xlane.f32.xlu1 %v550_v31  ;;  %v2416_v33 = vpop.f32.mrf.mxu0 }
 0x155   :  { %v2967_v34 = vadd.f32 %v503_v28, %v48_v25  ;;  %v2969_v35 = vadd.f32 %v502_v27, %v45_v26 }
 0x156   :  { %v381_v36 = vpop.f32.mrf.mxu1  ;;  %v432_v37 = vpop.f32.mrf.mxu0 }
 0x157   :  { %v504_v42 = vmul.f32 0.35355338, %v381_v36  ;;  %v505_v43 = vmul.f32 0.35355338, %v432_v37  ;;  %v556_v44 = vsel %vm525_vm2, %v2967_v34, -inf  ;;  %v553_v45 = vsel %vm525_vm2, %v2969_v35, -inf }
 0x158   :  { %v2422_v46 = vpop.f32.mrf.mxu1  ;;  %557 = vmax.xlane.f32.xlu1 %v556_v44  ;;  %554 = vmax.xlane.f32.xlu0 %v553_v45  ;;  %v2427_v47 = vpop.f32.mrf.mxu0 }
 0x159   :  { %v2981_v48 = vadd.f32 %v504_v42, %v49_v38  ;;  %v2983_v49 = vadd.f32 %v505_v43, %v52_v39 }
 0x15a   :  { %v435_v50 = vpop.f32.mrf.mxu0  ;;  %v486_v51 = vpop.f32.mrf.mxu1 }
 0x15b   :  { %v506_v56 = vmul.f32 0.35355338, %v435_v50  ;;  %v507_v57 = vmul.f32 0.35355338, %v486_v51  ;;  %v559_v58 = vsel %vm525_vm2, %v2981_v48, -inf  ;;  %v562_v59 = vsel %vm525_vm2, %v2983_v49, -inf }
 0x15c   :  { %v2433_v60 = vpop.f32.mrf.mxu1  ;;  %560 = vmax.xlane.f32.xlu0 %v559_v58  ;;  %563 = vmax.xlane.f32.xlu1 %v562_v59  ;;  %v2428_v61 = vpop.f32.mrf.mxu0 }
 0x15d   :  { %v2995_v62 = vadd.f32 %v507_v57, %v56_v54  ;;  %v2997_v63 = vadd.f32 %v506_v56, %v53_v55 }
 0x15e   :  { %v489_v11 = vpop.f32.mrf.mxu1 }
 0x15f   :  { %v508_v13 = vmul.f32 0.35355338, %v489_v11  ;;  %v568_v14 = vsel %vm525_vm2, %v2995_v62, -inf  ;;  %v565_v15 = vsel %vm525_vm2, %v2997_v63, -inf }
 0x160   :  { %v2434_v16 = vpop.f32.mrf.mxu1  ;;  %569 = vmax.xlane.f32.xlu1 %v568_v14  ;;  %566 = vmax.xlane.f32.xlu0 %v565_v15 }
 0x161   :  { %v3006_v17 = vadd.f32 %v508_v13, %v57_v12 }
 0x163   :  { %v571_v18 = vsel %vm525_vm2, %v3006_v17, -inf }
 0x164   :  { %572 = vmax.xlane.f32.xlu0 %v571_v18 }
 0x171   :  { %804 = vrot.lane.b32.xlu1 %v2813_v3, %s2773_s26 }
 0x175   :  { %851 = vrot.lane.b32.xlu1 %v2819_v4, %s2773_s26 }
 0x179   :  { %945 = vrot.lane.b32.xlu1 %v2831_v6, %s2773_s26 }
 0x17a   :  { %757 = vrot.lane.b32.xlu0 %v2803_v2, %s2773_s26 }
 0x17d   :  { %1039 = vrot.lane.b32.xlu1 %v2843_v8, %s2773_s26 }
 0x17e   :  { %898 = vrot.lane.b32.xlu0 %v2825_v5, %s2773_s26 }
 0x182   :  { %992 = vrot.lane.b32.xlu0 %v2837_v7, %s2773_s26  ;;  %s2774_s26 = smov 104  }
 0x1cd   :  { %v528_v19 = vpop.xlane.xlu0 %527 }
 0x1ce   :  { %v574_v20 = vsub.f32 %v2901_v30, %v528_v19 }
 0x1d0   :  { %v590_v23 = vmul.f32 1.442695, %v574_v20 }
 0x1d1   :  { %v531_v24 = vpop.xlane.xlu1 %530  ;;  %v534_v25 = vpop.xlane.xlu0 %533 }
 0x1d2   :  { %2635 = vpow2.f32 %v590_v23  ;;  %v575_v26 = vsub.f32 %v2911_v40, %v531_v24  ;;  %v576_v27 = vsub.f32 %v2913_v41, %v534_v25 }
 0x1d4   :  { %v592_v28 = vmul.f32 1.442695, %v575_v26  ;;  %v594_v29 = vmul.f32 1.442695, %v576_v27 }
 0x1d5   :  { %v540_v31 = vpop.xlane.xlu1 %539  ;;  %v537_v32 = vpop.xlane.xlu0 %536 }
 0x1d6   :  { %2637 = vpow2.f32 %v592_v28  ;;  %v578_v33 = vsub.f32 %v2925_v52, %v540_v31  ;;  %v577_v36 = vsub.f32 %v2927_v53, %v537_v32 }
 0x1d7   :  { %2639 = vpow2.f32 %v594_v29 }
 0x1d8   :  { %v598_v37 = vmul.f32 1.442695, %v578_v33  ;;  %v596_v30 = vmul.f32 1.442695, %v577_v36 }
 0x1d9   :  { %v546_v38 = vpop.xlane.xlu1 %545  ;;  %v543_v39 = vpop.xlane.xlu0 %542 }
 0x1da   :  { %2641 = vpow2.f32 %v598_v37  ;;  %v580_v42 = vsub.f32 %v2941_v10, %v546_v38  ;;  %v579_v40 = vsub.f32 %v2939_v9, %v543_v39 }
 0x1db   :  { %2643 = vpow2.f32 %v596_v30 }
 0x1dc   :  { %v602_v41 = vmul.f32 1.442695, %v580_v42  ;;  %v600_v43 = vmul.f32 1.442695, %v579_v40 }
 0x1dd   :  { %v552_v44 = vpop.xlane.xlu1 %551  ;;  %v549_v45 = vpop.xlane.xlu0 %548 }
 0x1de   :  { %2645 = vpow2.f32 %v602_v41  ;;  %v582_v52 = vsub.f32 %v2955_v22, %v552_v44  ;;  %v581_v53 = vsub.f32 %v2953_v21, %v549_v45 }
 0x1df   :  { %v3033_v46 = vpop.eup %2635  ;;  %2647 = vpow2.f32 %v600_v43 }
 0x1e0   :  { %v606_v47 = vmul.f32 1.442695, %v582_v52  ;;  %v604_v50 = vmul.f32 1.442695, %v581_v53  ;;  %v622_v10 = vsel %vm525_vm2, %v3033_v46, 0.0 }
 0x1e1   :  { %v558_v51 = vpop.xlane.xlu1 %557  ;;  %623 = vadd.xlane.f32.xlu1 %v622_v10  ;;  %v555_v9 = vpop.xlane.xlu0 %554 }
 0x1e2   :  { %2649 = vpow2.f32 %v606_v47  ;;  %v584_v54 = vsub.f32 %v2967_v34, %v558_v51  ;;  %v583_v55 = vsub.f32 %v2969_v35, %v555_v9 }
 0x1e3   :  { %v3039_v56 = vpop.eup %2637  ;;  %2651 = vpow2.f32 %v604_v50 }
 0x1e4   :  { %v3041_v21 = vpop.eup %2639  ;;  %v610_v22 = vmul.f32 1.442695, %v584_v54  ;;  %v608_v57 = vmul.f32 1.442695, %v583_v55  ;;  %v625_v58 = vsel %vm525_vm2, %v3039_v56, 0.0 }
 0x1e5   :  { %v564_v59 = vpop.xlane.xlu1 %563  ;;  %626 = vadd.xlane.f32.xlu0 %v625_v58  ;;  %v628_v60 = vsel %vm525_vm2, %v3041_v21, 0.0  ;;  %v561_v61 = vpop.xlane.xlu0 %560 }
 0x1e6   :  { %2653 = vpow2.f32 %v610_v22  ;;  %v586_v34 = vsub.f32 %v2983_v49, %v564_v59  ;;  %629 = vadd.xlane.f32.xlu1 %v628_v60  ;;  %v585_v35 = vsub.f32 %v2981_v48, %v561_v61 }
 0x1e7   :  { %v3049_v11 = vpop.eup %2641  ;;  %2655 = vpow2.f32 %v608_v57 }
 0x1e8   :  { %v3051_v12 = vpop.eup %2643  ;;  %v614_v13 = vmul.f32 1.442695, %v586_v34  ;;  %v612_v14 = vmul.f32 1.442695, %v585_v35  ;;  %v634_v15 = vsel %vm525_vm2, %v3049_v11, 0.0 }
 0x1e9   :  { %v570_v16 = vpop.xlane.xlu1 %569  ;;  %v631_v18 = vsel %vm525_vm2, %v3051_v12, 0.0  ;;  %v567_v19 = vpop.xlane.xlu0 %566 }
 0x1ea   :  { %2657 = vpow2.f32 %v614_v13  ;;  %v588_v49 = vsub.f32 %v2995_v62, %v570_v16  ;;  %635 = vadd.xlane.f32.xlu1 %v634_v15  ;;  %632 = vadd.xlane.f32.xlu0 %v631_v18  ;;  %v587_v48 = vsub.f32 %v2997_v63, %v567_v19 }
 0x1eb   :  { %v3059_v20 = vpop.eup %2645  ;;  %2659 = vpow2.f32 %v612_v14 }
 0x1ec   :  { %v3061_v23 = vpop.eup %2647  ;;  %v618_v24 = vmul.f32 1.442695, %v588_v49  ;;  %v616_v25 = vmul.f32 1.442695, %v587_v48  ;;  %v640_v26 = vsel %vm525_vm2, %v3059_v20, 0.0 }
 0x1ed   :  { %v637_v27 = vsel %vm525_vm2, %v3061_v23, 0.0  ;;  %v573_v28 = vpop.xlane.xlu0 %572 }
 0x1ee   :  { %2661 = vpow2.f32 %v618_v24  ;;  %641 = vadd.xlane.f32.xlu1 %v640_v26  ;;  %638 = vadd.xlane.f32.xlu0 %v637_v27  ;;  %v589_v62 = vsub.f32 %v3006_v17, %v573_v28 }
 0x1ef   :  { %v3068_v63 = vpop.eup %2649  ;;  %2663 = vpow2.f32 %v616_v25 }
 0x1f0   :  { %v3070_v29 = vpop.eup %2651  ;;  %v620_v31 = vmul.f32 1.442695, %v589_v62  ;;  %v646_v32 = vsel %vm525_vm2, %v3068_v63, 0.0 }
 0x1f1   :  { %v643_v33 = vsel %vm525_vm2, %v3070_v29, 0.0  ;;  %v758_v36 = vpop.permute.xlu0 %757 }
 0x1f2   :  { %2665 = vpow2.f32 %v620_v31  ;;  %647 = vadd.xlane.f32.xlu1 %v646_v32  ;;  %644 = vadd.xlane.f32.xlu0 %v643_v33 }
 0x1f3   :  { %v3076_v37 = vpop.eup %2653  ;;  %2442 = vmatpush3.bf16.msra.mxu1 %v758_v36 }
 0x1f4   :  { %v3078_v17 = vpop.eup %2655  ;;  %v652_v30 = vsel %vm525_vm2, %v3076_v37, 0.0  ;;  %2453 = vmatprep.subr.bf16.mxu1 %v2770_v1 }
 0x1f5   :  { %v649_v38 = vsel %vm525_vm2, %v3078_v17, 0.0  ;;  %v899_v10 = vpop.permute.xlu0 %898 }
 0x1f6   :  { %653 = vadd.xlane.f32.xlu1 %v652_v30  ;;  %650 = vadd.xlane.f32.xlu0 %v649_v38 }
 0x1f7   :  { %v3085_v39 = vpop.eup %2657 }
 0x1f8   :  { %v3087_v42 = vpop.eup %2659  ;;  %v658_v40 = vsel %vm525_vm2, %v3085_v39, 0.0 }
 0x1f9   :  { %v655_v41 = vsel %vm525_vm2, %v3087_v42, 0.0 }
 0x1fa   :  { %659 = vadd.xlane.f32.xlu1 %v658_v40  ;;  %656 = vadd.xlane.f32.xlu0 %v655_v41 }
 0x1fb   :  { %v3093_v43 = vpop.eup %2661 }
 0x1fc   :  { %v3095_v44 = vpop.eup %2663  ;;  %v664_v45 = vsel %vm525_vm2, %v3093_v43, 0.0 }
 0x1fd   :  { %v661_v52 = vsel %vm525_vm2, %v3095_v44, 0.0 }
 0x1fe   :  { %665 = vadd.xlane.f32.xlu1 %v664_v45  ;;  %662 = vadd.xlane.f32.xlu0 %v661_v52 }
 0x1ff   :  { %v3101_v53 = vpop.eup %2665 }
 0x200   :  { %v667_v47 = vsel %vm525_vm2, %v3101_v53, 0.0 }
 0x202   :  { %668 = vadd.xlane.f32.xlu0 %v667_v47 }
 0x20f   :  { %1139 = vrot.lane.b32.xlu1 %v2803_v2, %s2774_s26 }
 0x213   :  { %1137 = vrot.lane.b32.xlu1 %v2803_v2, %s2775_s4  ;;  %v805_v2 = vpop.permute.xlu1 %804 }
 0x217   :  { %1241 = vrot.lane.b32.xlu1 %v2819_v4, %s2774_s26 }
 0x218   :  { %1088 = vrot.lane.b32.xlu0 %v2796_v0, %s2774_s26 }
 0x21b   :  { %1239 = vrot.lane.b32.xlu1 %v2819_v4, %s2775_s4  ;;  %v852_v4 = vpop.permute.xlu1 %851 }
 0x21c   :  { %1086 = vrot.lane.b32.xlu0 %v2796_v0, %s2775_s4 }
 0x21f   :  { %1343 = vrot.lane.b32.xlu1 %v2831_v6, %s2774_s26  ;;  %v3121_v50 = vpop.permute.xlu1 %945 }
 0x220   :  { %1190 = vrot.lane.b32.xlu0 %v2813_v3, %s2774_s26 }
 0x223   :  { %1341 = vrot.lane.b32.xlu1 %v2831_v6, %s2775_s4  ;;  %v3123_v6 = vpop.permute.xlu1 %1039 }
 0x224   :  { %1188 = vrot.lane.b32.xlu0 %v2813_v3, %s2775_s4  ;;  %v3125_v3 = vpop.permute.xlu0 %992 }
 0x227   :  { %1445 = vrot.lane.b32.xlu1 %v2843_v8, %s2774_s26 }
 0x228   :  { %1292 = vrot.lane.b32.xlu0 %v2825_v5, %s2774_s26 }
 0x22b   :  { %1443 = vrot.lane.b32.xlu1 %v2843_v8, %s2775_s4 }
 0x22c   :  { %1290 = vrot.lane.b32.xlu0 %v2825_v5, %s2775_s4 }
 0x22f   :  { %1710 = vrot.lane.b32.xlu1 %v2796_v0, %s2776_s5 }
 0x230   :  { %1394 = vrot.lane.b32.xlu0 %v2837_v7, %s2774_s26 }
 0x234   :  { %1392 = vrot.lane.b32.xlu0 %v2837_v7, %s2775_s4 }
 0x26a   :  { %v624_v51 = vpop.xlane.xlu1 %623 }
 0x26b   :  { %2667 = vrcp.f32 %v624_v51 }
 0x26e   :  { %v627_v9 = vpop.xlane.xlu0 %626 }
 0x26f   :  { %v630_v54 = vpop.xlane.xlu1 %629  ;;  %2669 = vrcp.f32 %v627_v9 }
 0x270   :  { %2671 = vrcp.f32 %v630_v54 }
 0x273   :  { %v636_v5 = vpop.xlane.xlu1 %635  ;;  %v633_v8 = vpop.xlane.xlu0 %632 }
 0x274   :  { %2673 = vrcp.f32 %v633_v8 }
 0x275   :  { %2675 = vrcp.f32 %v636_v5 }
 0x277   :  { %v642_v7 = vpop.xlane.xlu1 %641  ;;  %v639_v55 = vpop.xlane.xlu0 %638 }
 0x278   :  { %2677 = vrcp.f32 %v639_v55  ;;  %v2668_v22 = vpop.eup %2667 }
 0x279   :  { %2679 = vrcp.f32 %v642_v7  ;;  %v686_v60 = vmul.f32 %v2668_v22, %v3033_v46 }
 0x27b   :  { %v648_v57 = vpop.xlane.xlu1 %647  ;;  %v645_v58 = vpop.xlane.xlu0 %644 }
 0x27c   :  { %v2670_v59 = vpop.eup %2669  ;;  %2681 = vrcp.f32 %v645_v58 }
 0x27d   :  { %v687_v61 = vmul.f32 %v2670_v59, %v3039_v56  ;;  %2683 = vrcp.f32 %v648_v57  ;;  %v2672_v14 = vpop.eup %2671 }
 0x27e   :  { %v688_v46 = vmul.f32 %v2672_v14, %v3041_v21 }
 0x27f   :  { %v654_v34 = vpop.xlane.xlu1 %653  ;;  %v651_v35 = vpop.xlane.xlu0 %650  ;;  %v702_v13 = vpack.c.bf16 %v687_v61, %v686_v60 }
 0x280   :  { %2685 = vrcp.f32 %v651_v35 }
 0x281   :  { %2438 = vmatmul.mubr.msk.bf16.vlgmr.msra.gmra.mxu0 %vm525_vm2, %v702_v13  ;;  %v2674_v15 = vpop.eup %2673  ;;  %2687 = vrcp.f32 %v654_v34 }
 0x282   :  { %2448 = vmatpush3.bf16.msra.mxu0 %v805_v2  ;;  %2449 = vmatprep.mubr.msk.bf16.mxu0 %vm2771_vm0, %v2770_v1  ;;  %v689_v56 = vmul.f32 %v2674_v15, %v3051_v12  ;;  %v2676_v19 = vpop.eup %2675 }
 0x283   :  { %v660_v16 = vpop.xlane.xlu1 %659  ;;  %v657_v18 = vpop.xlane.xlu0 %656  ;;  %2459 = vmatprep.subr.bf16.mxu0 %v2770_v1  ;;  %v690_v26 = vmul.f32 %v2676_v19, %v3049_v11 }
 0x284   :  { %2689 = vrcp.f32 %v657_v18  ;;  %v703_v49 = vpack.c.bf16 %v689_v56, %v688_v46 }
 0x285   :  { %v2678_v48 = vpop.eup %2677  ;;  %2691 = vrcp.f32 %v660_v16 }
 0x286   :  { %2444 = vmatmul.mubr.msk.bf16.vlgmr.msra.gmra.mxu1 %vm525_vm2, %v703_v49  ;;  %v691_v27 = vmul.f32 %v2678_v48, %v3061_v23  ;;  %v2680_v28 = vpop.eup %2679 }
 0x287   :  { %v666_v24 = vpop.xlane.xlu1 %665  ;;  %v663_v25 = vpop.xlane.xlu0 %662  ;;  %2454 = vmatpush3.bf16.msra.mxu1 %v852_v4  ;;  %2455 = vmatprep.mubr.msk.bf16.mxu1 %vm2771_vm0, %v2770_v1  ;;  %v692_v31 = vmul.f32 %v2680_v28, %v3059_v20 }
 0x288   :  { %2693 = vrcp.f32 %v663_v25  ;;  %v704_v21 = vpack.c.bf16 %v691_v27, %v690_v26  ;;  %2465 = vmatprep.subr.bf16.mxu1 %v2770_v1 }
 0x289   :  { %v2682_v12 = vpop.eup %2681  ;;  %2695 = vrcp.f32 %v666_v24 }
 0x28a   :  { %2450 = vmatmul.mubr.msk.bf16.vlgmr.msra.gmra.mxu0 %vm525_vm2, %v704_v21  ;;  %v693_v11 = vmul.f32 %v2682_v12, %v3070_v29  ;;  %v2684_v32 = vpop.eup %2683 }
 0x28b   :  { %v669_v62 = vpop.xlane.xlu0 %668  ;;  %2460 = vmatpush3.bf16.msra.mxu0 %v899_v10  ;;  %2461 = vmatprep.mubr.msk.bf16.mxu0 %vm2771_vm0, %v2770_v1  ;;  %v1140_v36 = vpop.permute.xlu1 %1139  ;;  %v694_v30 = vmul.f32 %v2684_v32, %v3068_v63 }
 0x28c   :  { %2697 = vrcp.f32 %v669_v62  ;;  %v705_v23 = vpack.c.bf16 %v693_v11, %v692_v31  ;;  %2471 = vmatprep.subr.bf16.mxu0 %v2770_v1 }
 0x28d   :  { %v2686_v33 = vpop.eup %2685 }
 0x28e   :  { %2456 = vmatmul.mubr.msk.bf16.vlgmr.msra.gmra.mxu1 %vm525_vm2, %v705_v23  ;;  %v695_v38 = vmul.f32 %v2686_v33, %v3078_v17  ;;  %v2688_v40 = vpop.eup %2687 }
 0x28f   :  { %v1089_v20 = vpop.permute.xlu0 %1088  ;;  %2466 = vmatpush3.bf16.msra.mxu1 %v3121_v50  ;;  %2467 = vmatprep.mubr.msk.bf16.mxu1 %vm2771_vm0, %v2770_v1  ;;  %v696_v45 = vmul.f32 %v2688_v40, %v3076_v37  ;;  %v1138_v17 = vpop.permute.xlu1 %1137 }
 0x290   :  { %v706_v29 = vpack.c.bf16 %v695_v38, %v694_v30  ;;  %2477 = vmatprep.subr.bf16.mxu1 %v2770_v1  ;;  %v1094_v51 = vsel %vm67_vm1, %v1089_v20, 0 }
 0x291   :  { %v2690_v41 = vpop.eup %2689 }
 0x292   :  { %2462 = vmatmul.mubr.msk.bf16.vlgmr.msra.gmra.mxu0 %vm525_vm2, %v706_v29  ;;  %v697_v52 = vmul.f32 %v2690_v41, %v3087_v42  ;;  %v2692_v47 = vpop.eup %2691 }
 0x293   :  { %v1087_v63 = vpop.permute.xlu0 %1086  ;;  %2472 = vmatpush3.bf16.msra.mxu0 %v3125_v3  ;;  %2473 = vmatprep.mubr.msk.bf16.mxu0 %vm2771_vm0, %v2770_v1  ;;  %v698_v10 = vmul.f32 %v2692_v47, %v3085_v39  ;;  %v1242_v8 = vpop.permute.xlu1 %1241 }
 0x294   :  { %v707_v2 = vpack.c.bf16 %v697_v52, %v696_v45  ;;  %2483 = vmatprep.subr.bf16.mxu0 %v2770_v1  ;;  %v1247_v55 = vsel %vm67_vm1, %v1242_v8, 0 }
 0x295   :  { %v2694_v4 = vpop.eup %2693 }
 0x296   :  { %v2696_v50 = vpop.eup %2695  ;;  %2468 = vmatmul.mubr.msk.bf16.vlgmr.msra.gmra.mxu1 %vm525_vm2, %v707_v2  ;;  %v699_v37 = vmul.f32 %v2694_v4, %v3095_v44  ;;  %v30_v2 = vld [vmem:[%s3620_s1 + $0x10] sm:$0xff] }
 0x297   :  { %v1191_v42 = vpop.permute.xlu0 %1190  ;;  %2478 = vmatpush3.bf16.msra.mxu1 %v3123_v6  ;;  %2479 = vmatprep.mubr.msk.bf16.mxu1 %vm2771_vm0, %v2770_v1  ;;  %v700_v54 = vmul.f32 %v2696_v50, %v3093_v43  ;;  %v1145_v6 = vsel %vm67_vm1, %v1140_v36, 0  ;;  %v1240_v43 = vpop.permute.xlu1 %1239 }
 0x298   :  { %v708_v9 = vpack.c.bf16 %v699_v37, %v698_v10  ;;  %2489 = vmatprep.subr.bf16.mxu1 %v2770_v1 }
 0x299   :  { %v2698_v3 = vpop.eup %2697 }
 0x29a   :  { %v701_v5 = vmul.f32 %v2698_v3, %v3101_v53  ;;  %2474 = vmatmul.mubr.msk.bf16.vlgmr.msra.gmra.mxu0 %vm525_vm2, %v708_v9  ;;  %v1196_v53 = vsel %vm67_vm1, %v1191_v42, 0  ;;  %v31_v9 = vld [vmem:[%s3620_s1 + $0x18] sm:$0xff] }
 0x29b   :  { %2484 = vmatpush3.bf16.xpose.msra.mxu0 %v1094_v51  ;;  %2485 = vmatprep.mubr.msk.bf16.mxu0 %vm2771_vm0, %v2770_v1  ;;  %v1189_v44 = vpop.permute.xlu0 %1188  ;;  %v1344_v22 = vpop.permute.xlu1 %1343  ;;  %v34_v51 = vld [vmem:[%s3620_s1 + $0x30] sm:$0xff] }
 0x29c   :  { %v709_v39 = vpack.c.bf16 %v701_v5, %v700_v54  ;;  %2495 = vmatprep.subr.bf16.mxu0 %v2770_v1  ;;  %v1349_v60 = vsel %vm67_vm1, %v1344_v22, 0  ;;  %v38_v22 = vld [vmem:[%s3620_s1 + $0x50] sm:$0xff] }
 0x29e   :  { %2480 = vmatmul.mubr.msk.bf16.vlgmr.msra.gmra.mxu1 %vm525_vm2, %v709_v39 }
 0x29f   :  { %2490 = vmatpush3.bf16.xpose.msra.mxu1 %v1145_v6  ;;  %2491 = vmatprep.mubr.msk.bf16.mxu1 %vm2771_vm0, %v2770_v1  ;;  %v1293_v7 = vpop.permute.xlu0 %1292  ;;  %v1342_v59 = vpop.permute.xlu1 %1341 }
 0x2a0   :  { %2501 = vmatprep.subr.bf16.mxu1 %v2770_v1  ;;  %v1298_v58 = vsel %vm67_vm1, %v1293_v7, 0 }
 0x2a2   :  { %2486 = vmatmul.mubr.msk.bf16.vlgmr.msra.gmra.mxu0 %vm67_vm1, %v1087_v63 }
 0x2a3   :  { %2496 = vmatpush3.bf16.xpose.msra.mxu0 %v1196_v53  ;;  %2497 = vmatprep.mubr.msk.bf16.mxu0 %vm2771_vm0, %v2770_v1  ;;  %v1291_v57 = vpop.permute.xlu0 %1290  ;;  %v1446_v35 = vpop.permute.xlu1 %1445 }
 0x2a4   :  { %2507 = vmatprep.subr.bf16.mxu0 %v2770_v1  ;;  %v1451_v13 = vsel %vm67_vm1, %v1446_v35, 0 }
 0x2a6   :  { %2492 = vmatmul.mubr.msk.bf16.vlgmr.msra.gmra.mxu1 %vm67_vm1, %v1138_v17 }
 0x2a7   :  { %2502 = vmatpush3.bf16.xpose.msra.mxu1 %v1247_v55  ;;  %2503 = vmatprep.mubr.msk.bf16.mxu1 %vm2771_vm0, %v2770_v1  ;;  %v1395_v61 = vpop.permute.xlu0 %1394  ;;  %v1444_v15 = vpop.permute.xlu1 %1443  ;;  %v35_v55 = vld [vmem:[%s3620_s1 + $0x38] sm:$0xff] }
 0x2a8   :  { %2513 = vmatprep.subr.bf16.mxu1 %v2770_v1  ;;  %v1400_v34 = vsel %vm67_vm1, %v1395_v61, 0 }
 0x2aa   :  { %2498 = vmatmul.mubr.msk.bf16.vlgmr.msra.gmra.mxu0 %vm67_vm1, %v1189_v44 }
 0x2ab   :  { %2508 = vmatpush3.bf16.xpose.msra.mxu0 %v1298_v58  ;;  %2509 = vmatprep.mubr.msk.bf16.mxu0 %vm2771_vm0, %v2770_v1  ;;  %v1393_v14 = vpop.permute.xlu0 %1392  ;;  %v1711_v16 = vpop.permute.xlu1 %1710 }
 0x2ac   :  { %2519 = vmatprep.subr.bf16.mxu0 %v2770_v1 }
 0x2ae   :  { %2504 = vmatmul.mubr.msk.bf16.vlgmr.msra.gmra.mxu1 %vm67_vm1, %v1240_v43 }
 0x2af   :  { %2514 = vmatpush3.bf16.xpose.msra.mxu1 %v1349_v60  ;;  %2515 = vmatprep.mubr.msk.bf16.mxu1 %vm2771_vm0, %v2770_v1 }
 0x2b0   :  { %2525 = vmatprep.subr.bf16.mxu1 %v2770_v1 }
 0x2b2   :  { %2510 = vmatmul.mubr.msk.bf16.vlgmr.msra.gmra.mxu0 %vm67_vm1, %v1291_v57 }
 0x2b3   :  { %2520 = vmatpush3.bf16.xpose.msra.mxu0 %v1400_v34  ;;  %2521 = vmatprep.mubr.msk.bf16.mxu0 %vm2771_vm0, %v2770_v1 }
 0x2b4   :  { %2531 = vmatprep.subr.bf16.mxu0 %v2770_v1 }
 0x2b6   :  { %2516 = vmatmul.mubr.msk.bf16.vlgmr.msra.gmra.mxu1 %vm67_vm1, %v1342_v59 }
 0x2b7   :  { %2526 = vmatpush3.bf16.xpose.msra.mxu1 %v1451_v13  ;;  %2527 = vmatprep.mubr.msk.bf16.mxu1 %vm2771_vm0, %v2770_v1 }
 0x2b8   :  { %2537 = vmatprep.subr.bf16.mxu1 %v2770_v1 }
 0x2ba   :  { %2522 = vmatmul.mubr.msk.bf16.vlgmr.msra.gmra.mxu0 %vm67_vm1, %v1393_v14 }
 0x2bb   :  { %2533 = vmatprep.mubr.msk.bf16.mxu0 %vm2771_vm0, %v2770_v1  ;;  %2532 = vmatpush3.bf16.msra.mxu0 %v1711_v16  ;;  %v42_v16 = vld [vmem:[%s3620_s1 + $0x70] sm:$0xff] }
 0x2bc   :  { %2543 = vmatprep.subr.bf16.mxu0 %v2770_v1 }
 0x2be   :  { %2528 = vmatmul.mubr.msk.bf16.vlgmr.msra.gmra.mxu1 %vm67_vm1, %v1444_v15 }
 0x2bf   :  { %2539 = vmatprep.mubr.msk.bf16.mxu1 %vm2771_vm0, %v2770_v1 }
 0x341   :  { %v3219_v18 = vpop.f32.mrf.mxu0 }
 0x343   :  { %v2439_v46 = vpop.f32.mrf.mxu0 }
 0x344   :  { %v39_v46 = vld [vmem:[%s3620_s1 + $0x58] sm:$0xff] }
 0x345   :  { %v3221_v56 = vpop.f32.mrf.mxu0 }
 0x346   :  { %v3223_v19 = vpop.f32.mrf.mxu1 }
 0x347   :  { %v2440_v49 = vpop.f32.mrf.mxu0 }
 0x348   :  { %v2445_v48 = vpop.f32.mrf.mxu1 }
 0x34a   :  { %v3225_v24 = vpop.f32.mrf.mxu1  ;;  %v3227_v25 = vpop.f32.mrf.mxu0 }
 0x34c   :  { %v2446_v26 = vpop.f32.mrf.mxu1  ;;  %v2451_v27 = vpop.f32.mrf.mxu0 }
 0x34e   :  { %v3229_v0 = vpop.f32.mrf.mxu0  ;;  %v3231_v28 = vpop.f32.mrf.mxu1 }
 0x350   :  { %v2452_v21 = vpop.f32.mrf.mxu0  ;;  %v2457_v12 = vpop.f32.mrf.mxu1 }
 0x352   :  { %v3233_v62 = vpop.f32.mrf.mxu1  ;;  %v3235_v31 = vpop.f32.mrf.mxu0 }
 0x354   :  { %v2458_v11 = vpop.f32.mrf.mxu1  ;;  %v2463_v32 = vpop.f32.mrf.mxu0 }
 0x356   :  { %v3237_v23 = vpop.f32.mrf.mxu0  ;;  %v3239_v33 = vpop.f32.mrf.mxu1 }
 0x358   :  { %v2464_v36 = vpop.f32.mrf.mxu0  ;;  %v2469_v30 = vpop.f32.mrf.mxu1 }
 0x35a   :  { %v3241_v38 = vpop.f32.mrf.mxu1  ;;  %v3243_v20 = vpop.f32.mrf.mxu0 }
 0x35c   :  { %v2470_v40 = vpop.f32.mrf.mxu1  ;;  %v2475_v29 = vpop.f32.mrf.mxu0 }
 0x35d   :  { %v43_v40 = vld [vmem:[%s3620_s1 + $0x78] sm:$0xff]  ;;  %v46_v29 = vld [vmem:[%s3620_s1 + $0x90] sm:$0xff] }
 0x35e   :  { %v3245_v41 = vpop.f32.mrf.mxu0  ;;  %v3247_v45 = vpop.f32.mrf.mxu1 }
 0x360   :  { %v2476_v52 = vpop.f32.mrf.mxu0  ;;  %v2481_v63 = vpop.f32.mrf.mxu1 }
 0x362   :  { %v3249_v47 = vpop.f32.mrf.mxu1  ;;  %v1130_v17 = vpop.f32.mrf.mxu0 }
 0x363   :  { %v1494_v4 = vmul.f32 0.35355338, %v1130_v17 }
 0x364   :  { %v2482_v50 = vpop.f32.mrf.mxu1  ;;  %v2487_v10 = vpop.f32.mrf.mxu0 }
 0x365   :  { %v3254_v37 = vadd.f32 %v1494_v4, %v30_v2 }
 0x366   :  { %v1133_v42 = vpop.f32.mrf.mxu0  ;;  %v1181_v3 = vpop.f32.mrf.mxu1 }
 0x367   :  { %v1495_v54 = vmul.f32 0.35355338, %v1133_v42  ;;  %v1496_v5 = vmul.f32 0.35355338, %v1181_v3  ;;  %v1526_v8 = vsel %vm525_vm2, %v3254_v37, -inf }
 0x368   :  { %v2493_v39 = vpop.f32.mrf.mxu1  ;;  %1527 = vmax.xlane.f32.xlu0 %v1526_v8  ;;  %v2488_v44 = vpop.f32.mrf.mxu0 }
 0x369   :  { %v3264_v6 = vadd.f32 %v1496_v5, %v34_v51  ;;  %v3266_v43 = vadd.f32 %v1495_v54, %v31_v9  ;;  %v50_v9 = vld [vmem:[%s3620_s1 + $0xb0] sm:$0xff]  ;;  %v47_v54 = vld [vmem:[%s3620_s1 + $0x98] sm:$0xff] }
 0x36a   :  { %v1184_v53 = vpop.f32.mrf.mxu1  ;;  %v1232_v7 = vpop.f32.mrf.mxu0 }
 0x36b   :  { %v1497_v57 = vmul.f32 0.35355338, %v1184_v53  ;;  %v1498_v58 = vmul.f32 0.35355338, %v1232_v7  ;;  %v1532_v59 = vsel %vm525_vm2, %v3264_v6, -inf  ;;  %v1529_v60 = vsel %vm525_vm2, %v3266_v43, -inf }
 0x36c   :  { %v2494_v61 = vpop.f32.mrf.mxu1  ;;  %1533 = vmax.xlane.f32.xlu0 %v1532_v59  ;;  %1530 = vmax.xlane.f32.xlu1 %v1529_v60  ;;  %v2499_v34 = vpop.f32.mrf.mxu0  ;;  %v51_v59 = vld [vmem:[%s3620_s1 + $0xb8] sm:$0xff]  ;;  %v54_v60 = vld [vmem:[%s3620_s1 + $0xd0] sm:$0xff] }
 0x36d   :  { %v3278_v35 = vadd.f32 %v1497_v57, %v35_v55  ;;  %v3280_v13 = vadd.f32 %v1498_v58, %v38_v22 }
 0x36e   :  { %v1235_v14 = vpop.f32.mrf.mxu0  ;;  %v1283_v15 = vpop.f32.mrf.mxu1 }
 0x36f   :  { %v1499_v49 = vmul.f32 0.35355338, %v1235_v14  ;;  %v1500_v48 = vmul.f32 0.35355338, %v1283_v15  ;;  %v1535_v26 = vsel %vm525_vm2, %v3278_v35, -inf  ;;  %v1538_v27 = vsel %vm525_vm2, %v3280_v13, -inf }
 0x370   :  { %v2505_v21 = vpop.f32.mrf.mxu1  ;;  %1536 = vmax.xlane.f32.xlu0 %v1535_v26  ;;  %1539 = vmax.xlane.f32.xlu1 %v1538_v27  ;;  %v2500_v12 = vpop.f32.mrf.mxu0 }
 0x371   :  { %v3292_v11 = vadd.f32 %v1500_v48, %v42_v16  ;;  %v3294_v32 = vadd.f32 %v1499_v49, %v39_v46  ;;  %v58_v21 = vld [vmem:[%s3620_s1 + $0xf0] sm:$0xff]  ;;  %v55_v12 = vld [vmem:[%s3620_s1 + $0xd8] sm:$0xff] }
 0x372   :  { %v1286_v36 = vpop.f32.mrf.mxu1  ;;  %v1334_v30 = vpop.f32.mrf.mxu0 }
 0x373   :  { %v1501_v52 = vmul.f32 0.35355338, %v1286_v36  ;;  %v1502_v63 = vmul.f32 0.35355338, %v1334_v30  ;;  %v1544_v17 = vsel %vm525_vm2, %v3292_v11, -inf  ;;  %v1541_v2 = vsel %vm525_vm2, %v3294_v32, -inf }
 0x374   :  { %v2506_v4 = vpop.f32.mrf.mxu1  ;;  %1545 = vmax.xlane.f32.xlu1 %v1544_v17  ;;  %1542 = vmax.xlane.f32.xlu0 %v1541_v2  ;;  %v2511_v50 = vpop.f32.mrf.mxu0 }
 0x375   :  { %v3306_v10 = vadd.f32 %v1501_v52, %v43_v40  ;;  %v3308_v42 = vadd.f32 %v1502_v63, %v46_v29  ;;  %v59_v50 = vld [vmem:[%s3620_s1 + $0xf8] sm:$0xff] }
 0x376   :  { %v1337_v3 = vpop.f32.mrf.mxu0  ;;  %v1385_v51 = vpop.f32.mrf.mxu1 }
 0x377   :  { %v1503_v5 = vmul.f32 0.35355338, %v1337_v3  ;;  %v1504_v8 = vmul.f32 0.35355338, %v1385_v51  ;;  %v1547_v39 = vsel %vm525_vm2, %v3306_v10, -inf  ;;  %v1550_v44 = vsel %vm525_vm2, %v3308_v42, -inf }
 0x378   :  { %v2517_v53 = vpop.f32.mrf.mxu1  ;;  %1548 = vmax.xlane.f32.xlu0 %v1547_v39  ;;  %1551 = vmax.xlane.f32.xlu1 %v1550_v44  ;;  %v2512_v7 = vpop.f32.mrf.mxu0  ;;  %v2763_v39 = vld [vmem:[%s3619_s0 + $0x10] sm:$0xff]   ;;  %v2764_v44 = vld [vmem:[%s3619_s0 + $0x18] sm:$0xff]  }
 0x379   :  { %v3320_v55 = vadd.f32 %v1504_v8, %v50_v9  ;;  %v3322_v22 = vadd.f32 %v1503_v5, %v47_v54  ;;  %v2765_v53 = vld [vmem:[%s3619_s0 + $0x28] sm:$0xff]  }
 0x37a   :  { %v1388_v57 = vpop.f32.mrf.mxu1  ;;  %v1436_v58 = vpop.f32.mrf.mxu0  ;;  %v2766_v7 = vld [vmem:[%s3619_s0 + $0x8] sm:$0xff]  }
 0x37b   :  { %v1505_v61 = vmul.f32 0.35355338, %v1388_v57  ;;  %v1506_v34 = vmul.f32 0.35355338, %v1436_v58  ;;  %v1556_v14 = vsel %vm525_vm2, %v3320_v55, -inf  ;;  %v1553_v15 = vsel %vm525_vm2, %v3322_v22, -inf }
 0x37c   :  { %v2518_v16 = vpop.f32.mrf.mxu1  ;;  %1557 = vmax.xlane.f32.xlu1 %v1556_v14  ;;  %1554 = vmax.xlane.f32.xlu0 %v1553_v15  ;;  %v2523_v46 = vpop.f32.mrf.mxu0  ;;  %v2767_v57 = vld [vmem:[%s3619_s0 + $0x20] sm:$0xff]  }
 0x37d   :  { %v3334_v49 = vadd.f32 %v1505_v61, %v51_v59  ;;  %v3336_v48 = vadd.f32 %v1506_v34, %v54_v60 }
 0x37e   :  { %v1439_v26 = vpop.f32.mrf.mxu0  ;;  %v1487_v27 = vpop.f32.mrf.mxu1 }
 0x37f   :  { %v1507_v36 = vmul.f32 0.35355338, %v1439_v26  ;;  %v1508_v30 = vmul.f32 0.35355338, %v1487_v27  ;;  %v1559_v40 = vsel %vm525_vm2, %v3334_v49, -inf  ;;  %v1562_v29 = vsel %vm525_vm2, %v3336_v48, -inf }
 0x380   :  { %v2529_v52 = vpop.f32.mrf.mxu1  ;;  %1560 = vmax.xlane.f32.xlu0 %v1559_v40  ;;  %1563 = vmax.xlane.f32.xlu1 %v1562_v29  ;;  %v2524_v63 = vpop.f32.mrf.mxu0 }
 0x381   :  { %v3348_v17 = vadd.f32 %v1508_v30, %v58_v21  ;;  %v3350_v2 = vadd.f32 %v1507_v36, %v55_v12 }
 0x382   :  { %v1490_v4 = vpop.f32.mrf.mxu1 }
 0x383   :  { %v1509_v3 = vmul.f32 0.35355338, %v1490_v4  ;;  %v1568_v51 = vsel %vm525_vm2, %v3348_v17, -inf  ;;  %v1565_v9 = vsel %vm525_vm2, %v3350_v2, -inf }
 0x384   :  { %v2530_v54 = vpop.f32.mrf.mxu1  ;;  %1569 = vmax.xlane.f32.xlu1 %v1568_v51  ;;  %1566 = vmax.xlane.f32.xlu0 %v1565_v9 }
 0x385   :  { %v3359_v5 = vadd.f32 %v1509_v3, %v59_v50 }
 0x387   :  { %v1571_v8 = vsel %vm525_vm2, %v3359_v5, -inf }
 0x388   :  { %1572 = vmax.xlane.f32.xlu0 %v1571_v8 }
 0x395   :  { %1804 = vrot.lane.b32.xlu1 %v2763_v39, %s2776_s5 }
 0x399   :  { %1851 = vrot.lane.b32.xlu1 %v2764_v44, %s2776_s5 }
 0x39d   :  { %1945 = vrot.lane.b32.xlu1 %v2765_v53, %s2776_s5 }
 0x39e   :  { %1757 = vrot.lane.b32.xlu0 %v2766_v7, %s2776_s5 }
 0x3a2   :  { %1898 = vrot.lane.b32.xlu0 %v2767_v57, %s2776_s5 }
 0x3f1   :  { %v1528_v58 = vpop.xlane.xlu0 %1527 }
 0x3f2   :  { %v1574_v59 = vsub.f32 %v3254_v37, %v1528_v58 }
 0x3f4   :  { %v1590_v60 = vmul.f32 1.442695, %v1574_v59 }
 0x3f5   :  { %v1531_v61 = vpop.xlane.xlu1 %1530  ;;  %v1534_v34 = vpop.xlane.xlu0 %1533 }
 0x3f6   :  { %2699 = vpow2.f32 %v1590_v60  ;;  %v1575_v14 = vsub.f32 %v3266_v43, %v1531_v61  ;;  %v1576_v15 = vsub.f32 %v3264_v6, %v1534_v34 }
 0x3f8   :  { %v1592_v16 = vmul.f32 1.442695, %v1575_v14  ;;  %v1594_v46 = vmul.f32 1.442695, %v1576_v15 }
 0x3f9   :  { %v1540_v26 = vpop.xlane.xlu1 %1539  ;;  %v1537_v27 = vpop.xlane.xlu0 %1536 }
 0x3fa   :  { %2701 = vpow2.f32 %v1592_v16  ;;  %v1578_v21 = vsub.f32 %v3280_v13, %v1540_v26  ;;  %v1577_v12 = vsub.f32 %v3278_v35, %v1537_v27 }
 0x3fb   :  { %2703 = vpow2.f32 %v1594_v46 }
 0x3fc   :  { %v1598_v36 = vmul.f32 1.442695, %v1578_v21  ;;  %v1596_v37 = vmul.f32 1.442695, %v1577_v12 }
 0x3fd   :  { %v1546_v30 = vpop.xlane.xlu1 %1545  ;;  %v1543_v40 = vpop.xlane.xlu0 %1542 }
 0x3fe   :  { %2705 = vpow2.f32 %v1598_v36  ;;  %v1580_v29 = vsub.f32 %v3292_v11, %v1546_v30  ;;  %v1579_v43 = vsub.f32 %v3294_v32, %v1543_v40 }
 0x3ff   :  { %2707 = vpow2.f32 %v1596_v37 }
 0x400   :  { %v1602_v6 = vmul.f32 1.442695, %v1580_v29  ;;  %v1600_v52 = vmul.f32 1.442695, %v1579_v43 }
 0x401   :  { %v1552_v63 = vpop.xlane.xlu1 %1551  ;;  %v1549_v4 = vpop.xlane.xlu0 %1548 }
 0x402   :  { %2709 = vpow2.f32 %v1602_v6  ;;  %v1582_v13 = vsub.f32 %v3308_v42, %v1552_v63  ;;  %v1581_v35 = vsub.f32 %v3306_v10, %v1549_v4 }
 0x403   :  { %v3392_v50 = vpop.eup %2699  ;;  %2711 = vpow2.f32 %v1600_v52 }
 0x404   :  { %v1606_v3 = vmul.f32 1.442695, %v1582_v13  ;;  %v1604_v51 = vmul.f32 1.442695, %v1581_v35  ;;  %v1622_v11 = vsel %vm525_vm2, %v3392_v50, 0.0 }
 0x405   :  { %v1558_v9 = vpop.xlane.xlu1 %1557  ;;  %1623 = vadd.xlane.f32.xlu1 %v1622_v11  ;;  %v1555_v32 = vpop.xlane.xlu0 %1554 }
 0x406   :  { %2713 = vpow2.f32 %v1606_v3  ;;  %v1584_v54 = vsub.f32 %v3320_v55, %v1558_v9  ;;  %v1583_v8 = vsub.f32 %v3322_v22, %v1555_v32 }
 0x407   :  { %v3398_v39 = vpop.eup %2701  ;;  %2715 = vpow2.f32 %v1604_v51 }
 0x408   :  { %v3400_v10 = vpop.eup %2703  ;;  %v1610_v42 = vmul.f32 1.442695, %v1584_v54  ;;  %v1608_v44 = vmul.f32 1.442695, %v1583_v8  ;;  %v1625_v53 = vsel %vm525_vm2, %v3398_v39, 0.0 }
 0x409   :  { %v1564_v7 = vpop.xlane.xlu1 %1563  ;;  %1626 = vadd.xlane.f32.xlu0 %v1625_v53  ;;  %v1628_v57 = vsel %vm525_vm2, %v3400_v10, 0.0  ;;  %v1561_v58 = vpop.xlane.xlu0 %1560  ;;  %v2768_v53 = vld [vmem:[%s3619_s0 + $0x38] sm:$0xff]  }
 0x40a   :  { %2717 = vpow2.f32 %v1610_v42  ;;  %v1586_v55 = vsub.f32 %v3336_v48, %v1564_v7  ;;  %1629 = vadd.xlane.f32.xlu1 %v1628_v57  ;;  %v1585_v22 = vsub.f32 %v3334_v49, %v1561_v58  ;;  %v2769_v7 = vld [vmem:[%s3619_s0 + $0x30] sm:$0xff]   ;;  %s2777_s0 = smov 8  }
 0x40b   :  { %v3408_v59 = vpop.eup %2705  ;;  %2719 = vpow2.f32 %v1608_v44 }
 0x40c   :  { %v3410_v60 = vpop.eup %2707  ;;  %v1614_v61 = vmul.f32 1.442695, %v1586_v55  ;;  %v1612_v34 = vmul.f32 1.442695, %v1585_v22  ;;  %v1634_v14 = vsel %vm525_vm2, %v3408_v59, 0.0 }
 0x40d   :  { %v1570_v15 = vpop.xlane.xlu1 %1569  ;;  %v1631_v16 = vsel %vm525_vm2, %v3410_v60, 0.0  ;;  %v1567_v46 = vpop.xlane.xlu0 %1566 }
 0x40e   :  { %2721 = vpow2.f32 %v1614_v61  ;;  %v1588_v48 = vsub.f32 %v3348_v17, %v1570_v15  ;;  %1635 = vadd.xlane.f32.xlu1 %v1634_v14  ;;  %1632 = vadd.xlane.f32.xlu0 %v1631_v16  ;;  %v1587_v49 = vsub.f32 %v3350_v2, %v1567_v46 }
 0x40f   :  { %v3418_v26 = vpop.eup %2709  ;;  %2723 = vpow2.f32 %v1612_v34 }
 0x410   :  { %v3420_v27 = vpop.eup %2711  ;;  %v1618_v21 = vmul.f32 1.442695, %v1588_v48  ;;  %v1616_v12 = vmul.f32 1.442695, %v1587_v49  ;;  %v1640_v36 = vsel %vm525_vm2, %v3418_v26, 0.0 }
 0x411   :  { %v1637_v37 = vsel %vm525_vm2, %v3420_v27, 0.0  ;;  %v1573_v30 = vpop.xlane.xlu0 %1572  ;;  %v1805_v57 = vpop.permute.xlu1 %1804 }
 0x412   :  { %2725 = vpow2.f32 %v1618_v21  ;;  %1641 = vadd.xlane.f32.xlu1 %v1640_v36  ;;  %1638 = vadd.xlane.f32.xlu0 %v1637_v37  ;;  %v1589_v17 = vsub.f32 %v3359_v5, %v1573_v30 }
 0x413   :  { %v3427_v2 = vpop.eup %2713  ;;  %2727 = vpow2.f32 %v1616_v12 }
 0x414   :  { %v3429_v40 = vpop.eup %2715  ;;  %v1620_v29 = vmul.f32 1.442695, %v1589_v17  ;;  %v1646_v43 = vsel %vm525_vm2, %v3427_v2, 0.0 }
 0x415   :  { %v1643_v6 = vsel %vm525_vm2, %v3429_v40, 0.0  ;;  %v1758_v52 = vpop.permute.xlu0 %1757  ;;  %v1852_v58 = vpop.permute.xlu1 %1851 }
 0x416   :  { %2729 = vpow2.f32 %v1620_v29  ;;  %1647 = vadd.xlane.f32.xlu1 %v1646_v43  ;;  %1644 = vadd.xlane.f32.xlu0 %v1643_v6 }
 0x417   :  { %v3435_v63 = vpop.eup %2717  ;;  %2538 = vmatpush3.bf16.msra.mxu1 %v1758_v52 }
 0x418   :  { %v3437_v5 = vpop.eup %2719  ;;  %v1652_v4 = vsel %vm525_vm2, %v3435_v63, 0.0  ;;  %2549 = vmatprep.subr.bf16.mxu1 %v2770_v1 }
 0x419   :  { %v1649_v13 = vsel %vm525_vm2, %v3437_v5, 0.0  ;;  %v3472_v55 = vpop.permute.xlu1 %1945  ;;  %v1899_v22 = vpop.permute.xlu0 %1898 }
 0x41a   :  { %1653 = vadd.xlane.f32.xlu1 %v1652_v4  ;;  %1650 = vadd.xlane.f32.xlu0 %v1649_v13 }
 0x41b   :  { %v3444_v35 = vpop.eup %2721 }
 0x41c   :  { %v3446_v3 = vpop.eup %2723  ;;  %v1658_v51 = vsel %vm525_vm2, %v3444_v35, 0.0 }
 0x41d   :  { %v1655_v11 = vsel %vm525_vm2, %v3446_v3, 0.0 }
 0x41e   :  { %1659 = vadd.xlane.f32.xlu1 %v1658_v51  ;;  %1656 = vadd.xlane.f32.xlu0 %v1655_v11 }
 0x41f   :  { %v3452_v9 = vpop.eup %2725 }
 0x420   :  { %v3454_v32 = vpop.eup %2727  ;;  %v1664_v54 = vsel %vm525_vm2, %v3452_v9, 0.0 }
 0x421   :  { %v1661_v8 = vsel %vm525_vm2, %v3454_v32, 0.0 }
 0x422   :  { %1665 = vadd.xlane.f32.xlu1 %v1664_v54  ;;  %1662 = vadd.xlane.f32.xlu0 %v1661_v8 }
 0x423   :  { %v3460_v42 = vpop.eup %2729 }
 0x424   :  { %v1667_v44 = vsel %vm525_vm2, %v3460_v42, 0.0 }
 0x426   :  { %1668 = vadd.xlane.f32.xlu0 %v1667_v44 }
 0x433   :  { %2039 = vrot.lane.b32.xlu1 %v2768_v53, %s2776_s5 }
 0x43c   :  { %1992 = vrot.lane.b32.xlu0 %v2769_v7, %s2776_s5 }
 0x48e   :  { %v1624_v61 = vpop.xlane.xlu1 %1623 }
 0x48f   :  { %2731 = vrcp.f32 %v1624_v61 }
 0x492   :  { %v1627_v34 = vpop.xlane.xlu0 %1626 }
 0x493   :  { %v1630_v14 = vpop.xlane.xlu1 %1629  ;;  %2733 = vrcp.f32 %v1627_v34 }
 0x494   :  { %2735 = vrcp.f32 %v1630_v14 }
 0x497   :  { %v1636_v15 = vpop.xlane.xlu1 %1635  ;;  %v1633_v16 = vpop.xlane.xlu0 %1632 }
 0x498   :  { %2737 = vrcp.f32 %v1633_v16 }
 0x499   :  { %2739 = vrcp.f32 %v1636_v15 }
 0x49b   :  { %v1642_v46 = vpop.xlane.xlu1 %1641  ;;  %v1639_v48 = vpop.xlane.xlu0 %1638 }
 0x49c   :  { %2741 = vrcp.f32 %v1639_v48  ;;  %v2732_v49 = vpop.eup %2731 }
 0x49d   :  { %2743 = vrcp.f32 %v1642_v46  ;;  %v1686_v37 = vmul.f32 %v2732_v49, %v3392_v50 }
 0x49f   :  { %v1648_v21 = vpop.xlane.xlu1 %1647  ;;  %v1645_v12 = vpop.xlane.xlu0 %1644 }
 0x4a0   :  { %v2734_v36 = vpop.eup %2733  ;;  %2745 = vrcp.f32 %v1645_v12 }
 0x4a1   :  { %v1687_v30 = vmul.f32 %v2734_v36, %v3398_v39  ;;  %2747 = vrcp.f32 %v1648_v21  ;;  %v2736_v6 = vpop.eup %2735 }
 0x4a2   :  { %v1688_v50 = vmul.f32 %v2736_v6, %v3400_v10 }
 0x4a3   :  { %v1654_v17 = vpop.xlane.xlu1 %1653  ;;  %v1651_v29 = vpop.xlane.xlu0 %1650  ;;  %v1702_v43 = vpack.c.bf16 %v1687_v30, %v1686_v37 }
 0x4a4   :  { %2749 = vrcp.f32 %v1651_v29 }
 0x4a5   :  { %2534 = vmatmul.mubr.msk.bf16.vlgmr.msra.gmra.mxu0 %vm525_vm2, %v1702_v43  ;;  %v2738_v52 = vpop.eup %2737  ;;  %2751 = vrcp.f32 %v1654_v17 }
 0x4a6   :  { %2544 = vmatpush3.bf16.msra.mxu0 %v1805_v57  ;;  %2545 = vmatprep.mubr.msk.bf16.mxu0 %vm2771_vm0, %v2770_v1  ;;  %v1689_v39 = vmul.f32 %v2738_v52, %v3410_v60  ;;  %v2740_v51 = vpop.eup %2739 }
 0x4a7   :  { %v1660_v4 = vpop.xlane.xlu1 %1659  ;;  %v1657_v13 = vpop.xlane.xlu0 %1656  ;;  %2555 = vmatprep.subr.bf16.mxu0 %v2770_v1  ;;  %v1690_v53 = vmul.f32 %v2740_v51, %v3408_v59 }
 0x4a8   :  { %2753 = vrcp.f32 %v1657_v13  ;;  %v1703_v11 = vpack.c.bf16 %v1689_v39, %v1688_v50 }
 0x4a9   :  { %v2742_v54 = vpop.eup %2741  ;;  %2755 = vrcp.f32 %v1660_v4 }
 0x4aa   :  { %2540 = vmatmul.mubr.msk.bf16.vlgmr.msra.gmra.mxu1 %vm525_vm2, %v1703_v11  ;;  %v1691_v7 = vmul.f32 %v2742_v54, %v3420_v27  ;;  %v2744_v57 = vpop.eup %2743 }
 0x4ab   :  { %v1666_v8 = vpop.xlane.xlu1 %1665  ;;  %v1663_v44 = vpop.xlane.xlu0 %1662  ;;  %2550 = vmatpush3.bf16.msra.mxu1 %v1852_v58  ;;  %2551 = vmatprep.mubr.msk.bf16.mxu1 %vm2771_vm0, %v2770_v1  ;;  %v1692_v34 = vmul.f32 %v2744_v57, %v3418_v26 }
 0x4ac   :  { %2757 = vrcp.f32 %v1663_v44  ;;  %v1704_v10 = vpack.c.bf16 %v1691_v7, %v1690_v53  ;;  %2561 = vmatprep.subr.bf16.mxu1 %v2770_v1 }
 0x4ad   :  { %v2746_v60 = vpop.eup %2745  ;;  %2759 = vrcp.f32 %v1666_v8 }
 0x4ae   :  { %2546 = vmatmul.mubr.msk.bf16.vlgmr.msra.gmra.mxu0 %vm525_vm2, %v1704_v10  ;;  %v1693_v59 = vmul.f32 %v2746_v60, %v3429_v40  ;;  %v2748_v14 = vpop.eup %2747 }
 0x4af   :  { %v1669_v61 = vpop.xlane.xlu0 %1668  ;;  %2556 = vmatpush3.bf16.msra.mxu0 %v1899_v22  ;;  %2557 = vmatprep.mubr.msk.bf16.mxu0 %vm2771_vm0, %v2770_v1  ;;  %v1694_v15 = vmul.f32 %v2748_v14, %v3427_v2 }
 0x4b0   :  { %2761 = vrcp.f32 %v1669_v61  ;;  %v1705_v27 = vpack.c.bf16 %v1693_v59, %v1692_v34  ;;  %2567 = vmatprep.subr.bf16.mxu0 %v2770_v1 }
 0x4b1   :  { %v2750_v58 = vpop.eup %2749 }
 0x4b2   :  { %2552 = vmatmul.mubr.msk.bf16.vlgmr.msra.gmra.mxu1 %vm525_vm2, %v1705_v27  ;;  %v1695_v16 = vmul.f32 %v2750_v58, %v3437_v5  ;;  %v2752_v46 = vpop.eup %2751  ;;  %v2040_v5 = vpop.permute.xlu1 %2039 }
 0x4b3   :  { %2562 = vmatpush3.bf16.msra.mxu1 %v3472_v55  ;;  %2563 = vmatprep.mubr.msk.bf16.mxu1 %vm2771_vm0, %v2770_v1  ;;  %v1993_v40 = vpop.permute.xlu0 %1992  ;;  %v1696_v48 = vmul.f32 %v2752_v46, %v3435_v63 }
 0x4b4   :  { %v1706_v26 = vpack.c.bf16 %v1695_v16, %v1694_v15  ;;  %2573 = vmatprep.subr.bf16.mxu1 %v2770_v1 }
 0x4b5   :  { %v2754_v22 = vpop.eup %2753 }
 0x4b6   :  { %2558 = vmatmul.mubr.msk.bf16.vlgmr.msra.gmra.mxu0 %vm525_vm2, %v1706_v26  ;;  %v1697_v49 = vmul.f32 %v2754_v22, %v3446_v3  ;;  %v2756_v2 = vpop.eup %2755 }
 0x4b7   :  { %2568 = vmatpush3.bf16.msra.mxu0 %v1993_v40  ;;  %2569 = vmatprep.mubr.msk.bf16.mxu0 %vm2771_vm0, %v2770_v1  ;;  %v1698_v36 = vmul.f32 %v2756_v2, %v3444_v35 }
 0x4b8   :  { %v1707_v55 = vpack.c.bf16 %v1697_v49, %v1696_v48 }
 0x4b9   :  { %v2758_v21 = vpop.eup %2757 }
 0x4ba   :  { %v2760_v12 = vpop.eup %2759  ;;  %2564 = vmatmul.mubr.msk.bf16.vlgmr.msra.gmra.mxu1 %vm525_vm2, %v1707_v55  ;;  %v1699_v37 = vmul.f32 %v2758_v21, %v3454_v32 }
 0x4bb   :  { %2574 = vmatpush3.bf16.msra.mxu1 %v2040_v5  ;;  %2575 = vmatprep.mubr.msk.bf16.mxu1 %vm2771_vm0, %v2770_v1  ;;  %v1700_v30 = vmul.f32 %v2760_v12, %v3452_v9 }
 0x4bc   :  { %v1708_v3 = vpack.c.bf16 %v1699_v37, %v1698_v36 }
 0x4bd   :  { %v2762_v63 = vpop.eup %2761 }
 0x4be   :  { %v1701_v17 = vmul.f32 %v2762_v63, %v3460_v42  ;;  %2570 = vmatmul.mubr.msk.bf16.vlgmr.msra.gmra.mxu0 %vm525_vm2, %v1708_v3 }
 0x4c0   :  { %v1709_v29 = vpack.c.bf16 %v1701_v17, %v1700_v30 }
 0x4c2   :  { %2576 = vmatmul.mubr.msk.bf16.vlgmr.msra.gmra.mxu1 %vm525_vm2, %v1709_v29 }
 0x565   :  { %v1750_v43 = vpop.f32.mrf.mxu0 }
 0x567   :  { %v2535_v6 = vpop.f32.mrf.mxu0 }
 0x569   :  { %v1753_v35 = vpop.f32.mrf.mxu0 }
 0x56a   :  { %v2587_v52 = vpack.i.bf16 %v1753_v35, %v1750_v43  ;;  %v1797_v32 = vpop.f32.mrf.mxu1 }
 0x56b   :  { %v2536_v4 = vpop.f32.mrf.mxu0 }
 0x56c   :  { %2588 = vrot.lane.b32.xlu0 %v2587_v52, %s2777_s0  ;;  %v2541_v1 = vpop.f32.mrf.mxu1 }
 0x56e   :  { %v1800_v13 = vpop.f32.mrf.mxu1  ;;  %v1844_v50 = vpop.f32.mrf.mxu0 }
 0x56f   :  { %v2592_v9 = vpack.i.bf16 %v1800_v13, %v1797_v32 }
 0x570   :  { %v2542_v39 = vpop.f32.mrf.mxu1  ;;  %v2547_v42 = vpop.f32.mrf.mxu0 }
 0x571   :  { %2593 = vrot.lane.b32.xlu1 %v2592_v9, %s2777_s0 }
 0x572   :  { %v1847_v51 = vpop.f32.mrf.mxu0  ;;  %v1891_v11 = vpop.f32.mrf.mxu1 }
 0x573   :  { %v2597_v54 = vpack.i.bf16 %v1847_v51, %v1844_v50 }
 0x574   :  { %v2548_v8 = vpop.f32.mrf.mxu0  ;;  %v2553_v44 = vpop.f32.mrf.mxu1 }
 0x575   :  { %2598 = vrot.lane.b32.xlu0 %v2597_v54, %s2777_s0 }
 0x576   :  { %v1894_v53 = vpop.f32.mrf.mxu1  ;;  %v1938_v7 = vpop.f32.mrf.mxu0 }
 0x577   :  { %v2602_v57 = vpack.i.bf16 %v1894_v53, %v1891_v11 }
 0x578   :  { %v2554_v10 = vpop.f32.mrf.mxu1  ;;  %v2559_v60 = vpop.f32.mrf.mxu0 }
 0x579   :  { %2603 = vrot.lane.b32.xlu1 %v2602_v57, %s2777_s0 }
 0x57a   :  { %v1941_v61 = vpop.f32.mrf.mxu0  ;;  %v1985_v34 = vpop.f32.mrf.mxu1 }
 0x57b   :  { %v2607_v59 = vpack.i.bf16 %v1941_v61, %v1938_v7 }
 0x57c   :  { %v2560_v14 = vpop.f32.mrf.mxu0  ;;  %v2565_v27 = vpop.f32.mrf.mxu1 }
 0x57d   :  { %2608 = vrot.lane.b32.xlu0 %v2607_v59, %s2777_s0 }
 0x57e   :  { %v1988_v58 = vpop.f32.mrf.mxu1  ;;  %v2032_v15 = vpop.f32.mrf.mxu0 }
 0x57f   :  { %v2612_v16 = vpack.i.bf16 %v1988_v58, %v1985_v34 }
 0x580   :  { %v2566_v46 = vpop.f32.mrf.mxu1  ;;  %v2571_v26 = vpop.f32.mrf.mxu0 }
 0x581   :  { %2613 = vrot.lane.b32.xlu1 %v2612_v16, %s2777_s0 }
 0x582   :  { %v2035_v40 = vpop.f32.mrf.mxu0  ;;  %v2079_v22 = vpop.f32.mrf.mxu1 }
 0x583   :  { %v2617_v48 = vpack.i.bf16 %v2035_v40, %v2032_v15 }
 0x584   :  { %v2572_v49 = vpop.f32.mrf.mxu0  ;;  %v2577_v2 = vpop.f32.mrf.mxu1 }
 0x585   :  { %2618 = vrot.lane.b32.xlu0 %v2617_v48, %s2777_s0 }
 0x586   :  { %v2082_v5 = vpop.f32.mrf.mxu1 }
 0x587   :  { %v2622_v55 = vpack.i.bf16 %v2082_v5, %v2079_v22 }
 0x588   :  { %v2578_v21 = vpop.f32.mrf.mxu1 }
 0x589   :  { %2623 = vrot.lane.b32.xlu1 %v2622_v55, %s2777_s0 }
 0x5de   :  { %v2589_v12 = vpop.permute.xlu0 %2588 }
 0x5df   :  { %v2591_v36 = vunpack.i.h.bf16 %v2589_v12  ;;  %v2590_v37 = vunpack.i.l.bf16 %v2589_v12 }
 0x5e1   :  { %v2151_v63 = vsel %vm67_vm1, %v3221_v56, %v2591_v36  ;;  %v2150_v3 = vsel %vm67_vm1, %v3219_v18, %v2590_v37 }
 0x5e2   :  { %v2308_v30 = vpack.c.bf16 %v2151_v63, %v2151_v63  ;;  %v2307_v17 = vpack.c.bf16 %v2150_v3, %v2150_v3 }
 0x5e3   :  { %v2594_v29 = vpop.permute.xlu1 %2593 }
 0x5e4   :  { %2232 = vst.msk [vmem:[%s3621_s2 + $0x4] sm:$0xf] %vm2230_vm3, %v2308_v30  ;;  %2231 = vst.msk [vmem:[%s3621_s2] sm:$0xf] %vm2230_vm3, %v2307_v17  ;;  %v2596_v43 = vunpack.i.h.bf16 %v2594_v29  ;;  %v2595_v6 = vunpack.i.l.bf16 %v2594_v29 }
 0x5e6   :  { %v2153_v56 = vsel %vm67_vm1, %v3225_v24, %v2596_v43  ;;  %v2152_v18 = vsel %vm67_vm1, %v3223_v19, %v2595_v6 }
 0x5e7   :  { %v2310_v35 = vpack.c.bf16 %v2153_v56, %v2153_v56  ;;  %v2309_v52 = vpack.c.bf16 %v2152_v18, %v2152_v18  ;;  %v2599_v32 = vpop.permute.xlu0 %2598 }
 0x5e8   :  { %v2601_v4 = vunpack.i.h.bf16 %v2599_v32  ;;  %v2600_v1 = vunpack.i.l.bf16 %v2599_v32 }
 0x5e9   :  { %2234 = vst.msk [vmem:[%s3621_s2 + $0xc] sm:$0xf] %vm2230_vm3, %v2310_v35  ;;  %2233 = vst.msk [vmem:[%s3621_s2 + $0x8] sm:$0xf] %vm2230_vm3, %v2309_v52 }
 0x5ea   :  { %v2155_v24 = vsel %vm67_vm1, %v3229_v0, %v2601_v4  ;;  %v2154_v19 = vsel %vm67_vm1, %v3227_v25, %v2600_v1 }
 0x5eb   :  { %v2312_v13 = vpack.c.bf16 %v2155_v24, %v2155_v24  ;;  %v2311_v50 = vpack.c.bf16 %v2154_v19, %v2154_v19  ;;  %v2604_v9 = vpop.permute.xlu1 %2603 }
 0x5ec   :  { %v2606_v39 = vunpack.i.h.bf16 %v2604_v9  ;;  %v2605_v42 = vunpack.i.l.bf16 %v2604_v9 }
 0x5ed   :  { %2236 = vst.msk [vmem:[%s3621_s2 + $0x14] sm:$0xf] %vm2230_vm3, %v2312_v13  ;;  %2235 = vst.msk [vmem:[%s3621_s2 + $0x10] sm:$0xf] %vm2230_vm3, %v2311_v50 }
 0x5ee   :  { %v2157_v0 = vsel %vm67_vm1, %v3233_v62, %v2606_v39  ;;  %v2156_v25 = vsel %vm67_vm1, %v3231_v28, %v2605_v42 }
 0x5ef   :  { %v2314_v51 = vpack.c.bf16 %v2157_v0, %v2157_v0  ;;  %v2313_v11 = vpack.c.bf16 %v2156_v25, %v2156_v25  ;;  %v2609_v54 = vpop.permute.xlu0 %2608 }
 0x5f0   :  { %v2611_v8 = vunpack.i.h.bf16 %v2609_v54  ;;  %v2610_v44 = vunpack.i.l.bf16 %v2609_v54 }
 0x5f1   :  { %2238 = vst.msk [vmem:[%s3621_s2 + $0x1c] sm:$0xf] %vm2230_vm3, %v2314_v51  ;;  %2237 = vst.msk [vmem:[%s3621_s2 + $0x18] sm:$0xf] %vm2230_vm3, %v2313_v11 }
 0x5f2   :  { %v2159_v62 = vsel %vm67_vm1, %v3237_v23, %v2611_v8  ;;  %v2158_v28 = vsel %vm67_vm1, %v3235_v31, %v2610_v44 }
 0x5f3   :  { %v2316_v53 = vpack.c.bf16 %v2159_v62, %v2159_v62  ;;  %v2315_v7 = vpack.c.bf16 %v2158_v28, %v2158_v28  ;;  %v2614_v57 = vpop.permute.xlu1 %2613 }
 0x5f4   :  { %v2616_v10 = vunpack.i.h.bf16 %v2614_v57  ;;  %v2615_v60 = vunpack.i.l.bf16 %v2614_v57 }
 0x5f5   :  { %2240 = vst.msk [vmem:[%s3621_s2 + $0x24] sm:$0xf] %vm2230_vm3, %v2316_v53  ;;  %2239 = vst.msk [vmem:[%s3621_s2 + $0x20] sm:$0xf] %vm2230_vm3, %v2315_v7 }
 0x5f6   :  { %v2161_v23 = vsel %vm67_vm1, %v3241_v38, %v2616_v10  ;;  %v2160_v31 = vsel %vm67_vm1, %v3239_v33, %v2615_v60 }
 0x5f7   :  { %v2318_v61 = vpack.c.bf16 %v2161_v23, %v2161_v23  ;;  %v2317_v34 = vpack.c.bf16 %v2160_v31, %v2160_v31  ;;  %v2619_v59 = vpop.permute.xlu0 %2618 }
 0x5f8   :  { %v2621_v14 = vunpack.i.h.bf16 %v2619_v59  ;;  %v2620_v27 = vunpack.i.l.bf16 %v2619_v59 }
 0x5f9   :  { %2242 = vst.msk [vmem:[%s3621_s2 + $0x2c] sm:$0xf] %vm2230_vm3, %v2318_v61  ;;  %2241 = vst.msk [vmem:[%s3621_s2 + $0x28] sm:$0xf] %vm2230_vm3, %v2317_v34 }
 0x5fa   :  { %v2163_v38 = vsel %vm67_vm1, %v3245_v41, %v2621_v14  ;;  %v2162_v33 = vsel %vm67_vm1, %v3243_v20, %v2620_v27 }
 0x5fb   :  { %v2320_v58 = vpack.c.bf16 %v2163_v38, %v2163_v38  ;;  %v2319_v15 = vpack.c.bf16 %v2162_v33, %v2162_v33  ;;  %v2624_v16 = vpop.permute.xlu1 %2623 }
 0x5fc   :  { %v2626_v46 = vunpack.i.h.bf16 %v2624_v16  ;;  %v2625_v26 = vunpack.i.l.bf16 %v2624_v16 }
 0x5fd   :  { %2244 = vst.msk [vmem:[%s3621_s2 + $0x34] sm:$0xf] %vm2230_vm3, %v2320_v58  ;;  %2243 = vst.msk [vmem:[%s3621_s2 + $0x30] sm:$0xf] %vm2230_vm3, %v2319_v15 }
 0x5fe   :  { %v2165_v41 = vsel %vm67_vm1, %v3249_v47, %v2626_v46  ;;  %v2164_v20 = vsel %vm67_vm1, %v3247_v45, %v2625_v26 }
 0x5ff   :  { %v2322_v40 = vpack.c.bf16 %v2165_v41, %v2165_v41  ;;  %v2321_v22 = vpack.c.bf16 %v2164_v20, %v2164_v20 }
 0x601   :  { %2246 = vst.msk [vmem:[%s3621_s2 + $0x3c] sm:$0xf] %vm2230_vm3, %v2322_v40  ;;  %2245 = vst.msk [vmem:[%s3621_s2 + $0x38] sm:$0xf] %vm2230_vm3, %v2321_v22 }

// kernel: _lambda_.38
= control target key start
LH: loop header
LB: loop body
LE: loop exit
PB: predicated region body
PF: predicated region fallthrough
CT: control target
= control target key end

     0   :  { %vm52_vm0 = vcmask 261120   ;;  %s192_s1 = inlined_call_operand.vmem [shape: bf16[32,32], index: 1, kind: input, shape index: {}]   ;;  %s193_s0 = inlined_call_operand.vmem [shape: bf16[32,32], index: 0, kind: input, shape index: {}]   ;;  %s194_s2 = inlined_call_operand.vmem [shape: f32[1,32], index: 2, kind: input, shape index: {}]   ;;  %s195_s3 = inlined_call_operand.vmem [shape: f32[32,32], index: 3, kind: output, shape index: {}]  }
   0x1   :  { %v135_v0 = vld [vmem:[%s192_s1 + $0x8] sm:$0xff]   ;;  %v136_v1 = vld [vmem:[%s192_s1] sm:$0xff]  }
   0x2   :  { %127 = vmatprep.subr.bf16.mxu0 %v135_v0  ;;  %v137_v2 = vld [vmem:[%s193_s0] sm:$0xff]   ;;  %v138_v3 = vld [vmem:[%s193_s0 + $0x8] sm:$0xff]  }
   0x3   :  { %128 = vmatpush3.bf16.msra.mxu0 %v135_v0  ;;  %131 = vmatprep.mubr.msk.bf16.mxu0 %vm52_vm0, %v137_v2  ;;  %v116_v4 = vld [vmem:[%s194_s2] ss:$0 sm:$0xff] }
   0x4   :  { %129 = vmatprep.subr.bf16.mxu0 %v136_v1 }
   0x7   :  { %130 = vmatpush3.bf16.msra.mxu0 %v136_v1 }
   0xa   :  { %132 = vmatmul.mubr.msk.bf16.vlgmr.msra.gmra.mxu0 %vm52_vm0, %v138_v3 }
  0xca   :  { %v133_v5 = vpop.f32.mrf.mxu0 }
  0xcb   :  { %v102_v6 = vadd.f32 %v133_v5, %v116_v4 }
  0xcc   :  { %v93_v7 = vpop.f32.mrf.mxu0 }
  0xcd   :  { %110 = vst.msk [vmem:[%s195_s3 + $0x10] sm:$0xff] %vm52_vm0, %v102_v6  ;;  %v94_v8 = vadd.f32 %v116_v4, %v93_v7 }
  0xce   :  { %v134_v9 = vpop.f32.mrf.mxu0 }
  0xcf   :  { %108 = vst.msk [vmem:[%s195_s3] sm:$0xff] %vm52_vm0, %v94_v8  ;;  %v105_v10 = vadd.f32 %v134_v9, %v116_v4 }
  0xd0   :  { %v96_v11 = vpop.f32.mrf.mxu0 }
  0xd1   :  { %111 = vst.msk [vmem:[%s195_s3 + $0x18] sm:$0xff] %vm52_vm0, %v105_v10  ;;  %v97_v12 = vadd.f32 %v116_v4, %v96_v11 }
  0xd3   :  { %109 = vst.msk [vmem:[%s195_s3 + $0x8] sm:$0xff] %vm52_vm0, %v97_v12 }

// kernel: _lambda_.39
= control target key start
LH: loop header
LB: loop body
LE: loop exit
PB: predicated region body
PF: predicated region fallthrough
CT: control target
= control target key end

     0   :  { %vm25_vm0 = vcmask 261120   ;;  %s482_s0 = inlined_call_operand.vmem [shape: f32[32,32], index: 0, kind: input, shape index: {}]   ;;  %s483_s3 = inlined_call_operand.vmem [shape: bf16[32,128], index: 3, kind: input, shape index: {}]   ;;  %s484_s1 = inlined_call_operand.vmem [shape: f32[1,32], index: 1, kind: input, shape index: {}]   ;;  %s485_s2 = inlined_call_operand.vmem [shape: f32[1,32], index: 2, kind: input, shape index: {}]   ;;  %s486_s4 = inlined_call_operand.vmem [shape: f32[1,128], index: 4, kind: input, shape index: {}]   ;;  %s487_s5 = inlined_call_operand.vmem [shape: bf16[32,128], index: 5, kind: output, shape index: {}]  }
   0x1   :  { %v21_v0 = vld [vmem:[%s482_s0] sm:$0xff]  ;;  %v23_v1 = vld [vmem:[%s482_s0 + $0x10] sm:$0xff]  ;;  %v22_v2 = vld [vmem:[%s482_s0 + $0x8] sm:$0xff] }
   0x2   :  { %v26_v3 = vsel %vm25_vm0, %v21_v0, 0.0  ;;  %v32_v4 = vsel %vm25_vm0, %v23_v1, 0.0  ;;  %v24_v5 = vld [vmem:[%s482_s0 + $0x18] sm:$0xff]  ;;  %v29_v6 = vsel %vm25_vm0, %v22_v2, 0.0  ;;  %v351_v28 = vld [vmem:[%s483_s3 + $0x8] sm:$0xff]   ;;  %v352_v29 = vld [vmem:[%s483_s3] sm:$0xff]  }
   0x3   :  { %27 = vadd.xlane.f32.xlu0 %v26_v3  ;;  %33 = vadd.xlane.f32.xlu1 %v32_v4  ;;  %v35_v7 = vsel %vm25_vm0, %v24_v5, 0.0  ;;  %v313_v44 = vld [vmem:[%s484_s1] ss:$0 sm:$0xff] }
   0x4   :  { %343 = vmatprep.subr.bf16.mxu0 %v351_v28  ;;  %v314_v49 = vld [vmem:[%s485_s2] ss:$0 sm:$0xff] }
   0x5   :  { %344 = vmatpush3.bf16.msra.mxu0 %v351_v28  ;;  %v315_v62 = vld [vmem:[%s486_s4] ss:$0 sm:$0xff] }
   0x6   :  { %345 = vmatprep.subr.bf16.mxu0 %v352_v29 }
   0x7   :  { %30 = vadd.xlane.f32.xlu0 %v29_v6  ;;  %36 = vadd.xlane.f32.xlu1 %v35_v7 }
   0x9   :  { %346 = vmatpush3.bf16.msra.mxu0 %v352_v29 }
  0x8c   :  { %v28_v8 = vpop.xlane.xlu0 %27  ;;  %v34_v9 = vpop.xlane.xlu1 %33 }
  0x8d   :  { %v39_v10 = vmul.f32 0.03125, %v28_v8  ;;  %v41_v11 = vmul.f32 0.03125, %v34_v9 }
  0x8f   :  { %v43_v12 = vsub.f32 %v21_v0, %v39_v10  ;;  %v45_v13 = vsub.f32 %v23_v1, %v41_v11 }
  0x90   :  { %v31_v14 = vpop.xlane.xlu0 %30  ;;  %v37_v15 = vpop.xlane.xlu1 %36 }
  0x91   :  { %v40_v16 = vmul.f32 0.03125, %v31_v14  ;;  %v42_v17 = vmul.f32 0.03125, %v37_v15  ;;  %v47_v18 = vmul.f32 %v43_v12, %v43_v12  ;;  %v49_v19 = vmul.f32 %v45_v13, %v45_v13 }
  0x93   :  { %v44_v20 = vsub.f32 %v22_v2, %v40_v16  ;;  %v46_v21 = vsub.f32 %v24_v5, %v42_v17  ;;  %v51_v22 = vsel %vm25_vm0, %v47_v18, 0.0  ;;  %v57_v23 = vsel %vm25_vm0, %v49_v19, 0.0 }
  0x94   :  { %52 = vadd.xlane.f32.xlu0 %v51_v22 }
  0x95   :  { %v48_v24 = vmul.f32 %v44_v20, %v44_v20  ;;  %v50_v25 = vmul.f32 %v46_v21, %v46_v21 }
  0x97   :  { %v54_v26 = vsel %vm25_vm0, %v48_v24, 0.0  ;;  %v60_v27 = vsel %vm25_vm0, %v50_v25, 0.0 }
  0x98   :  { %58 = vadd.xlane.f32.xlu0 %v57_v23  ;;  %55 = vadd.xlane.f32.xlu1 %v54_v26 }
  0x9c   :  { %61 = vadd.xlane.f32.xlu1 %v60_v27 }
 0x11d   :  { %v53_v30 = vpop.xlane.xlu0 %52 }
 0x11e   :  { %v63_v31 = vmul.f32 0.03125, %v53_v30 }
 0x120   :  { %v67_v32 = vadd.f32 1e-05, %v63_v31 }
 0x121   :  { %v56_v33 = vpop.xlane.xlu1 %55  ;;  %v59_v34 = vpop.xlane.xlu0 %58 }
 0x122   :  { %353 = vrsqrt.f32 %v67_v32  ;;  %v64_v35 = vmul.f32 0.03125, %v56_v33  ;;  %v65_v36 = vmul.f32 0.03125, %v59_v34 }
 0x124   :  { %v68_v37 = vadd.f32 1e-05, %v64_v35  ;;  %v69_v38 = vadd.f32 1e-05, %v65_v36 }
 0x125   :  { %v62_v39 = vpop.xlane.xlu1 %61 }
 0x126   :  { %355 = vrsqrt.f32 %v68_v37  ;;  %v66_v40 = vmul.f32 0.03125, %v62_v39 }
 0x127   :  { %357 = vrsqrt.f32 %v69_v38 }
 0x128   :  { %v70_v41 = vadd.f32 1e-05, %v66_v40 }
 0x12a   :  { %359 = vrsqrt.f32 %v70_v41 }
 0x12f   :  { %v354_v42 = vpop.eup %353 }
 0x130   :  { %v75_v43 = vmul.f32 %v354_v42, %v43_v12 }
 0x132   :  { %v86_v48 = vmul.f32 %v313_v44, %v75_v43 }
 0x133   :  { %v356_v45 = vpop.eup %355 }
 0x134   :  { %v358_v46 = vpop.eup %357  ;;  %v76_v47 = vmul.f32 %v356_v45, %v44_v20  ;;  %v97_v53 = vadd.f32 %v314_v49, %v86_v48 }
 0x135   :  { %v77_v50 = vmul.f32 %v358_v46, %v45_v13 }
 0x136   :  { %v87_v51 = vmul.f32 %v313_v44, %v76_v47 }
 0x137   :  { %v360_v52 = vpop.eup %359  ;;  %v88_v56 = vmul.f32 %v313_v44, %v77_v50 }
 0x138   :  { %v98_v54 = vadd.f32 %v314_v49, %v87_v51  ;;  %v78_v55 = vmul.f32 %v360_v52, %v46_v21 }
 0x139   :  { %v99_v59 = vadd.f32 %v314_v49, %v88_v56 }
 0x13a   :  { %v101_v57 = vpack.c.bf16 %v98_v54, %v97_v53  ;;  %v89_v58 = vmul.f32 %v313_v44, %v78_v55 }
 0x13c   :  { %347 = vmatprep.mubr.msk.bf16.mxu0 %vm25_vm0, %v101_v57  ;;  %v100_v60 = vadd.f32 %v314_v49, %v89_v58 }
 0x13e   :  { %v102_v61 = vpack.c.bf16 %v100_v60, %v99_v59 }
 0x140   :  { %348 = vmatmul.mubr.msk.bf16.vlgmr.msra.gmra.mxu0 %vm25_vm0, %v102_v61 }
 0x200   :  { %v349_v63 = vpop.f32.mrf.mxu0 }
 0x201   :  { %v444_v0 = vadd.f32 %v349_v63, %v315_v62 }
 0x202   :  { %v166_v1 = vpop.f32.mrf.mxu0 }
 0x203   :  { %v447_v2 = vmul.f32 0.70710677, %v444_v0  ;;  %v449_v3 = vadd.f32 %v315_v62, %v166_v1 }
 0x204   :  { %v350_v4 = vpop.f32.mrf.mxu0 }
 0x205   :  { %v187_v5 = vand.u32 2147483647, %v447_v2  ;;  %v453_v6 = vmul.f32 0.70710677, %v449_v3  ;;  %v455_v7 = vadd.f32 %v350_v4, %v315_v62  ;;  %vm267_vm1 = vcmp.ge.f32.partialorder %v447_v2, 0.0 }
 0x206   :  { %v169_v8 = vpop.f32.mrf.mxu0 }
 0x207   :  { %v191_v9 = vmul.f32 0.3275911, %v187_v5  ;;  %v185_v10 = vand.u32 2147483647, %v453_v6  ;;  %v459_v11 = vmul.f32 0.70710677, %v455_v7  ;;  %v461_v12 = vadd.f32 %v315_v62, %v169_v8 }
 0x208   :  { %v243_v23 = vsub.f32 0.0, %v187_v5  ;;  %vm265_vm2 = vcmp.ge.f32.partialorder %v453_v6, 0.0  ;;  %v277_v6 = vmul.f32 0.5, %v449_v3 }
 0x209   :  { %v195_v13 = vadd.f32 1.0, %v191_v9  ;;  %v189_v14 = vmul.f32 0.3275911, %v185_v10  ;;  %v188_v15 = vand.u32 2147483647, %v459_v11  ;;  %v241_v24 = vsub.f32 0.0, %v185_v10 }
 0x20a   :  { %v465_v16 = vmul.f32 0.70710677, %v461_v12  ;;  %v247_v25 = vmul.f32 %v243_v23, %v187_v5  ;;  %vm268_vm3 = vcmp.ge.f32.partialorder %v459_v11, 0.0 }
 0x20b   :  { %361 = vrcp.f32 %v195_v13  ;;  %v193_v17 = vadd.f32 1.0, %v189_v14  ;;  %v192_v18 = vmul.f32 0.3275911, %v188_v15  ;;  %v244_v26 = vsub.f32 0.0, %v188_v15 }
 0x20c   :  { %v186_v19 = vand.u32 2147483647, %v465_v16  ;;  %v245_v28 = vmul.f32 %v241_v24, %v185_v10  ;;  %v253_v30 = vmul.f32 1.442695, %v247_v25  ;;  %vm266_vm4 = vcmp.ge.f32.partialorder %v465_v16, 0.0 }
 0x20d   :  { %363 = vrcp.f32 %v193_v17  ;;  %v196_v20 = vadd.f32 1.0, %v192_v18  ;;  %v248_v32 = vmul.f32 %v244_v26, %v188_v15 }
 0x20e   :  { %v190_v21 = vmul.f32 0.3275911, %v186_v19  ;;  %v242_v31 = vsub.f32 0.0, %v186_v19  ;;  %v249_v36 = vmul.f32 1.442695, %v245_v28 }
 0x20f   :  { %365 = vrcp.f32 %v196_v20  ;;  %v255_v42 = vmul.f32 1.442695, %v248_v32 }
 0x210   :  { %v194_v22 = vadd.f32 1.0, %v190_v21  ;;  %v246_v39 = vmul.f32 %v242_v31, %v186_v19 }
 0x212   :  { %367 = vrcp.f32 %v194_v22  ;;  %v251_v49 = vmul.f32 1.442695, %v246_v39  ;;  %v280_v39 = vmul.f32 0.5, %v455_v7 }
 0x213   :  { %369 = vpow2.f32 %v253_v30 }
 0x214   :  { %371 = vpow2.f32 %v249_v36 }
 0x215   :  { %373 = vpow2.f32 %v255_v42 }
 0x216   :  { %375 = vpow2.f32 %v251_v49 }
 0x218   :  { %v362_v27 = vpop.eup %361 }
 0x219   :  { %v207_v29 = vmul.f32 1.0614054, %v362_v27 }
 0x21a   :  { %v364_v33 = vpop.eup %363 }
 0x21b   :  { %v211_v34 = vadd.f32 -1.4531521, %v207_v29  ;;  %v205_v35 = vmul.f32 1.0614054, %v364_v33 }
 0x21c   :  { %v366_v37 = vpop.eup %365 }
 0x21d   :  { %v215_v38 = vmul.f32 %v362_v27, %v211_v34  ;;  %v209_v40 = vadd.f32 -1.4531521, %v205_v35  ;;  %v208_v41 = vmul.f32 1.0614054, %v366_v37 }
 0x21f   :  { %v219_v43 = vadd.f32 1.4214138, %v215_v38  ;;  %v368_v44 = vpop.eup %367  ;;  %v213_v45 = vmul.f32 %v364_v33, %v209_v40  ;;  %v212_v46 = vadd.f32 -1.4531521, %v208_v41  ;;  %v279_v38 = vmul.f32 0.5, %v444_v0 }
 0x220   :  { %v206_v48 = vmul.f32 1.0614054, %v368_v44  ;;  %v370_v5 = vpop.eup %369 }
 0x221   :  { %v223_v47 = vmul.f32 %v362_v27, %v219_v43  ;;  %v217_v50 = vadd.f32 1.4214138, %v213_v45  ;;  %v216_v51 = vmul.f32 %v366_v37, %v212_v46  ;;  %v372_v17 = vpop.eup %371  ;;  %v278_v45 = vmul.f32 0.5, %v461_v12 }
 0x222   :  { %v210_v53 = vadd.f32 -1.4531521, %v206_v48  ;;  %v374_v22 = vpop.eup %373 }
 0x223   :  { %v227_v52 = vadd.f32 -0.28449672, %v223_v47  ;;  %v221_v54 = vmul.f32 %v364_v33, %v217_v50  ;;  %v220_v55 = vadd.f32 1.4214138, %v216_v51  ;;  %v376_v28 = vpop.eup %375 }
 0x224   :  { %v214_v57 = vmul.f32 %v368_v44, %v210_v53 }
 0x225   :  { %v231_v56 = vmul.f32 %v362_v27, %v227_v52  ;;  %v225_v58 = vadd.f32 -0.28449672, %v221_v54  ;;  %v224_v59 = vmul.f32 %v366_v37, %v220_v55 }
 0x226   :  { %v218_v61 = vadd.f32 1.4214138, %v214_v57 }
 0x227   :  { %v235_v60 = vadd.f32 0.2548296, %v231_v56  ;;  %v229_v62 = vmul.f32 %v364_v33, %v225_v58  ;;  %v228_v63 = vadd.f32 -0.28449672, %v224_v59 }
 0x228   :  { %v222_v4 = vmul.f32 %v368_v44, %v218_v61 }
 0x229   :  { %v239_v1 = vmul.f32 %v362_v27, %v235_v60  ;;  %v233_v8 = vadd.f32 0.2548296, %v229_v62  ;;  %v232_v9 = vmul.f32 %v366_v37, %v228_v63 }
 0x22a   :  { %v226_v13 = vadd.f32 -0.28449672, %v222_v4 }
 0x22b   :  { %v259_v10 = vmul.f32 %v370_v5, %v239_v1  ;;  %v237_v14 = vmul.f32 %v364_v33, %v233_v8  ;;  %v236_v15 = vadd.f32 0.2548296, %v232_v9 }
 0x22c   :  { %v230_v19 = vmul.f32 %v368_v44, %v226_v13 }
 0x22d   :  { %v263_v18 = vsub.f32 1.0, %v259_v10  ;;  %v257_v20 = vmul.f32 %v372_v17, %v237_v14  ;;  %v240_v21 = vmul.f32 %v366_v37, %v236_v15 }
 0x22e   :  { %v234_v24 = vadd.f32 0.2548296, %v230_v19 }
 0x22f   :  { %v271_v23 = vsub.f32 0.0, %v263_v18  ;;  %v261_v25 = vsub.f32 1.0, %v257_v20  ;;  %v260_v26 = vmul.f32 %v374_v22, %v240_v21 }
 0x230   :  { %v238_v27 = vmul.f32 %v368_v44, %v234_v24 }
 0x231   :  { %v275_v29 = vsel %vm267_vm1, %v263_v18, %v271_v23  ;;  %v269_v30 = vsub.f32 0.0, %v261_v25  ;;  %v264_v31 = vsub.f32 1.0, %v260_v26 }
 0x232   :  { %v258_v32 = vmul.f32 %v376_v28, %v238_v27  ;;  %v283_v34 = vadd.f32 1.0, %v275_v29 }
 0x233   :  { %v272_v33 = vsub.f32 0.0, %v264_v31  ;;  %v273_v35 = vsel %vm265_vm2, %v261_v25, %v269_v30 }
 0x234   :  { %v262_v36 = vsub.f32 1.0, %v258_v32  ;;  %v281_v41 = vadd.f32 1.0, %v273_v35  ;;  %v287_v42 = vmul.f32 %v283_v34, %v279_v38 }
 0x235   :  { %v276_v37 = vsel %vm268_vm3, %v264_v31, %v272_v33 }
 0x236   :  { %v284_v2 = vadd.f32 1.0, %v276_v37  ;;  %v270_v40 = vsub.f32 0.0, %v262_v36  ;;  %v285_v47 = vmul.f32 %v281_v41, %v277_v6 }
 0x238   :  { %v288_v43 = vmul.f32 %v284_v2, %v280_v39  ;;  %v274_v44 = vsel %vm266_vm4, %v262_v36, %v270_v40 }
 0x239   :  { %v282_v46 = vadd.f32 1.0, %v274_v44 }
 0x23a   :  { %v336_v11 = vpack.c.bf16 %v288_v43, %v287_v42 }
 0x23b   :  { %v286_v48 = vmul.f32 %v282_v46, %v278_v45 }
 0x23c   :  { %338 = vst [vmem:[%s487_s5 + $0x8] sm:$0xff] %v336_v11  }
 0x23d   :  { %v331_v0 = vpack.c.bf16 %v286_v48, %v285_v47 }
 0x23f   :  { %332 = vst [vmem:[%s487_s5] sm:$0xff] %v331_v0  }

// kernel: _lambda_.37
= control target key start
LH: loop header
LB: loop body
LE: loop exit
PB: predicated region body
PF: predicated region fallthrough
CT: control target
= control target key end

     0   :  { %v1384_v1 = vmov 0.0   ;;  %vm1385_vm0 = vmmov 0   ;;  %s1386_s11 = smov 96   ;;  %vm31_vm1 = vcmask 64512   ;;  %vm141_vm2 = vcmask 130048   ;;  %s1387_s17 = smov 64   ;;  %s1654_s0 = inlined_call_operand.vmem [shape: bf16[2,16,96], index: 0, kind: input, shape index: {}]   ;;  %s1655_s1 = inlined_call_operand.vmem [shape: f32[1,4,16,16], index: 1, kind: input, shape index: {}]   ;;  %s1656_s2 = inlined_call_operand.vmem [shape: bf16[2,16,32], index: 2, kind: output, shape index: {}]  }
   0x1   :  { %v1418_v0 = vld [vmem:[%s1654_s0] sm:$0xff]   ;;  %1176 = vmatprep.subr.bf16.mxu0 %v1384_v1  ;;  %1182 = vmatprep.subr.bf16.mxu1 %v1384_v1  ;;  %v1430_v2 = vld [vmem:[%s1654_s0 + $0x8] sm:$0xff]   ;;  %s1388_s18 = smov 88   ;;  %s1389_s19 = smov 120   ;;  %vm1088_vm3 = vcmask 195584   ;;  %vm1109_vm4 = vcmask 257024  }
   0x2   :  { %1178 = vmatprep.mubr.msk.bf16.mxu0 %vm1385_vm0, %v1384_v1  ;;  %1184 = vmatprep.mubr.msk.bf16.mxu1 %vm1385_vm0, %v1384_v1  ;;  %v16_v8 = vld [vmem:[%s1655_s1] sm:$0xff]  ;;  %v17_v14 = vld [vmem:[%s1655_s1 + $0x8] sm:$0xff]  ;;  %s1390_s24 = smov 56   ;;  %s1391_s25 = smov 80  }
   0x3   :  { %29 = vrot.lane.b32.xlu0 %v1418_v0, %s1386_s11  ;;  %s1392_s26 = smov 112   ;;  %s1393_s3 = smov 48  }
   0x4   :  { %s1394_s4 = smov 72   ;;  %s1395_s5 = smov 104  }
   0x5   :  { %s1397_s10 = smov 8   ;;  %s1399_s12 = smov 24  }
   0x7   :  { %84 = vrot.lane.b32.xlu0 %v1430_v2, %s1386_s11  ;;  %s1398_s11 = smov 16  }
  0x75   :  { %v30_v3 = vpop.permute.xlu0 %29 }
  0x76   :  { %v36_v4 = vsel %vm31_vm1, %v30_v3, 0 }
  0x77   :  { %1177 = vmatpush3.bf16.xpose.msra.mxu0 %v36_v4 }
  0x78   :  { %1188 = vmatprep.subr.bf16.mxu0 %v1384_v1 }
  0x79   :  { %v85_v5 = vpop.permute.xlu0 %84 }
  0x7a   :  { %v90_v6 = vsel %vm31_vm1, %v85_v5, 0 }
  0x7b   :  { %1183 = vmatpush3.bf16.xpose.msra.mxu1 %v90_v6 }
  0x7c   :  { %1194 = vmatprep.subr.bf16.mxu1 %v1384_v1 }
  0x7e   :  { %1179 = vmatmul.mubr.msk.bf16.vlgmr.msra.gmra.mxu0 %vm31_vm1, %v1418_v0 }
  0x7f   :  { %1190 = vmatprep.mubr.msk.bf16.mxu0 %vm1385_vm0, %v1384_v1 }
  0x82   :  { %1185 = vmatmul.mubr.msk.bf16.vlgmr.msra.gmra.mxu1 %vm31_vm1, %v1430_v2 }
  0x83   :  { %1196 = vmatprep.mubr.msk.bf16.mxu1 %vm1385_vm0, %v1384_v1 }
 0x13e   :  { %v72_v7 = vpop.f32.mrf.mxu0 }
 0x13f   :  { %v133_v9 = vmul.f32 0.35355338, %v72_v7 }
 0x140   :  { %v1180_v10 = vpop.f32.mrf.mxu0 }
 0x141   :  { %v137_v11 = vadd.f32 %v133_v9, %v16_v8 }
 0x142   :  { %v75_v12 = vpop.f32.mrf.mxu0  ;;  %v126_v13 = vpop.f32.mrf.mxu1 }
 0x143   :  { %v134_v15 = vmul.f32 0.35355338, %v75_v12  ;;  %v135_v16 = vmul.f32 0.35355338, %v126_v13  ;;  %v142_v17 = vsel %vm141_vm2, %v137_v11, -inf }
 0x144   :  { %143 = vmax.xlane.f32.xlu1 %v142_v17  ;;  %v1181_v18 = vpop.f32.mrf.mxu0  ;;  %v1186_v19 = vpop.f32.mrf.mxu1 }
 0x145   :  { %v138_v20 = vadd.f32 %v134_v15, %v17_v14  ;;  %v139_v21 = vadd.f32 %v135_v16, %v16_v8  ;;  %v18_v18 = vld [vmem:[%s1655_s1 + $0x10] sm:$0xff] }
 0x146   :  { %v129_v22 = vpop.f32.mrf.mxu1 }
 0x147   :  { %v136_v23 = vmul.f32 0.35355338, %v129_v22  ;;  %v145_v24 = vsel %vm141_vm2, %v138_v20, -inf  ;;  %v148_v25 = vsel %vm141_vm2, %v139_v21, -inf }
 0x148   :  { %146 = vmax.xlane.f32.xlu1 %v145_v24  ;;  %149 = vmax.xlane.f32.xlu0 %v148_v25  ;;  %v1187_v26 = vpop.f32.mrf.mxu1  ;;  %v19_v25 = vld [vmem:[%s1655_s1 + $0x18] sm:$0xff] }
 0x149   :  { %v140_v27 = vadd.f32 %v136_v23, %v17_v14 }
 0x14b   :  { %v151_v28 = vsel %vm141_vm2, %v140_v27, -inf }
 0x14c   :  { %152 = vmax.xlane.f32.xlu1 %v151_v28 }
 0x15d   :  { %188 = vrot.lane.b32.xlu1 %v1418_v0, %s1387_s17 }
 0x15e   :  { %235 = vrot.lane.b32.xlu0 %v1430_v2, %s1387_s17 }
 0x161   :  { %284 = vrot.lane.b32.xlu1 %v1418_v0, %s1388_s18 }
 0x165   :  { %335 = vrot.lane.b32.xlu1 %v1430_v2, %s1388_s18 }
 0x1cd   :  { %v144_v29 = vpop.xlane.xlu1 %143 }
 0x1ce   :  { %v154_v30 = vsub.f32 %v137_v11, %v144_v29 }
 0x1d0   :  { %v158_v31 = vmul.f32 1.442695, %v154_v30 }
 0x1d1   :  { %v147_v32 = vpop.xlane.xlu1 %146  ;;  %v150_v33 = vpop.xlane.xlu0 %149 }
 0x1d2   :  { %1320 = vpow2.f32 %v158_v31  ;;  %v155_v34 = vsub.f32 %v138_v20, %v147_v32  ;;  %v156_v35 = vsub.f32 %v139_v21, %v150_v33 }
 0x1d4   :  { %v162_v36 = vmul.f32 1.442695, %v156_v35  ;;  %v160_v37 = vmul.f32 1.442695, %v155_v34 }
 0x1d5   :  { %v153_v38 = vpop.xlane.xlu1 %152  ;;  %v236_v50 = vpop.permute.xlu0 %235 }
 0x1d6   :  { %v157_v39 = vsub.f32 %v140_v27, %v153_v38  ;;  %1322 = vpow2.f32 %v162_v36  ;;  %1195 = vmatpush3.bf16.msra.mxu1 %v236_v50 }
 0x1d7   :  { %1324 = vpow2.f32 %v160_v37  ;;  %1206 = vmatprep.subr.bf16.mxu1 %v1384_v1 }
 0x1d8   :  { %v164_v40 = vmul.f32 1.442695, %v157_v39 }
 0x1d9   :  { %v189_v41 = vpop.permute.xlu1 %188 }
 0x1da   :  { %1189 = vmatpush3.bf16.msra.mxu0 %v189_v41  ;;  %1326 = vpow2.f32 %v164_v40 }
 0x1db   :  { %1200 = vmatprep.subr.bf16.mxu0 %v1384_v1 }
 0x1dd   :  { %v285_v51 = vpop.permute.xlu1 %284 }
 0x1de   :  { %v290_v3 = vsel %vm31_vm1, %v285_v51, 0 }
 0x1df   :  { %v1321_v42 = vpop.eup %1320 }
 0x1e0   :  { %v166_v43 = vsel %vm141_vm2, %v1321_v42, 0.0 }
 0x1e1   :  { %167 = vadd.xlane.f32.xlu1 %v166_v43  ;;  %v336_v52 = vpop.permute.xlu1 %335 }
 0x1e2   :  { %v341_v8 = vsel %vm31_vm1, %v336_v52, 0 }
 0x1e3   :  { %v1323_v44 = vpop.eup %1322 }
 0x1e4   :  { %v172_v45 = vsel %vm141_vm2, %v1323_v44, 0.0  ;;  %v1325_v46 = vpop.eup %1324 }
 0x1e5   :  { %173 = vadd.xlane.f32.xlu1 %v172_v45  ;;  %v169_v47 = vsel %vm141_vm2, %v1325_v46, 0.0 }
 0x1e7   :  { %v1327_v48 = vpop.eup %1326 }
 0x1e8   :  { %v175_v49 = vsel %vm141_vm2, %v1327_v48, 0.0 }
 0x1e9   :  { %170 = vadd.xlane.f32.xlu1 %v169_v47 }
 0x1ed   :  { %176 = vadd.xlane.f32.xlu1 %v175_v49 }
 0x1fe   :  { %282 = vrot.lane.b32.xlu1 %v1418_v0, %s1389_s19 }
 0x202   :  { %333 = vrot.lane.b32.xlu1 %v1430_v2, %s1389_s19 }
 0x26a   :  { %v168_v53 = vpop.xlane.xlu1 %167 }
 0x26b   :  { %1328 = vrcp.f32 %v168_v53 }
 0x26e   :  { %v174_v54 = vpop.xlane.xlu1 %173 }
 0x272   :  { %v171_v55 = vpop.xlane.xlu1 %170 }
 0x273   :  { %1330 = vrcp.f32 %v171_v55 }
 0x274   :  { %1332 = vrcp.f32 %v174_v54 }
 0x276   :  { %v177_v56 = vpop.xlane.xlu1 %176 }
 0x277   :  { %1334 = vrcp.f32 %v177_v56 }
 0x278   :  { %v1329_v57 = vpop.eup %1328 }
 0x279   :  { %v182_v59 = vmul.f32 %v1329_v57, %v1321_v42 }
 0x27a   :  { %v283_v7 = vpop.permute.xlu1 %282 }
 0x27e   :  { %v334_v9 = vpop.permute.xlu1 %333 }
 0x280   :  { %v1331_v58 = vpop.eup %1330 }
 0x281   :  { %v183_v60 = vmul.f32 %v1331_v58, %v1325_v46  ;;  %v1333_v61 = vpop.eup %1332 }
 0x282   :  { %v184_v4 = vmul.f32 %v1333_v61, %v1323_v44 }
 0x283   :  { %v186_v62 = vpack.c.bf16 %v183_v60, %v182_v59 }
 0x284   :  { %v1335_v63 = vpop.eup %1334 }
 0x285   :  { %1191 = vmatmul.mubr.msk.bf16.vlgmr.msra.gmra.mxu0 %vm141_vm2, %v186_v62  ;;  %v185_v5 = vmul.f32 %v1335_v63, %v1327_v48 }
 0x286   :  { %1201 = vmatpush3.bf16.xpose.msra.mxu0 %v290_v3  ;;  %1202 = vmatprep.mubr.msk.bf16.mxu0 %vm1385_vm0, %v1384_v1 }
 0x287   :  { %v187_v6 = vpack.c.bf16 %v185_v5, %v184_v4  ;;  %1212 = vmatprep.subr.bf16.mxu0 %v1384_v1 }
 0x289   :  { %1197 = vmatmul.mubr.msk.bf16.vlgmr.msra.gmra.mxu1 %vm141_vm2, %v187_v6 }
 0x28a   :  { %1207 = vmatpush3.bf16.xpose.msra.mxu1 %v341_v8  ;;  %1208 = vmatprep.mubr.msk.bf16.mxu1 %vm1385_vm0, %v1384_v1 }
 0x28b   :  { %1218 = vmatprep.subr.bf16.mxu1 %v1384_v1 }
 0x28d   :  { %1203 = vmatmul.mubr.msk.bf16.vlgmr.msra.gmra.mxu0 %vm31_vm1, %v283_v7 }
 0x28e   :  { %1214 = vmatprep.mubr.msk.bf16.mxu0 %vm1385_vm0, %v1384_v1 }
 0x291   :  { %1209 = vmatmul.mubr.msk.bf16.vlgmr.msra.gmra.mxu1 %vm31_vm1, %v334_v9 }
 0x292   :  { %1220 = vmatprep.mubr.msk.bf16.mxu1 %vm1385_vm0, %v1384_v1 }
 0x345   :  { %v1483_v10 = vpop.f32.mrf.mxu0 }
 0x347   :  { %v1192_v11 = vpop.f32.mrf.mxu0 }
 0x349   :  { %v1485_v12 = vpop.f32.mrf.mxu0  ;;  %v1487_v13 = vpop.f32.mrf.mxu1 }
 0x34b   :  { %v1193_v14 = vpop.f32.mrf.mxu0  ;;  %v1198_v15 = vpop.f32.mrf.mxu1 }
 0x34d   :  { %v1489_v16 = vpop.f32.mrf.mxu1  ;;  %v326_v17 = vpop.f32.mrf.mxu0 }
 0x34e   :  { %v384_v19 = vmul.f32 0.35355338, %v326_v17 }
 0x34f   :  { %v1199_v20 = vpop.f32.mrf.mxu1  ;;  %v1204_v21 = vpop.f32.mrf.mxu0 }
 0x350   :  { %v388_v22 = vadd.f32 %v384_v19, %v18_v18 }
 0x351   :  { %v329_v23 = vpop.f32.mrf.mxu0  ;;  %v377_v24 = vpop.f32.mrf.mxu1 }
 0x352   :  { %v385_v26 = vmul.f32 0.35355338, %v329_v23  ;;  %v386_v27 = vmul.f32 0.35355338, %v377_v24  ;;  %v392_v28 = vsel %vm141_vm2, %v388_v22, -inf }
 0x353   :  { %393 = vmax.xlane.f32.xlu0 %v392_v28  ;;  %v1205_v29 = vpop.f32.mrf.mxu0  ;;  %v1210_v30 = vpop.f32.mrf.mxu1 }
 0x354   :  { %v389_v31 = vadd.f32 %v385_v26, %v19_v25  ;;  %v390_v32 = vadd.f32 %v386_v27, %v18_v18 }
 0x355   :  { %v380_v33 = vpop.f32.mrf.mxu1 }
 0x356   :  { %v387_v34 = vmul.f32 0.35355338, %v380_v33  ;;  %v395_v35 = vsel %vm141_vm2, %v389_v31, -inf  ;;  %v398_v36 = vsel %vm141_vm2, %v390_v32, -inf }
 0x357   :  { %396 = vmax.xlane.f32.xlu1 %v395_v35  ;;  %399 = vmax.xlane.f32.xlu0 %v398_v36  ;;  %v1211_v37 = vpop.f32.mrf.mxu1 }
 0x358   :  { %v391_v38 = vadd.f32 %v387_v34, %v19_v25  ;;  %v20_v34 = vld [vmem:[%s1655_s1 + $0x20] sm:$0xff] }
 0x35a   :  { %v401_v39 = vsel %vm141_vm2, %v391_v38, -inf }
 0x35b   :  { %402 = vmax.xlane.f32.xlu0 %v401_v39 }
 0x368   :  { %438 = vrot.lane.b32.xlu1 %v1418_v0, %s1390_s24 }
 0x3dc   :  { %v394_v40 = vpop.xlane.xlu0 %393 }
 0x3dd   :  { %v404_v41 = vsub.f32 %v388_v22, %v394_v40 }
 0x3df   :  { %v408_v42 = vmul.f32 1.442695, %v404_v41 }
 0x3e0   :  { %v397_v43 = vpop.xlane.xlu1 %396  ;;  %v400_v44 = vpop.xlane.xlu0 %399 }
 0x3e1   :  { %1336 = vpow2.f32 %v408_v42  ;;  %v405_v45 = vsub.f32 %v389_v31, %v397_v43  ;;  %v406_v46 = vsub.f32 %v390_v32, %v400_v44  ;;  %v21_v42 = vld [vmem:[%s1655_s1 + $0x28] sm:$0xff] }
 0x3e3   :  { %v410_v47 = vmul.f32 1.442695, %v405_v45  ;;  %v412_v48 = vmul.f32 1.442695, %v406_v46 }
 0x3e4   :  { %v403_v49 = vpop.xlane.xlu0 %402  ;;  %v439_v50 = vpop.permute.xlu1 %438 }
 0x3e5   :  { %1338 = vpow2.f32 %v410_v47  ;;  %v407_v51 = vsub.f32 %v391_v38, %v403_v49  ;;  %1213 = vmatpush3.bf16.msra.mxu0 %v439_v50 }
 0x3e6   :  { %1340 = vpow2.f32 %v412_v48  ;;  %1224 = vmatprep.subr.bf16.mxu0 %v1384_v1 }
 0x3e7   :  { %v414_v52 = vmul.f32 1.442695, %v407_v51 }
 0x3e9   :  { %1342 = vpow2.f32 %v414_v52 }
 0x3ee   :  { %v1337_v53 = vpop.eup %1336 }
 0x3ef   :  { %v416_v54 = vsel %vm141_vm2, %v1337_v53, 0.0 }
 0x3f0   :  { %417 = vadd.xlane.f32.xlu1 %v416_v54 }
 0x3f2   :  { %v1339_v55 = vpop.eup %1338 }
 0x3f3   :  { %v1341_v56 = vpop.eup %1340  ;;  %v419_v57 = vsel %vm141_vm2, %v1339_v55, 0.0 }
 0x3f4   :  { %v422_v58 = vsel %vm141_vm2, %v1341_v56, 0.0  ;;  %420 = vadd.xlane.f32.xlu0 %v419_v57 }
 0x3f5   :  { %423 = vadd.xlane.f32.xlu1 %v422_v58 }
 0x3f6   :  { %v1343_v59 = vpop.eup %1342 }
 0x3f7   :  { %v425_v60 = vsel %vm141_vm2, %v1343_v59, 0.0 }
 0x3f8   :  { %426 = vadd.xlane.f32.xlu0 %v425_v60 }
 0x406   :  { %534 = vrot.lane.b32.xlu1 %v1418_v0, %s1391_s25 }
 0x40a   :  { %585 = vrot.lane.b32.xlu1 %v1430_v2, %s1391_s25 }
 0x40e   :  { %485 = vrot.lane.b32.xlu0 %v1430_v2, %s1390_s24  ;;  %583 = vrot.lane.b32.xlu1 %v1430_v2, %s1392_s26 }
 0x412   :  { %532 = vrot.lane.b32.xlu0 %v1418_v0, %s1392_s26 }
 0x479   :  { %v418_v61 = vpop.xlane.xlu1 %417 }
 0x47a   :  { %1344 = vrcp.f32 %v418_v61 }
 0x47d   :  { %v421_v62 = vpop.xlane.xlu0 %420 }
 0x47e   :  { %v424_v63 = vpop.xlane.xlu1 %423  ;;  %1346 = vrcp.f32 %v421_v62 }
 0x47f   :  { %1348 = vrcp.f32 %v424_v63 }
 0x481   :  { %v427_v3 = vpop.xlane.xlu0 %426 }
 0x482   :  { %1350 = vrcp.f32 %v427_v3  ;;  %v535_v6 = vpop.permute.xlu1 %534 }
 0x483   :  { %v540_v14 = vsel %vm31_vm1, %v535_v6, 0 }
 0x485   :  { %v486_v4 = vpop.permute.xlu0 %485 }
 0x486   :  { %1219 = vmatpush3.bf16.msra.mxu1 %v486_v4  ;;  %v586_v18 = vpop.permute.xlu1 %585 }
 0x487   :  { %1230 = vmatprep.subr.bf16.mxu1 %v1384_v1  ;;  %v1345_v5 = vpop.eup %1344  ;;  %v591_v21 = vsel %vm31_vm1, %v586_v18, 0 }
 0x488   :  { %v432_v8 = vmul.f32 %v1345_v5, %v1337_v53 }
 0x489   :  { %v533_v23 = vpop.permute.xlu0 %532 }
 0x48a   :  { %v584_v24 = vpop.permute.xlu1 %583 }
 0x48b   :  { %v1347_v7 = vpop.eup %1346 }
 0x48c   :  { %v433_v9 = vmul.f32 %v1347_v7, %v1339_v55  ;;  %v1349_v11 = vpop.eup %1348 }
 0x48d   :  { %v434_v19 = vmul.f32 %v1349_v11, %v1341_v56 }
 0x48e   :  { %v436_v15 = vpack.c.bf16 %v433_v9, %v432_v8 }
 0x48f   :  { %v1351_v17 = vpop.eup %1350 }
 0x490   :  { %1215 = vmatmul.mubr.msk.bf16.vlgmr.msra.gmra.mxu0 %vm141_vm2, %v436_v15  ;;  %v435_v20 = vmul.f32 %v1351_v17, %v1343_v59 }
 0x491   :  { %1225 = vmatpush3.bf16.xpose.msra.mxu0 %v540_v14  ;;  %1226 = vmatprep.mubr.msk.bf16.mxu0 %vm1385_vm0, %v1384_v1 }
 0x492   :  { %v437_v22 = vpack.c.bf16 %v435_v20, %v434_v19  ;;  %1236 = vmatprep.subr.bf16.mxu0 %v1384_v1 }
 0x494   :  { %1221 = vmatmul.mubr.msk.bf16.vlgmr.msra.gmra.mxu1 %vm141_vm2, %v437_v22 }
 0x495   :  { %1231 = vmatpush3.bf16.xpose.msra.mxu1 %v591_v21  ;;  %1232 = vmatprep.mubr.msk.bf16.mxu1 %vm1385_vm0, %v1384_v1 }
 0x496   :  { %1242 = vmatprep.subr.bf16.mxu1 %v1384_v1 }
 0x498   :  { %1227 = vmatmul.mubr.msk.bf16.vlgmr.msra.gmra.mxu0 %vm31_vm1, %v533_v23 }
 0x499   :  { %1238 = vmatprep.mubr.msk.bf16.mxu0 %vm1385_vm0, %v1384_v1 }
 0x49c   :  { %1233 = vmatmul.mubr.msk.bf16.vlgmr.msra.gmra.mxu1 %vm31_vm1, %v584_v24 }
 0x49d   :  { %1244 = vmatprep.mubr.msk.bf16.mxu1 %vm1385_vm0, %v1384_v1 }
 0x550   :  { %v1531_v25 = vpop.f32.mrf.mxu0 }
 0x552   :  { %v1216_v26 = vpop.f32.mrf.mxu0 }
 0x554   :  { %v1533_v27 = vpop.f32.mrf.mxu0  ;;  %v1535_v28 = vpop.f32.mrf.mxu1 }
 0x555   :  { %v1288_v29 = vpack.i.bf16 %v1533_v27, %v1531_v25 }
 0x556   :  { %v1217_v30 = vpop.f32.mrf.mxu0  ;;  %v1222_v31 = vpop.f32.mrf.mxu1 }
 0x558   :  { %v1539_v32 = vpop.f32.mrf.mxu1  ;;  %v576_v33 = vpop.f32.mrf.mxu0 }
 0x559   :  { %v1293_v35 = vpack.i.bf16 %v1539_v32, %v1535_v28  ;;  %v634_v36 = vmul.f32 0.35355338, %v576_v33 }
 0x55a   :  { %v1223_v37 = vpop.f32.mrf.mxu1  ;;  %v1228_v38 = vpop.f32.mrf.mxu0 }
 0x55b   :  { %v638_v39 = vadd.f32 %v634_v36, %v20_v34 }
 0x55c   :  { %v579_v40 = vpop.f32.mrf.mxu0  ;;  %v627_v41 = vpop.f32.mrf.mxu1 }
 0x55d   :  { %v635_v43 = vmul.f32 0.35355338, %v579_v40  ;;  %v636_v44 = vmul.f32 0.35355338, %v627_v41  ;;  %v642_v45 = vsel %vm141_vm2, %v638_v39, -inf }
 0x55e   :  { %643 = vmax.xlane.f32.xlu0 %v642_v45  ;;  %v1229_v46 = vpop.f32.mrf.mxu0  ;;  %v1234_v47 = vpop.f32.mrf.mxu1 }
 0x55f   :  { %v639_v48 = vadd.f32 %v635_v43, %v21_v42  ;;  %v640_v49 = vadd.f32 %v636_v44, %v20_v34 }
 0x560   :  { %v630_v50 = vpop.f32.mrf.mxu1 }
 0x561   :  { %v637_v51 = vmul.f32 0.35355338, %v630_v50  ;;  %v645_v52 = vsel %vm141_vm2, %v639_v48, -inf  ;;  %v648_v53 = vsel %vm141_vm2, %v640_v49, -inf }
 0x562   :  { %646 = vmax.xlane.f32.xlu1 %v645_v52  ;;  %649 = vmax.xlane.f32.xlu0 %v648_v53  ;;  %v1235_v54 = vpop.f32.mrf.mxu1 }
 0x563   :  { %v641_v55 = vadd.f32 %v637_v51, %v21_v42 }
 0x565   :  { %v651_v56 = vsel %vm141_vm2, %v641_v55, -inf }
 0x566   :  { %652 = vmax.xlane.f32.xlu0 %v651_v56 }
 0x573   :  { %688 = vrot.lane.b32.xlu1 %v1418_v0, %s1393_s3 }
 0x5e7   :  { %v644_v57 = vpop.xlane.xlu0 %643 }
 0x5e8   :  { %v654_v58 = vsub.f32 %v638_v39, %v644_v57  ;;  %v22_v57 = vld [vmem:[%s1655_s1 + $0x30] sm:$0xff] }
 0x5ea   :  { %v658_v59 = vmul.f32 1.442695, %v654_v58 }
 0x5eb   :  { %v647_v60 = vpop.xlane.xlu1 %646  ;;  %v650_v61 = vpop.xlane.xlu0 %649 }
 0x5ec   :  { %1352 = vpow2.f32 %v658_v59  ;;  %v655_v62 = vsub.f32 %v639_v48, %v647_v60  ;;  %v656_v63 = vsub.f32 %v640_v49, %v650_v61 }
 0x5ee   :  { %v660_v3 = vmul.f32 1.442695, %v655_v62  ;;  %v662_v4 = vmul.f32 1.442695, %v656_v63 }
 0x5ef   :  { %v653_v5 = vpop.xlane.xlu0 %652  ;;  %v689_v6 = vpop.permute.xlu1 %688 }
 0x5f0   :  { %1354 = vpow2.f32 %v660_v3  ;;  %v657_v7 = vsub.f32 %v641_v55, %v653_v5  ;;  %1237 = vmatpush3.bf16.msra.mxu0 %v689_v6  ;;  %v23_v3 = vld [vmem:[%s1655_s1 + $0x38] sm:$0xff]  ;;  %s1396_s1 = smov 40  }
 0x5f1   :  { %1356 = vpow2.f32 %v662_v4  ;;  %1248 = vmatprep.subr.bf16.mxu0 %v1384_v1 }
 0x5f2   :  { %v664_v8 = vmul.f32 1.442695, %v657_v7 }
 0x5f4   :  { %1358 = vpow2.f32 %v664_v8 }
 0x5f9   :  { %v1353_v9 = vpop.eup %1352 }
 0x5fa   :  { %v666_v11 = vsel %vm141_vm2, %v1353_v9, 0.0 }
 0x5fb   :  { %667 = vadd.xlane.f32.xlu1 %v666_v11 }
 0x5fd   :  { %v1355_v14 = vpop.eup %1354 }
 0x5fe   :  { %v1357_v15 = vpop.eup %1356  ;;  %v669_v17 = vsel %vm141_vm2, %v1355_v14, 0.0 }
 0x5ff   :  { %v672_v18 = vsel %vm141_vm2, %v1357_v15, 0.0  ;;  %670 = vadd.xlane.f32.xlu0 %v669_v17 }
 0x600   :  { %673 = vadd.xlane.f32.xlu1 %v672_v18 }
 0x601   :  { %v1359_v19 = vpop.eup %1358 }
 0x602   :  { %v675_v20 = vsel %vm141_vm2, %v1359_v19, 0.0 }
 0x603   :  { %676 = vadd.xlane.f32.xlu0 %v675_v20 }
 0x611   :  { %784 = vrot.lane.b32.xlu1 %v1418_v0, %s1394_s4 }
 0x615   :  { %835 = vrot.lane.b32.xlu1 %v1430_v2, %s1394_s4 }
 0x619   :  { %735 = vrot.lane.b32.xlu0 %v1430_v2, %s1393_s3  ;;  %833 = vrot.lane.b32.xlu1 %v1430_v2, %s1395_s5 }
 0x61d   :  { %782 = vrot.lane.b32.xlu0 %v1418_v0, %s1395_s5 }
 0x684   :  { %v668_v21 = vpop.xlane.xlu1 %667 }
 0x685   :  { %1360 = vrcp.f32 %v668_v21 }
 0x688   :  { %v671_v22 = vpop.xlane.xlu0 %670 }
 0x689   :  { %v674_v23 = vpop.xlane.xlu1 %673  ;;  %1362 = vrcp.f32 %v671_v22 }
 0x68a   :  { %1364 = vrcp.f32 %v674_v23 }
 0x68c   :  { %v677_v24 = vpop.xlane.xlu0 %676 }
 0x68d   :  { %1366 = vrcp.f32 %v677_v24  ;;  %v785_v31 = vpop.permute.xlu1 %784 }
 0x68e   :  { %v790_v38 = vsel %vm31_vm1, %v785_v31, 0 }
 0x690   :  { %v736_v26 = vpop.permute.xlu0 %735 }
 0x691   :  { %1243 = vmatpush3.bf16.msra.mxu1 %v736_v26  ;;  %v836_v41 = vpop.permute.xlu1 %835 }
 0x692   :  { %1254 = vmatprep.subr.bf16.mxu1 %v1384_v1  ;;  %v1361_v30 = vpop.eup %1360  ;;  %v841_v44 = vsel %vm31_vm1, %v836_v41, 0 }
 0x693   :  { %v682_v34 = vmul.f32 %v1361_v30, %v1353_v9 }
 0x694   :  { %v783_v46 = vpop.permute.xlu0 %782 }
 0x695   :  { %v834_v47 = vpop.permute.xlu1 %833 }
 0x696   :  { %v1363_v33 = vpop.eup %1362 }
 0x697   :  { %v683_v36 = vmul.f32 %v1363_v33, %v1355_v14  ;;  %v1365_v37 = vpop.eup %1364 }
 0x698   :  { %v684_v42 = vmul.f32 %v1365_v37, %v1357_v15 }
 0x699   :  { %v686_v39 = vpack.c.bf16 %v683_v36, %v682_v34 }
 0x69a   :  { %v1367_v40 = vpop.eup %1366 }
 0x69b   :  { %1239 = vmatmul.mubr.msk.bf16.vlgmr.msra.gmra.mxu0 %vm141_vm2, %v686_v39  ;;  %v685_v43 = vmul.f32 %v1367_v40, %v1359_v19 }
 0x69c   :  { %1249 = vmatpush3.bf16.xpose.msra.mxu0 %v790_v38  ;;  %1250 = vmatprep.mubr.msk.bf16.mxu0 %vm1385_vm0, %v1384_v1 }
 0x69d   :  { %v687_v45 = vpack.c.bf16 %v685_v43, %v684_v42  ;;  %1260 = vmatprep.subr.bf16.mxu0 %v1384_v1 }
 0x69f   :  { %1245 = vmatmul.mubr.msk.bf16.vlgmr.msra.gmra.mxu1 %vm141_vm2, %v687_v45 }
 0x6a0   :  { %1255 = vmatpush3.bf16.xpose.msra.mxu1 %v841_v44  ;;  %1256 = vmatprep.mubr.msk.bf16.mxu1 %vm1385_vm0, %v1384_v1 }
 0x6a1   :  { %1266 = vmatprep.subr.bf16.mxu1 %v1384_v1 }
 0x6a3   :  { %1251 = vmatmul.mubr.msk.bf16.vlgmr.msra.gmra.mxu0 %vm31_vm1, %v783_v46 }
 0x6a4   :  { %1262 = vmatprep.mubr.msk.bf16.mxu0 %vm1385_vm0, %v1384_v1 }
 0x6a7   :  { %1257 = vmatmul.mubr.msk.bf16.vlgmr.msra.gmra.mxu1 %vm31_vm1, %v834_v47 }
 0x6a8   :  { %1268 = vmatprep.mubr.msk.bf16.mxu1 %vm1385_vm0, %v1384_v1 }
 0x75b   :  { %v1583_v48 = vpop.f32.mrf.mxu0 }
 0x75d   :  { %v1240_v49 = vpop.f32.mrf.mxu0 }
 0x75f   :  { %v1585_v50 = vpop.f32.mrf.mxu0  ;;  %v1587_v51 = vpop.f32.mrf.mxu1 }
 0x760   :  { %v1298_v52 = vpack.i.bf16 %v1585_v50, %v1583_v48 }
 0x761   :  { %v1241_v53 = vpop.f32.mrf.mxu0  ;;  %v1246_v54 = vpop.f32.mrf.mxu1 }
 0x763   :  { %v1591_v55 = vpop.f32.mrf.mxu1  ;;  %v826_v56 = vpop.f32.mrf.mxu0 }
 0x764   :  { %v1303_v1 = vpack.i.bf16 %v1591_v55, %v1587_v51  ;;  %v884_v58 = vmul.f32 0.35355338, %v826_v56 }
 0x765   :  { %v1247_v59 = vpop.f32.mrf.mxu1  ;;  %v1252_v60 = vpop.f32.mrf.mxu0 }
 0x766   :  { %v888_v61 = vadd.f32 %v884_v58, %v22_v57 }
 0x767   :  { %v829_v62 = vpop.f32.mrf.mxu0  ;;  %v877_v63 = vpop.f32.mrf.mxu1 }
 0x768   :  { %v885_v4 = vmul.f32 0.35355338, %v829_v62  ;;  %v886_v5 = vmul.f32 0.35355338, %v877_v63  ;;  %v892_v6 = vsel %vm141_vm2, %v888_v61, -inf }
 0x769   :  { %893 = vmax.xlane.f32.xlu0 %v892_v6  ;;  %v1253_v7 = vpop.f32.mrf.mxu0  ;;  %v1258_v8 = vpop.f32.mrf.mxu1 }
 0x76a   :  { %v889_v9 = vadd.f32 %v885_v4, %v23_v3  ;;  %v890_v11 = vadd.f32 %v886_v5, %v22_v57 }
 0x76b   :  { %v880_v14 = vpop.f32.mrf.mxu1 }
 0x76c   :  { %v887_v15 = vmul.f32 0.35355338, %v880_v14  ;;  %v895_v17 = vsel %vm141_vm2, %v889_v9, -inf  ;;  %v898_v18 = vsel %vm141_vm2, %v890_v11, -inf }
 0x76d   :  { %896 = vmax.xlane.f32.xlu1 %v895_v17  ;;  %899 = vmax.xlane.f32.xlu0 %v898_v18  ;;  %v1259_v19 = vpop.f32.mrf.mxu1 }
 0x76e   :  { %v891_v20 = vadd.f32 %v887_v15, %v23_v3 }
 0x770   :  { %v901_v21 = vsel %vm141_vm2, %v891_v20, -inf }
 0x771   :  { %902 = vmax.xlane.f32.xlu0 %v901_v21 }
 0x7f2   :  { %v894_v22 = vpop.xlane.xlu0 %893 }
 0x7f3   :  { %v904_v23 = vsub.f32 %v888_v61, %v894_v22 }
 0x7f5   :  { %v908_v24 = vmul.f32 1.442695, %v904_v23 }
 0x7f6   :  { %v897_v26 = vpop.xlane.xlu1 %896  ;;  %v900_v30 = vpop.xlane.xlu0 %899 }
 0x7f7   :  { %1368 = vpow2.f32 %v908_v24  ;;  %v905_v31 = vsub.f32 %v889_v9, %v897_v26  ;;  %v906_v33 = vsub.f32 %v890_v11, %v900_v30 }
 0x7f9   :  { %v910_v34 = vmul.f32 1.442695, %v905_v31  ;;  %v912_v36 = vmul.f32 1.442695, %v906_v33 }
 0x7fa   :  { %v903_v37 = vpop.xlane.xlu0 %902 }
 0x7fb   :  { %1370 = vpow2.f32 %v910_v34  ;;  %v907_v38 = vsub.f32 %v891_v20, %v903_v37 }
 0x7fc   :  { %1372 = vpow2.f32 %v912_v36 }
 0x7fd   :  { %v914_v39 = vmul.f32 1.442695, %v907_v38 }
 0x7ff   :  { %1374 = vpow2.f32 %v914_v39 }
 0x804   :  { %v1369_v40 = vpop.eup %1368 }
 0x805   :  { %v916_v41 = vsel %vm141_vm2, %v1369_v40, 0.0 }
 0x806   :  { %917 = vadd.xlane.f32.xlu1 %v916_v41 }
 0x808   :  { %v1371_v42 = vpop.eup %1370 }
 0x809   :  { %v1373_v43 = vpop.eup %1372  ;;  %v919_v44 = vsel %vm141_vm2, %v1371_v42, 0.0 }
 0x80a   :  { %v922_v45 = vsel %vm141_vm2, %v1373_v43, 0.0  ;;  %920 = vadd.xlane.f32.xlu0 %v919_v44 }
 0x80b   :  { %923 = vadd.xlane.f32.xlu1 %v922_v45 }
 0x80c   :  { %v1375_v46 = vpop.eup %1374 }
 0x80d   :  { %v925_v47 = vsel %vm141_vm2, %v1375_v46, 0.0 }
 0x80e   :  { %926 = vadd.xlane.f32.xlu0 %v925_v47 }
 0x81c   :  { %938 = vrot.lane.b32.xlu1 %v1418_v0, %s1396_s1 }
 0x820   :  { %1289 = vrot.lane.b32.xlu1 %v1288_v29, %s1397_s10 }
 0x824   :  { %1294 = vrot.lane.b32.xlu1 %v1293_v35, %s1397_s10  ;;  %985 = vrot.lane.b32.xlu0 %v1430_v2, %s1396_s1 }
 0x828   :  { %1304 = vrot.lane.b32.xlu1 %v1303_v1, %s1398_s11  ;;  %1299 = vrot.lane.b32.xlu0 %v1298_v52, %s1398_s11 }
 0x88f   :  { %v918_v49 = vpop.xlane.xlu1 %917 }
 0x890   :  { %1376 = vrcp.f32 %v918_v49 }
 0x893   :  { %v921_v0 = vpop.xlane.xlu0 %920 }
 0x894   :  { %v924_v51 = vpop.xlane.xlu1 %923  ;;  %1378 = vrcp.f32 %v921_v0 }
 0x895   :  { %1380 = vrcp.f32 %v924_v51 }
 0x897   :  { %v927_v25 = vpop.xlane.xlu0 %926 }
 0x898   :  { %v939_v27 = vpop.permute.xlu1 %938  ;;  %1382 = vrcp.f32 %v927_v25 }
 0x899   :  { %1261 = vmatpush3.bf16.msra.mxu0 %v939_v27 }
 0x89b   :  { %v986_v28 = vpop.permute.xlu0 %985 }
 0x89c   :  { %1267 = vmatpush3.bf16.msra.mxu1 %v986_v28  ;;  %v1290_v4 = vpop.permute.xlu1 %1289 }
 0x89d   :  { %v1377_v29 = vpop.eup %1376  ;;  %v1292_v7 = vunpack.i.h.bf16 %v1290_v4  ;;  %v1291_v8 = vunpack.i.l.bf16 %v1290_v4 }
 0x89e   :  { %v932_v32 = vmul.f32 %v1377_v29, %v1369_v40 }
 0x89f   :  { %v1300_v6 = vpop.permute.xlu0 %1299  ;;  %v1081_v15 = vsel %vm31_vm1, %v1485_v12, %v1292_v7  ;;  %v1080_v17 = vsel %vm31_vm1, %v1483_v10, %v1291_v8 }
 0x8a0   :  { %v1295_v5 = vpop.permute.xlu1 %1294  ;;  %v1302_v9 = vunpack.i.h.bf16 %v1300_v6  ;;  %v1301_v11 = vunpack.i.l.bf16 %v1300_v6 }
 0x8a1   :  { %v1379_v2 = vpop.eup %1378  ;;  %v1297_v19 = vunpack.i.h.bf16 %v1295_v5  ;;  %v1296_v20 = vunpack.i.l.bf16 %v1295_v5 }
 0x8a2   :  { %v933_v35 = vmul.f32 %v1379_v2, %v1371_v42  ;;  %v1381_v53 = vpop.eup %1380  ;;  %v1085_v23 = vsel %vm141_vm2, %v1081_v15, %v1302_v9  ;;  %v1084_v24 = vsel %vm141_vm2, %v1080_v17, %v1301_v11 }
 0x8a3   :  { %v934_v50 = vmul.f32 %v1381_v53, %v1373_v43  ;;  %v1083_v36 = vsel %vm31_vm1, %v1489_v16, %v1297_v19  ;;  %v1082_v37 = vsel %vm31_vm1, %v1487_v13, %v1296_v20 }
 0x8a4   :  { %v936_v54 = vpack.c.bf16 %v933_v35, %v932_v32  ;;  %v1305_v14 = vpop.permute.xlu1 %1304 }
 0x8a5   :  { %v1383_v48 = vpop.eup %1382  ;;  %v1307_v26 = vunpack.i.h.bf16 %v1305_v14  ;;  %v1306_v30 = vunpack.i.l.bf16 %v1305_v14 }
 0x8a6   :  { %1263 = vmatmul.mubr.msk.bf16.vlgmr.msra.gmra.mxu0 %vm141_vm2, %v936_v54  ;;  %v935_v52 = vmul.f32 %v1383_v48, %v1375_v46 }
 0x8a7   :  { %v1086_v40 = vsel %vm141_vm2, %v1082_v37, %v1306_v30  ;;  %v1087_v41 = vsel %vm141_vm2, %v1083_v36, %v1307_v26 }
 0x8a8   :  { %v937_v55 = vpack.c.bf16 %v935_v52, %v934_v50 }
 0x8aa   :  { %1269 = vmatmul.mubr.msk.bf16.vlgmr.msra.gmra.mxu1 %vm141_vm2, %v937_v55 }
 0x966   :  { %v978_v56 = vpop.f32.mrf.mxu0 }
 0x968   :  { %v1264_v57 = vpop.f32.mrf.mxu0 }
 0x96a   :  { %v981_v1 = vpop.f32.mrf.mxu0  ;;  %v1025_v58 = vpop.f32.mrf.mxu1 }
 0x96b   :  { %v1308_v59 = vpack.i.bf16 %v981_v1, %v978_v56 }
 0x96c   :  { %v1265_v60 = vpop.f32.mrf.mxu0  ;;  %v1270_v61 = vpop.f32.mrf.mxu1 }
 0x96d   :  { %1309 = vrot.lane.b32.xlu0 %v1308_v59, %s1399_s12 }
 0x96e   :  { %v1028_v62 = vpop.f32.mrf.mxu1 }
 0x96f   :  { %v1313_v63 = vpack.i.bf16 %v1028_v62, %v1025_v58 }
 0x970   :  { %v1271_v3 = vpop.f32.mrf.mxu1 }
 0x971   :  { %1314 = vrot.lane.b32.xlu1 %v1313_v63, %s1399_s12 }
 0x9df   :  { %v1310_v18 = vpop.permute.xlu0 %1309 }
 0x9e0   :  { %v1312_v21 = vunpack.i.h.bf16 %v1310_v18  ;;  %v1311_v22 = vunpack.i.l.bf16 %v1310_v18 }
 0x9e2   :  { %v1089_v31 = vsel %vm1088_vm3, %v1084_v24, %v1311_v22  ;;  %v1090_v12 = vsel %vm1088_vm3, %v1085_v23, %v1312_v21 }
 0x9e3   :  { %v1140_v33 = vpack.c.bf16 %v1089_v31, %v1089_v31  ;;  %v1141_v34 = vpack.c.bf16 %v1090_v12, %v1090_v12  ;;  %v1315_v10 = vpop.permute.xlu1 %1314 }
 0x9e4   :  { %v1317_v38 = vunpack.i.h.bf16 %v1315_v10  ;;  %v1316_v39 = vunpack.i.l.bf16 %v1315_v10 }
 0x9e5   :  { %1110 = vst.msk [vmem:[%s1656_s2] sm:$0xf] %vm1109_vm4, %v1140_v33  ;;  %1111 = vst.msk [vmem:[%s1656_s2 + $0x4] sm:$0xf] %vm1109_vm4, %v1141_v34 }
 0x9e6   :  { %v1092_v16 = vsel %vm1088_vm3, %v1087_v41, %v1317_v38  ;;  %v1091_v13 = vsel %vm1088_vm3, %v1086_v40, %v1316_v39 }
 0x9e7   :  { %v1143_v42 = vpack.c.bf16 %v1092_v16, %v1092_v16  ;;  %v1142_v43 = vpack.c.bf16 %v1091_v13, %v1091_v13 }
 0x9e9   :  { %1113 = vst.msk [vmem:[%s1656_s2 + $0xc] sm:$0xf] %vm1109_vm4, %v1143_v42  ;;  %1112 = vst.msk [vmem:[%s1656_s2 + $0x8] sm:$0xf] %vm1109_vm4, %v1142_v43 }

// kernel: _lambda_.46
= control target key start
LH: loop header
LB: loop body
LE: loop exit
PB: predicated region body
PF: predicated region fallthrough
CT: control target
= control target key end

     0   :  { %vm18_vm0 = vcmask 261120   ;;  %s174_s0 = inlined_call_operand.vmem [shape: f32[32,32], index: 0, kind: input, shape index: {}]   ;;  %s175_s1 = inlined_call_operand.vmem [shape: f32[1,32], index: 1, kind: input, shape index: {}]   ;;  %s176_s2 = inlined_call_operand.vmem [shape: f32[1,32], index: 2, kind: input, shape index: {}]   ;;  %s177_s3 = inlined_call_operand.vmem [shape: f32[32,32], index: 3, kind: output, shape index: {}]  }
   0x1   :  { %v14_v0 = vld [vmem:[%s174_s0] sm:$0xff]  ;;  %v16_v1 = vld [vmem:[%s174_s0 + $0x10] sm:$0xff]  ;;  %v15_v2 = vld [vmem:[%s174_s0 + $0x8] sm:$0xff] }
   0x2   :  { %v19_v3 = vsel %vm18_vm0, %v14_v0, 0.0  ;;  %v25_v4 = vsel %vm18_vm0, %v16_v1, 0.0  ;;  %v17_v5 = vld [vmem:[%s174_s0 + $0x18] sm:$0xff]  ;;  %v22_v6 = vsel %vm18_vm0, %v15_v2, 0.0  ;;  %v102_v41 = vld [vmem:[%s175_s1] ss:$0 sm:$0xff] }
   0x3   :  { %20 = vadd.xlane.f32.xlu0 %v19_v3  ;;  %26 = vadd.xlane.f32.xlu1 %v25_v4  ;;  %v28_v7 = vsel %vm18_vm0, %v17_v5, 0.0  ;;  %v103_v43 = vld [vmem:[%s176_s2] ss:$0 sm:$0xff] }
   0x7   :  { %23 = vadd.xlane.f32.xlu0 %v22_v6  ;;  %29 = vadd.xlane.f32.xlu1 %v28_v7 }
  0x8c   :  { %v21_v8 = vpop.xlane.xlu0 %20  ;;  %v27_v9 = vpop.xlane.xlu1 %26 }
  0x8d   :  { %v32_v10 = vmul.f32 0.03125, %v21_v8  ;;  %v34_v11 = vmul.f32 0.03125, %v27_v9 }
  0x8f   :  { %v36_v12 = vsub.f32 %v14_v0, %v32_v10  ;;  %v38_v13 = vsub.f32 %v16_v1, %v34_v11 }
  0x90   :  { %v24_v14 = vpop.xlane.xlu0 %23  ;;  %v30_v15 = vpop.xlane.xlu1 %29 }
  0x91   :  { %v33_v16 = vmul.f32 0.03125, %v24_v14  ;;  %v35_v17 = vmul.f32 0.03125, %v30_v15  ;;  %v40_v18 = vmul.f32 %v36_v12, %v36_v12  ;;  %v42_v19 = vmul.f32 %v38_v13, %v38_v13 }
  0x93   :  { %v37_v20 = vsub.f32 %v15_v2, %v33_v16  ;;  %v39_v21 = vsub.f32 %v17_v5, %v35_v17  ;;  %v44_v22 = vsel %vm18_vm0, %v40_v18, 0.0  ;;  %v50_v23 = vsel %vm18_vm0, %v42_v19, 0.0 }
  0x94   :  { %45 = vadd.xlane.f32.xlu0 %v44_v22 }
  0x95   :  { %v41_v24 = vmul.f32 %v37_v20, %v37_v20  ;;  %v43_v25 = vmul.f32 %v39_v21, %v39_v21 }
  0x97   :  { %v47_v26 = vsel %vm18_vm0, %v41_v24, 0.0  ;;  %v53_v27 = vsel %vm18_vm0, %v43_v25, 0.0 }
  0x98   :  { %51 = vadd.xlane.f32.xlu0 %v50_v23  ;;  %48 = vadd.xlane.f32.xlu1 %v47_v26 }
  0x9c   :  { %54 = vadd.xlane.f32.xlu1 %v53_v27 }
 0x11d   :  { %v46_v28 = vpop.xlane.xlu0 %45 }
 0x11e   :  { %v56_v29 = vmul.f32 0.03125, %v46_v28 }
 0x120   :  { %v60_v30 = vadd.f32 1e-05, %v56_v29 }
 0x121   :  { %v49_v31 = vpop.xlane.xlu1 %48  ;;  %v52_v32 = vpop.xlane.xlu0 %51 }
 0x122   :  { %104 = vrsqrt.f32 %v60_v30  ;;  %v57_v33 = vmul.f32 0.03125, %v49_v31  ;;  %v58_v34 = vmul.f32 0.03125, %v52_v32 }
 0x124   :  { %v61_v35 = vadd.f32 1e-05, %v57_v33  ;;  %v62_v36 = vadd.f32 1e-05, %v58_v34 }
 0x125   :  { %v55_v37 = vpop.xlane.xlu1 %54 }
 0x126   :  { %106 = vrsqrt.f32 %v61_v35  ;;  %v59_v38 = vmul.f32 0.03125, %v55_v37 }
 0x127   :  { %108 = vrsqrt.f32 %v62_v36 }
 0x128   :  { %v63_v39 = vadd.f32 1e-05, %v59_v38 }
 0x12a   :  { %110 = vrsqrt.f32 %v63_v39 }
 0x12f   :  { %v105_v40 = vpop.eup %104 }
 0x130   :  { %v68_v42 = vmul.f32 %v105_v40, %v36_v12 }
 0x132   :  { %v79_v44 = vmul.f32 %v102_v41, %v68_v42 }
 0x133   :  { %v107_v45 = vpop.eup %106 }
 0x134   :  { %v109_v46 = vpop.eup %108  ;;  %v90_v47 = vadd.f32 %v103_v43, %v79_v44  ;;  %v69_v48 = vmul.f32 %v107_v45, %v37_v20 }
 0x135   :  { %v70_v49 = vmul.f32 %v109_v46, %v38_v13 }
 0x136   :  { %94 = vst.msk [vmem:[%s177_s3] sm:$0xff] %vm18_vm0, %v90_v47  ;;  %v80_v50 = vmul.f32 %v102_v41, %v69_v48 }
 0x137   :  { %v111_v51 = vpop.eup %110  ;;  %v81_v52 = vmul.f32 %v102_v41, %v70_v49 }
 0x138   :  { %v91_v53 = vadd.f32 %v103_v43, %v80_v50  ;;  %v71_v54 = vmul.f32 %v111_v51, %v39_v21 }
 0x139   :  { %v92_v55 = vadd.f32 %v103_v43, %v81_v52 }
 0x13a   :  { %95 = vst.msk [vmem:[%s177_s3 + $0x8] sm:$0xff] %vm18_vm0, %v91_v53  ;;  %v82_v56 = vmul.f32 %v102_v41, %v71_v54 }
 0x13b   :  { %96 = vst.msk [vmem:[%s177_s3 + $0x10] sm:$0xff] %vm18_vm0, %v92_v55 }
 0x13c   :  { %v93_v57 = vadd.f32 %v103_v43, %v82_v56 }
 0x13e   :  { %97 = vst.msk [vmem:[%s177_s3 + $0x18] sm:$0xff] %vm18_vm0, %v93_v57 }

// kernel: _lambda_.40
= control target key start
LH: loop header
LB: loop body
LE: loop exit
PB: predicated region body
PF: predicated region fallthrough
CT: control target
= control target key end

     0   :  { %vm162_vm0 = vcmask 261120   ;;  %s308_s1 = inlined_call_operand.vmem [shape: bf16[128,32], index: 1, kind: input, shape index: {}]   ;;  %s309_s0 = inlined_call_operand.vmem [shape: bf16[32,128], index: 0, kind: input, shape index: {}]   ;;  %s310_s2 = inlined_call_operand.vmem [shape: f32[1,32], index: 2, kind: input, shape index: {}]   ;;  %s311_s3 = inlined_call_operand.vmem [shape: f32[32,32], index: 3, kind: input, shape index: {}]   ;;  %s312_s4 = inlined_call_operand.vmem [shape: f32[32,32], index: 4, kind: output, shape index: {}]  }
   0x1   :  { %v212_v0 = vld [vmem:[%s308_s1 + $0x38] sm:$0xff]   ;;  %v213_v1 = vld [vmem:[%s308_s1 + $0x30] sm:$0xff]   ;;  %v214_v2 = vld [vmem:[%s308_s1 + $0x28] sm:$0xff]  }
   0x2   :  { %192 = vmatprep.subr.bf16.mxu0 %v212_v0  ;;  %v215_v3 = vld [vmem:[%s308_s1 + $0x20] sm:$0xff]   ;;  %v216_v5 = vld [vmem:[%s308_s1 + $0x18] sm:$0xff]   ;;  %v217_v6 = vld [vmem:[%s308_s1 + $0x10] sm:$0xff]  }
   0x3   :  { %193 = vmatpush3.bf16.msra.mxu0 %v212_v0  ;;  %v220_v4 = vld [vmem:[%s309_s0] sm:$0xff]   ;;  %v218_v7 = vld [vmem:[%s308_s1 + $0x8] sm:$0xff]   ;;  %v156_v12 = vld [vmem:[%s311_s3 + $0x10] sm:$0xff] }
   0x4   :  { %194 = vmatprep.subr.bf16.mxu0 %v213_v1  ;;  %208 = vmatprep.mubr.bf16.mxu0 %v220_v4  ;;  %v219_v8 = vld [vmem:[%s308_s1] sm:$0xff]   ;;  %v221_v9 = vld [vmem:[%s309_s0 + $0x8] sm:$0xff]   ;;  %v157_v19 = vld [vmem:[%s311_s3 + $0x18] sm:$0xff] }
   0x5   :  { %v171_v10 = vld [vmem:[%s310_s2] ss:$0 sm:$0xff]  ;;  %v155_v23 = vld [vmem:[%s311_s3 + $0x8] sm:$0xff] }
   0x6   :  { %v154_v15 = vld [vmem:[%s311_s3] sm:$0xff] }
   0x7   :  { %195 = vmatpush3.bf16.msra.mxu0 %v213_v1 }
   0x8   :  { %196 = vmatprep.subr.bf16.mxu0 %v214_v2 }
   0xb   :  { %197 = vmatpush3.bf16.msra.mxu0 %v214_v2 }
   0xc   :  { %198 = vmatprep.subr.bf16.mxu0 %v215_v3 }
   0xf   :  { %199 = vmatpush3.bf16.msra.mxu0 %v215_v3 }
  0x10   :  { %200 = vmatprep.subr.bf16.mxu0 %v216_v5 }
  0x13   :  { %201 = vmatpush3.bf16.msra.mxu0 %v216_v5 }
  0x14   :  { %202 = vmatprep.subr.bf16.mxu0 %v217_v6 }
  0x17   :  { %203 = vmatpush3.bf16.msra.mxu0 %v217_v6 }
  0x18   :  { %204 = vmatprep.subr.bf16.mxu0 %v218_v7 }
  0x1b   :  { %205 = vmatpush3.bf16.msra.mxu0 %v218_v7 }
  0x1c   :  { %206 = vmatprep.subr.bf16.mxu0 %v219_v8 }
  0x1f   :  { %207 = vmatpush3.bf16.msra.mxu0 %v219_v8 }
  0x22   :  { %209 = vmatmul.mubr.bf16.vlgmr.msra.gmra.mxu0 %v221_v9 }
  0xe2   :  { %v210_v11 = vpop.f32.mrf.mxu0 }
  0xe3   :  { %v148_v13 = vadd.f32 %v210_v11, %v171_v10 }
  0xe4   :  { %v139_v14 = vpop.f32.mrf.mxu0 }
  0xe5   :  { %v160_v16 = vadd.f32 %v156_v12, %v148_v13  ;;  %v140_v17 = vadd.f32 %v171_v10, %v139_v14 }
  0xe6   :  { %v211_v18 = vpop.f32.mrf.mxu0 }
  0xe7   :  { %165 = vst.msk [vmem:[%s312_s4 + $0x10] sm:$0xff] %vm162_vm0, %v160_v16  ;;  %v158_v20 = vadd.f32 %v154_v15, %v140_v17  ;;  %v151_v21 = vadd.f32 %v211_v18, %v171_v10 }
  0xe8   :  { %v142_v22 = vpop.f32.mrf.mxu0 }
  0xe9   :  { %163 = vst.msk [vmem:[%s312_s4] sm:$0xff] %vm162_vm0, %v158_v20  ;;  %v161_v24 = vadd.f32 %v157_v19, %v151_v21  ;;  %v143_v25 = vadd.f32 %v171_v10, %v142_v22 }
  0xeb   :  { %166 = vst.msk [vmem:[%s312_s4 + $0x18] sm:$0xff] %vm162_vm0, %v161_v24  ;;  %v159_v26 = vadd.f32 %v155_v23, %v143_v25 }
  0xed   :  { %164 = vst.msk [vmem:[%s312_s4 + $0x8] sm:$0xff] %vm162_vm0, %v159_v26 }

// kernel: _lambda_.47
= control target key start
LH: loop header
LB: loop body
LE: loop exit
PB: predicated region body
PF: predicated region fallthrough
CT: control target
= control target key end

     0   :  { %v109_v0 = vmov 0.0   ;;  %vm110_vm0 = vmmov 0   ;;  %vm40_vm1 = vcmask 261120   ;;  %vm84_vm2 = vcmask 80896   ;;  %s146_s1 = inlined_call_operand.vmem [shape: bf16[32,10], index: 1, kind: input, shape index: {}]   ;;  %s147_s0 = inlined_call_operand.vmem [shape: f32[8,32], index: 0, kind: input, shape index: {}]   ;;  %s148_s2 = inlined_call_operand.vmem [shape: f32[1,10], index: 2, kind: input, shape index: {}]   ;;  %s149_s3 = inlined_call_operand.vmem [shape: f32[8,10], index: 3, kind: output, shape index: {}]  }
   0x1   :  { %97 = vmatprep.subr.bf16.mxu0 %v109_v0  ;;  %v107_v1 = vld [vmem:[%s146_s1 + $0x8] sm:$0xff]   ;;  %101 = vmatprep.mubr.msk.bf16.mxu0 %vm110_vm0, %v109_v0  ;;  %v108_v2 = vld [vmem:[%s146_s1] sm:$0xff]  }
   0x2   :  { %98 = vmatpush3.bf16.msra.mxu0 %v107_v1  ;;  %v15_v3 = vld [vmem:[%s147_s0] sm:$0xff] }
   0x3   :  { %99 = vmatprep.subr.bf16.mxu0 %v109_v0  ;;  %v16_v4 = vpack.c.bf16 %v15_v3, %v15_v3  ;;  %v90_v5 = vld [vmem:[%s148_s2] ss:$0 sm:$0xff] }
   0x6   :  { %100 = vmatpush3.bf16.msra.mxu0 %v108_v2 }
   0x9   :  { %102 = vmatmul.mubr.msk.bf16.vlgmr.msra.gmra.mxu0 %vm40_vm1, %v16_v4 }
  0xc9   :  { %v78_v6 = vpop.f32.mrf.mxu0 }
  0xca   :  { %v79_v7 = vadd.f32 %v90_v5, %v78_v6 }
  0xcb   :  { %v103_v8 = vpop.f32.mrf.mxu0 }
  0xcc   :  { %85 = vst.msk [vmem:[%s149_s3] sm:$0xff] %vm84_vm2, %v79_v7 }
  0xcd   :  { %v81_v9 = vpop.f32.mrf.mxu0 }
  0xcf   :  { %v104_v10 = vpop.f32.mrf.mxu0 }

</bundles_post_ra>
